<compile_context>
chip_gen: v5e
topology: v5e:2x2
jax: 0.10.0
libtpu: 0.0.40
codegen_flags: <defaults>
</compile_context>

<pallas_src>
import math

import jax
import jax.numpy as jnp
from jax.experimental import pallas as pl
from jax.experimental.pallas import tpu as pltpu

# ----------------------------- config (small ViT-B/32) -----------------------
B = 2                 # batch
IMG = 64              # spatial size (ViT-B/32 uses 224)
PATCH = 32            # patch size (same as vit_b_32)
C_IN = 3              # RGB channels after the feature stage
D = 64                # hidden dim      (ViT-B: 768)
HEADS = 4             # attention heads (ViT-B: 12)
HEAD_DIM = D // HEADS
MLP_DIM = 128         # MLP hidden      (ViT-B: 3072)
LAYERS = 2            # encoder depth   (ViT-B: 12)
NUM_CLASSES = 2       # label_type == 'direction'
HEAD_PAD = 128        # lane-dense padded head output (sliced to NUM_CLASSES outside)
NP_SIDE = IMG // PATCH
N_PATCH = NP_SIDE * NP_SIDE
SEQ = N_PATCH + 1     # +1 cls token
PATCH_DIM = C_IN * PATCH * PATCH
LN_EPS = 1e-6         # torchvision ViT uses LayerNorm(eps=1e-6)
DTYPE = jnp.float32   # model is tiny; bf16 matmul inputs only pay off at real ViT-B scale

LAYER_KEYS = ("ln1_g", "ln1_b", "qkv_w", "qkv_b", "out_w", "out_b",
              "ln2_g", "ln2_b", "mlp_w1", "mlp_b1", "mlp_w2", "mlp_b2")
N_LAYER_PARAMS = len(LAYER_KEYS)
N_INPUTS = 5 + N_LAYER_PARAMS * LAYERS + 4   # patches/pe/cls/pos + layers + final LN/head


# ----------------------------- fused Pallas kernel ----------------------------
def _layer_norm(x, g, b):
    mu = jnp.mean(x, axis=-1, keepdims=True)
    var = jnp.mean(jnp.square(x - mu), axis=-1, keepdims=True)
    return (x - mu) * jax.lax.rsqrt(var + LN_EPS) * g + b


def _vit_forward_kernel(*refs):
    """Whole ViT forward in one kernel invocation (everything fits in VMEM).

    refs = (patches, pe_w, pe_b, cls, pos,
            [12 params per encoder layer] * LAYERS,
            ln_g, ln_b, head_w, head_b,     # inputs
            out_ref,                        # (B, HEAD_PAD) padded logits
            xbuf,                           # VMEM scratch: residual stream (B*SEQ, D)
            clsbuf)                         # VMEM scratch: gathered cls tokens (B, D)
    """
    in_refs = refs[:N_INPUTS]
    out_ref = refs[N_INPUTS]
    xbuf = refs[N_INPUTS + 1]
    clsbuf = refs[N_INPUTS + 2]

    patches_ref, pe_w_ref, pe_b_ref, cls_ref, pos_ref = in_refs[:5]
    layer_refs = in_refs[5:5 + N_LAYER_PARAMS * LAYERS]
    lnf_g_ref, lnf_b_ref, head_w_ref, head_b_ref = in_refs[5 + N_LAYER_PARAMS * LAYERS:]

    f32 = jnp.float32

    # ---- patch embedding: Conv2d(k=P, s=P) as one MXU matmul ----
    patches = patches_ref[...].astype(f32)                              # (B*N_PATCH, PATCH_DIM)
    tok = jnp.dot(patches, pe_w_ref[...], preferred_element_type=f32) + pe_b_ref[...]

    # ---- [cls] + positional embedding, assembled into the residual buffer ----
    pos = pos_ref[...]                                                  # (SEQ, D)
    cls_tok = cls_ref[...] + pos[0:1, :]                                # (1, D)
    for b in range(B):
        xbuf[b * SEQ:b * SEQ + 1, :] = cls_tok
        xbuf[b * SEQ + 1:(b + 1) * SEQ, :] = (
            tok[b * N_PATCH:(b + 1) * N_PATCH, :] + pos[1:SEQ, :])

    # ---- pre-LN encoder blocks (fully unrolled; all matmuls hit the MXU) ----
    for li in range(LAYERS):
        (ln1_g, ln1_b, qkv_w, qkv_b, out_w, out_b,
         ln2_g, ln2_b, mlp_w1, mlp_b1, mlp_w2, mlp_b2) = (
            r[...] for r in layer_refs[li * N_LAYER_PARAMS:(li + 1) * N_LAYER_PARAMS])

        # --- multi-head self-attention ---
        # NOTE: 1/sqrt(HEAD_DIM) is pre-folded into the Q columns of qkv_w/qkv_b
        # at parameter-prep time, so no scaling happens here.
        x = xbuf[...]                                                   # (B*SEQ, D)
        y = _layer_norm(x, ln1_g, ln1_b)
        qkv = jnp.dot(y, qkv_w, preferred_element_type=f32) + qkv_b     # (B*SEQ, 3D)

        for b in range(B):
            base = b * SEQ
            qb = qkv[base:base + SEQ, 0:D]
            kb = qkv[base:base + SEQ, D:2 * D]
            vb = qkv[base:base + SEQ, 2 * D:3 * D]
            acc = None
            for h in range(HEADS):
                lo = h * HEAD_DIM
                qh = qb[:, lo:lo + HEAD_DIM]
                kh = kb[:, lo:lo + HEAD_DIM]
                vh = vb[:, lo:lo + HEAD_DIM]
                s = jnp.dot(qh, kh.T, preferred_element_type=f32)        # (SEQ, SEQ)
                s = s - jnp.max(s, axis=-1, keepdims=True)
                e = jnp.exp(s)
                p = e * pl.reciprocal(jnp.sum(e, axis=-1, keepdims=True), approx=True)
                ho = jnp.dot(p, vh, preferred_element_type=f32)          # (SEQ, HEAD_DIM)
                # Fold the head back through its slice of the out-projection:
                # concat(heads) @ W_out == sum_h head_h @ W_out[h*hd:(h+1)*hd, :]
                contrib = jnp.dot(ho, out_w[lo:lo + HEAD_DIM, :],
                                  preferred_element_type=f32)            # (SEQ, D)
                acc = contrib if acc is None else acc + contrib
            # residual add, fused in the same kernel
            xbuf[base:base + SEQ, :] = x[base:base + SEQ, :] + acc + out_b

        # --- MLP ---
        x = xbuf[...]
        y = _layer_norm(x, ln2_g, ln2_b)
        h1 = jnp.dot(y, mlp_w1, preferred_element_type=f32) + mlp_b1
        # TODO(synk): PyTorch nn.GELU() is the exact erf form; tanh approx kept
        # for guaranteed Mosaic lowering (max abs diff ~1e-3).
        h1 = jax.nn.gelu(h1)
        h2 = jnp.dot(h1, mlp_w2, preferred_element_type=f32) + mlp_b2
        xbuf[...] = x + h2

    # ---- final LN (cls tokens only) + classification head, one batched matmul ----
    xfin = xbuf[...]
    for b in range(B):
        clsbuf[b:b + 1, :] = xfin[b * SEQ:b * SEQ + 1, :]
    cls_all = _layer_norm(clsbuf[...], lnf_g_ref[...], lnf_b_ref[...])   # (B, D)
    out_ref[...] = (jnp.dot(cls_all, head_w_ref[...], preferred_element_type=f32)
                    + head_b_ref[...]).astype(out_ref.dtype)             # (B, HEAD_PAD) lane-dense


# ----------------------------- wrapper / glue ---------------------------------
def _full_spec(a):
    """Full-array BlockSpec for a grid=(1,) fused kernel."""
    return pl.BlockSpec(a.shape, lambda i, nd=a.ndim: (0,) * nd)


def extract_patches(x):
    """x: (B, C, H, W) -> (B*N_PATCH, C*P*P), flattened as (C, ph, pw).

    Single XLA reshape/transpose kept outside the kernel; at this size it is a
    one-pass strided copy (the fused kernel is the win).
    """
    b, c, h, w = x.shape
    x = x.reshape(b, c, NP_SIDE, PATCH, NP_SIDE, PATCH)
    x = x.transpose(0, 2, 4, 1, 3, 5)                    # (B, nh, nw, C, P, P)
    return x.reshape(b * N_PATCH, c * PATCH * PATCH)


def vit_forward(params, x_img):
    """x_img: (B, 3, IMG, IMG) -> logits (B, NUM_CLASSES). One pallas_call."""
    patches = extract_patches(x_img)

    flat_inputs = [patches, params["pe_w"], params["pe_b"],
                   params["cls_token"], params["pos_emb"]]
    for lp in params["layers"]:
        flat_inputs += [lp[k] for k in LAYER_KEYS]
    flat_inputs += [params["ln_g"], params["ln_b"],
                    params["head_w"], params["head_b"]]
    assert len(flat_inputs) == N_INPUTS

    logits_pad = pl.pallas_call(
        _vit_forward_kernel,
        out_shape=jax.ShapeDtypeStruct((B, HEAD_PAD), DTYPE),
        grid=(1,),
        in_specs=[_full_spec(a) for a in flat_inputs],
        out_specs=pl.BlockSpec((B, HEAD_PAD), lambda i: (0, 0)),
        scratch_shapes=[pltpu.VMEM((B * SEQ, D), jnp.float32),
                        pltpu.VMEM((B, D), jnp.float32)],
        compiler_params=pltpu.CompilerParams(
            dimension_semantics=("arbitrary",),
            vmem_limit_bytes=32 * 1024 * 1024,
        ),
    )(*flat_inputs)
    return logits_pad[:, :NUM_CLASSES]


def feature_forward(x):
    # TODO(synk): feature_modules.FeatureModule is not provided; identity stand-in.
    return x, None


def custom_vit_b_32_forward(params, x):
    """Mirrors Custom_ViT_B_32.forward: feature -> squeeze(1) -> backbone."""
    x, _musk = feature_forward(x)        # (B, 1, 3, H, W)
    x = jnp.squeeze(x, axis=1)           # (B, 3, H, W)
    return vit_forward(params, x)


# ----------------------------- parameter init --------------------------------
def init_params(key):
    """All weights stored kernel-ready: (in_features, out_features), biases (1, N).

    Parameter-prep optimizations (no work at forward time):
      * all projections pre-transposed (no .T in the forward),
      * attention scale 1/sqrt(HEAD_DIM) folded into the Q slice of qkv_w/qkv_b,
      * classification head lane-padded to HEAD_PAD columns (zeros).
    """
    def nrm(k, shape, scale=0.02):
        return (scale * jax.random.normal(k, shape)).astype(DTYPE)

    keys = jax.random.split(key, 4 + LAYERS)

    # torchvision zero-inits the head; use a small random head so the output is
    # nontrivial. Columns >= NUM_CLASSES are zero padding for lane density.
    head_w = jnp.zeros((D, HEAD_PAD), DTYPE)
    head_w = head_w.at[:, :NUM_CLASSES].set(nrm(keys[2], (D, NUM_CLASSES)))

    params = {
        "pe_w": nrm(keys[0], (PATCH_DIM, D)),
        "pe_b": jnp.zeros((1, D), DTYPE),
        "cls_token": jnp.zeros((1, D), DTYPE),
        "pos_emb": nrm(keys[1], (SEQ, D)),
        "ln_g": jnp.ones((1, D), DTYPE),
        "ln_b": jnp.zeros((1, D), DTYPE),
        "head_w": head_w,
        "head_b": jnp.zeros((1, HEAD_PAD), DTYPE),
        "layers": [],
    }
    attn_scale = 1.0 / math.sqrt(HEAD_DIM)
    for li in range(LAYERS):
        lk = jax.random.split(keys[4 + li], 4)
        qkv_w = nrm(lk[0], (D, 3 * D))                    # in_proj_weight.T
        qkv_b = jnp.zeros((1, 3 * D), DTYPE)
        # Fold attention scaling into the Q projection (mathematically identical:
        # softmax((q*s) k^T) == softmax(s * q k^T)).
        qkv_w = qkv_w.at[:, :D].multiply(attn_scale)
        qkv_b = qkv_b.at[:, :D].multiply(attn_scale)
        params["layers"].append({
            "ln1_g": jnp.ones((1, D), DTYPE), "ln1_b": jnp.zeros((1, D), DTYPE),
            "qkv_w": qkv_w,
            "qkv_b": qkv_b,
            "out_w": nrm(lk[1], (D, D)),                  # out_proj.weight.T
            "out_b": jnp.zeros((1, D), DTYPE),
            "ln2_g": jnp.ones((1, D), DTYPE), "ln2_b": jnp.zeros((1, D), DTYPE),
            "mlp_w1": nrm(lk[2], (D, MLP_DIM)),           # mlp.0.weight.T
            "mlp_b1": jnp.zeros((1, MLP_DIM), DTYPE),
            "mlp_w2": nrm(lk[3], (MLP_DIM, D)),           # mlp.3.weight.T
            "mlp_b2": jnp.zeros((1, D), DTYPE),
        })
    return params


# ----------------------------------- main -------------------------------------
if __name__ == "__main__":
    key = jax.random.PRNGKey(0)
    pkey, xkey = jax.random.split(key)
    params = init_params(pkey)
    # input as produced upstream of the (identity) feature stage: (B, 1, 3, H, W)
    x = jax.random.normal(xkey, (B, 1, C_IN, IMG, IMG), dtype=DTYPE)

    fwd = jax.jit(custom_vit_b_32_forward)
    logits = fwd(params, x)
    logits = jax.block_until_ready(logits)
    assert logits.shape == (B, NUM_CLASSES), logits.shape
    assert bool(jnp.all(jnp.isfinite(logits)))
    print("KERNEL_OK")
</pallas_src>

<mosaic_0001>
module attributes {stable_mosaic.version = 11 : i64} {
  func.func @_vit_forward_kernel(%arg0: i32, %arg1: memref<8x3072xf32, #tpu.memory_space<vmem>>, %arg2: memref<3072x64xf32, #tpu.memory_space<vmem>>, %arg3: memref<1x64xf32, #tpu.memory_space<vmem>>, %arg4: memref<1x64xf32, #tpu.memory_space<vmem>>, %arg5: memref<5x64xf32, #tpu.memory_space<vmem>>, %arg6: memref<1x64xf32, #tpu.memory_space<vmem>>, %arg7: memref<1x64xf32, #tpu.memory_space<vmem>>, %arg8: memref<64x192xf32, #tpu.memory_space<vmem>>, %arg9: memref<1x192xf32, #tpu.memory_space<vmem>>, %arg10: memref<64x64xf32, #tpu.memory_space<vmem>>, %arg11: memref<1x64xf32, #tpu.memory_space<vmem>>, %arg12: memref<1x64xf32, #tpu.memory_space<vmem>>, %arg13: memref<1x64xf32, #tpu.memory_space<vmem>>, %arg14: memref<64x128xf32, #tpu.memory_space<vmem>>, %arg15: memref<1x128xf32, #tpu.memory_space<vmem>>, %arg16: memref<128x64xf32, #tpu.memory_space<vmem>>, %arg17: memref<1x64xf32, #tpu.memory_space<vmem>>, %arg18: memref<1x64xf32, #tpu.memory_space<vmem>>, %arg19: memref<1x64xf32, #tpu.memory_space<vmem>>, %arg20: memref<64x192xf32, #tpu.memory_space<vmem>>, %arg21: memref<1x192xf32, #tpu.memory_space<vmem>>, %arg22: memref<64x64xf32, #tpu.memory_space<vmem>>, %arg23: memref<1x64xf32, #tpu.memory_space<vmem>>, %arg24: memref<1x64xf32, #tpu.memory_space<vmem>>, %arg25: memref<1x64xf32, #tpu.memory_space<vmem>>, %arg26: memref<64x128xf32, #tpu.memory_space<vmem>>, %arg27: memref<1x128xf32, #tpu.memory_space<vmem>>, %arg28: memref<128x64xf32, #tpu.memory_space<vmem>>, %arg29: memref<1x64xf32, #tpu.memory_space<vmem>>, %arg30: memref<1x64xf32, #tpu.memory_space<vmem>>, %arg31: memref<1x64xf32, #tpu.memory_space<vmem>>, %arg32: memref<64x128xf32, #tpu.memory_space<vmem>>, %arg33: memref<1x128xf32, #tpu.memory_space<vmem>>, %arg34: memref<2x128xf32, #tpu.memory_space<vmem>>, %arg35: memref<10x64xf32, #tpu.memory_space<vmem>>, %arg36: memref<2x64xf32, #tpu.memory_space<vmem>>) attributes {dimension_semantics = [#tpu.dimension_semantics<arbitrary>], iteration_bounds = array<i64: 1>, scalar_prefetch = 0 : i64, scratch_operands = 2 : i64, tpu.core_type = #tpu.core_type<tc>, window_params = [{pipeline_mode = #tpu.pipeline_mode<synchronous>, transform_indices = @transform_0, window_bounds = array<i64: 8, 3072>}, {pipeline_mode = #tpu.pipeline_mode<synchronous>, transform_indices = @transform_1, window_bounds = array<i64: 3072, 64>}, {pipeline_mode = #tpu.pipeline_mode<synchronous>, transform_indices = @transform_2, window_bounds = array<i64: 1, 64>}, {pipeline_mode = #tpu.pipeline_mode<synchronous>, transform_indices = @transform_3, window_bounds = array<i64: 1, 64>}, {pipeline_mode = #tpu.pipeline_mode<synchronous>, transform_indices = @transform_4, window_bounds = array<i64: 5, 64>}, {pipeline_mode = #tpu.pipeline_mode<synchronous>, transform_indices = @transform_5, window_bounds = array<i64: 1, 64>}, {pipeline_mode = #tpu.pipeline_mode<synchronous>, transform_indices = @transform_6, window_bounds = array<i64: 1, 64>}, {pipeline_mode = #tpu.pipeline_mode<synchronous>, transform_indices = @transform_7, window_bounds = array<i64: 64, 192>}, {pipeline_mode = #tpu.pipeline_mode<synchronous>, transform_indices = @transform_8, window_bounds = array<i64: 1, 192>}, {pipeline_mode = #tpu.pipeline_mode<synchronous>, transform_indices = @transform_9, window_bounds = array<i64: 64, 64>}, {pipeline_mode = #tpu.pipeline_mode<synchronous>, transform_indices = @transform_10, window_bounds = array<i64: 1, 64>}, {pipeline_mode = #tpu.pipeline_mode<synchronous>, transform_indices = @transform_11, window_bounds = array<i64: 1, 64>}, {pipeline_mode = #tpu.pipeline_mode<synchronous>, transform_indices = @transform_12, window_bounds = array<i64: 1, 64>}, {pipeline_mode = #tpu.pipeline_mode<synchronous>, transform_indices = @transform_13, window_bounds = array<i64: 64, 128>}, {pipeline_mode = #tpu.pipeline_mode<synchronous>, transform_indices = @transform_14, window_bounds = array<i64: 1, 128>}, {pipeline_mode = #tpu.pipeline_mode<synchronous>, transform_indices = @transform_15, window_bounds = array<i64: 128, 64>}, {pipeline_mode = #tpu.pipeline_mode<synchronous>, transform_indices = @transform_16, window_bounds = array<i64: 1, 64>}, {pipeline_mode = #tpu.pipeline_mode<synchronous>, transform_indices = @transform_17, window_bounds = array<i64: 1, 64>}, {pipeline_mode = #tpu.pipeline_mode<synchronous>, transform_indices = @transform_18, window_bounds = array<i64: 1, 64>}, {pipeline_mode = #tpu.pipeline_mode<synchronous>, transform_indices = @transform_19, window_bounds = array<i64: 64, 192>}, {pipeline_mode = #tpu.pipeline_mode<synchronous>, transform_indices = @transform_20, window_bounds = array<i64: 1, 192>}, {pipeline_mode = #tpu.pipeline_mode<synchronous>, transform_indices = @transform_21, window_bounds = array<i64: 64, 64>}, {pipeline_mode = #tpu.pipeline_mode<synchronous>, transform_indices = @transform_22, window_bounds = array<i64: 1, 64>}, {pipeline_mode = #tpu.pipeline_mode<synchronous>, transform_indices = @transform_23, window_bounds = array<i64: 1, 64>}, {pipeline_mode = #tpu.pipeline_mode<synchronous>, transform_indices = @transform_24, window_bounds = array<i64: 1, 64>}, {pipeline_mode = #tpu.pipeline_mode<synchronous>, transform_indices = @transform_25, window_bounds = array<i64: 64, 128>}, {pipeline_mode = #tpu.pipeline_mode<synchronous>, transform_indices = @transform_26, window_bounds = array<i64: 1, 128>}, {pipeline_mode = #tpu.pipeline_mode<synchronous>, transform_indices = @transform_27, window_bounds = array<i64: 128, 64>}, {pipeline_mode = #tpu.pipeline_mode<synchronous>, transform_indices = @transform_28, window_bounds = array<i64: 1, 64>}, {pipeline_mode = #tpu.pipeline_mode<synchronous>, transform_indices = @transform_29, window_bounds = array<i64: 1, 64>}, {pipeline_mode = #tpu.pipeline_mode<synchronous>, transform_indices = @transform_30, window_bounds = array<i64: 1, 64>}, {pipeline_mode = #tpu.pipeline_mode<synchronous>, transform_indices = @transform_31, window_bounds = array<i64: 64, 128>}, {pipeline_mode = #tpu.pipeline_mode<synchronous>, transform_indices = @transform_32, window_bounds = array<i64: 1, 128>}, {pipeline_mode = #tpu.pipeline_mode<synchronous>, transform_indices = @transform_33, window_bounds = array<i64: 2, 128>}]} {
    %c0 = arith.constant 0 : index
    %c0_0 = arith.constant 0 : index
    %0 = vector.load %arg1[%c0, %c0_0] : memref<8x3072xf32, #tpu.memory_space<vmem>>, vector<8x3072xf32>
    %c0_1 = arith.constant 0 : index
    %c0_2 = arith.constant 0 : index
    %1 = vector.load %arg2[%c0_1, %c0_2] : memref<3072x64xf32, #tpu.memory_space<vmem>>, vector<3072x64xf32>
    %cst = arith.constant dense<0.000000e+00> : vector<8x64xf32>
    %2 = tpu.matmul %0, %1, %cst {dimension_numbers = #tpu.dot_dimension_numbers<[1], [0], [0], [1], [0, 0, 1, 1], [], []>} : vector<8x3072xf32>, vector<3072x64xf32>, vector<8x64xf32> -> vector<8x64xf32>
    %c0_3 = arith.constant 0 : index
    %c0_4 = arith.constant 0 : index
    %3 = vector.load %arg3[%c0_3, %c0_4] : memref<1x64xf32, #tpu.memory_space<vmem>>, vector<1x64xf32>
    %4 = vector.broadcast %3 : vector<1x64xf32> to vector<8x64xf32>
    %5 = arith.addf %2, %4 : vector<8x64xf32>
    %c0_5 = arith.constant 0 : index
    %c0_6 = arith.constant 0 : index
    %6 = vector.load %arg5[%c0_5, %c0_6] : memref<5x64xf32, #tpu.memory_space<vmem>>, vector<5x64xf32>
    %c0_7 = arith.constant 0 : index
    %c0_8 = arith.constant 0 : index
    %7 = vector.load %arg4[%c0_7, %c0_8] : memref<1x64xf32, #tpu.memory_space<vmem>>, vector<1x64xf32>
    %8 = vector.extract_strided_slice %6 {offsets = [0, 0], sizes = [1, 64], strides = [1, 1]} : vector<5x64xf32> to vector<1x64xf32>
    %9 = arith.addf %7, %8 : vector<1x64xf32>
    %c0_9 = arith.constant 0 : index
    %c0_10 = arith.constant 0 : index
    %10 = vector.load %arg35[%c0_9, %c0_10] : memref<10x64xf32, #tpu.memory_space<vmem>>, vector<1x64xf32>
    tpu.vector_store %arg35[%c0_9, %c0_10], %9 {strides = array<i32>} : memref<10x64xf32, #tpu.memory_space<vmem>>, vector<1x64xf32>,
    %11 = vector.extract_strided_slice %5 {offsets = [0, 0], sizes = [4, 64], strides = [1, 1]} : vector<8x64xf32> to vector<4x64xf32>
    %12 = vector.extract_strided_slice %6 {offsets = [1, 0], sizes = [4, 64], strides = [1, 1]} : vector<5x64xf32> to vector<4x64xf32>
    %13 = arith.addf %11, %12 : vector<4x64xf32>
    %c1 = arith.constant 1 : index
    %c0_11 = arith.constant 0 : index
    %14 = vector.load %arg35[%c1, %c0_11] : memref<10x64xf32, #tpu.memory_space<vmem>>, vector<4x64xf32>
    tpu.vector_store %arg35[%c1, %c0_11], %13 {strides = array<i32>} : memref<10x64xf32, #tpu.memory_space<vmem>>, vector<4x64xf32>,
    %c5 = arith.constant 5 : index
    %c0_12 = arith.constant 0 : index
    %15 = vector.load %arg35[%c5, %c0_12] : memref<10x64xf32, #tpu.memory_space<vmem>>, vector<1x64xf32>
    tpu.vector_store %arg35[%c5, %c0_12], %9 {strides = array<i32>} : memref<10x64xf32, #tpu.memory_space<vmem>>, vector<1x64xf32>,
    %16 = vector.extract_strided_slice %5 {offsets = [4, 0], sizes = [4, 64], strides = [1, 1]} : vector<8x64xf32> to vector<4x64xf32>
    %17 = vector.extract_strided_slice %6 {offsets = [1, 0], sizes = [4, 64], strides = [1, 1]} : vector<5x64xf32> to vector<4x64xf32>
    %18 = arith.addf %16, %17 : vector<4x64xf32>
    %c6 = arith.constant 6 : index
    %c0_13 = arith.constant 0 : index
    %19 = vector.load %arg35[%c6, %c0_13] : memref<10x64xf32, #tpu.memory_space<vmem>>, vector<4x64xf32>
    tpu.vector_store %arg35[%c6, %c0_13], %18 {strides = array<i32>} : memref<10x64xf32, #tpu.memory_space<vmem>>, vector<4x64xf32>,
    %c0_14 = arith.constant 0 : index
    %c0_15 = arith.constant 0 : index
    %20 = vector.load %arg6[%c0_14, %c0_15] : memref<1x64xf32, #tpu.memory_space<vmem>>, vector<1x64xf32>
    %c0_16 = arith.constant 0 : index
    %c0_17 = arith.constant 0 : index
    %21 = vector.load %arg7[%c0_16, %c0_17] : memref<1x64xf32, #tpu.memory_space<vmem>>, vector<1x64xf32>
    %c0_18 = arith.constant 0 : index
    %c0_19 = arith.constant 0 : index
    %22 = vector.load %arg8[%c0_18, %c0_19] : memref<64x192xf32, #tpu.memory_space<vmem>>, vector<64x192xf32>
    %c0_20 = arith.constant 0 : index
    %c0_21 = arith.constant 0 : index
    %23 = vector.load %arg9[%c0_20, %c0_21] : memref<1x192xf32, #tpu.memory_space<vmem>>, vector<1x192xf32>
    %c0_22 = arith.constant 0 : index
    %c0_23 = arith.constant 0 : index
    %24 = vector.load %arg10[%c0_22, %c0_23] : memref<64x64xf32, #tpu.memory_space<vmem>>, vector<64x64xf32>
    %c0_24 = arith.constant 0 : index
    %c0_25 = arith.constant 0 : index
    %25 = vector.load %arg11[%c0_24, %c0_25] : memref<1x64xf32, #tpu.memory_space<vmem>>, vector<1x64xf32>
    %c0_26 = arith.constant 0 : index
    %c0_27 = arith.constant 0 : index
    %26 = vector.load %arg12[%c0_26, %c0_27] : memref<1x64xf32, #tpu.memory_space<vmem>>, vector<1x64xf32>
    %c0_28 = arith.constant 0 : index
    %c0_29 = arith.constant 0 : index
    %27 = vector.load %arg13[%c0_28, %c0_29] : memref<1x64xf32, #tpu.memory_space<vmem>>, vector<1x64xf32>
    %c0_30 = arith.constant 0 : index
    %c0_31 = arith.constant 0 : index
    %28 = vector.load %arg14[%c0_30, %c0_31] : memref<64x128xf32, #tpu.memory_space<vmem>>, vector<64x128xf32>
    %c0_32 = arith.constant 0 : index
    %c0_33 = arith.constant 0 : index
    %29 = vector.load %arg15[%c0_32, %c0_33] : memref<1x128xf32, #tpu.memory_space<vmem>>, vector<1x128xf32>
    %c0_34 = arith.constant 0 : index
    %c0_35 = arith.constant 0 : index
    %30 = vector.load %arg16[%c0_34, %c0_35] : memref<128x64xf32, #tpu.memory_space<vmem>>, vector<128x64xf32>
    %c0_36 = arith.constant 0 : index
    %c0_37 = arith.constant 0 : index
    %31 = vector.load %arg17[%c0_36, %c0_37] : memref<1x64xf32, #tpu.memory_space<vmem>>, vector<1x64xf32>
    %c0_38 = arith.constant 0 : index
    %c0_39 = arith.constant 0 : index
    %32 = vector.load %arg35[%c0_38, %c0_39] : memref<10x64xf32, #tpu.memory_space<vmem>>, vector<10x64xf32>
    %cst_40 = arith.constant dense<0.000000e+00> : vector<10xf32>
    %33 = vector.multi_reduction <add>, %32, %cst_40 [1] : vector<10x64xf32> to vector<10xf32>
    %34 = vector.shape_cast %33 : vector<10xf32> to vector<10x1xf32>
    %cst_41 = arith.constant 6.400000e+01 : f32
    %35 = vector.broadcast %cst_41 : f32 to vector<10x1xf32>
    %36 = arith.divf %34, %35 : vector<10x1xf32>
    %37 = vector.broadcast %36 : vector<10x1xf32> to vector<10x64xf32>
    %38 = arith.subf %32, %37 : vector<10x64xf32>
    %39 = arith.mulf %38, %38 : vector<10x64xf32>
    %cst_42 = arith.constant dense<0.000000e+00> : vector<10xf32>
    %40 = vector.multi_reduction <add>, %39, %cst_42 [1] : vector<10x64xf32> to vector<10xf32>
    %41 = vector.shape_cast %40 : vector<10xf32> to vector<10x1xf32>
    %cst_43 = arith.constant 6.400000e+01 : f32
    %42 = vector.broadcast %cst_43 : f32 to vector<10x1xf32>
    %43 = arith.divf %41, %42 : vector<10x1xf32>
    %44 = vector.broadcast %36 : vector<10x1xf32> to vector<10x64xf32>
    %45 = arith.subf %32, %44 : vector<10x64xf32>
    %cst_44 = arith.constant 9.99999997E-7 : f32
    %46 = vector.broadcast %cst_44 : f32 to vector<10x1xf32>
    %47 = arith.addf %43, %46 : vector<10x1xf32>
    %48 = math.rsqrt %47 : vector<10x1xf32>
    %49 = vector.broadcast %48 : vector<10x1xf32> to vector<10x64xf32>
    %50 = arith.mulf %45, %49 : vector<10x64xf32>
    %51 = vector.broadcast %20 : vector<1x64xf32> to vector<10x64xf32>
    %52 = arith.mulf %50, %51 : vector<10x64xf32>
    %53 = vector.broadcast %21 : vector<1x64xf32> to vector<10x64xf32>
    %54 = arith.addf %52, %53 : vector<10x64xf32>
    %cst_45 = arith.constant dense<0.000000e+00> : vector<10x192xf32>
    %55 = tpu.matmul %54, %22, %cst_45 {dimension_numbers = #tpu.dot_dimension_numbers<[1], [0], [0], [1], [0, 0, 1, 1], [], []>} : vector<10x64xf32>, vector<64x192xf32>, vector<10x192xf32> -> vector<10x192xf32>
    %56 = vector.broadcast %23 : vector<1x192xf32> to vector<10x192xf32>
    %57 = arith.addf %55, %56 : vector<10x192xf32>
    %58 = vector.extract_strided_slice %57 {offsets = [0, 0], sizes = [5, 64], strides = [1, 1]} : vector<10x192xf32> to vector<5x64xf32>
    %59 = vector.extract_strided_slice %57 {offsets = [0, 64], sizes = [5, 64], strides = [1, 1]} : vector<10x192xf32> to vector<5x64xf32>
    %60 = vector.extract_strided_slice %57 {offsets = [0, 128], sizes = [5, 64], strides = [1, 1]} : vector<10x192xf32> to vector<5x64xf32>
    %61 = vector.extract_strided_slice %58 {offsets = [0, 0], sizes = [5, 16], strides = [1, 1]} : vector<5x64xf32> to vector<5x16xf32>
    %62 = vector.extract_strided_slice %59 {offsets = [0, 0], sizes = [5, 16], strides = [1, 1]} : vector<5x64xf32> to vector<5x16xf32>
    %63 = vector.extract_strided_slice %60 {offsets = [0, 0], sizes = [5, 16], strides = [1, 1]} : vector<5x64xf32> to vector<5x16xf32>
    %64 = tpu.transpose %62, [1, 0] : vector<5x16xf32> -> vector<16x5xf32>
    %cst_46 = arith.constant dense<0.000000e+00> : vector<5x5xf32>
    %65 = tpu.matmul %61, %64, %cst_46 {dimension_numbers = #tpu.dot_dimension_numbers<[1], [0], [0], [1], [0, 0, 1, 1], [], []>} : vector<5x16xf32>, vector<16x5xf32>, vector<5x5xf32> -> vector<5x5xf32>
    %cst_47 = arith.constant dense<0xFF800000> : vector<5xf32>
    %66 = vector.multi_reduction <maximumf>, %65, %cst_47 [1] : vector<5x5xf32> to vector<5xf32>
    %67 = vector.shape_cast %66 : vector<5xf32> to vector<5x1xf32>
    %68 = vector.broadcast %67 : vector<5x1xf32> to vector<5x5xf32>
    %69 = arith.subf %65, %68 : vector<5x5xf32>
    %70 = math.exp %69 : vector<5x5xf32>
    %cst_48 = arith.constant dense<0.000000e+00> : vector<5xf32>
    %71 = vector.multi_reduction <add>, %70, %cst_48 [1] : vector<5x5xf32> to vector<5xf32>
    %72 = vector.shape_cast %71 : vector<5xf32> to vector<5x1xf32>
    %73 = tpu.reciprocal %72 {approx = true} : vector<5x1xf32> -> vector<5x1xf32>
    %74 = vector.broadcast %73 : vector<5x1xf32> to vector<5x5xf32>
    %75 = arith.mulf %70, %74 : vector<5x5xf32>
    %cst_49 = arith.constant dense<0.000000e+00> : vector<5x16xf32>
    %76 = tpu.matmul %75, %63, %cst_49 {dimension_numbers = #tpu.dot_dimension_numbers<[1], [0], [0], [1], [0, 0, 1, 1], [], []>} : vector<5x5xf32>, vector<5x16xf32>, vector<5x16xf32> -> vector<5x16xf32>
    %77 = vector.extract_strided_slice %24 {offsets = [0, 0], sizes = [16, 64], strides = [1, 1]} : vector<64x64xf32> to vector<16x64xf32>
    %cst_50 = arith.constant dense<0.000000e+00> : vector<5x64xf32>
    %78 = tpu.matmul %76, %77, %cst_50 {dimension_numbers = #tpu.dot_dimension_numbers<[1], [0], [0], [1], [0, 0, 1, 1], [], []>} : vector<5x16xf32>, vector<16x64xf32>, vector<5x64xf32> -> vector<5x64xf32>
    %79 = vector.extract_strided_slice %58 {offsets = [0, 16], sizes = [5, 16], strides = [1, 1]} : vector<5x64xf32> to vector<5x16xf32>
    %80 = vector.extract_strided_slice %59 {offsets = [0, 16], sizes = [5, 16], strides = [1, 1]} : vector<5x64xf32> to vector<5x16xf32>
    %81 = vector.extract_strided_slice %60 {offsets = [0, 16], sizes = [5, 16], strides = [1, 1]} : vector<5x64xf32> to vector<5x16xf32>
    %82 = tpu.transpose %80, [1, 0] : vector<5x16xf32> -> vector<16x5xf32>
    %cst_51 = arith.constant dense<0.000000e+00> : vector<5x5xf32>
    %83 = tpu.matmul %79, %82, %cst_51 {dimension_numbers = #tpu.dot_dimension_numbers<[1], [0], [0], [1], [0, 0, 1, 1], [], []>} : vector<5x16xf32>, vector<16x5xf32>, vector<5x5xf32> -> vector<5x5xf32>
    %cst_52 = arith.constant dense<0xFF800000> : vector<5xf32>
    %84 = vector.multi_reduction <maximumf>, %83, %cst_52 [1] : vector<5x5xf32> to vector<5xf32>
    %85 = vector.shape_cast %84 : vector<5xf32> to vector<5x1xf32>
    %86 = vector.broadcast %85 : vector<5x1xf32> to vector<5x5xf32>
    %87 = arith.subf %83, %86 : vector<5x5xf32>
    %88 = math.exp %87 : vector<5x5xf32>
    %cst_53 = arith.constant dense<0.000000e+00> : vector<5xf32>
    %89 = vector.multi_reduction <add>, %88, %cst_53 [1] : vector<5x5xf32> to vector<5xf32>
    %90 = vector.shape_cast %89 : vector<5xf32> to vector<5x1xf32>
    %91 = tpu.reciprocal %90 {approx = true} : vector<5x1xf32> -> vector<5x1xf32>
    %92 = vector.broadcast %91 : vector<5x1xf32> to vector<5x5xf32>
    %93 = arith.mulf %88, %92 : vector<5x5xf32>
    %cst_54 = arith.constant dense<0.000000e+00> : vector<5x16xf32>
    %94 = tpu.matmul %93, %81, %cst_54 {dimension_numbers = #tpu.dot_dimension_numbers<[1], [0], [0], [1], [0, 0, 1, 1], [], []>} : vector<5x5xf32>, vector<5x16xf32>, vector<5x16xf32> -> vector<5x16xf32>
    %95 = vector.extract_strided_slice %24 {offsets = [16, 0], sizes = [16, 64], strides = [1, 1]} : vector<64x64xf32> to vector<16x64xf32>
    %cst_55 = arith.constant dense<0.000000e+00> : vector<5x64xf32>
    %96 = tpu.matmul %94, %95, %cst_55 {dimension_numbers = #tpu.dot_dimension_numbers<[1], [0], [0], [1], [0, 0, 1, 1], [], []>} : vector<5x16xf32>, vector<16x64xf32>, vector<5x64xf32> -> vector<5x64xf32>
    %97 = arith.addf %78, %96 : vector<5x64xf32>
    %98 = vector.extract_strided_slice %58 {offsets = [0, 32], sizes = [5, 16], strides = [1, 1]} : vector<5x64xf32> to vector<5x16xf32>
    %99 = vector.extract_strided_slice %59 {offsets = [0, 32], sizes = [5, 16], strides = [1, 1]} : vector<5x64xf32> to vector<5x16xf32>
    %100 = vector.extract_strided_slice %60 {offsets = [0, 32], sizes = [5, 16], strides = [1, 1]} : vector<5x64xf32> to vector<5x16xf32>
    %101 = tpu.transpose %99, [1, 0] : vector<5x16xf32> -> vector<16x5xf32>
    %cst_56 = arith.constant dense<0.000000e+00> : vector<5x5xf32>
    %102 = tpu.matmul %98, %101, %cst_56 {dimension_numbers = #tpu.dot_dimension_numbers<[1], [0], [0], [1], [0, 0, 1, 1], [], []>} : vector<5x16xf32>, vector<16x5xf32>, vector<5x5xf32> -> vector<5x5xf32>
    %cst_57 = arith.constant dense<0xFF800000> : vector<5xf32>
    %103 = vector.multi_reduction <maximumf>, %102, %cst_57 [1] : vector<5x5xf32> to vector<5xf32>
    %104 = vector.shape_cast %103 : vector<5xf32> to vector<5x1xf32>
    %105 = vector.broadcast %104 : vector<5x1xf32> to vector<5x5xf32>
    %106 = arith.subf %102, %105 : vector<5x5xf32>
    %107 = math.exp %106 : vector<5x5xf32>
    %cst_58 = arith.constant dense<0.000000e+00> : vector<5xf32>
    %108 = vector.multi_reduction <add>, %107, %cst_58 [1] : vector<5x5xf32> to vector<5xf32>
    %109 = vector.shape_cast %108 : vector<5xf32> to vector<5x1xf32>
    %110 = tpu.reciprocal %109 {approx = true} : vector<5x1xf32> -> vector<5x1xf32>
    %111 = vector.broadcast %110 : vector<5x1xf32> to vector<5x5xf32>
    %112 = arith.mulf %107, %111 : vector<5x5xf32>
    %cst_59 = arith.constant dense<0.000000e+00> : vector<5x16xf32>
    %113 = tpu.matmul %112, %100, %cst_59 {dimension_numbers = #tpu.dot_dimension_numbers<[1], [0], [0], [1], [0, 0, 1, 1], [], []>} : vector<5x5xf32>, vector<5x16xf32>, vector<5x16xf32> -> vector<5x16xf32>
    %114 = vector.extract_strided_slice %24 {offsets = [32, 0], sizes = [16, 64], strides = [1, 1]} : vector<64x64xf32> to vector<16x64xf32>
    %cst_60 = arith.constant dense<0.000000e+00> : vector<5x64xf32>
    %115 = tpu.matmul %113, %114, %cst_60 {dimension_numbers = #tpu.dot_dimension_numbers<[1], [0], [0], [1], [0, 0, 1, 1], [], []>} : vector<5x16xf32>, vector<16x64xf32>, vector<5x64xf32> -> vector<5x64xf32>
    %116 = arith.addf %97, %115 : vector<5x64xf32>
    %117 = vector.extract_strided_slice %58 {offsets = [0, 48], sizes = [5, 16], strides = [1, 1]} : vector<5x64xf32> to vector<5x16xf32>
    %118 = vector.extract_strided_slice %59 {offsets = [0, 48], sizes = [5, 16], strides = [1, 1]} : vector<5x64xf32> to vector<5x16xf32>
    %119 = vector.extract_strided_slice %60 {offsets = [0, 48], sizes = [5, 16], strides = [1, 1]} : vector<5x64xf32> to vector<5x16xf32>
    %120 = tpu.transpose %118, [1, 0] : vector<5x16xf32> -> vector<16x5xf32>
    %cst_61 = arith.constant dense<0.000000e+00> : vector<5x5xf32>
    %121 = tpu.matmul %117, %120, %cst_61 {dimension_numbers = #tpu.dot_dimension_numbers<[1], [0], [0], [1], [0, 0, 1, 1], [], []>} : vector<5x16xf32>, vector<16x5xf32>, vector<5x5xf32> -> vector<5x5xf32>
    %cst_62 = arith.constant dense<0xFF800000> : vector<5xf32>
    %122 = vector.multi_reduction <maximumf>, %121, %cst_62 [1] : vector<5x5xf32> to vector<5xf32>
    %123 = vector.shape_cast %122 : vector<5xf32> to vector<5x1xf32>
    %124 = vector.broadcast %123 : vector<5x1xf32> to vector<5x5xf32>
    %125 = arith.subf %121, %124 : vector<5x5xf32>
    %126 = math.exp %125 : vector<5x5xf32>
    %cst_63 = arith.constant dense<0.000000e+00> : vector<5xf32>
    %127 = vector.multi_reduction <add>, %126, %cst_63 [1] : vector<5x5xf32> to vector<5xf32>
    %128 = vector.shape_cast %127 : vector<5xf32> to vector<5x1xf32>
    %129 = tpu.reciprocal %128 {approx = true} : vector<5x1xf32> -> vector<5x1xf32>
    %130 = vector.broadcast %129 : vector<5x1xf32> to vector<5x5xf32>
    %131 = arith.mulf %126, %130 : vector<5x5xf32>
    %cst_64 = arith.constant dense<0.000000e+00> : vector<5x16xf32>
    %132 = tpu.matmul %131, %119, %cst_64 {dimension_numbers = #tpu.dot_dimension_numbers<[1], [0], [0], [1], [0, 0, 1, 1], [], []>} : vector<5x5xf32>, vector<5x16xf32>, vector<5x16xf32> -> vector<5x16xf32>
    %133 = vector.extract_strided_slice %24 {offsets = [48, 0], sizes = [16, 64], strides = [1, 1]} : vector<64x64xf32> to vector<16x64xf32>
    %cst_65 = arith.constant dense<0.000000e+00> : vector<5x64xf32>
    %134 = tpu.matmul %132, %133, %cst_65 {dimension_numbers = #tpu.dot_dimension_numbers<[1], [0], [0], [1], [0, 0, 1, 1], [], []>} : vector<5x16xf32>, vector<16x64xf32>, vector<5x64xf32> -> vector<5x64xf32>
    %135 = arith.addf %116, %134 : vector<5x64xf32>
    %136 = vector.extract_strided_slice %32 {offsets = [0, 0], sizes = [5, 64], strides = [1, 1]} : vector<10x64xf32> to vector<5x64xf32>
    %137 = arith.addf %136, %135 : vector<5x64xf32>
    %138 = vector.broadcast %25 : vector<1x64xf32> to vector<5x64xf32>
    %139 = arith.addf %137, %138 : vector<5x64xf32>
    %c0_66 = arith.constant 0 : index
    %c0_67 = arith.constant 0 : index
    %140 = vector.load %arg35[%c0_66, %c0_67] : memref<10x64xf32, #tpu.memory_space<vmem>>, vector<5x64xf32>
    tpu.vector_store %arg35[%c0_66, %c0_67], %139 {strides = array<i32>} : memref<10x64xf32, #tpu.memory_space<vmem>>, vector<5x64xf32>,
    %141 = vector.extract_strided_slice %57 {offsets = [5, 0], sizes = [5, 64], strides = [1, 1]} : vector<10x192xf32> to vector<5x64xf32>
    %142 = vector.extract_strided_slice %57 {offsets = [5, 64], sizes = [5, 64], strides = [1, 1]} : vector<10x192xf32> to vector<5x64xf32>
    %143 = vector.extract_strided_slice %57 {offsets = [5, 128], sizes = [5, 64], strides = [1, 1]} : vector<10x192xf32> to vector<5x64xf32>
    %144 = vector.extract_strided_slice %141 {offsets = [0, 0], sizes = [5, 16], strides = [1, 1]} : vector<5x64xf32> to vector<5x16xf32>
    %145 = vector.extract_strided_slice %142 {offsets = [0, 0], sizes = [5, 16], strides = [1, 1]} : vector<5x64xf32> to vector<5x16xf32>
    %146 = vector.extract_strided_slice %143 {offsets = [0, 0], sizes = [5, 16], strides = [1, 1]} : vector<5x64xf32> to vector<5x16xf32>
    %147 = tpu.transpose %145, [1, 0] : vector<5x16xf32> -> vector<16x5xf32>
    %cst_68 = arith.constant dense<0.000000e+00> : vector<5x5xf32>
    %148 = tpu.matmul %144, %147, %cst_68 {dimension_numbers = #tpu.dot_dimension_numbers<[1], [0], [0], [1], [0, 0, 1, 1], [], []>} : vector<5x16xf32>, vector<16x5xf32>, vector<5x5xf32> -> vector<5x5xf32>
    %cst_69 = arith.constant dense<0xFF800000> : vector<5xf32>
    %149 = vector.multi_reduction <maximumf>, %148, %cst_69 [1] : vector<5x5xf32> to vector<5xf32>
    %150 = vector.shape_cast %149 : vector<5xf32> to vector<5x1xf32>
    %151 = vector.broadcast %150 : vector<5x1xf32> to vector<5x5xf32>
    %152 = arith.subf %148, %151 : vector<5x5xf32>
    %153 = math.exp %152 : vector<5x5xf32>
    %cst_70 = arith.constant dense<0.000000e+00> : vector<5xf32>
    %154 = vector.multi_reduction <add>, %153, %cst_70 [1] : vector<5x5xf32> to vector<5xf32>
    %155 = vector.shape_cast %154 : vector<5xf32> to vector<5x1xf32>
    %156 = tpu.reciprocal %155 {approx = true} : vector<5x1xf32> -> vector<5x1xf32>
    %157 = vector.broadcast %156 : vector<5x1xf32> to vector<5x5xf32>
    %158 = arith.mulf %153, %157 : vector<5x5xf32>
    %cst_71 = arith.constant dense<0.000000e+00> : vector<5x16xf32>
    %159 = tpu.matmul %158, %146, %cst_71 {dimension_numbers = #tpu.dot_dimension_numbers<[1], [0], [0], [1], [0, 0, 1, 1], [], []>} : vector<5x5xf32>, vector<5x16xf32>, vector<5x16xf32> -> vector<5x16xf32>
    %160 = vector.extract_strided_slice %24 {offsets = [0, 0], sizes = [16, 64], strides = [1, 1]} : vector<64x64xf32> to vector<16x64xf32>
    %cst_72 = arith.constant dense<0.000000e+00> : vector<5x64xf32>
    %161 = tpu.matmul %159, %160, %cst_72 {dimension_numbers = #tpu.dot_dimension_numbers<[1], [0], [0], [1], [0, 0, 1, 1], [], []>} : vector<5x16xf32>, vector<16x64xf32>, vector<5x64xf32> -> vector<5x64xf32>
    %162 = vector.extract_strided_slice %141 {offsets = [0, 16], sizes = [5, 16], strides = [1, 1]} : vector<5x64xf32> to vector<5x16xf32>
    %163 = vector.extract_strided_slice %142 {offsets = [0, 16], sizes = [5, 16], strides = [1, 1]} : vector<5x64xf32> to vector<5x16xf32>
    %164 = vector.extract_strided_slice %143 {offsets = [0, 16], sizes = [5, 16], strides = [1, 1]} : vector<5x64xf32> to vector<5x16xf32>
    %165 = tpu.transpose %163, [1, 0] : vector<5x16xf32> -> vector<16x5xf32>
    %cst_73 = arith.constant dense<0.000000e+00> : vector<5x5xf32>
    %166 = tpu.matmul %162, %165, %cst_73 {dimension_numbers = #tpu.dot_dimension_numbers<[1], [0], [0], [1], [0, 0, 1, 1], [], []>} : vector<5x16xf32>, vector<16x5xf32>, vector<5x5xf32> -> vector<5x5xf32>
    %cst_74 = arith.constant dense<0xFF800000> : vector<5xf32>
    %167 = vector.multi_reduction <maximumf>, %166, %cst_74 [1] : vector<5x5xf32> to vector<5xf32>
    %168 = vector.shape_cast %167 : vector<5xf32> to vector<5x1xf32>
    %169 = vector.broadcast %168 : vector<5x1xf32> to vector<5x5xf32>
    %170 = arith.subf %166, %169 : vector<5x5xf32>
    %171 = math.exp %170 : vector<5x5xf32>
    %cst_75 = arith.constant dense<0.000000e+00> : vector<5xf32>
    %172 = vector.multi_reduction <add>, %171, %cst_75 [1] : vector<5x5xf32> to vector<5xf32>
    %173 = vector.shape_cast %172 : vector<5xf32> to vector<5x1xf32>
    %174 = tpu.reciprocal %173 {approx = true} : vector<5x1xf32> -> vector<5x1xf32>
    %175 = vector.broadcast %174 : vector<5x1xf32> to vector<5x5xf32>
    %176 = arith.mulf %171, %175 : vector<5x5xf32>
    %cst_76 = arith.constant dense<0.000000e+00> : vector<5x16xf32>
    %177 = tpu.matmul %176, %164, %cst_76 {dimension_numbers = #tpu.dot_dimension_numbers<[1], [0], [0], [1], [0, 0, 1, 1], [], []>} : vector<5x5xf32>, vector<5x16xf32>, vector<5x16xf32> -> vector<5x16xf32>
    %178 = vector.extract_strided_slice %24 {offsets = [16, 0], sizes = [16, 64], strides = [1, 1]} : vector<64x64xf32> to vector<16x64xf32>
    %cst_77 = arith.constant dense<0.000000e+00> : vector<5x64xf32>
    %179 = tpu.matmul %177, %178, %cst_77 {dimension_numbers = #tpu.dot_dimension_numbers<[1], [0], [0], [1], [0, 0, 1, 1], [], []>} : vector<5x16xf32>, vector<16x64xf32>, vector<5x64xf32> -> vector<5x64xf32>
    %180 = arith.addf %161, %179 : vector<5x64xf32>
    %181 = vector.extract_strided_slice %141 {offsets = [0, 32], sizes = [5, 16], strides = [1, 1]} : vector<5x64xf32> to vector<5x16xf32>
    %182 = vector.extract_strided_slice %142 {offsets = [0, 32], sizes = [5, 16], strides = [1, 1]} : vector<5x64xf32> to vector<5x16xf32>
    %183 = vector.extract_strided_slice %143 {offsets = [0, 32], sizes = [5, 16], strides = [1, 1]} : vector<5x64xf32> to vector<5x16xf32>
    %184 = tpu.transpose %182, [1, 0] : vector<5x16xf32> -> vector<16x5xf32>
    %cst_78 = arith.constant dense<0.000000e+00> : vector<5x5xf32>
    %185 = tpu.matmul %181, %184, %cst_78 {dimension_numbers = #tpu.dot_dimension_numbers<[1], [0], [0], [1], [0, 0, 1, 1], [], []>} : vector<5x16xf32>, vector<16x5xf32>, vector<5x5xf32> -> vector<5x5xf32>
    %cst_79 = arith.constant dense<0xFF800000> : vector<5xf32>
    %186 = vector.multi_reduction <maximumf>, %185, %cst_79 [1] : vector<5x5xf32> to vector<5xf32>
    %187 = vector.shape_cast %186 : vector<5xf32> to vector<5x1xf32>
    %188 = vector.broadcast %187 : vector<5x1xf32> to vector<5x5xf32>
    %189 = arith.subf %185, %188 : vector<5x5xf32>
    %190 = math.exp %189 : vector<5x5xf32>
    %cst_80 = arith.constant dense<0.000000e+00> : vector<5xf32>
    %191 = vector.multi_reduction <add>, %190, %cst_80 [1] : vector<5x5xf32> to vector<5xf32>
    %192 = vector.shape_cast %191 : vector<5xf32> to vector<5x1xf32>
    %193 = tpu.reciprocal %192 {approx = true} : vector<5x1xf32> -> vector<5x1xf32>
    %194 = vector.broadcast %193 : vector<5x1xf32> to vector<5x5xf32>
    %195 = arith.mulf %190, %194 : vector<5x5xf32>
    %cst_81 = arith.constant dense<0.000000e+00> : vector<5x16xf32>
    %196 = tpu.matmul %195, %183, %cst_81 {dimension_numbers = #tpu.dot_dimension_numbers<[1], [0], [0], [1], [0, 0, 1, 1], [], []>} : vector<5x5xf32>, vector<5x16xf32>, vector<5x16xf32> -> vector<5x16xf32>
    %197 = vector.extract_strided_slice %24 {offsets = [32, 0], sizes = [16, 64], strides = [1, 1]} : vector<64x64xf32> to vector<16x64xf32>
    %cst_82 = arith.constant dense<0.000000e+00> : vector<5x64xf32>
    %198 = tpu.matmul %196, %197, %cst_82 {dimension_numbers = #tpu.dot_dimension_numbers<[1], [0], [0], [1], [0, 0, 1, 1], [], []>} : vector<5x16xf32>, vector<16x64xf32>, vector<5x64xf32> -> vector<5x64xf32>
    %199 = arith.addf %180, %198 : vector<5x64xf32>
    %200 = vector.extract_strided_slice %141 {offsets = [0, 48], sizes = [5, 16], strides = [1, 1]} : vector<5x64xf32> to vector<5x16xf32>
    %201 = vector.extract_strided_slice %142 {offsets = [0, 48], sizes = [5, 16], strides = [1, 1]} : vector<5x64xf32> to vector<5x16xf32>
    %202 = vector.extract_strided_slice %143 {offsets = [0, 48], sizes = [5, 16], strides = [1, 1]} : vector<5x64xf32> to vector<5x16xf32>
    %203 = tpu.transpose %201, [1, 0] : vector<5x16xf32> -> vector<16x5xf32>
    %cst_83 = arith.constant dense<0.000000e+00> : vector<5x5xf32>
    %204 = tpu.matmul %200, %203, %cst_83 {dimension_numbers = #tpu.dot_dimension_numbers<[1], [0], [0], [1], [0, 0, 1, 1], [], []>} : vector<5x16xf32>, vector<16x5xf32>, vector<5x5xf32> -> vector<5x5xf32>
    %cst_84 = arith.constant dense<0xFF800000> : vector<5xf32>
    %205 = vector.multi_reduction <maximumf>, %204, %cst_84 [1] : vector<5x5xf32> to vector<5xf32>
    %206 = vector.shape_cast %205 : vector<5xf32> to vector<5x1xf32>
    %207 = vector.broadcast %206 : vector<5x1xf32> to vector<5x5xf32>
    %208 = arith.subf %204, %207 : vector<5x5xf32>
    %209 = math.exp %208 : vector<5x5xf32>
    %cst_85 = arith.constant dense<0.000000e+00> : vector<5xf32>
    %210 = vector.multi_reduction <add>, %209, %cst_85 [1] : vector<5x5xf32> to vector<5xf32>
    %211 = vector.shape_cast %210 : vector<5xf32> to vector<5x1xf32>
    %212 = tpu.reciprocal %211 {approx = true} : vector<5x1xf32> -> vector<5x1xf32>
    %213 = vector.broadcast %212 : vector<5x1xf32> to vector<5x5xf32>
    %214 = arith.mulf %209, %213 : vector<5x5xf32>
    %cst_86 = arith.constant dense<0.000000e+00> : vector<5x16xf32>
    %215 = tpu.matmul %214, %202, %cst_86 {dimension_numbers = #tpu.dot_dimension_numbers<[1], [0], [0], [1], [0, 0, 1, 1], [], []>} : vector<5x5xf32>, vector<5x16xf32>, vector<5x16xf32> -> vector<5x16xf32>
    %216 = vector.extract_strided_slice %24 {offsets = [48, 0], sizes = [16, 64], strides = [1, 1]} : vector<64x64xf32> to vector<16x64xf32>
    %cst_87 = arith.constant dense<0.000000e+00> : vector<5x64xf32>
    %217 = tpu.matmul %215, %216, %cst_87 {dimension_numbers = #tpu.dot_dimension_numbers<[1], [0], [0], [1], [0, 0, 1, 1], [], []>} : vector<5x16xf32>, vector<16x64xf32>, vector<5x64xf32> -> vector<5x64xf32>
    %218 = arith.addf %199, %217 : vector<5x64xf32>
    %219 = vector.extract_strided_slice %32 {offsets = [5, 0], sizes = [5, 64], strides = [1, 1]} : vector<10x64xf32> to vector<5x64xf32>
    %220 = arith.addf %219, %218 : vector<5x64xf32>
    %221 = vector.broadcast %25 : vector<1x64xf32> to vector<5x64xf32>
    %222 = arith.addf %220, %221 : vector<5x64xf32>
    %c5_88 = arith.constant 5 : index
    %c0_89 = arith.constant 0 : index
    %223 = vector.load %arg35[%c5_88, %c0_89] : memref<10x64xf32, #tpu.memory_space<vmem>>, vector<5x64xf32>
    tpu.vector_store %arg35[%c5_88, %c0_89], %222 {strides = array<i32>} : memref<10x64xf32, #tpu.memory_space<vmem>>, vector<5x64xf32>,
    %c0_90 = arith.constant 0 : index
    %c0_91 = arith.constant 0 : index
    %224 = vector.load %arg35[%c0_90, %c0_91] : memref<10x64xf32, #tpu.memory_space<vmem>>, vector<10x64xf32>
    %cst_92 = arith.constant dense<0.000000e+00> : vector<10xf32>
    %225 = vector.multi_reduction <add>, %224, %cst_92 [1] : vector<10x64xf32> to vector<10xf32>
    %226 = vector.shape_cast %225 : vector<10xf32> to vector<10x1xf32>
    %cst_93 = arith.constant 6.400000e+01 : f32
    %227 = vector.broadcast %cst_93 : f32 to vector<10x1xf32>
    %228 = arith.divf %226, %227 : vector<10x1xf32>
    %229 = vector.broadcast %228 : vector<10x1xf32> to vector<10x64xf32>
    %230 = arith.subf %224, %229 : vector<10x64xf32>
    %231 = arith.mulf %230, %230 : vector<10x64xf32>
    %cst_94 = arith.constant dense<0.000000e+00> : vector<10xf32>
    %232 = vector.multi_reduction <add>, %231, %cst_94 [1] : vector<10x64xf32> to vector<10xf32>
    %233 = vector.shape_cast %232 : vector<10xf32> to vector<10x1xf32>
    %cst_95 = arith.constant 6.400000e+01 : f32
    %234 = vector.broadcast %cst_95 : f32 to vector<10x1xf32>
    %235 = arith.divf %233, %234 : vector<10x1xf32>
    %236 = vector.broadcast %228 : vector<10x1xf32> to vector<10x64xf32>
    %237 = arith.subf %224, %236 : vector<10x64xf32>
    %cst_96 = arith.constant 9.99999997E-7 : f32
    %238 = vector.broadcast %cst_96 : f32 to vector<10x1xf32>
    %239 = arith.addf %235, %238 : vector<10x1xf32>
    %240 = math.rsqrt %239 : vector<10x1xf32>
    %241 = vector.broadcast %240 : vector<10x1xf32> to vector<10x64xf32>
    %242 = arith.mulf %237, %241 : vector<10x64xf32>
    %243 = vector.broadcast %26 : vector<1x64xf32> to vector<10x64xf32>
    %244 = arith.mulf %242, %243 : vector<10x64xf32>
    %245 = vector.broadcast %27 : vector<1x64xf32> to vector<10x64xf32>
    %246 = arith.addf %244, %245 : vector<10x64xf32>
    %cst_97 = arith.constant dense<0.000000e+00> : vector<10x128xf32>
    %247 = tpu.matmul %246, %28, %cst_97 {dimension_numbers = #tpu.dot_dimension_numbers<[1], [0], [0], [1], [0, 0, 1, 1], [], []>} : vector<10x64xf32>, vector<64x128xf32>, vector<10x128xf32> -> vector<10x128xf32>
    %248 = vector.broadcast %29 : vector<1x128xf32> to vector<10x128xf32>
    %249 = arith.addf %247, %248 : vector<10x128xf32>
    %250 = arith.mulf %249, %249 : vector<10x128xf32>
    %251 = arith.mulf %249, %250 : vector<10x128xf32>
    %cst_98 = arith.constant 4.471500e-02 : f32
    %252 = vector.broadcast %cst_98 : f32 to vector<10x128xf32>
    %253 = arith.mulf %252, %251 : vector<10x128xf32>
    %254 = arith.addf %249, %253 : vector<10x128xf32>
    %cst_99 = arith.constant 0.797884583 : f32
    %255 = vector.broadcast %cst_99 : f32 to vector<10x128xf32>
    %256 = arith.mulf %255, %254 : vector<10x128xf32>
    %257 = math.tanh %256 : vector<10x128xf32>
    %cst_100 = arith.constant 1.000000e+00 : f32
    %258 = vector.broadcast %cst_100 : f32 to vector<10x128xf32>
    %259 = arith.addf %258, %257 : vector<10x128xf32>
    %cst_101 = arith.constant 5.000000e-01 : f32
    %260 = vector.broadcast %cst_101 : f32 to vector<10x128xf32>
    %261 = arith.mulf %260, %259 : vector<10x128xf32>
    %262 = arith.mulf %249, %261 : vector<10x128xf32>
    %cst_102 = arith.constant dense<0.000000e+00> : vector<10x64xf32>
    %263 = tpu.matmul %262, %30, %cst_102 {dimension_numbers = #tpu.dot_dimension_numbers<[1], [0], [0], [1], [0, 0, 1, 1], [], []>} : vector<10x128xf32>, vector<128x64xf32>, vector<10x64xf32> -> vector<10x64xf32>
    %264 = vector.broadcast %31 : vector<1x64xf32> to vector<10x64xf32>
    %265 = arith.addf %263, %264 : vector<10x64xf32>
    %266 = arith.addf %224, %265 : vector<10x64xf32>
    %c0_103 = arith.constant 0 : index
    %c0_104 = arith.constant 0 : index
    %267 = vector.load %arg35[%c0_103, %c0_104] : memref<10x64xf32, #tpu.memory_space<vmem>>, vector<10x64xf32>
    tpu.vector_store %arg35[%c0_103, %c0_104], %266 {strides = array<i32>} : memref<10x64xf32, #tpu.memory_space<vmem>>, vector<10x64xf32>,
    %c0_105 = arith.constant 0 : index
    %c0_106 = arith.constant 0 : index
    %268 = vector.load %arg18[%c0_105, %c0_106] : memref<1x64xf32, #tpu.memory_space<vmem>>, vector<1x64xf32>
    %c0_107 = arith.constant 0 : index
    %c0_108 = arith.constant 0 : index
    %269 = vector.load %arg19[%c0_107, %c0_108] : memref<1x64xf32, #tpu.memory_space<vmem>>, vector<1x64xf32>
    %c0_109 = arith.constant 0 : index
    %c0_110 = arith.constant 0 : index
    %270 = vector.load %arg20[%c0_109, %c0_110] : memref<64x192xf32, #tpu.memory_space<vmem>>, vector<64x192xf32>
    %c0_111 = arith.constant 0 : index
    %c0_112 = arith.constant 0 : index
    %271 = vector.load %arg21[%c0_111, %c0_112] : memref<1x192xf32, #tpu.memory_space<vmem>>, vector<1x192xf32>
    %c0_113 = arith.constant 0 : index
    %c0_114 = arith.constant 0 : index
    %272 = vector.load %arg22[%c0_113, %c0_114] : memref<64x64xf32, #tpu.memory_space<vmem>>, vector<64x64xf32>
    %c0_115 = arith.constant 0 : index
    %c0_116 = arith.constant 0 : index
    %273 = vector.load %arg23[%c0_115, %c0_116] : memref<1x64xf32, #tpu.memory_space<vmem>>, vector<1x64xf32>
    %c0_117 = arith.constant 0 : index
    %c0_118 = arith.constant 0 : index
    %274 = vector.load %arg24[%c0_117, %c0_118] : memref<1x64xf32, #tpu.memory_space<vmem>>, vector<1x64xf32>
    %c0_119 = arith.constant 0 : index
    %c0_120 = arith.constant 0 : index
    %275 = vector.load %arg25[%c0_119, %c0_120] : memref<1x64xf32, #tpu.memory_space<vmem>>, vector<1x64xf32>
    %c0_121 = arith.constant 0 : index
    %c0_122 = arith.constant 0 : index
    %276 = vector.load %arg26[%c0_121, %c0_122] : memref<64x128xf32, #tpu.memory_space<vmem>>, vector<64x128xf32>
    %c0_123 = arith.constant 0 : index
    %c0_124 = arith.constant 0 : index
    %277 = vector.load %arg27[%c0_123, %c0_124] : memref<1x128xf32, #tpu.memory_space<vmem>>, vector<1x128xf32>
    %c0_125 = arith.constant 0 : index
    %c0_126 = arith.constant 0 : index
    %278 = vector.load %arg28[%c0_125, %c0_126] : memref<128x64xf32, #tpu.memory_space<vmem>>, vector<128x64xf32>
    %c0_127 = arith.constant 0 : index
    %c0_128 = arith.constant 0 : index
    %279 = vector.load %arg29[%c0_127, %c0_128] : memref<1x64xf32, #tpu.memory_space<vmem>>, vector<1x64xf32>
    %c0_129 = arith.constant 0 : index
    %c0_130 = arith.constant 0 : index
    %280 = vector.load %arg35[%c0_129, %c0_130] : memref<10x64xf32, #tpu.memory_space<vmem>>, vector<10x64xf32>
    %cst_131 = arith.constant dense<0.000000e+00> : vector<10xf32>
    %281 = vector.multi_reduction <add>, %280, %cst_131 [1] : vector<10x64xf32> to vector<10xf32>
    %282 = vector.shape_cast %281 : vector<10xf32> to vector<10x1xf32>
    %cst_132 = arith.constant 6.400000e+01 : f32
    %283 = vector.broadcast %cst_132 : f32 to vector<10x1xf32>
    %284 = arith.divf %282, %283 : vector<10x1xf32>
    %285 = vector.broadcast %284 : vector<10x1xf32> to vector<10x64xf32>
    %286 = arith.subf %280, %285 : vector<10x64xf32>
    %287 = arith.mulf %286, %286 : vector<10x64xf32>
    %cst_133 = arith.constant dense<0.000000e+00> : vector<10xf32>
    %288 = vector.multi_reduction <add>, %287, %cst_133 [1] : vector<10x64xf32> to vector<10xf32>
    %289 = vector.shape_cast %288 : vector<10xf32> to vector<10x1xf32>
    %cst_134 = arith.constant 6.400000e+01 : f32
    %290 = vector.broadcast %cst_134 : f32 to vector<10x1xf32>
    %291 = arith.divf %289, %290 : vector<10x1xf32>
    %292 = vector.broadcast %284 : vector<10x1xf32> to vector<10x64xf32>
    %293 = arith.subf %280, %292 : vector<10x64xf32>
    %cst_135 = arith.constant 9.99999997E-7 : f32
    %294 = vector.broadcast %cst_135 : f32 to vector<10x1xf32>
    %295 = arith.addf %291, %294 : vector<10x1xf32>
    %296 = math.rsqrt %295 : vector<10x1xf32>
    %297 = vector.broadcast %296 : vector<10x1xf32> to vector<10x64xf32>
    %298 = arith.mulf %293, %297 : vector<10x64xf32>
    %299 = vector.broadcast %268 : vector<1x64xf32> to vector<10x64xf32>
    %300 = arith.mulf %298, %299 : vector<10x64xf32>
    %301 = vector.broadcast %269 : vector<1x64xf32> to vector<10x64xf32>
    %302 = arith.addf %300, %301 : vector<10x64xf32>
    %cst_136 = arith.constant dense<0.000000e+00> : vector<10x192xf32>
    %303 = tpu.matmul %302, %270, %cst_136 {dimension_numbers = #tpu.dot_dimension_numbers<[1], [0], [0], [1], [0, 0, 1, 1], [], []>} : vector<10x64xf32>, vector<64x192xf32>, vector<10x192xf32> -> vector<10x192xf32>
    %304 = vector.broadcast %271 : vector<1x192xf32> to vector<10x192xf32>
    %305 = arith.addf %303, %304 : vector<10x192xf32>
    %306 = vector.extract_strided_slice %305 {offsets = [0, 0], sizes = [5, 64], strides = [1, 1]} : vector<10x192xf32> to vector<5x64xf32>
    %307 = vector.extract_strided_slice %305 {offsets = [0, 64], sizes = [5, 64], strides = [1, 1]} : vector<10x192xf32> to vector<5x64xf32>
    %308 = vector.extract_strided_slice %305 {offsets = [0, 128], sizes = [5, 64], strides = [1, 1]} : vector<10x192xf32> to vector<5x64xf32>
    %309 = vector.extract_strided_slice %306 {offsets = [0, 0], sizes = [5, 16], strides = [1, 1]} : vector<5x64xf32> to vector<5x16xf32>
    %310 = vector.extract_strided_slice %307 {offsets = [0, 0], sizes = [5, 16], strides = [1, 1]} : vector<5x64xf32> to vector<5x16xf32>
    %311 = vector.extract_strided_slice %308 {offsets = [0, 0], sizes = [5, 16], strides = [1, 1]} : vector<5x64xf32> to vector<5x16xf32>
    %312 = tpu.transpose %310, [1, 0] : vector<5x16xf32> -> vector<16x5xf32>
    %cst_137 = arith.constant dense<0.000000e+00> : vector<5x5xf32>
    %313 = tpu.matmul %309, %312, %cst_137 {dimension_numbers = #tpu.dot_dimension_numbers<[1], [0], [0], [1], [0, 0, 1, 1], [], []>} : vector<5x16xf32>, vector<16x5xf32>, vector<5x5xf32> -> vector<5x5xf32>
    %cst_138 = arith.constant dense<0xFF800000> : vector<5xf32>
    %314 = vector.multi_reduction <maximumf>, %313, %cst_138 [1] : vector<5x5xf32> to vector<5xf32>
    %315 = vector.shape_cast %314 : vector<5xf32> to vector<5x1xf32>
    %316 = vector.broadcast %315 : vector<5x1xf32> to vector<5x5xf32>
    %317 = arith.subf %313, %316 : vector<5x5xf32>
    %318 = math.exp %317 : vector<5x5xf32>
    %cst_139 = arith.constant dense<0.000000e+00> : vector<5xf32>
    %319 = vector.multi_reduction <add>, %318, %cst_139 [1] : vector<5x5xf32> to vector<5xf32>
    %320 = vector.shape_cast %319 : vector<5xf32> to vector<5x1xf32>
    %321 = tpu.reciprocal %320 {approx = true} : vector<5x1xf32> -> vector<5x1xf32>
    %322 = vector.broadcast %321 : vector<5x1xf32> to vector<5x5xf32>
    %323 = arith.mulf %318, %322 : vector<5x5xf32>
    %cst_140 = arith.constant dense<0.000000e+00> : vector<5x16xf32>
    %324 = tpu.matmul %323, %311, %cst_140 {dimension_numbers = #tpu.dot_dimension_numbers<[1], [0], [0], [1], [0, 0, 1, 1], [], []>} : vector<5x5xf32>, vector<5x16xf32>, vector<5x16xf32> -> vector<5x16xf32>
    %325 = vector.extract_strided_slice %272 {offsets = [0, 0], sizes = [16, 64], strides = [1, 1]} : vector<64x64xf32> to vector<16x64xf32>
    %cst_141 = arith.constant dense<0.000000e+00> : vector<5x64xf32>
    %326 = tpu.matmul %324, %325, %cst_141 {dimension_numbers = #tpu.dot_dimension_numbers<[1], [0], [0], [1], [0, 0, 1, 1], [], []>} : vector<5x16xf32>, vector<16x64xf32>, vector<5x64xf32> -> vector<5x64xf32>
    %327 = vector.extract_strided_slice %306 {offsets = [0, 16], sizes = [5, 16], strides = [1, 1]} : vector<5x64xf32> to vector<5x16xf32>
    %328 = vector.extract_strided_slice %307 {offsets = [0, 16], sizes = [5, 16], strides = [1, 1]} : vector<5x64xf32> to vector<5x16xf32>
    %329 = vector.extract_strided_slice %308 {offsets = [0, 16], sizes = [5, 16], strides = [1, 1]} : vector<5x64xf32> to vector<5x16xf32>
    %330 = tpu.transpose %328, [1, 0] : vector<5x16xf32> -> vector<16x5xf32>
    %cst_142 = arith.constant dense<0.000000e+00> : vector<5x5xf32>
    %331 = tpu.matmul %327, %330, %cst_142 {dimension_numbers = #tpu.dot_dimension_numbers<[1], [0], [0], [1], [0, 0, 1, 1], [], []>} : vector<5x16xf32>, vector<16x5xf32>, vector<5x5xf32> -> vector<5x5xf32>
    %cst_143 = arith.constant dense<0xFF800000> : vector<5xf32>
    %332 = vector.multi_reduction <maximumf>, %331, %cst_143 [1] : vector<5x5xf32> to vector<5xf32>
    %333 = vector.shape_cast %332 : vector<5xf32> to vector<5x1xf32>
    %334 = vector.broadcast %333 : vector<5x1xf32> to vector<5x5xf32>
    %335 = arith.subf %331, %334 : vector<5x5xf32>
    %336 = math.exp %335 : vector<5x5xf32>
    %cst_144 = arith.constant dense<0.000000e+00> : vector<5xf32>
    %337 = vector.multi_reduction <add>, %336, %cst_144 [1] : vector<5x5xf32> to vector<5xf32>
    %338 = vector.shape_cast %337 : vector<5xf32> to vector<5x1xf32>
    %339 = tpu.reciprocal %338 {approx = true} : vector<5x1xf32> -> vector<5x1xf32>
    %340 = vector.broadcast %339 : vector<5x1xf32> to vector<5x5xf32>
    %341 = arith.mulf %336, %340 : vector<5x5xf32>
    %cst_145 = arith.constant dense<0.000000e+00> : vector<5x16xf32>
    %342 = tpu.matmul %341, %329, %cst_145 {dimension_numbers = #tpu.dot_dimension_numbers<[1], [0], [0], [1], [0, 0, 1, 1], [], []>} : vector<5x5xf32>, vector<5x16xf32>, vector<5x16xf32> -> vector<5x16xf32>
    %343 = vector.extract_strided_slice %272 {offsets = [16, 0], sizes = [16, 64], strides = [1, 1]} : vector<64x64xf32> to vector<16x64xf32>
    %cst_146 = arith.constant dense<0.000000e+00> : vector<5x64xf32>
    %344 = tpu.matmul %342, %343, %cst_146 {dimension_numbers = #tpu.dot_dimension_numbers<[1], [0], [0], [1], [0, 0, 1, 1], [], []>} : vector<5x16xf32>, vector<16x64xf32>, vector<5x64xf32> -> vector<5x64xf32>
    %345 = arith.addf %326, %344 : vector<5x64xf32>
    %346 = vector.extract_strided_slice %306 {offsets = [0, 32], sizes = [5, 16], strides = [1, 1]} : vector<5x64xf32> to vector<5x16xf32>
    %347 = vector.extract_strided_slice %307 {offsets = [0, 32], sizes = [5, 16], strides = [1, 1]} : vector<5x64xf32> to vector<5x16xf32>
    %348 = vector.extract_strided_slice %308 {offsets = [0, 32], sizes = [5, 16], strides = [1, 1]} : vector<5x64xf32> to vector<5x16xf32>
    %349 = tpu.transpose %347, [1, 0] : vector<5x16xf32> -> vector<16x5xf32>
    %cst_147 = arith.constant dense<0.000000e+00> : vector<5x5xf32>
    %350 = tpu.matmul %346, %349, %cst_147 {dimension_numbers = #tpu.dot_dimension_numbers<[1], [0], [0], [1], [0, 0, 1, 1], [], []>} : vector<5x16xf32>, vector<16x5xf32>, vector<5x5xf32> -> vector<5x5xf32>
    %cst_148 = arith.constant dense<0xFF800000> : vector<5xf32>
    %351 = vector.multi_reduction <maximumf>, %350, %cst_148 [1] : vector<5x5xf32> to vector<5xf32>
    %352 = vector.shape_cast %351 : vector<5xf32> to vector<5x1xf32>
    %353 = vector.broadcast %352 : vector<5x1xf32> to vector<5x5xf32>
    %354 = arith.subf %350, %353 : vector<5x5xf32>
    %355 = math.exp %354 : vector<5x5xf32>
    %cst_149 = arith.constant dense<0.000000e+00> : vector<5xf32>
    %356 = vector.multi_reduction <add>, %355, %cst_149 [1] : vector<5x5xf32> to vector<5xf32>
    %357 = vector.shape_cast %356 : vector<5xf32> to vector<5x1xf32>
    %358 = tpu.reciprocal %357 {approx = true} : vector<5x1xf32> -> vector<5x1xf32>
    %359 = vector.broadcast %358 : vector<5x1xf32> to vector<5x5xf32>
    %360 = arith.mulf %355, %359 : vector<5x5xf32>
    %cst_150 = arith.constant dense<0.000000e+00> : vector<5x16xf32>
    %361 = tpu.matmul %360, %348, %cst_150 {dimension_numbers = #tpu.dot_dimension_numbers<[1], [0], [0], [1], [0, 0, 1, 1], [], []>} : vector<5x5xf32>, vector<5x16xf32>, vector<5x16xf32> -> vector<5x16xf32>
    %362 = vector.extract_strided_slice %272 {offsets = [32, 0], sizes = [16, 64], strides = [1, 1]} : vector<64x64xf32> to vector<16x64xf32>
    %cst_151 = arith.constant dense<0.000000e+00> : vector<5x64xf32>
    %363 = tpu.matmul %361, %362, %cst_151 {dimension_numbers = #tpu.dot_dimension_numbers<[1], [0], [0], [1], [0, 0, 1, 1], [], []>} : vector<5x16xf32>, vector<16x64xf32>, vector<5x64xf32> -> vector<5x64xf32>
    %364 = arith.addf %345, %363 : vector<5x64xf32>
    %365 = vector.extract_strided_slice %306 {offsets = [0, 48], sizes = [5, 16], strides = [1, 1]} : vector<5x64xf32> to vector<5x16xf32>
    %366 = vector.extract_strided_slice %307 {offsets = [0, 48], sizes = [5, 16], strides = [1, 1]} : vector<5x64xf32> to vector<5x16xf32>
    %367 = vector.extract_strided_slice %308 {offsets = [0, 48], sizes = [5, 16], strides = [1, 1]} : vector<5x64xf32> to vector<5x16xf32>
    %368 = tpu.transpose %366, [1, 0] : vector<5x16xf32> -> vector<16x5xf32>
    %cst_152 = arith.constant dense<0.000000e+00> : vector<5x5xf32>
    %369 = tpu.matmul %365, %368, %cst_152 {dimension_numbers = #tpu.dot_dimension_numbers<[1], [0], [0], [1], [0, 0, 1, 1], [], []>} : vector<5x16xf32>, vector<16x5xf32>, vector<5x5xf32> -> vector<5x5xf32>
    %cst_153 = arith.constant dense<0xFF800000> : vector<5xf32>
    %370 = vector.multi_reduction <maximumf>, %369, %cst_153 [1] : vector<5x5xf32> to vector<5xf32>
    %371 = vector.shape_cast %370 : vector<5xf32> to vector<5x1xf32>
    %372 = vector.broadcast %371 : vector<5x1xf32> to vector<5x5xf32>
    %373 = arith.subf %369, %372 : vector<5x5xf32>
    %374 = math.exp %373 : vector<5x5xf32>
    %cst_154 = arith.constant dense<0.000000e+00> : vector<5xf32>
    %375 = vector.multi_reduction <add>, %374, %cst_154 [1] : vector<5x5xf32> to vector<5xf32>
    %376 = vector.shape_cast %375 : vector<5xf32> to vector<5x1xf32>
    %377 = tpu.reciprocal %376 {approx = true} : vector<5x1xf32> -> vector<5x1xf32>
    %378 = vector.broadcast %377 : vector<5x1xf32> to vector<5x5xf32>
    %379 = arith.mulf %374, %378 : vector<5x5xf32>
    %cst_155 = arith.constant dense<0.000000e+00> : vector<5x16xf32>
    %380 = tpu.matmul %379, %367, %cst_155 {dimension_numbers = #tpu.dot_dimension_numbers<[1], [0], [0], [1], [0, 0, 1, 1], [], []>} : vector<5x5xf32>, vector<5x16xf32>, vector<5x16xf32> -> vector<5x16xf32>
    %381 = vector.extract_strided_slice %272 {offsets = [48, 0], sizes = [16, 64], strides = [1, 1]} : vector<64x64xf32> to vector<16x64xf32>
    %cst_156 = arith.constant dense<0.000000e+00> : vector<5x64xf32>
    %382 = tpu.matmul %380, %381, %cst_156 {dimension_numbers = #tpu.dot_dimension_numbers<[1], [0], [0], [1], [0, 0, 1, 1], [], []>} : vector<5x16xf32>, vector<16x64xf32>, vector<5x64xf32> -> vector<5x64xf32>
    %383 = arith.addf %364, %382 : vector<5x64xf32>
    %384 = vector.extract_strided_slice %280 {offsets = [0, 0], sizes = [5, 64], strides = [1, 1]} : vector<10x64xf32> to vector<5x64xf32>
    %385 = arith.addf %384, %383 : vector<5x64xf32>
    %386 = vector.broadcast %273 : vector<1x64xf32> to vector<5x64xf32>
    %387 = arith.addf %385, %386 : vector<5x64xf32>
    %c0_157 = arith.constant 0 : index
    %c0_158 = arith.constant 0 : index
    %388 = vector.load %arg35[%c0_157, %c0_158] : memref<10x64xf32, #tpu.memory_space<vmem>>, vector<5x64xf32>
    tpu.vector_store %arg35[%c0_157, %c0_158], %387 {strides = array<i32>} : memref<10x64xf32, #tpu.memory_space<vmem>>, vector<5x64xf32>,
    %389 = vector.extract_strided_slice %305 {offsets = [5, 0], sizes = [5, 64], strides = [1, 1]} : vector<10x192xf32> to vector<5x64xf32>
    %390 = vector.extract_strided_slice %305 {offsets = [5, 64], sizes = [5, 64], strides = [1, 1]} : vector<10x192xf32> to vector<5x64xf32>
    %391 = vector.extract_strided_slice %305 {offsets = [5, 128], sizes = [5, 64], strides = [1, 1]} : vector<10x192xf32> to vector<5x64xf32>
    %392 = vector.extract_strided_slice %389 {offsets = [0, 0], sizes = [5, 16], strides = [1, 1]} : vector<5x64xf32> to vector<5x16xf32>
    %393 = vector.extract_strided_slice %390 {offsets = [0, 0], sizes = [5, 16], strides = [1, 1]} : vector<5x64xf32> to vector<5x16xf32>
    %394 = vector.extract_strided_slice %391 {offsets = [0, 0], sizes = [5, 16], strides = [1, 1]} : vector<5x64xf32> to vector<5x16xf32>
    %395 = tpu.transpose %393, [1, 0] : vector<5x16xf32> -> vector<16x5xf32>
    %cst_159 = arith.constant dense<0.000000e+00> : vector<5x5xf32>
    %396 = tpu.matmul %392, %395, %cst_159 {dimension_numbers = #tpu.dot_dimension_numbers<[1], [0], [0], [1], [0, 0, 1, 1], [], []>} : vector<5x16xf32>, vector<16x5xf32>, vector<5x5xf32> -> vector<5x5xf32>
    %cst_160 = arith.constant dense<0xFF800000> : vector<5xf32>
    %397 = vector.multi_reduction <maximumf>, %396, %cst_160 [1] : vector<5x5xf32> to vector<5xf32>
    %398 = vector.shape_cast %397 : vector<5xf32> to vector<5x1xf32>
    %399 = vector.broadcast %398 : vector<5x1xf32> to vector<5x5xf32>
    %400 = arith.subf %396, %399 : vector<5x5xf32>
    %401 = math.exp %400 : vector<5x5xf32>
    %cst_161 = arith.constant dense<0.000000e+00> : vector<5xf32>
    %402 = vector.multi_reduction <add>, %401, %cst_161 [1] : vector<5x5xf32> to vector<5xf32>
    %403 = vector.shape_cast %402 : vector<5xf32> to vector<5x1xf32>
    %404 = tpu.reciprocal %403 {approx = true} : vector<5x1xf32> -> vector<5x1xf32>
    %405 = vector.broadcast %404 : vector<5x1xf32> to vector<5x5xf32>
    %406 = arith.mulf %401, %405 : vector<5x5xf32>
    %cst_162 = arith.constant dense<0.000000e+00> : vector<5x16xf32>
    %407 = tpu.matmul %406, %394, %cst_162 {dimension_numbers = #tpu.dot_dimension_numbers<[1], [0], [0], [1], [0, 0, 1, 1], [], []>} : vector<5x5xf32>, vector<5x16xf32>, vector<5x16xf32> -> vector<5x16xf32>
    %408 = vector.extract_strided_slice %272 {offsets = [0, 0], sizes = [16, 64], strides = [1, 1]} : vector<64x64xf32> to vector<16x64xf32>
    %cst_163 = arith.constant dense<0.000000e+00> : vector<5x64xf32>
    %409 = tpu.matmul %407, %408, %cst_163 {dimension_numbers = #tpu.dot_dimension_numbers<[1], [0], [0], [1], [0, 0, 1, 1], [], []>} : vector<5x16xf32>, vector<16x64xf32>, vector<5x64xf32> -> vector<5x64xf32>
    %410 = vector.extract_strided_slice %389 {offsets = [0, 16], sizes = [5, 16], strides = [1, 1]} : vector<5x64xf32> to vector<5x16xf32>
    %411 = vector.extract_strided_slice %390 {offsets = [0, 16], sizes = [5, 16], strides = [1, 1]} : vector<5x64xf32> to vector<5x16xf32>
    %412 = vector.extract_strided_slice %391 {offsets = [0, 16], sizes = [5, 16], strides = [1, 1]} : vector<5x64xf32> to vector<5x16xf32>
    %413 = tpu.transpose %411, [1, 0] : vector<5x16xf32> -> vector<16x5xf32>
    %cst_164 = arith.constant dense<0.000000e+00> : vector<5x5xf32>
    %414 = tpu.matmul %410, %413, %cst_164 {dimension_numbers = #tpu.dot_dimension_numbers<[1], [0], [0], [1], [0, 0, 1, 1], [], []>} : vector<5x16xf32>, vector<16x5xf32>, vector<5x5xf32> -> vector<5x5xf32>
    %cst_165 = arith.constant dense<0xFF800000> : vector<5xf32>
    %415 = vector.multi_reduction <maximumf>, %414, %cst_165 [1] : vector<5x5xf32> to vector<5xf32>
    %416 = vector.shape_cast %415 : vector<5xf32> to vector<5x1xf32>
    %417 = vector.broadcast %416 : vector<5x1xf32> to vector<5x5xf32>
    %418 = arith.subf %414, %417 : vector<5x5xf32>
    %419 = math.exp %418 : vector<5x5xf32>
    %cst_166 = arith.constant dense<0.000000e+00> : vector<5xf32>
    %420 = vector.multi_reduction <add>, %419, %cst_166 [1] : vector<5x5xf32> to vector<5xf32>
    %421 = vector.shape_cast %420 : vector<5xf32> to vector<5x1xf32>
    %422 = tpu.reciprocal %421 {approx = true} : vector<5x1xf32> -> vector<5x1xf32>
    %423 = vector.broadcast %422 : vector<5x1xf32> to vector<5x5xf32>
    %424 = arith.mulf %419, %423 : vector<5x5xf32>
    %cst_167 = arith.constant dense<0.000000e+00> : vector<5x16xf32>
    %425 = tpu.matmul %424, %412, %cst_167 {dimension_numbers = #tpu.dot_dimension_numbers<[1], [0], [0], [1], [0, 0, 1, 1], [], []>} : vector<5x5xf32>, vector<5x16xf32>, vector<5x16xf32> -> vector<5x16xf32>
    %426 = vector.extract_strided_slice %272 {offsets = [16, 0], sizes = [16, 64], strides = [1, 1]} : vector<64x64xf32> to vector<16x64xf32>
    %cst_168 = arith.constant dense<0.000000e+00> : vector<5x64xf32>
    %427 = tpu.matmul %425, %426, %cst_168 {dimension_numbers = #tpu.dot_dimension_numbers<[1], [0], [0], [1], [0, 0, 1, 1], [], []>} : vector<5x16xf32>, vector<16x64xf32>, vector<5x64xf32> -> vector<5x64xf32>
    %428 = arith.addf %409, %427 : vector<5x64xf32>
    %429 = vector.extract_strided_slice %389 {offsets = [0, 32], sizes = [5, 16], strides = [1, 1]} : vector<5x64xf32> to vector<5x16xf32>
    %430 = vector.extract_strided_slice %390 {offsets = [0, 32], sizes = [5, 16], strides = [1, 1]} : vector<5x64xf32> to vector<5x16xf32>
    %431 = vector.extract_strided_slice %391 {offsets = [0, 32], sizes = [5, 16], strides = [1, 1]} : vector<5x64xf32> to vector<5x16xf32>
    %432 = tpu.transpose %430, [1, 0] : vector<5x16xf32> -> vector<16x5xf32>
    %cst_169 = arith.constant dense<0.000000e+00> : vector<5x5xf32>
    %433 = tpu.matmul %429, %432, %cst_169 {dimension_numbers = #tpu.dot_dimension_numbers<[1], [0], [0], [1], [0, 0, 1, 1], [], []>} : vector<5x16xf32>, vector<16x5xf32>, vector<5x5xf32> -> vector<5x5xf32>
    %cst_170 = arith.constant dense<0xFF800000> : vector<5xf32>
    %434 = vector.multi_reduction <maximumf>, %433, %cst_170 [1] : vector<5x5xf32> to vector<5xf32>
    %435 = vector.shape_cast %434 : vector<5xf32> to vector<5x1xf32>
    %436 = vector.broadcast %435 : vector<5x1xf32> to vector<5x5xf32>
    %437 = arith.subf %433, %436 : vector<5x5xf32>
    %438 = math.exp %437 : vector<5x5xf32>
    %cst_171 = arith.constant dense<0.000000e+00> : vector<5xf32>
    %439 = vector.multi_reduction <add>, %438, %cst_171 [1] : vector<5x5xf32> to vector<5xf32>
    %440 = vector.shape_cast %439 : vector<5xf32> to vector<5x1xf32>
    %441 = tpu.reciprocal %440 {approx = true} : vector<5x1xf32> -> vector<5x1xf32>
    %442 = vector.broadcast %441 : vector<5x1xf32> to vector<5x5xf32>
    %443 = arith.mulf %438, %442 : vector<5x5xf32>
    %cst_172 = arith.constant dense<0.000000e+00> : vector<5x16xf32>
    %444 = tpu.matmul %443, %431, %cst_172 {dimension_numbers = #tpu.dot_dimension_numbers<[1], [0], [0], [1], [0, 0, 1, 1], [], []>} : vector<5x5xf32>, vector<5x16xf32>, vector<5x16xf32> -> vector<5x16xf32>
    %445 = vector.extract_strided_slice %272 {offsets = [32, 0], sizes = [16, 64], strides = [1, 1]} : vector<64x64xf32> to vector<16x64xf32>
    %cst_173 = arith.constant dense<0.000000e+00> : vector<5x64xf32>
    %446 = tpu.matmul %444, %445, %cst_173 {dimension_numbers = #tpu.dot_dimension_numbers<[1], [0], [0], [1], [0, 0, 1, 1], [], []>} : vector<5x16xf32>, vector<16x64xf32>, vector<5x64xf32> -> vector<5x64xf32>
    %447 = arith.addf %428, %446 : vector<5x64xf32>
    %448 = vector.extract_strided_slice %389 {offsets = [0, 48], sizes = [5, 16], strides = [1, 1]} : vector<5x64xf32> to vector<5x16xf32>
    %449 = vector.extract_strided_slice %390 {offsets = [0, 48], sizes = [5, 16], strides = [1, 1]} : vector<5x64xf32> to vector<5x16xf32>
    %450 = vector.extract_strided_slice %391 {offsets = [0, 48], sizes = [5, 16], strides = [1, 1]} : vector<5x64xf32> to vector<5x16xf32>
    %451 = tpu.transpose %449, [1, 0] : vector<5x16xf32> -> vector<16x5xf32>
    %cst_174 = arith.constant dense<0.000000e+00> : vector<5x5xf32>
    %452 = tpu.matmul %448, %451, %cst_174 {dimension_numbers = #tpu.dot_dimension_numbers<[1], [0], [0], [1], [0, 0, 1, 1], [], []>} : vector<5x16xf32>, vector<16x5xf32>, vector<5x5xf32> -> vector<5x5xf32>
    %cst_175 = arith.constant dense<0xFF800000> : vector<5xf32>
    %453 = vector.multi_reduction <maximumf>, %452, %cst_175 [1] : vector<5x5xf32> to vector<5xf32>
    %454 = vector.shape_cast %453 : vector<5xf32> to vector<5x1xf32>
    %455 = vector.broadcast %454 : vector<5x1xf32> to vector<5x5xf32>
    %456 = arith.subf %452, %455 : vector<5x5xf32>
    %457 = math.exp %456 : vector<5x5xf32>
    %cst_176 = arith.constant dense<0.000000e+00> : vector<5xf32>
    %458 = vector.multi_reduction <add>, %457, %cst_176 [1] : vector<5x5xf32> to vector<5xf32>
    %459 = vector.shape_cast %458 : vector<5xf32> to vector<5x1xf32>
    %460 = tpu.reciprocal %459 {approx = true} : vector<5x1xf32> -> vector<5x1xf32>
    %461 = vector.broadcast %460 : vector<5x1xf32> to vector<5x5xf32>
    %462 = arith.mulf %457, %461 : vector<5x5xf32>
    %cst_177 = arith.constant dense<0.000000e+00> : vector<5x16xf32>
    %463 = tpu.matmul %462, %450, %cst_177 {dimension_numbers = #tpu.dot_dimension_numbers<[1], [0], [0], [1], [0, 0, 1, 1], [], []>} : vector<5x5xf32>, vector<5x16xf32>, vector<5x16xf32> -> vector<5x16xf32>
    %464 = vector.extract_strided_slice %272 {offsets = [48, 0], sizes = [16, 64], strides = [1, 1]} : vector<64x64xf32> to vector<16x64xf32>
    %cst_178 = arith.constant dense<0.000000e+00> : vector<5x64xf32>
    %465 = tpu.matmul %463, %464, %cst_178 {dimension_numbers = #tpu.dot_dimension_numbers<[1], [0], [0], [1], [0, 0, 1, 1], [], []>} : vector<5x16xf32>, vector<16x64xf32>, vector<5x64xf32> -> vector<5x64xf32>
    %466 = arith.addf %447, %465 : vector<5x64xf32>
    %467 = vector.extract_strided_slice %280 {offsets = [5, 0], sizes = [5, 64], strides = [1, 1]} : vector<10x64xf32> to vector<5x64xf32>
    %468 = arith.addf %467, %466 : vector<5x64xf32>
    %469 = vector.broadcast %273 : vector<1x64xf32> to vector<5x64xf32>
    %470 = arith.addf %468, %469 : vector<5x64xf32>
    %c5_179 = arith.constant 5 : index
    %c0_180 = arith.constant 0 : index
    %471 = vector.load %arg35[%c5_179, %c0_180] : memref<10x64xf32, #tpu.memory_space<vmem>>, vector<5x64xf32>
    tpu.vector_store %arg35[%c5_179, %c0_180], %470 {strides = array<i32>} : memref<10x64xf32, #tpu.memory_space<vmem>>, vector<5x64xf32>,
    %c0_181 = arith.constant 0 : index
    %c0_182 = arith.constant 0 : index
    %472 = vector.load %arg35[%c0_181, %c0_182] : memref<10x64xf32, #tpu.memory_space<vmem>>, vector<10x64xf32>
    %cst_183 = arith.constant dense<0.000000e+00> : vector<10xf32>
    %473 = vector.multi_reduction <add>, %472, %cst_183 [1] : vector<10x64xf32> to vector<10xf32>
    %474 = vector.shape_cast %473 : vector<10xf32> to vector<10x1xf32>
    %cst_184 = arith.constant 6.400000e+01 : f32
    %475 = vector.broadcast %cst_184 : f32 to vector<10x1xf32>
    %476 = arith.divf %474, %475 : vector<10x1xf32>
    %477 = vector.broadcast %476 : vector<10x1xf32> to vector<10x64xf32>
    %478 = arith.subf %472, %477 : vector<10x64xf32>
    %479 = arith.mulf %478, %478 : vector<10x64xf32>
    %cst_185 = arith.constant dense<0.000000e+00> : vector<10xf32>
    %480 = vector.multi_reduction <add>, %479, %cst_185 [1] : vector<10x64xf32> to vector<10xf32>
    %481 = vector.shape_cast %480 : vector<10xf32> to vector<10x1xf32>
    %cst_186 = arith.constant 6.400000e+01 : f32
    %482 = vector.broadcast %cst_186 : f32 to vector<10x1xf32>
    %483 = arith.divf %481, %482 : vector<10x1xf32>
    %484 = vector.broadcast %476 : vector<10x1xf32> to vector<10x64xf32>
    %485 = arith.subf %472, %484 : vector<10x64xf32>
    %cst_187 = arith.constant 9.99999997E-7 : f32
    %486 = vector.broadcast %cst_187 : f32 to vector<10x1xf32>
    %487 = arith.addf %483, %486 : vector<10x1xf32>
    %488 = math.rsqrt %487 : vector<10x1xf32>
    %489 = vector.broadcast %488 : vector<10x1xf32> to vector<10x64xf32>
    %490 = arith.mulf %485, %489 : vector<10x64xf32>
    %491 = vector.broadcast %274 : vector<1x64xf32> to vector<10x64xf32>
    %492 = arith.mulf %490, %491 : vector<10x64xf32>
    %493 = vector.broadcast %275 : vector<1x64xf32> to vector<10x64xf32>
    %494 = arith.addf %492, %493 : vector<10x64xf32>
    %cst_188 = arith.constant dense<0.000000e+00> : vector<10x128xf32>
    %495 = tpu.matmul %494, %276, %cst_188 {dimension_numbers = #tpu.dot_dimension_numbers<[1], [0], [0], [1], [0, 0, 1, 1], [], []>} : vector<10x64xf32>, vector<64x128xf32>, vector<10x128xf32> -> vector<10x128xf32>
    %496 = vector.broadcast %277 : vector<1x128xf32> to vector<10x128xf32>
    %497 = arith.addf %495, %496 : vector<10x128xf32>
    %498 = arith.mulf %497, %497 : vector<10x128xf32>
    %499 = arith.mulf %497, %498 : vector<10x128xf32>
    %cst_189 = arith.constant 4.471500e-02 : f32
    %500 = vector.broadcast %cst_189 : f32 to vector<10x128xf32>
    %501 = arith.mulf %500, %499 : vector<10x128xf32>
    %502 = arith.addf %497, %501 : vector<10x128xf32>
    %cst_190 = arith.constant 0.797884583 : f32
    %503 = vector.broadcast %cst_190 : f32 to vector<10x128xf32>
    %504 = arith.mulf %503, %502 : vector<10x128xf32>
    %505 = math.tanh %504 : vector<10x128xf32>
    %cst_191 = arith.constant 1.000000e+00 : f32
    %506 = vector.broadcast %cst_191 : f32 to vector<10x128xf32>
    %507 = arith.addf %506, %505 : vector<10x128xf32>
    %cst_192 = arith.constant 5.000000e-01 : f32
    %508 = vector.broadcast %cst_192 : f32 to vector<10x128xf32>
    %509 = arith.mulf %508, %507 : vector<10x128xf32>
    %510 = arith.mulf %497, %509 : vector<10x128xf32>
    %cst_193 = arith.constant dense<0.000000e+00> : vector<10x64xf32>
    %511 = tpu.matmul %510, %278, %cst_193 {dimension_numbers = #tpu.dot_dimension_numbers<[1], [0], [0], [1], [0, 0, 1, 1], [], []>} : vector<10x128xf32>, vector<128x64xf32>, vector<10x64xf32> -> vector<10x64xf32>
    %512 = vector.broadcast %279 : vector<1x64xf32> to vector<10x64xf32>
    %513 = arith.addf %511, %512 : vector<10x64xf32>
    %514 = arith.addf %472, %513 : vector<10x64xf32>
    %c0_194 = arith.constant 0 : index
    %c0_195 = arith.constant 0 : index
    %515 = vector.load %arg35[%c0_194, %c0_195] : memref<10x64xf32, #tpu.memory_space<vmem>>, vector<10x64xf32>
    tpu.vector_store %arg35[%c0_194, %c0_195], %514 {strides = array<i32>} : memref<10x64xf32, #tpu.memory_space<vmem>>, vector<10x64xf32>,
    %c0_196 = arith.constant 0 : index
    %c0_197 = arith.constant 0 : index
    %516 = vector.load %arg35[%c0_196, %c0_197] : memref<10x64xf32, #tpu.memory_space<vmem>>, vector<10x64xf32>
    %517 = vector.extract_strided_slice %516 {offsets = [0, 0], sizes = [1, 64], strides = [1, 1]} : vector<10x64xf32> to vector<1x64xf32>
    %c0_198 = arith.constant 0 : index
    %c0_199 = arith.constant 0 : index
    %518 = vector.load %arg36[%c0_198, %c0_199] : memref<2x64xf32, #tpu.memory_space<vmem>>, vector<1x64xf32>
    tpu.vector_store %arg36[%c0_198, %c0_199], %517 {strides = array<i32>} : memref<2x64xf32, #tpu.memory_space<vmem>>, vector<1x64xf32>,
    %519 = vector.extract_strided_slice %516 {offsets = [5, 0], sizes = [1, 64], strides = [1, 1]} : vector<10x64xf32> to vector<1x64xf32>
    %c1_200 = arith.constant 1 : index
    %c0_201 = arith.constant 0 : index
    %520 = vector.load %arg36[%c1_200, %c0_201] : memref<2x64xf32, #tpu.memory_space<vmem>>, vector<1x64xf32>
    tpu.vector_store %arg36[%c1_200, %c0_201], %519 {strides = array<i32>} : memref<2x64xf32, #tpu.memory_space<vmem>>, vector<1x64xf32>,
    %c0_202 = arith.constant 0 : index
    %c0_203 = arith.constant 0 : index
    %521 = vector.load %arg36[%c0_202, %c0_203] : memref<2x64xf32, #tpu.memory_space<vmem>>, vector<2x64xf32>
    %c0_204 = arith.constant 0 : index
    %c0_205 = arith.constant 0 : index
    %522 = vector.load %arg30[%c0_204, %c0_205] : memref<1x64xf32, #tpu.memory_space<vmem>>, vector<1x64xf32>
    %c0_206 = arith.constant 0 : index
    %c0_207 = arith.constant 0 : index
    %523 = vector.load %arg31[%c0_206, %c0_207] : memref<1x64xf32, #tpu.memory_space<vmem>>, vector<1x64xf32>
    %cst_208 = arith.constant dense<0.000000e+00> : vector<2xf32>
    %524 = vector.multi_reduction <add>, %521, %cst_208 [1] : vector<2x64xf32> to vector<2xf32>
    %525 = vector.shape_cast %524 : vector<2xf32> to vector<2x1xf32>
    %cst_209 = arith.constant 6.400000e+01 : f32
    %526 = vector.broadcast %cst_209 : f32 to vector<2x1xf32>
    %527 = arith.divf %525, %526 : vector<2x1xf32>
    %528 = vector.broadcast %527 : vector<2x1xf32> to vector<2x64xf32>
    %529 = arith.subf %521, %528 : vector<2x64xf32>
    %530 = arith.mulf %529, %529 : vector<2x64xf32>
    %cst_210 = arith.constant dense<0.000000e+00> : vector<2xf32>
    %531 = vector.multi_reduction <add>, %530, %cst_210 [1] : vector<2x64xf32> to vector<2xf32>
    %532 = vector.shape_cast %531 : vector<2xf32> to vector<2x1xf32>
    %cst_211 = arith.constant 6.400000e+01 : f32
    %533 = vector.broadcast %cst_211 : f32 to vector<2x1xf32>
    %534 = arith.divf %532, %533 : vector<2x1xf32>
    %535 = vector.broadcast %527 : vector<2x1xf32> to vector<2x64xf32>
    %536 = arith.subf %521, %535 : vector<2x64xf32>
    %cst_212 = arith.constant 9.99999997E-7 : f32
    %537 = vector.broadcast %cst_212 : f32 to vector<2x1xf32>
    %538 = arith.addf %534, %537 : vector<2x1xf32>
    %539 = math.rsqrt %538 : vector<2x1xf32>
    %540 = vector.broadcast %539 : vector<2x1xf32> to vector<2x64xf32>
    %541 = arith.mulf %536, %540 : vector<2x64xf32>
    %542 = vector.broadcast %522 : vector<1x64xf32> to vector<2x64xf32>
    %543 = arith.mulf %541, %542 : vector<2x64xf32>
    %544 = vector.broadcast %523 : vector<1x64xf32> to vector<2x64xf32>
    %545 = arith.addf %543, %544 : vector<2x64xf32>
    %c0_213 = arith.constant 0 : index
    %c0_214 = arith.constant 0 : index
    %546 = vector.load %arg32[%c0_213, %c0_214] : memref<64x128xf32, #tpu.memory_space<vmem>>, vector<64x128xf32>
    %cst_215 = arith.constant dense<0.000000e+00> : vector<2x128xf32>
    %547 = tpu.matmul %545, %546, %cst_215 {dimension_numbers = #tpu.dot_dimension_numbers<[1], [0], [0], [1], [0, 0, 1, 1], [], []>} : vector<2x64xf32>, vector<64x128xf32>, vector<2x128xf32> -> vector<2x128xf32>
    %c0_216 = arith.constant 0 : index
    %c0_217 = arith.constant 0 : index
    %548 = vector.load %arg33[%c0_216, %c0_217] : memref<1x128xf32, #tpu.memory_space<vmem>>, vector<1x128xf32>
    %549 = vector.broadcast %548 : vector<1x128xf32> to vector<2x128xf32>
    %550 = arith.addf %547, %549 : vector<2x128xf32>
    %c0_218 = arith.constant 0 : index
    %c0_219 = arith.constant 0 : index
    %551 = vector.load %arg34[%c0_218, %c0_219] : memref<2x128xf32, #tpu.memory_space<vmem>>, vector<2x128xf32>
    tpu.vector_store %arg34[%c0_218, %c0_219], %550 {strides = array<i32>} : memref<2x128xf32, #tpu.memory_space<vmem>>, vector<2x128xf32>,
    return
  }
  func.func @transform_0(%arg0: i32) -> (i32, i32) {
    %c0_i32 = arith.constant 0 : i32
    %c0_i32_0 = arith.constant 0 : i32
    %c0_i32_1 = arith.constant 0 : i32
    return %c0_i32, %c0_i32_0 : i32, i32
  }
  func.func @transform_1(%arg0: i32) -> (i32, i32) {
    %c0_i32 = arith.constant 0 : i32
    %c0_i32_0 = arith.constant 0 : i32
    %c0_i32_1 = arith.constant 0 : i32
    return %c0_i32, %c0_i32_0 : i32, i32
  }
  func.func @transform_2(%arg0: i32) -> (i32, i32) {
    %c0_i32 = arith.constant 0 : i32
    %c0_i32_0 = arith.constant 0 : i32
    %c0_i32_1 = arith.constant 0 : i32
    return %c0_i32, %c0_i32_0 : i32, i32
  }
  func.func @transform_3(%arg0: i32) -> (i32, i32) {
    %c0_i32 = arith.constant 0 : i32
    %c0_i32_0 = arith.constant 0 : i32
    %c0_i32_1 = arith.constant 0 : i32
    return %c0_i32, %c0_i32_0 : i32, i32
  }
  func.func @transform_4(%arg0: i32) -> (i32, i32) {
    %c0_i32 = arith.constant 0 : i32
    %c0_i32_0 = arith.constant 0 : i32
    %c0_i32_1 = arith.constant 0 : i32
    return %c0_i32, %c0_i32_0 : i32, i32
  }
  func.func @transform_5(%arg0: i32) -> (i32, i32) {
    %c0_i32 = arith.constant 0 : i32
    %c0_i32_0 = arith.constant 0 : i32
    %c0_i32_1 = arith.constant 0 : i32
    return %c0_i32, %c0_i32_0 : i32, i32
  }
  func.func @transform_6(%arg0: i32) -> (i32, i32) {
    %c0_i32 = arith.constant 0 : i32
    %c0_i32_0 = arith.constant 0 : i32
    %c0_i32_1 = arith.constant 0 : i32
    return %c0_i32, %c0_i32_0 : i32, i32
  }
  func.func @transform_7(%arg0: i32) -> (i32, i32) {
    %c0_i32 = arith.constant 0 : i32
    %c0_i32_0 = arith.constant 0 : i32
    %c0_i32_1 = arith.constant 0 : i32
    return %c0_i32, %c0_i32_0 : i32, i32
  }
  func.func @transform_8(%arg0: i32) -> (i32, i32) {
    %c0_i32 = arith.constant 0 : i32
    %c0_i32_0 = arith.constant 0 : i32
    %c0_i32_1 = arith.constant 0 : i32
    return %c0_i32, %c0_i32_0 : i32, i32
  }
  func.func @transform_9(%arg0: i32) -> (i32, i32) {
    %c0_i32 = arith.constant 0 : i32
    %c0_i32_0 = arith.constant 0 : i32
    %c0_i32_1 = arith.constant 0 : i32
    return %c0_i32, %c0_i32_0 : i32, i32
  }
  func.func @transform_10(%arg0: i32) -> (i32, i32) {
    %c0_i32 = arith.constant 0 : i32
    %c0_i32_0 = arith.constant 0 : i32
    %c0_i32_1 = arith.constant 0 : i32
    return %c0_i32, %c0_i32_0 : i32, i32
  }
  func.func @transform_11(%arg0: i32) -> (i32, i32) {
    %c0_i32 = arith.constant 0 : i32
    %c0_i32_0 = arith.constant 0 : i32
    %c0_i32_1 = arith.constant 0 : i32
    return %c0_i32, %c0_i32_0 : i32, i32
  }
  func.func @transform_12(%arg0: i32) -> (i32, i32) {
    %c0_i32 = arith.constant 0 : i32
    %c0_i32_0 = arith.constant 0 : i32
    %c0_i32_1 = arith.constant 0 : i32
    return %c0_i32, %c0_i32_0 : i32, i32
  }
  func.func @transform_13(%arg0: i32) -> (i32, i32) {
    %c0_i32 = arith.constant 0 : i32
    %c0_i32_0 = arith.constant 0 : i32
    %c0_i32_1 = arith.constant 0 : i32
    return %c0_i32, %c0_i32_0 : i32, i32
  }
  func.func @transform_14(%arg0: i32) -> (i32, i32) {
    %c0_i32 = arith.constant 0 : i32
    %c0_i32_0 = arith.constant 0 : i32
    %c0_i32_1 = arith.constant 0 : i32
    return %c0_i32, %c0_i32_0 : i32, i32
  }
  func.func @transform_15(%arg0: i32) -> (i32, i32) {
    %c0_i32 = arith.constant 0 : i32
    %c0_i32_0 = arith.constant 0 : i32
    %c0_i32_1 = arith.constant 0 : i32
    return %c0_i32, %c0_i32_0 : i32, i32
  }
  func.func @transform_16(%arg0: i32) -> (i32, i32) {
    %c0_i32 = arith.constant 0 : i32
    %c0_i32_0 = arith.constant 0 : i32
    %c0_i32_1 = arith.constant 0 : i32
    return %c0_i32, %c0_i32_0 : i32, i32
  }
  func.func @transform_17(%arg0: i32) -> (i32, i32) {
    %c0_i32 = arith.constant 0 : i32
    %c0_i32_0 = arith.constant 0 : i32
    %c0_i32_1 = arith.constant 0 : i32
    return %c0_i32, %c0_i32_0 : i32, i32
  }
  func.func @transform_18(%arg0: i32) -> (i32, i32) {
    %c0_i32 = arith.constant 0 : i32
    %c0_i32_0 = arith.constant 0 : i32
    %c0_i32_1 = arith.constant 0 : i32
    return %c0_i32, %c0_i32_0 : i32, i32
  }
  func.func @transform_19(%arg0: i32) -> (i32, i32) {
    %c0_i32 = arith.constant 0 : i32
    %c0_i32_0 = arith.constant 0 : i32
    %c0_i32_1 = arith.constant 0 : i32
    return %c0_i32, %c0_i32_0 : i32, i32
  }
  func.func @transform_20(%arg0: i32) -> (i32, i32) {
    %c0_i32 = arith.constant 0 : i32
    %c0_i32_0 = arith.constant 0 : i32
    %c0_i32_1 = arith.constant 0 : i32
    return %c0_i32, %c0_i32_0 : i32, i32
  }
  func.func @transform_21(%arg0: i32) -> (i32, i32) {
    %c0_i32 = arith.constant 0 : i32
    %c0_i32_0 = arith.constant 0 : i32
    %c0_i32_1 = arith.constant 0 : i32
    return %c0_i32, %c0_i32_0 : i32, i32
  }
  func.func @transform_22(%arg0: i32) -> (i32, i32) {
    %c0_i32 = arith.constant 0 : i32
    %c0_i32_0 = arith.constant 0 : i32
    %c0_i32_1 = arith.constant 0 : i32
    return %c0_i32, %c0_i32_0 : i32, i32
  }
  func.func @transform_23(%arg0: i32) -> (i32, i32) {
    %c0_i32 = arith.constant 0 : i32
    %c0_i32_0 = arith.constant 0 : i32
    %c0_i32_1 = arith.constant 0 : i32
    return %c0_i32, %c0_i32_0 : i32, i32
  }
  func.func @transform_24(%arg0: i32) -> (i32, i32) {
    %c0_i32 = arith.constant 0 : i32
    %c0_i32_0 = arith.constant 0 : i32
    %c0_i32_1 = arith.constant 0 : i32
    return %c0_i32, %c0_i32_0 : i32, i32
  }
  func.func @transform_25(%arg0: i32) -> (i32, i32) {
    %c0_i32 = arith.constant 0 : i32
    %c0_i32_0 = arith.constant 0 : i32
    %c0_i32_1 = arith.constant 0 : i32
    return %c0_i32, %c0_i32_0 : i32, i32
  }
  func.func @transform_26(%arg0: i32) -> (i32, i32) {
    %c0_i32 = arith.constant 0 : i32
    %c0_i32_0 = arith.constant 0 : i32
    %c0_i32_1 = arith.constant 0 : i32
    return %c0_i32, %c0_i32_0 : i32, i32
  }
  func.func @transform_27(%arg0: i32) -> (i32, i32) {
    %c0_i32 = arith.constant 0 : i32
    %c0_i32_0 = arith.constant 0 : i32
    %c0_i32_1 = arith.constant 0 : i32
    return %c0_i32, %c0_i32_0 : i32, i32
  }
  func.func @transform_28(%arg0: i32) -> (i32, i32) {
    %c0_i32 = arith.constant 0 : i32
    %c0_i32_0 = arith.constant 0 : i32
    %c0_i32_1 = arith.constant 0 : i32
    return %c0_i32, %c0_i32_0 : i32, i32
  }
  func.func @transform_29(%arg0: i32) -> (i32, i32) {
    %c0_i32 = arith.constant 0 : i32
    %c0_i32_0 = arith.constant 0 : i32
    %c0_i32_1 = arith.constant 0 : i32
    return %c0_i32, %c0_i32_0 : i32, i32
  }
  func.func @transform_30(%arg0: i32) -> (i32, i32) {
    %c0_i32 = arith.constant 0 : i32
    %c0_i32_0 = arith.constant 0 : i32
    %c0_i32_1 = arith.constant 0 : i32
    return %c0_i32, %c0_i32_0 : i32, i32
  }
  func.func @transform_31(%arg0: i32) -> (i32, i32) {
    %c0_i32 = arith.constant 0 : i32
    %c0_i32_0 = arith.constant 0 : i32
    %c0_i32_1 = arith.constant 0 : i32
    return %c0_i32, %c0_i32_0 : i32, i32
  }
  func.func @transform_32(%arg0: i32) -> (i32, i32) {
    %c0_i32 = arith.constant 0 : i32
    %c0_i32_0 = arith.constant 0 : i32
    %c0_i32_1 = arith.constant 0 : i32
    return %c0_i32, %c0_i32_0 : i32, i32
  }
  func.func @transform_33(%arg0: i32) -> (i32, i32) {
    %c0_i32 = arith.constant 0 : i32
    %c0_i32_0 = arith.constant 0 : i32
    %c0_i32_1 = arith.constant 0 : i32
    return %c0_i32, %c0_i32_0 : i32, i32
  }
}

</mosaic_0001>

<bundles_post_ra>
// kernel: squeeze.1
= control target key start
LH: loop header
LB: loop body
LE: loop exit
PB: predicated region body
PF: predicated region fallthrough
CT: control target
= control target key end

     0   :  { %2 = vsyncpa [#allocation1], 0  ;;  %s3494_s8 = smov [#allocation0]   ;;  %s5071_s0 = inlined_call_operand.hbm [shape: f32[2,1,3,64,64], index: 0, kind: input, shape index: {}]   ;;  %s5072_s1 = inlined_call_operand.vmem [shape: f32[2,3,2,32,2,32], index: 1, kind: output, shape index: {}]  }
   0x1   :  { %s6_s0 = sshll.u32 %s5071_s0, 4  ;;  %s8_s9 = sshll.u32 %s3494_s8, 4  ;;  %s7_s0 = int_to_ptr.hbm [resolvable:$true] %s6_s0  ;;  %s9_s9 = int_to_ptr.vmem [resolvable:$true] %s8_s9 }
   0x2   :  { %11 = dma.hbm_to_vmem [thread:$0]  %s7_s0, 6144, %s9_s9, [#allocation1]  }
   0x3   :  { %3492 = dma.done.wait [#allocation1], 6144  }
   0x4   :  { %3493 = vsyncadd [#allocation1], 4294961152  ;;  %v3509_v0 = vld [vmem:[#allocation0 + $0x10] sm:$0xff]   ;;  %v3511_v1 = vld [vmem:[#allocation0] sm:$0xff]   ;;  %s3495_s10 = smov 96   ;;  %vm15_vm0 = vcmask 261120  }
   0x5   :  { %366 = vrot.lane.b32.xlu1 %v3509_v0, %s3495_s10  ;;  %348 = vrot.lane.b32.xlu0 %v3511_v1, %s3495_s10  ;;  %v3517_v2 = vld [vmem:[#allocation0 + $0x20] sm:$0xff]   ;;  %v3521_v3 = vld [vmem:[#allocation0 + $0x18] sm:$0xff]   ;;  %v3523_v4 = vld [vmem:[#allocation0 + $0x8] sm:$0xff]   ;;  %29 = vst.msk [vmem:[#allocation2 + $0x80] ss:$8 sm:$0xf] %vm15_vm0, %v3509_v0  }
   0x6   :  { %384 = vrot.lane.b32.xlu2 %v3517_v2, %s3495_s10  ;;  %v3525_v5 = vld [vmem:[#allocation0 + $0x28] sm:$0xff]   ;;  %v3533_v6 = vld [vmem:[#allocation0 + $0x38] sm:$0xff]   ;;  %v3535_v7 = vld [vmem:[#allocation0 + $0x30] sm:$0xff]   ;;  %43 = vst.msk [vmem:[#allocation2 + $0x100] ss:$8 sm:$0xf] %vm15_vm0, %v3517_v2  }
   0x7   :  { %v3537_v8 = vld [vmem:[#allocation0 + $0x40] sm:$0xff]   ;;  %v3545_v9 = vld [vmem:[#allocation0 + $0x50] sm:$0xff]   ;;  %v3547_v10 = vld [vmem:[#allocation0 + $0x48] sm:$0xff]   ;;  %45 = vst.msk [vmem:[#allocation2 + $0x100] ss:$8 sm:$0xf0] %vm15_vm0, %v3517_v2  }
   0x8   :  { %v3549_v11 = vld [vmem:[#allocation0 + $0x58] sm:$0xff]   ;;  %v3557_v12 = vld [vmem:[#allocation0 + $0x68] sm:$0xff]   ;;  %v3559_v13 = vld [vmem:[#allocation0 + $0x60] sm:$0xff]   ;;  %31 = vst.msk [vmem:[#allocation2 + $0x80] ss:$8 sm:$0xf0] %vm15_vm0, %v3509_v0  }
   0x9   :  { %v3561_v14 = vld [vmem:[#allocation0 + $0x70] sm:$0xff]   ;;  %v3569_v15 = vld [vmem:[#allocation0 + $0x80] sm:$0xff]   ;;  %v3571_v16 = vld [vmem:[#allocation0 + $0x78] sm:$0xff]   ;;  %16 = vst.msk [vmem:[#allocation2] ss:$8 sm:$0xf] %vm15_vm0, %v3511_v1  }
   0xa   :  { %v3573_v17 = vld [vmem:[#allocation0 + $0x88] sm:$0xff]   ;;  %v3581_v18 = vld [vmem:[#allocation0 + $0x98] sm:$0xff]   ;;  %v3583_v19 = vld [vmem:[#allocation0 + $0x90] sm:$0xff]   ;;  %17 = vst.msk [vmem:[#allocation2] ss:$8 sm:$0xf0] %vm15_vm0, %v3511_v1  }
   0xb   :  { %v3585_v20 = vld [vmem:[#allocation0 + $0xa0] sm:$0xff]   ;;  %v545_v21 = vld [vmem:[#allocation0 + $0xb0] sm:$0xff]   ;;  %v536_v22 = vld [vmem:[#allocation0 + $0xa8] sm:$0xff]   ;;  %50 = vst.msk [vmem:[#allocation2 + $0x140] ss:$8 sm:$0xf] %vm15_vm0, %v3525_v5  }
   0xc   :  { %v3593_v23 = vld [vmem:[#allocation0 + $0xb8] sm:$0xff]   ;;  %v572_v24 = vld [vmem:[#allocation0 + $0xc8] sm:$0xff]   ;;  %v563_v25 = vld [vmem:[#allocation0 + $0xc0] sm:$0xff]   ;;  %52 = vst.msk [vmem:[#allocation2 + $0x140] ss:$8 sm:$0xf0] %vm15_vm0, %v3525_v5  }
   0xd   :  { %375 = vrot.lane.b32.xlu1 %v3521_v3, %s3495_s10  ;;  %357 = vrot.lane.b32.xlu0 %v3523_v4, %s3495_s10  ;;  %v581_v26 = vld [vmem:[#allocation0 + $0xd0] sm:$0xff]   ;;  %v599_v27 = vld [vmem:[#allocation0 + $0xe0] sm:$0xff]   ;;  %v590_v28 = vld [vmem:[#allocation0 + $0xd8] sm:$0xff]   ;;  %36 = vst.msk [vmem:[#allocation2 + $0xc0] ss:$8 sm:$0xf] %vm15_vm0, %v3521_v3  }
   0xe   :  { %393 = vrot.lane.b32.xlu2 %v3525_v5, %s3495_s10  ;;  %v608_v29 = vld [vmem:[#allocation0 + $0xe8] sm:$0xff]   ;;  %v626_v30 = vld [vmem:[#allocation0 + $0xf8] sm:$0xff]   ;;  %v617_v31 = vld [vmem:[#allocation0 + $0xf0] sm:$0xff]   ;;  %38 = vst.msk [vmem:[#allocation2 + $0xc0] ss:$8 sm:$0xf0] %vm15_vm0, %v3521_v3  }
   0xf   :  { %v635_v32 = vld [vmem:[#allocation0 + $0x100] sm:$0xff]   ;;  %v653_v33 = vld [vmem:[#allocation0 + $0x110] sm:$0xff]   ;;  %v644_v34 = vld [vmem:[#allocation0 + $0x108] sm:$0xff]   ;;  %22 = vst.msk [vmem:[#allocation2 + $0x40] ss:$8 sm:$0xf] %vm15_vm0, %v3523_v4  }
  0x10   :  { %v662_v35 = vld [vmem:[#allocation0 + $0x118] sm:$0xff]   ;;  %24 = vst.msk [vmem:[#allocation2 + $0x40] ss:$8 sm:$0xf0] %vm15_vm0, %v3523_v4   ;;  %v680_v37 = vld [vmem:[#allocation0 + $0x128] sm:$0xff]   ;;  %v671_v38 = vld [vmem:[#allocation0 + $0x120] sm:$0xff]  }
  0x11   :  { %71 = vst.msk [vmem:[#allocation2 + $0x200] ss:$8 sm:$0xf] %vm15_vm0, %v3537_v8   ;;  %v707_v42 = vld [vmem:[#allocation0 + $0x140] sm:$0xff]   ;;  %v698_v43 = vld [vmem:[#allocation0 + $0x138] sm:$0xff]   ;;  %v689_v47 = vld [vmem:[#allocation0 + $0x130] sm:$0xff]  }
  0x12   :  { %73 = vst.msk [vmem:[#allocation2 + $0x200] ss:$8 sm:$0xf0] %vm15_vm0, %v3537_v8   ;;  %v734_v51 = vld [vmem:[#allocation0 + $0x158] sm:$0xff]   ;;  %v725_v52 = vld [vmem:[#allocation0 + $0x150] sm:$0xff]   ;;  %v752_v57 = vld [vmem:[#allocation0 + $0x168] sm:$0xff]  }
  0x13   :  { %64 = vst.msk [vmem:[#allocation2 + $0x1c0] ss:$8 sm:$0xf] %vm15_vm0, %v3533_v6   ;;  %v761_v55 = vld [vmem:[#allocation0 + $0x170] sm:$0xff]  }
  0x14   :  { %66 = vst.msk [vmem:[#allocation2 + $0x1c0] ss:$8 sm:$0xf0] %vm15_vm0, %v3533_v6  }
  0x15   :  { %411 = vrot.lane.b32.xlu1 %v3533_v6, %s3495_s10  ;;  %402 = vrot.lane.b32.xlu0 %v3535_v7, %s3495_s10  ;;  %57 = vst.msk [vmem:[#allocation2 + $0x180] ss:$8 sm:$0xf] %vm15_vm0, %v3535_v7  }
  0x16   :  { %420 = vrot.lane.b32.xlu2 %v3537_v8, %s3495_s10  ;;  %59 = vst.msk [vmem:[#allocation2 + $0x180] ss:$8 sm:$0xf0] %vm15_vm0, %v3535_v7  }
  0x17   :  { %92 = vst.msk [vmem:[#allocation2 + $0x2c0] ss:$8 sm:$0xf] %vm15_vm0, %v3549_v11  }
  0x18   :  { %94 = vst.msk [vmem:[#allocation2 + $0x2c0] ss:$8 sm:$0xf0] %vm15_vm0, %v3549_v11  }
  0x19   :  { %85 = vst.msk [vmem:[#allocation2 + $0x280] ss:$8 sm:$0xf] %vm15_vm0, %v3545_v9  }
  0x1a   :  { %87 = vst.msk [vmem:[#allocation2 + $0x280] ss:$8 sm:$0xf0] %vm15_vm0, %v3545_v9  }
  0x1b   :  { %78 = vst.msk [vmem:[#allocation2 + $0x240] ss:$8 sm:$0xf] %vm15_vm0, %v3547_v10  }
  0x1c   :  { %80 = vst.msk [vmem:[#allocation2 + $0x240] ss:$8 sm:$0xf0] %vm15_vm0, %v3547_v10  }
  0x1d   :  { %438 = vrot.lane.b32.xlu1 %v3545_v9, %s3495_s10  ;;  %429 = vrot.lane.b32.xlu0 %v3547_v10, %s3495_s10  ;;  %v770_v9 = vld [vmem:[#allocation0 + $0x178] sm:$0xff]   ;;  %113 = vst.msk [vmem:[#allocation2 + $0x380] ss:$8 sm:$0xf] %vm15_vm0, %v3561_v14  }
  0x1e   :  { %447 = vrot.lane.b32.xlu2 %v3549_v11, %s3495_s10  ;;  %115 = vst.msk [vmem:[#allocation2 + $0x380] ss:$8 sm:$0xf0] %vm15_vm0, %v3561_v14  }
  0x1f   :  { %106 = vst.msk [vmem:[#allocation2 + $0x340] ss:$8 sm:$0xf] %vm15_vm0, %v3557_v12  }
  0x20   :  { %108 = vst.msk [vmem:[#allocation2 + $0x340] ss:$8 sm:$0xf0] %vm15_vm0, %v3557_v12  }
  0x21   :  { %99 = vst.msk [vmem:[#allocation2 + $0x300] ss:$8 sm:$0xf] %vm15_vm0, %v3559_v13  }
  0x22   :  { %101 = vst.msk [vmem:[#allocation2 + $0x300] ss:$8 sm:$0xf0] %vm15_vm0, %v3559_v13  }
  0x23   :  { %134 = vst.msk [vmem:[#allocation2 + $0x440] ss:$8 sm:$0xf] %vm15_vm0, %v3573_v17  }
  0x24   :  { %136 = vst.msk [vmem:[#allocation2 + $0x440] ss:$8 sm:$0xf0] %vm15_vm0, %v3573_v17  }
  0x25   :  { %465 = vrot.lane.b32.xlu1 %v3557_v12, %s3495_s10  ;;  %456 = vrot.lane.b32.xlu0 %v3559_v13, %s3495_s10  ;;  %127 = vst.msk [vmem:[#allocation2 + $0x400] ss:$8 sm:$0xf] %vm15_vm0, %v3569_v15  }
  0x26   :  { %474 = vrot.lane.b32.xlu2 %v3561_v14, %s3495_s10  ;;  %129 = vst.msk [vmem:[#allocation2 + $0x400] ss:$8 sm:$0xf0] %vm15_vm0, %v3569_v15  }
  0x27   :  { %120 = vst.msk [vmem:[#allocation2 + $0x3c0] ss:$8 sm:$0xf] %vm15_vm0, %v3571_v16  }
  0x28   :  { %122 = vst.msk [vmem:[#allocation2 + $0x3c0] ss:$8 sm:$0xf0] %vm15_vm0, %v3571_v16  }
  0x29   :  { %155 = vst.msk [vmem:[#allocation2 + $0x500] ss:$8 sm:$0xf] %vm15_vm0, %v3585_v20  }
  0x2a   :  { %157 = vst.msk [vmem:[#allocation2 + $0x500] ss:$8 sm:$0xf0] %vm15_vm0, %v3585_v20  }
  0x2b   :  { %148 = vst.msk [vmem:[#allocation2 + $0x4c0] ss:$8 sm:$0xf] %vm15_vm0, %v3581_v18  }
  0x2c   :  { %150 = vst.msk [vmem:[#allocation2 + $0x4c0] ss:$8 sm:$0xf0] %vm15_vm0, %v3581_v18  }
  0x2d   :  { %492 = vrot.lane.b32.xlu1 %v3569_v15, %s3495_s10  ;;  %483 = vrot.lane.b32.xlu0 %v3571_v16, %s3495_s10  ;;  %141 = vst.msk [vmem:[#allocation2 + $0x480] ss:$8 sm:$0xf] %vm15_vm0, %v3583_v19  }
  0x2e   :  { %501 = vrot.lane.b32.xlu2 %v3573_v17, %s3495_s10  ;;  %143 = vst.msk [vmem:[#allocation2 + $0x480] ss:$8 sm:$0xf0] %vm15_vm0, %v3583_v19  }
  0x2f   :  { %176 = vst.msk [vmem:[#allocation2 + $0x5c0] ss:$8 sm:$0xf] %vm15_vm0, %v3593_v23  }
  0x30   :  { %178 = vst.msk [vmem:[#allocation2 + $0x5c0] ss:$8 sm:$0xf0] %vm15_vm0, %v3593_v23  }
  0x35   :  { %519 = vrot.lane.b32.xlu1 %v3581_v18, %s3495_s10  ;;  %510 = vrot.lane.b32.xlu0 %v3583_v19, %s3495_s10 }
  0x36   :  { %528 = vrot.lane.b32.xlu2 %v3585_v20, %s3495_s10 }
  0x3d   :  { %546 = vrot.lane.b32.xlu1 %v545_v21, %s3495_s10  ;;  %537 = vrot.lane.b32.xlu0 %v536_v22, %s3495_s10  ;;  %v716_v21 = vld [vmem:[#allocation0 + $0x148] sm:$0xff]  }
  0x3e   :  { %555 = vrot.lane.b32.xlu2 %v3593_v23, %s3495_s10  ;;  %v166_v23 = vld [vmem:[#allocation0 + $0xb0] sm:$0xff]  }
  0x3f   :  { %169 = vst.msk [vmem:[#allocation2 + $0x580] ss:$8 sm:$0xf] %vm15_vm0, %v166_v23  }
  0x40   :  { %171 = vst.msk [vmem:[#allocation2 + $0x580] ss:$8 sm:$0xf0] %vm15_vm0, %v166_v23  }
  0x45   :  { %573 = vrot.lane.b32.xlu1 %v572_v24, %s3495_s10  ;;  %564 = vrot.lane.b32.xlu0 %v563_v25, %s3495_s10 }
  0x46   :  { %582 = vrot.lane.b32.xlu2 %v581_v26, %s3495_s10 }
  0x4d   :  { %600 = vrot.lane.b32.xlu1 %v599_v27, %s3495_s10  ;;  %591 = vrot.lane.b32.xlu0 %v590_v28, %s3495_s10 }
  0x4e   :  { %609 = vrot.lane.b32.xlu2 %v608_v29, %s3495_s10 }
  0x55   :  { %627 = vrot.lane.b32.xlu1 %v626_v30, %s3495_s10  ;;  %618 = vrot.lane.b32.xlu0 %v617_v31, %s3495_s10 }
  0x56   :  { %636 = vrot.lane.b32.xlu2 %v635_v32, %s3495_s10 }
  0x5d   :  { %654 = vrot.lane.b32.xlu1 %v653_v33, %s3495_s10  ;;  %645 = vrot.lane.b32.xlu0 %v644_v34, %s3495_s10 }
  0x5e   :  { %663 = vrot.lane.b32.xlu2 %v662_v35, %s3495_s10 }
  0x60   :  { %v385_v36 = vpop.permute.xlu2 %384  }
  0x61   :  { %388 = vst.msk [vmem:[#allocation2 + $0x101] ss:$8 sm:$0xf] %vm15_vm0, %v385_v36  }
  0x62   :  { %390 = vst.msk [vmem:[#allocation2 + $0x101] ss:$8 sm:$0xf0] %vm15_vm0, %v385_v36  }
  0x65   :  { %681 = vrot.lane.b32.xlu1 %v680_v37, %s3495_s10  ;;  %672 = vrot.lane.b32.xlu0 %v671_v38, %s3495_s10 }
  0x66   :  { %690 = vrot.lane.b32.xlu2 %v689_v47, %s3495_s10 }
  0x68   :  { %v971_v39 = vld [vmem:[#allocation2 + $0x100] sm:$0x3]  ;;  %v977_v40 = vld [vmem:[#allocation2 + $0x108] sm:$0x3]  ;;  %v983_v41 = vld [vmem:[#allocation2 + $0x110] sm:$0x3]  ;;  %v394_v50 = vpop.permute.xlu2 %393  }
  0x69   :  { %3114 = vst [vmem:[%s5072_s1 + $0x40] sm:$0x3] %v971_v39  ;;  %v989_v44 = vld [vmem:[#allocation2 + $0x118] sm:$0x3]  ;;  %v995_v45 = vld [vmem:[#allocation2 + $0x120] sm:$0x3] }
  0x6a   :  { %3115 = vst [vmem:[%s5072_s1 + $0x42] sm:$0x3] %v977_v40  ;;  %v1001_v46 = vld [vmem:[#allocation2 + $0x128] sm:$0x3]  ;;  %v1007_v48 = vld [vmem:[#allocation2 + $0x130] sm:$0x3] }
  0x6b   :  { %3116 = vst [vmem:[%s5072_s1 + $0x44] sm:$0x3] %v983_v41  ;;  %v1013_v49 = vld [vmem:[#allocation2 + $0x138] sm:$0x3] }
  0x6c   :  { %3117 = vst [vmem:[%s5072_s1 + $0x46] sm:$0x3] %v989_v44 }
  0x6d   :  { %708 = vrot.lane.b32.xlu1 %v707_v42, %s3495_s10  ;;  %699 = vrot.lane.b32.xlu0 %v698_v43, %s3495_s10  ;;  %3118 = vst [vmem:[%s5072_s1 + $0x48] sm:$0x3] %v995_v45 }
  0x6e   :  { %3119 = vst [vmem:[%s5072_s1 + $0x4a] sm:$0x3] %v1001_v46  ;;  %717 = vrot.lane.b32.xlu2 %v716_v21, %s3495_s10 }
  0x6f   :  { %3120 = vst [vmem:[%s5072_s1 + $0x4c] sm:$0x3] %v1007_v48 }
  0x70   :  { %3121 = vst [vmem:[%s5072_s1 + $0x4e] sm:$0x3] %v1013_v49  ;;  %v421_v26 = vpop.permute.xlu2 %420  }
  0x71   :  { %397 = vst.msk [vmem:[#allocation2 + $0x141] ss:$8 sm:$0xf] %vm15_vm0, %v394_v50  }
  0x72   :  { %399 = vst.msk [vmem:[#allocation2 + $0x141] ss:$8 sm:$0xf0] %vm15_vm0, %v394_v50  }
  0x73   :  { %424 = vst.msk [vmem:[#allocation2 + $0x201] ss:$8 sm:$0xf] %vm15_vm0, %v421_v26  }
  0x74   :  { %426 = vst.msk [vmem:[#allocation2 + $0x201] ss:$8 sm:$0xf0] %vm15_vm0, %v421_v26  }
  0x75   :  { %735 = vrot.lane.b32.xlu1 %v734_v51, %s3495_s10  ;;  %726 = vrot.lane.b32.xlu0 %v725_v52, %s3495_s10  ;;  %v743_v52 = vld [vmem:[#allocation0 + $0x160] sm:$0xff]  }
  0x76   :  { %744 = vrot.lane.b32.xlu2 %v743_v52, %s3495_s10 }
  0x77   :  { %v367_v53 = vpop.permute.xlu1 %366   ;;  %v349_v54 = vpop.permute.xlu0 %348  }
  0x78   :  { %370 = vst.msk [vmem:[#allocation2 + $0x81] ss:$8 sm:$0xf] %vm15_vm0, %v367_v53   ;;  %v1019_v56 = vld [vmem:[#allocation2 + $0x140] sm:$0x3]  ;;  %v448_v50 = vpop.permute.xlu2 %447  }
  0x79   :  { %372 = vst.msk [vmem:[#allocation2 + $0x81] ss:$8 sm:$0xf0] %vm15_vm0, %v367_v53   ;;  %v1025_v58 = vld [vmem:[#allocation2 + $0x148] sm:$0x3] }
  0x7a   :  { %352 = vst.msk [vmem:[#allocation2 + $0x1] ss:$8 sm:$0xf] %vm15_vm0, %v349_v54   ;;  %v1031_v59 = vld [vmem:[#allocation2 + $0x150] sm:$0x3] }
  0x7b   :  { %354 = vst.msk [vmem:[#allocation2 + $0x1] ss:$8 sm:$0xf0] %vm15_vm0, %v349_v54   ;;  %v1037_v29 = vld [vmem:[#allocation2 + $0x158] sm:$0x3] }
  0x7c   :  { %3122 = vst [vmem:[%s5072_s1 + $0x50] sm:$0x3] %v1019_v56  ;;  %v1043_v30 = vld [vmem:[#allocation2 + $0x160] sm:$0x3]  ;;  %v1049_v31 = vld [vmem:[#allocation2 + $0x168] sm:$0x3] }
  0x7d   :  { %762 = vrot.lane.b32.xlu1 %v761_v55, %s3495_s10  ;;  %753 = vrot.lane.b32.xlu0 %v752_v57, %s3495_s10  ;;  %3123 = vst [vmem:[%s5072_s1 + $0x52] sm:$0x3] %v1025_v58  ;;  %v1055_v32 = vld [vmem:[#allocation2 + $0x170] sm:$0x3]  ;;  %v1061_v33 = vld [vmem:[#allocation2 + $0x178] sm:$0x3] }
  0x7e   :  { %3124 = vst [vmem:[%s5072_s1 + $0x54] sm:$0x3] %v1031_v59  ;;  %v1163_v53 = vld [vmem:[#allocation2 + $0x200] sm:$0x3]  ;;  %v1169_v54 = vld [vmem:[#allocation2 + $0x208] sm:$0x3]  ;;  %771 = vrot.lane.b32.xlu2 %v770_v9, %s3495_s10 }
  0x7f   :  { %v875_v60 = vld [vmem:[#allocation2 + $0x80] sm:$0x3]  ;;  %v881_v61 = vld [vmem:[#allocation2 + $0x88] sm:$0x3]  ;;  %v887_v62 = vld [vmem:[#allocation2 + $0x90] sm:$0x3]  ;;  %v376_v63 = vpop.permute.xlu1 %375   ;;  %v358_v0 = vpop.permute.xlu0 %357  }
  0x80   :  { %3098 = vst [vmem:[%s5072_s1 + $0x20] sm:$0x3] %v875_v60  ;;  %v893_v1 = vld [vmem:[#allocation2 + $0x98] sm:$0x3]  ;;  %v899_v2 = vld [vmem:[#allocation2 + $0xa0] sm:$0x3]  ;;  %v475_v10 = vpop.permute.xlu2 %474  }
  0x81   :  { %3099 = vst [vmem:[%s5072_s1 + $0x22] sm:$0x3] %v881_v61  ;;  %v905_v3 = vld [vmem:[#allocation2 + $0xa8] sm:$0x3]  ;;  %v911_v4 = vld [vmem:[#allocation2 + $0xb0] sm:$0x3] }
  0x82   :  { %3100 = vst [vmem:[%s5072_s1 + $0x24] sm:$0x3] %v887_v62  ;;  %v917_v5 = vld [vmem:[#allocation2 + $0xb8] sm:$0x3]  ;;  %v780_v6 = vld [vmem:[#allocation2] sm:$0x3] }
  0x83   :  { %3101 = vst [vmem:[%s5072_s1 + $0x26] sm:$0x3] %v893_v1  ;;  %v785_v7 = vld [vmem:[#allocation2 + $0x8] sm:$0x3]  ;;  %v791_v8 = vld [vmem:[#allocation2 + $0x10] sm:$0x3] }
  0x84   :  { %3102 = vst [vmem:[%s5072_s1 + $0x28] sm:$0x3] %v899_v2  ;;  %v797_v11 = vld [vmem:[#allocation2 + $0x18] sm:$0x3]  ;;  %v803_v22 = vld [vmem:[#allocation2 + $0x20] sm:$0x3] }
  0x85   :  { %3103 = vst [vmem:[%s5072_s1 + $0x2a] sm:$0x3] %v905_v3  ;;  %v809_v24 = vld [vmem:[#allocation2 + $0x28] sm:$0x3]  ;;  %v815_v25 = vld [vmem:[#allocation2 + $0x30] sm:$0x3] }
  0x86   :  { %3104 = vst [vmem:[%s5072_s1 + $0x2c] sm:$0x3] %v911_v4  ;;  %v821_v28 = vld [vmem:[#allocation2 + $0x38] sm:$0x3]  ;;  %v1175_v55 = vld [vmem:[#allocation2 + $0x210] sm:$0x3] }
  0x87   :  { %3105 = vst [vmem:[%s5072_s1 + $0x2e] sm:$0x3] %v917_v5  ;;  %v3740_v27 = vpop.permute.xlu1 %411   ;;  %v3772_v34 = vpop.permute.xlu0 %402   ;;  %v1181_v56 = vld [vmem:[#allocation2 + $0x218] sm:$0x3]  ;;  %v1187_v57 = vld [vmem:[#allocation2 + $0x220] sm:$0x3] }
  0x88   :  { %783 = vst [vmem:[%s5072_s1] sm:$0x3] %v780_v6  ;;  %v1193_v58 = vld [vmem:[#allocation2 + $0x228] sm:$0x3]  ;;  %v1199_v59 = vld [vmem:[#allocation2 + $0x230] sm:$0x3] }
  0x89   :  { %3083 = vst [vmem:[%s5072_s1 + $0x2] sm:$0x3] %v785_v7  ;;  %v1205_v61 = vld [vmem:[#allocation2 + $0x238] sm:$0x3] }
  0x8a   :  { %3084 = vst [vmem:[%s5072_s1 + $0x4] sm:$0x3] %v791_v8 }
  0x8b   :  { %3085 = vst [vmem:[%s5072_s1 + $0x6] sm:$0x3] %v797_v11 }
  0x8c   :  { %3086 = vst [vmem:[%s5072_s1 + $0x8] sm:$0x3] %v803_v22 }
  0x8d   :  { %3087 = vst [vmem:[%s5072_s1 + $0xa] sm:$0x3] %v809_v24 }
  0x8e   :  { %3088 = vst [vmem:[%s5072_s1 + $0xc] sm:$0x3] %v815_v25 }
  0x8f   :  { %3089 = vst [vmem:[%s5072_s1 + $0xe] sm:$0x3] %v821_v28  ;;  %v439_v60 = vpop.permute.xlu1 %438   ;;  %v3863_v2 = vpop.permute.xlu0 %429  }
  0x90   :  { %3125 = vst [vmem:[%s5072_s1 + $0x56] sm:$0x3] %v1037_v29 }
  0x91   :  { %3126 = vst [vmem:[%s5072_s1 + $0x58] sm:$0x3] %v1043_v30 }
  0x92   :  { %3127 = vst [vmem:[%s5072_s1 + $0x5a] sm:$0x3] %v1049_v31 }
  0x93   :  { %3128 = vst [vmem:[%s5072_s1 + $0x5c] sm:$0x3] %v1055_v32 }
  0x94   :  { %3129 = vst [vmem:[%s5072_s1 + $0x5e] sm:$0x3] %v1061_v33 }
  0x95   :  { %379 = vst.msk [vmem:[#allocation2 + $0xc1] ss:$8 sm:$0xf] %vm15_vm0, %v376_v63  }
  0x96   :  { %381 = vst.msk [vmem:[#allocation2 + $0xc1] ss:$8 sm:$0xf0] %vm15_vm0, %v376_v63  }
  0x97   :  { %361 = vst.msk [vmem:[#allocation2 + $0x41] ss:$8 sm:$0xf] %vm15_vm0, %v358_v0  }
  0x98   :  { %363 = vst.msk [vmem:[#allocation2 + $0x41] ss:$8 sm:$0xf0] %vm15_vm0, %v358_v0  }
  0x99   :  { %415 = vst.msk [vmem:[#allocation2 + $0x1c1] ss:$8 sm:$0xf] %vm15_vm0, %v3740_v27  }
  0x9a   :  { %3146 = vst [vmem:[%s5072_s1 + $0x80] sm:$0x3] %v1163_v53 }
  0x9b   :  { %3147 = vst [vmem:[%s5072_s1 + $0x82] sm:$0x3] %v1169_v54 }
  0x9c   :  { %v923_v35 = vld [vmem:[#allocation2 + $0xc0] sm:$0x3]  ;;  %v929_v36 = vld [vmem:[#allocation2 + $0xc8] sm:$0x3]  ;;  %v935_v37 = vld [vmem:[#allocation2 + $0xd0] sm:$0x3] }
  0x9d   :  { %3106 = vst [vmem:[%s5072_s1 + $0x30] sm:$0x3] %v923_v35  ;;  %v941_v38 = vld [vmem:[#allocation2 + $0xd8] sm:$0x3]  ;;  %v947_v39 = vld [vmem:[#allocation2 + $0xe0] sm:$0x3] }
  0x9e   :  { %3107 = vst [vmem:[%s5072_s1 + $0x32] sm:$0x3] %v929_v36  ;;  %v953_v40 = vld [vmem:[#allocation2 + $0xe8] sm:$0x3]  ;;  %v959_v41 = vld [vmem:[#allocation2 + $0xf0] sm:$0x3] }
  0x9f   :  { %3108 = vst [vmem:[%s5072_s1 + $0x34] sm:$0x3] %v935_v37  ;;  %v965_v42 = vld [vmem:[#allocation2 + $0xf8] sm:$0x3]  ;;  %v827_v43 = vld [vmem:[#allocation2 + $0x40] sm:$0x3] }
  0xa0   :  { %3109 = vst [vmem:[%s5072_s1 + $0x36] sm:$0x3] %v941_v38  ;;  %v833_v44 = vld [vmem:[#allocation2 + $0x48] sm:$0x3]  ;;  %v839_v45 = vld [vmem:[#allocation2 + $0x50] sm:$0x3] }
  0xa1   :  { %3110 = vst [vmem:[%s5072_s1 + $0x38] sm:$0x3] %v947_v39  ;;  %v845_v46 = vld [vmem:[#allocation2 + $0x58] sm:$0x3]  ;;  %v851_v47 = vld [vmem:[#allocation2 + $0x60] sm:$0x3] }
  0xa2   :  { %3111 = vst [vmem:[%s5072_s1 + $0x3a] sm:$0x3] %v953_v40  ;;  %v857_v48 = vld [vmem:[#allocation2 + $0x68] sm:$0x3]  ;;  %v863_v49 = vld [vmem:[#allocation2 + $0x70] sm:$0x3] }
  0xa3   :  { %3112 = vst [vmem:[%s5072_s1 + $0x3c] sm:$0x3] %v959_v41  ;;  %v869_v51 = vld [vmem:[#allocation2 + $0x78] sm:$0x3]  ;;  %v1115_v62 = vld [vmem:[#allocation2 + $0x1c0] sm:$0x3] }
  0xa4   :  { %3113 = vst [vmem:[%s5072_s1 + $0x3e] sm:$0x3] %v965_v42  ;;  %v1121_v63 = vld [vmem:[#allocation2 + $0x1c8] sm:$0x3]  ;;  %v1127_v0 = vld [vmem:[#allocation2 + $0x1d0] sm:$0x3] }
  0xa5   :  { %3090 = vst [vmem:[%s5072_s1 + $0x10] sm:$0x3] %v827_v43  ;;  %v1133_v1 = vld [vmem:[#allocation2 + $0x1d8] sm:$0x3] }
  0xa6   :  { %3091 = vst [vmem:[%s5072_s1 + $0x12] sm:$0x3] %v833_v44  ;;  %v457_v44 = vpop.permute.xlu0 %456  }
  0xa7   :  { %3092 = vst [vmem:[%s5072_s1 + $0x14] sm:$0x3] %v839_v45 }
  0xa8   :  { %3093 = vst [vmem:[%s5072_s1 + $0x16] sm:$0x3] %v845_v46 }
  0xa9   :  { %3094 = vst [vmem:[%s5072_s1 + $0x18] sm:$0x3] %v851_v47 }
  0xaa   :  { %3095 = vst [vmem:[%s5072_s1 + $0x1a] sm:$0x3] %v857_v48 }
  0xab   :  { %3096 = vst [vmem:[%s5072_s1 + $0x1c] sm:$0x3] %v863_v49 }
  0xac   :  { %3097 = vst [vmem:[%s5072_s1 + $0x1e] sm:$0x3] %v869_v51 }
  0xad   :  { %3148 = vst [vmem:[%s5072_s1 + $0x84] sm:$0x3] %v1175_v55  ;;  %v502_v55 = vpop.permute.xlu2 %501  }
  0xae   :  { %3149 = vst [vmem:[%s5072_s1 + $0x86] sm:$0x3] %v1181_v56 }
  0xaf   :  { %3150 = vst [vmem:[%s5072_s1 + $0x88] sm:$0x3] %v1187_v57 }
  0xb0   :  { %3151 = vst [vmem:[%s5072_s1 + $0x8a] sm:$0x3] %v1193_v58 }
  0xb1   :  { %3152 = vst [vmem:[%s5072_s1 + $0x8c] sm:$0x3] %v1199_v59 }
  0xb2   :  { %3153 = vst [vmem:[%s5072_s1 + $0x8e] sm:$0x3] %v1205_v61 }
  0xb3   :  { %417 = vst.msk [vmem:[#allocation2 + $0x1c1] ss:$8 sm:$0xf0] %vm15_vm0, %v3740_v27   ;;  %v3919_v27 = vpop.permute.xlu1 %465  }
  0xb4   :  { %3138 = vst [vmem:[%s5072_s1 + $0x70] sm:$0x3] %v1115_v62 }
  0xb5   :  { %3139 = vst [vmem:[%s5072_s1 + $0x72] sm:$0x3] %v1121_v63  ;;  %v4043_v63 = vpop.permute.xlu0 %483  }
  0xb6   :  { %3140 = vst [vmem:[%s5072_s1 + $0x74] sm:$0x3] %v1127_v0 }
  0xb7   :  { %3141 = vst [vmem:[%s5072_s1 + $0x76] sm:$0x3] %v1133_v1 }
  0xb8   :  { %406 = vst.msk [vmem:[#allocation2 + $0x181] ss:$8 sm:$0xf] %vm15_vm0, %v3772_v34  }
  0xb9   :  { %408 = vst.msk [vmem:[#allocation2 + $0x181] ss:$8 sm:$0xf0] %vm15_vm0, %v3772_v34  }
  0xba   :  { %v1139_v3 = vld [vmem:[#allocation2 + $0x1e0] sm:$0x3]  ;;  %v1145_v4 = vld [vmem:[#allocation2 + $0x1e8] sm:$0x3]  ;;  %v1151_v5 = vld [vmem:[#allocation2 + $0x1f0] sm:$0x3] }
  0xbb   :  { %3142 = vst [vmem:[%s5072_s1 + $0x78] sm:$0x3] %v1139_v3  ;;  %v1157_v6 = vld [vmem:[#allocation2 + $0x1f8] sm:$0x3]  ;;  %v493_v12 = vpop.permute.xlu1 %492  }
  0xbc   :  { %3143 = vst [vmem:[%s5072_s1 + $0x7a] sm:$0x3] %v1145_v4 }
  0xbd   :  { %3144 = vst [vmem:[%s5072_s1 + $0x7c] sm:$0x3] %v1151_v5  ;;  %v511_v16 = vpop.permute.xlu0 %510  }
  0xbe   :  { %3145 = vst [vmem:[%s5072_s1 + $0x7e] sm:$0x3] %v1157_v6 }
  0xbf   :  { %v1067_v7 = vld [vmem:[#allocation2 + $0x180] sm:$0x3]  ;;  %v1073_v8 = vld [vmem:[#allocation2 + $0x188] sm:$0x3]  ;;  %v1079_v11 = vld [vmem:[#allocation2 + $0x190] sm:$0x3] }
  0xc0   :  { %3130 = vst [vmem:[%s5072_s1 + $0x60] sm:$0x3] %v1067_v7  ;;  %v1085_v21 = vld [vmem:[#allocation2 + $0x198] sm:$0x3]  ;;  %v1091_v22 = vld [vmem:[#allocation2 + $0x1a0] sm:$0x3] }
  0xc1   :  { %3131 = vst [vmem:[%s5072_s1 + $0x62] sm:$0x3] %v1073_v8  ;;  %v1097_v24 = vld [vmem:[#allocation2 + $0x1a8] sm:$0x3]  ;;  %v1103_v25 = vld [vmem:[#allocation2 + $0x1b0] sm:$0x3] }
  0xc2   :  { %3132 = vst [vmem:[%s5072_s1 + $0x64] sm:$0x3] %v1079_v11  ;;  %v1109_v26 = vld [vmem:[#allocation2 + $0x1b8] sm:$0x3] }
  0xc3   :  { %3133 = vst [vmem:[%s5072_s1 + $0x66] sm:$0x3] %v1085_v21  ;;  %v4105_v9 = vpop.permute.xlu1 %519  }
  0xc4   :  { %3134 = vst [vmem:[%s5072_s1 + $0x68] sm:$0x3] %v1091_v22 }
  0xc5   :  { %3135 = vst [vmem:[%s5072_s1 + $0x6a] sm:$0x3] %v1097_v24 }
  0xc6   :  { %3136 = vst [vmem:[%s5072_s1 + $0x6c] sm:$0x3] %v1103_v25 }
  0xc7   :  { %3137 = vst [vmem:[%s5072_s1 + $0x6e] sm:$0x3] %v1109_v26  ;;  %v529_v26 = vpop.permute.xlu2 %528  }
  0xc8   :  { %451 = vst.msk [vmem:[#allocation2 + $0x2c1] ss:$8 sm:$0xf] %vm15_vm0, %v448_v50  }
  0xc9   :  { %453 = vst.msk [vmem:[#allocation2 + $0x2c1] ss:$8 sm:$0xf0] %vm15_vm0, %v448_v50  }
  0xca   :  { %442 = vst.msk [vmem:[#allocation2 + $0x281] ss:$8 sm:$0xf] %vm15_vm0, %v439_v60  }
  0xcb   :  { %444 = vst.msk [vmem:[#allocation2 + $0x281] ss:$8 sm:$0xf0] %vm15_vm0, %v439_v60   ;;  %v547_v18 = vpop.permute.xlu1 %546  }
  0xcc   :  { %433 = vst.msk [vmem:[#allocation2 + $0x241] ss:$8 sm:$0xf] %vm15_vm0, %v3863_v2  }
  0xcd   :  { %435 = vst.msk [vmem:[#allocation2 + $0x241] ss:$8 sm:$0xf0] %vm15_vm0, %v3863_v2  }
  0xce   :  { %478 = vst.msk [vmem:[#allocation2 + $0x381] ss:$8 sm:$0xf] %vm15_vm0, %v475_v10  }
  0xcf   :  { %v1307_v28 = vld [vmem:[#allocation2 + $0x2c0] sm:$0x3]  ;;  %v1313_v29 = vld [vmem:[#allocation2 + $0x2c8] sm:$0x3]  ;;  %v1319_v30 = vld [vmem:[#allocation2 + $0x2d0] sm:$0x3] }
  0xd0   :  { %3170 = vst [vmem:[%s5072_s1 + $0xb0] sm:$0x3] %v1307_v28  ;;  %v1325_v31 = vld [vmem:[#allocation2 + $0x2d8] sm:$0x3]  ;;  %v1331_v32 = vld [vmem:[#allocation2 + $0x2e0] sm:$0x3] }
  0xd1   :  { %3171 = vst [vmem:[%s5072_s1 + $0xb2] sm:$0x3] %v1313_v29  ;;  %v1337_v33 = vld [vmem:[#allocation2 + $0x2e8] sm:$0x3]  ;;  %v1343_v34 = vld [vmem:[#allocation2 + $0x2f0] sm:$0x3] }
  0xd2   :  { %3172 = vst [vmem:[%s5072_s1 + $0xb4] sm:$0x3] %v1319_v30  ;;  %v1349_v35 = vld [vmem:[#allocation2 + $0x2f8] sm:$0x3]  ;;  %v1259_v36 = vld [vmem:[#allocation2 + $0x280] sm:$0x3] }
  0xd3   :  { %3173 = vst [vmem:[%s5072_s1 + $0xb6] sm:$0x3] %v1325_v31  ;;  %v1265_v37 = vld [vmem:[#allocation2 + $0x288] sm:$0x3]  ;;  %v1271_v38 = vld [vmem:[#allocation2 + $0x290] sm:$0x3] }
  0xd4   :  { %3174 = vst [vmem:[%s5072_s1 + $0xb8] sm:$0x3] %v1331_v32  ;;  %v1277_v39 = vld [vmem:[#allocation2 + $0x298] sm:$0x3]  ;;  %v1283_v40 = vld [vmem:[#allocation2 + $0x2a0] sm:$0x3] }
  0xd5   :  { %3175 = vst [vmem:[%s5072_s1 + $0xba] sm:$0x3] %v1337_v33  ;;  %v1289_v41 = vld [vmem:[#allocation2 + $0x2a8] sm:$0x3]  ;;  %v1295_v42 = vld [vmem:[#allocation2 + $0x2b0] sm:$0x3] }
  0xd6   :  { %3176 = vst [vmem:[%s5072_s1 + $0xbc] sm:$0x3] %v1343_v34  ;;  %v1301_v43 = vld [vmem:[#allocation2 + $0x2b8] sm:$0x3]  ;;  %v1211_v14 = vld [vmem:[#allocation2 + $0x240] sm:$0x3] }
  0xd7   :  { %3177 = vst [vmem:[%s5072_s1 + $0xbe] sm:$0x3] %v1349_v35  ;;  %v1217_v45 = vld [vmem:[#allocation2 + $0x248] sm:$0x3]  ;;  %v1223_v46 = vld [vmem:[#allocation2 + $0x250] sm:$0x3] }
  0xd8   :  { %3162 = vst [vmem:[%s5072_s1 + $0xa0] sm:$0x3] %v1259_v36  ;;  %v1229_v47 = vld [vmem:[#allocation2 + $0x258] sm:$0x3]  ;;  %v1235_v48 = vld [vmem:[#allocation2 + $0x260] sm:$0x3] }
  0xd9   :  { %3163 = vst [vmem:[%s5072_s1 + $0xa2] sm:$0x3] %v1265_v37  ;;  %v1241_v49 = vld [vmem:[#allocation2 + $0x268] sm:$0x3]  ;;  %v1247_v50 = vld [vmem:[#allocation2 + $0x270] sm:$0x3] }
  0xda   :  { %3164 = vst [vmem:[%s5072_s1 + $0xa4] sm:$0x3] %v1271_v38  ;;  %v1253_v51 = vld [vmem:[#allocation2 + $0x278] sm:$0x3]  ;;  %v1451_v52 = vld [vmem:[#allocation2 + $0x380] sm:$0x3] }
  0xdb   :  { %3165 = vst [vmem:[%s5072_s1 + $0xa6] sm:$0x3] %v1277_v39  ;;  %v1457_v53 = vld [vmem:[#allocation2 + $0x388] sm:$0x3]  ;;  %v1463_v54 = vld [vmem:[#allocation2 + $0x390] sm:$0x3] }
  0xdc   :  { %3166 = vst [vmem:[%s5072_s1 + $0xa8] sm:$0x3] %v1283_v40  ;;  %v1469_v56 = vld [vmem:[#allocation2 + $0x398] sm:$0x3] }
  0xdd   :  { %3167 = vst [vmem:[%s5072_s1 + $0xaa] sm:$0x3] %v1289_v41 }
  0xde   :  { %3168 = vst [vmem:[%s5072_s1 + $0xac] sm:$0x3] %v1295_v42 }
  0xdf   :  { %3169 = vst [vmem:[%s5072_s1 + $0xae] sm:$0x3] %v1301_v43 }
  0xe0   :  { %480 = vst.msk [vmem:[#allocation2 + $0x381] ss:$8 sm:$0xf0] %vm15_vm0, %v475_v10  }
  0xe1   :  { %3154 = vst [vmem:[%s5072_s1 + $0x90] sm:$0x3] %v1211_v14 }
  0xe2   :  { %3155 = vst [vmem:[%s5072_s1 + $0x92] sm:$0x3] %v1217_v45 }
  0xe3   :  { %3156 = vst [vmem:[%s5072_s1 + $0x94] sm:$0x3] %v1223_v46 }
  0xe4   :  { %3157 = vst [vmem:[%s5072_s1 + $0x96] sm:$0x3] %v1229_v47 }
  0xe5   :  { %3158 = vst [vmem:[%s5072_s1 + $0x98] sm:$0x3] %v1235_v48  ;;  %v556_v48 = vpop.permute.xlu2 %555  }
  0xe6   :  { %3159 = vst [vmem:[%s5072_s1 + $0x9a] sm:$0x3] %v1241_v49 }
  0xe7   :  { %3160 = vst [vmem:[%s5072_s1 + $0x9c] sm:$0x3] %v1247_v50  ;;  %v1475_v57 = vld [vmem:[#allocation2 + $0x3a0] sm:$0x3]  ;;  %v1481_v58 = vld [vmem:[#allocation2 + $0x3a8] sm:$0x3] }
  0xe8   :  { %3161 = vst [vmem:[%s5072_s1 + $0x9e] sm:$0x3] %v1253_v51  ;;  %v1487_v59 = vld [vmem:[#allocation2 + $0x3b0] sm:$0x3]  ;;  %v1493_v60 = vld [vmem:[#allocation2 + $0x3b8] sm:$0x3] }
  0xe9   :  { %3194 = vst [vmem:[%s5072_s1 + $0xe0] sm:$0x3] %v1451_v52 }
  0xea   :  { %3195 = vst [vmem:[%s5072_s1 + $0xe2] sm:$0x3] %v1457_v53 }
  0xeb   :  { %3196 = vst [vmem:[%s5072_s1 + $0xe4] sm:$0x3] %v1463_v54 }
  0xec   :  { %3197 = vst [vmem:[%s5072_s1 + $0xe6] sm:$0x3] %v1469_v56  ;;  %v4231_v56 = vpop.permute.xlu0 %537  }
  0xed   :  { %3198 = vst [vmem:[%s5072_s1 + $0xe8] sm:$0x3] %v1475_v57 }
  0xee   :  { %3199 = vst [vmem:[%s5072_s1 + $0xea] sm:$0x3] %v1481_v58 }
  0xef   :  { %3200 = vst [vmem:[%s5072_s1 + $0xec] sm:$0x3] %v1487_v59 }
  0xf0   :  { %3201 = vst [vmem:[%s5072_s1 + $0xee] sm:$0x3] %v1493_v60 }
  0xf1   :  { %469 = vst.msk [vmem:[#allocation2 + $0x341] ss:$8 sm:$0xf] %vm15_vm0, %v3919_v27  }
  0xf2   :  { %471 = vst.msk [vmem:[#allocation2 + $0x341] ss:$8 sm:$0xf0] %vm15_vm0, %v3919_v27  }
  0xf3   :  { %460 = vst.msk [vmem:[#allocation2 + $0x301] ss:$8 sm:$0xf] %vm15_vm0, %v457_v44  }
  0xf4   :  { %462 = vst.msk [vmem:[#allocation2 + $0x301] ss:$8 sm:$0xf0] %vm15_vm0, %v457_v44  }
  0xf5   :  { %505 = vst.msk [vmem:[#allocation2 + $0x441] ss:$8 sm:$0xf] %vm15_vm0, %v502_v55  }
  0xf6   :  { %507 = vst.msk [vmem:[#allocation2 + $0x441] ss:$8 sm:$0xf0] %vm15_vm0, %v502_v55  }
  0xf7   :  { %496 = vst.msk [vmem:[#allocation2 + $0x401] ss:$8 sm:$0xf] %vm15_vm0, %v493_v12  }
  0xf8   :  { %v1403_v13 = vld [vmem:[#allocation2 + $0x340] sm:$0x3]  ;;  %v1409_v61 = vld [vmem:[#allocation2 + $0x348] sm:$0x3]  ;;  %v1415_v62 = vld [vmem:[#allocation2 + $0x350] sm:$0x3] }
  0xf9   :  { %3186 = vst [vmem:[%s5072_s1 + $0xd0] sm:$0x3] %v1403_v13  ;;  %v1421_v0 = vld [vmem:[#allocation2 + $0x358] sm:$0x3]  ;;  %v1427_v1 = vld [vmem:[#allocation2 + $0x360] sm:$0x3] }
  0xfa   :  { %3187 = vst [vmem:[%s5072_s1 + $0xd2] sm:$0x3] %v1409_v61  ;;  %v1433_v2 = vld [vmem:[#allocation2 + $0x368] sm:$0x3]  ;;  %v1439_v3 = vld [vmem:[#allocation2 + $0x370] sm:$0x3] }
  0xfb   :  { %3188 = vst [vmem:[%s5072_s1 + $0xd4] sm:$0x3] %v1415_v62  ;;  %v1445_v4 = vld [vmem:[#allocation2 + $0x378] sm:$0x3]  ;;  %v1355_v5 = vld [vmem:[#allocation2 + $0x300] sm:$0x3] }
  0xfc   :  { %3189 = vst [vmem:[%s5072_s1 + $0xd6] sm:$0x3] %v1421_v0  ;;  %v1361_v6 = vld [vmem:[#allocation2 + $0x308] sm:$0x3]  ;;  %v1367_v7 = vld [vmem:[#allocation2 + $0x310] sm:$0x3] }
  0xfd   :  { %3190 = vst [vmem:[%s5072_s1 + $0xd8] sm:$0x3] %v1427_v1  ;;  %v1373_v8 = vld [vmem:[#allocation2 + $0x318] sm:$0x3]  ;;  %v1379_v11 = vld [vmem:[#allocation2 + $0x320] sm:$0x3] }
  0xfe   :  { %3191 = vst [vmem:[%s5072_s1 + $0xda] sm:$0x3] %v1433_v2  ;;  %v1385_v21 = vld [vmem:[#allocation2 + $0x328] sm:$0x3]  ;;  %v1391_v22 = vld [vmem:[#allocation2 + $0x330] sm:$0x3] }
  0xff   :  { %3192 = vst [vmem:[%s5072_s1 + $0xdc] sm:$0x3] %v1439_v3  ;;  %v1397_v24 = vld [vmem:[#allocation2 + $0x338] sm:$0x3]  ;;  %v1595_v15 = vld [vmem:[#allocation2 + $0x440] sm:$0x3] }
 0x100   :  { %3193 = vst [vmem:[%s5072_s1 + $0xde] sm:$0x3] %v1445_v4  ;;  %v1601_v17 = vld [vmem:[#allocation2 + $0x448] sm:$0x3]  ;;  %v1607_v25 = vld [vmem:[#allocation2 + $0x450] sm:$0x3] }
 0x101   :  { %3178 = vst [vmem:[%s5072_s1 + $0xc0] sm:$0x3] %v1355_v5  ;;  %v1613_v10 = vld [vmem:[#allocation2 + $0x458] sm:$0x3]  ;;  %v1619_v27 = vld [vmem:[#allocation2 + $0x460] sm:$0x3] }
 0x102   :  { %3179 = vst [vmem:[%s5072_s1 + $0xc2] sm:$0x3] %v1361_v6  ;;  %v1625_v28 = vld [vmem:[#allocation2 + $0x468] sm:$0x3]  ;;  %v1631_v29 = vld [vmem:[#allocation2 + $0x470] sm:$0x3] }
 0x103   :  { %3180 = vst [vmem:[%s5072_s1 + $0xc4] sm:$0x3] %v1367_v7  ;;  %v1637_v30 = vld [vmem:[#allocation2 + $0x478] sm:$0x3]  ;;  %v1547_v31 = vld [vmem:[#allocation2 + $0x400] sm:$0x3] }
 0x104   :  { %3181 = vst [vmem:[%s5072_s1 + $0xc6] sm:$0x3] %v1373_v8  ;;  %v1553_v32 = vld [vmem:[#allocation2 + $0x408] sm:$0x3]  ;;  %v1559_v33 = vld [vmem:[#allocation2 + $0x410] sm:$0x3]  ;;  %v583_v8 = vpop.permute.xlu2 %582  }
 0x105   :  { %3182 = vst [vmem:[%s5072_s1 + $0xc8] sm:$0x3] %v1379_v11  ;;  %v1565_v34 = vld [vmem:[#allocation2 + $0x418] sm:$0x3]  ;;  %v159_v4 = vld [vmem:[#allocation0 + $0xa8] sm:$0xff]   ;;  %v4290_v11 = vpop.permute.xlu1 %573  }
 0x106   :  { %3183 = vst [vmem:[%s5072_s1 + $0xca] sm:$0x3] %v1385_v21 }
 0x107   :  { %3184 = vst [vmem:[%s5072_s1 + $0xcc] sm:$0x3] %v1391_v22 }
 0x108   :  { %3185 = vst [vmem:[%s5072_s1 + $0xce] sm:$0x3] %v1397_v24 }
 0x109   :  { %498 = vst.msk [vmem:[#allocation2 + $0x401] ss:$8 sm:$0xf0] %vm15_vm0, %v493_v12  }
 0x10a   :  { %3218 = vst [vmem:[%s5072_s1 + $0x110] sm:$0x3] %v1595_v15 }
 0x10b   :  { %3219 = vst [vmem:[%s5072_s1 + $0x112] sm:$0x3] %v1601_v17 }
 0x10c   :  { %3220 = vst [vmem:[%s5072_s1 + $0x114] sm:$0x3] %v1607_v25 }
 0x10d   :  { %3221 = vst [vmem:[%s5072_s1 + $0x116] sm:$0x3] %v1613_v10 }
 0x10e   :  { %3222 = vst [vmem:[%s5072_s1 + $0x118] sm:$0x3] %v1619_v27 }
 0x10f   :  { %3223 = vst [vmem:[%s5072_s1 + $0x11a] sm:$0x3] %v1625_v28 }
 0x110   :  { %3224 = vst [vmem:[%s5072_s1 + $0x11c] sm:$0x3] %v1631_v29  ;;  %v1571_v35 = vld [vmem:[#allocation2 + $0x420] sm:$0x3]  ;;  %v1577_v36 = vld [vmem:[#allocation2 + $0x428] sm:$0x3] }
 0x111   :  { %3225 = vst [vmem:[%s5072_s1 + $0x11e] sm:$0x3] %v1637_v30  ;;  %v1583_v37 = vld [vmem:[#allocation2 + $0x430] sm:$0x3]  ;;  %v1589_v38 = vld [vmem:[#allocation2 + $0x438] sm:$0x3] }
 0x112   :  { %3210 = vst [vmem:[%s5072_s1 + $0x100] sm:$0x3] %v1547_v31  ;;  %v194_v31 = vld [vmem:[#allocation0 + $0xd0] sm:$0xff]  }
 0x113   :  { %3211 = vst [vmem:[%s5072_s1 + $0x102] sm:$0x3] %v1553_v32  ;;  %v565_v32 = vpop.permute.xlu0 %564  }
 0x114   :  { %3212 = vst [vmem:[%s5072_s1 + $0x104] sm:$0x3] %v1559_v33  ;;  %v187_v33 = vld [vmem:[#allocation0 + $0xc8] sm:$0xff]  }
 0x115   :  { %3213 = vst [vmem:[%s5072_s1 + $0x106] sm:$0x3] %v1565_v34 }
 0x116   :  { %3214 = vst [vmem:[%s5072_s1 + $0x108] sm:$0x3] %v1571_v35 }
 0x117   :  { %3215 = vst [vmem:[%s5072_s1 + $0x10a] sm:$0x3] %v1577_v36 }
 0x118   :  { %3216 = vst [vmem:[%s5072_s1 + $0x10c] sm:$0x3] %v1583_v37 }
 0x119   :  { %3217 = vst [vmem:[%s5072_s1 + $0x10e] sm:$0x3] %v1589_v38 }
 0x11a   :  { %487 = vst.msk [vmem:[#allocation2 + $0x3c1] ss:$8 sm:$0xf] %vm15_vm0, %v4043_v63  }
 0x11b   :  { %489 = vst.msk [vmem:[#allocation2 + $0x3c1] ss:$8 sm:$0xf0] %vm15_vm0, %v4043_v63  }
 0x11c   :  { %532 = vst.msk [vmem:[#allocation2 + $0x501] ss:$8 sm:$0xf] %vm15_vm0, %v529_v26  }
 0x11d   :  { %534 = vst.msk [vmem:[#allocation2 + $0x501] ss:$8 sm:$0xf0] %vm15_vm0, %v529_v26  }
 0x11e   :  { %523 = vst.msk [vmem:[#allocation2 + $0x4c1] ss:$8 sm:$0xf] %vm15_vm0, %v4105_v9  }
 0x11f   :  { %525 = vst.msk [vmem:[#allocation2 + $0x4c1] ss:$8 sm:$0xf0] %vm15_vm0, %v4105_v9  }
 0x120   :  { %514 = vst.msk [vmem:[#allocation2 + $0x481] ss:$8 sm:$0xf] %vm15_vm0, %v511_v16  }
 0x121   :  { %v1499_v20 = vld [vmem:[#allocation2 + $0x3c0] sm:$0x3]  ;;  %v1505_v39 = vld [vmem:[#allocation2 + $0x3c8] sm:$0x3]  ;;  %v1511_v40 = vld [vmem:[#allocation2 + $0x3d0] sm:$0x3] }
 0x122   :  { %3202 = vst [vmem:[%s5072_s1 + $0xf0] sm:$0x3] %v1499_v20  ;;  %v1517_v41 = vld [vmem:[#allocation2 + $0x3d8] sm:$0x3]  ;;  %v1523_v42 = vld [vmem:[#allocation2 + $0x3e0] sm:$0x3] }
 0x123   :  { %3203 = vst [vmem:[%s5072_s1 + $0xf2] sm:$0x3] %v1505_v39  ;;  %v1529_v43 = vld [vmem:[#allocation2 + $0x3e8] sm:$0x3]  ;;  %v1535_v44 = vld [vmem:[#allocation2 + $0x3f0] sm:$0x3] }
 0x124   :  { %3204 = vst [vmem:[%s5072_s1 + $0xf4] sm:$0x3] %v1511_v40  ;;  %v1541_v14 = vld [vmem:[#allocation2 + $0x3f8] sm:$0x3]  ;;  %v1739_v45 = vld [vmem:[#allocation2 + $0x500] sm:$0x3] }
 0x125   :  { %3205 = vst [vmem:[%s5072_s1 + $0xf6] sm:$0x3] %v1517_v41  ;;  %v1745_v46 = vld [vmem:[#allocation2 + $0x508] sm:$0x3]  ;;  %v1751_v47 = vld [vmem:[#allocation2 + $0x510] sm:$0x3] }
 0x126   :  { %3206 = vst [vmem:[%s5072_s1 + $0xf8] sm:$0x3] %v1523_v42  ;;  %v1757_v49 = vld [vmem:[#allocation2 + $0x518] sm:$0x3]  ;;  %v1763_v50 = vld [vmem:[#allocation2 + $0x520] sm:$0x3] }
 0x127   :  { %3207 = vst [vmem:[%s5072_s1 + $0xfa] sm:$0x3] %v1529_v43  ;;  %v1769_v51 = vld [vmem:[#allocation2 + $0x528] sm:$0x3]  ;;  %v1775_v52 = vld [vmem:[#allocation2 + $0x530] sm:$0x3]  ;;  %v610_v43 = vpop.permute.xlu2 %609  }
 0x128   :  { %3208 = vst [vmem:[%s5072_s1 + $0xfc] sm:$0x3] %v1535_v44  ;;  %v1781_v53 = vld [vmem:[#allocation2 + $0x538] sm:$0x3]  ;;  %v1691_v19 = vld [vmem:[#allocation2 + $0x4c0] sm:$0x3] }
 0x129   :  { %3209 = vst [vmem:[%s5072_s1 + $0xfe] sm:$0x3] %v1541_v14  ;;  %v1697_v54 = vld [vmem:[#allocation2 + $0x4c8] sm:$0x3]  ;;  %v1703_v55 = vld [vmem:[#allocation2 + $0x4d0] sm:$0x3] }
 0x12a   :  { %3242 = vst [vmem:[%s5072_s1 + $0x140] sm:$0x3] %v1739_v45  ;;  %v1709_v57 = vld [vmem:[#allocation2 + $0x4d8] sm:$0x3]  ;;  %v1715_v58 = vld [vmem:[#allocation2 + $0x4e0] sm:$0x3] }
 0x12b   :  { %3243 = vst [vmem:[%s5072_s1 + $0x142] sm:$0x3] %v1745_v46  ;;  %v1721_v59 = vld [vmem:[#allocation2 + $0x4e8] sm:$0x3]  ;;  %v1727_v60 = vld [vmem:[#allocation2 + $0x4f0] sm:$0x3] }
 0x12c   :  { %3244 = vst [vmem:[%s5072_s1 + $0x144] sm:$0x3] %v1751_v47  ;;  %v1733_v12 = vld [vmem:[#allocation2 + $0x4f8] sm:$0x3]  ;;  %v1643_v13 = vld [vmem:[#allocation2 + $0x480] sm:$0x3] }
 0x12d   :  { %3245 = vst [vmem:[%s5072_s1 + $0x146] sm:$0x3] %v1757_v49  ;;  %v1649_v61 = vld [vmem:[#allocation2 + $0x488] sm:$0x3]  ;;  %v1655_v62 = vld [vmem:[#allocation2 + $0x490] sm:$0x3]  ;;  %v601_v49 = vpop.permute.xlu1 %600  }
 0x12e   :  { %3246 = vst [vmem:[%s5072_s1 + $0x148] sm:$0x3] %v1763_v50  ;;  %v1661_v63 = vld [vmem:[#allocation2 + $0x498] sm:$0x3]  ;;  %v215_v50 = vld [vmem:[#allocation0 + $0xe8] sm:$0xff]  }
 0x12f   :  { %3247 = vst [vmem:[%s5072_s1 + $0x14a] sm:$0x3] %v1769_v51 }
 0x130   :  { %3248 = vst [vmem:[%s5072_s1 + $0x14c] sm:$0x3] %v1775_v52 }
 0x131   :  { %3249 = vst [vmem:[%s5072_s1 + $0x14e] sm:$0x3] %v1781_v53 }
 0x132   :  { %516 = vst.msk [vmem:[#allocation2 + $0x481] ss:$8 sm:$0xf0] %vm15_vm0, %v511_v16  }
 0x133   :  { %3234 = vst [vmem:[%s5072_s1 + $0x130] sm:$0x3] %v1691_v19 }
 0x134   :  { %3235 = vst [vmem:[%s5072_s1 + $0x132] sm:$0x3] %v1697_v54 }
 0x135   :  { %3236 = vst [vmem:[%s5072_s1 + $0x134] sm:$0x3] %v1703_v55 }
 0x136   :  { %3237 = vst [vmem:[%s5072_s1 + $0x136] sm:$0x3] %v1709_v57 }
 0x137   :  { %3238 = vst [vmem:[%s5072_s1 + $0x138] sm:$0x3] %v1715_v58 }
 0x138   :  { %3239 = vst [vmem:[%s5072_s1 + $0x13a] sm:$0x3] %v1721_v59 }
 0x139   :  { %3240 = vst [vmem:[%s5072_s1 + $0x13c] sm:$0x3] %v1727_v60  ;;  %v1667_v0 = vld [vmem:[#allocation2 + $0x4a0] sm:$0x3]  ;;  %v1673_v1 = vld [vmem:[#allocation2 + $0x4a8] sm:$0x3] }
 0x13a   :  { %3241 = vst [vmem:[%s5072_s1 + $0x13e] sm:$0x3] %v1733_v12  ;;  %v1679_v2 = vld [vmem:[#allocation2 + $0x4b0] sm:$0x3]  ;;  %v1685_v3 = vld [vmem:[#allocation2 + $0x4b8] sm:$0x3] }
 0x13b   :  { %3226 = vst [vmem:[%s5072_s1 + $0x120] sm:$0x3] %v1643_v13 }
 0x13c   :  { %3227 = vst [vmem:[%s5072_s1 + $0x122] sm:$0x3] %v1649_v61 }
 0x13d   :  { %3228 = vst [vmem:[%s5072_s1 + $0x124] sm:$0x3] %v1655_v62 }
 0x13e   :  { %3229 = vst [vmem:[%s5072_s1 + $0x126] sm:$0x3] %v1661_v63 }
 0x13f   :  { %3230 = vst [vmem:[%s5072_s1 + $0x128] sm:$0x3] %v1667_v0  ;;  %v208_v0 = vld [vmem:[#allocation0 + $0xe0] sm:$0xff]  }
 0x140   :  { %3231 = vst [vmem:[%s5072_s1 + $0x12a] sm:$0x3] %v1673_v1  ;;  %v201_v1 = vld [vmem:[#allocation0 + $0xd8] sm:$0xff]  }
 0x141   :  { %3232 = vst [vmem:[%s5072_s1 + $0x12c] sm:$0x3] %v1679_v2 }
 0x142   :  { %3233 = vst [vmem:[%s5072_s1 + $0x12e] sm:$0x3] %v1685_v3 }
 0x143   :  { %559 = vst.msk [vmem:[#allocation2 + $0x5c1] ss:$8 sm:$0xf] %vm15_vm0, %v556_v48  }
 0x144   :  { %561 = vst.msk [vmem:[#allocation2 + $0x5c1] ss:$8 sm:$0xf0] %vm15_vm0, %v556_v48   ;;  %v180_v48 = vld [vmem:[#allocation0 + $0xc0] sm:$0xff]  }
 0x145   :  { %550 = vst.msk [vmem:[#allocation2 + $0x581] ss:$8 sm:$0xf] %vm15_vm0, %v547_v18  }
 0x146   :  { %552 = vst.msk [vmem:[#allocation2 + $0x581] ss:$8 sm:$0xf0] %vm15_vm0, %v547_v18   ;;  %v4408_v18 = vpop.permute.xlu0 %591  }
 0x147   :  { %162 = vst.msk [vmem:[#allocation2 + $0x540] ss:$8 sm:$0xf] %vm15_vm0, %v159_v4  }
 0x148   :  { %164 = vst.msk [vmem:[#allocation2 + $0x540] ss:$8 sm:$0xf0] %vm15_vm0, %v159_v4   ;;  %v637_v4 = vpop.permute.xlu2 %636  }
 0x149   :  { %541 = vst.msk [vmem:[#allocation2 + $0x541] ss:$8 sm:$0xf] %vm15_vm0, %v4231_v56  }
 0x14a   :  { %v1883_v5 = vld [vmem:[#allocation2 + $0x5c0] sm:$0x3]  ;;  %v1889_v6 = vld [vmem:[#allocation2 + $0x5c8] sm:$0x3]  ;;  %v1895_v7 = vld [vmem:[#allocation2 + $0x5d0] sm:$0x3] }
 0x14b   :  { %3266 = vst [vmem:[%s5072_s1 + $0x170] sm:$0x3] %v1883_v5  ;;  %v1901_v21 = vld [vmem:[#allocation2 + $0x5d8] sm:$0x3]  ;;  %v1907_v22 = vld [vmem:[#allocation2 + $0x5e0] sm:$0x3]  ;;  %v4466_v5 = vpop.permute.xlu1 %627  }
 0x14c   :  { %3267 = vst [vmem:[%s5072_s1 + $0x172] sm:$0x3] %v1889_v6  ;;  %v1913_v24 = vld [vmem:[#allocation2 + $0x5e8] sm:$0x3]  ;;  %v1919_v15 = vld [vmem:[#allocation2 + $0x5f0] sm:$0x3] }
 0x14d   :  { %3268 = vst [vmem:[%s5072_s1 + $0x174] sm:$0x3] %v1895_v7  ;;  %v1925_v17 = vld [vmem:[#allocation2 + $0x5f8] sm:$0x3]  ;;  %v1835_v25 = vld [vmem:[#allocation2 + $0x580] sm:$0x3] }
 0x14e   :  { %3269 = vst [vmem:[%s5072_s1 + $0x176] sm:$0x3] %v1901_v21  ;;  %v1841_v26 = vld [vmem:[#allocation2 + $0x588] sm:$0x3]  ;;  %v1847_v9 = vld [vmem:[#allocation2 + $0x590] sm:$0x3] }
 0x14f   :  { %3270 = vst [vmem:[%s5072_s1 + $0x178] sm:$0x3] %v1907_v22  ;;  %v1853_v10 = vld [vmem:[#allocation2 + $0x598] sm:$0x3]  ;;  %v1859_v27 = vld [vmem:[#allocation2 + $0x5a0] sm:$0x3] }
 0x150   :  { %3271 = vst [vmem:[%s5072_s1 + $0x17a] sm:$0x3] %v1913_v24  ;;  %v1865_v28 = vld [vmem:[#allocation2 + $0x5a8] sm:$0x3]  ;;  %v1871_v29 = vld [vmem:[#allocation2 + $0x5b0] sm:$0x3] }
 0x151   :  { %3272 = vst [vmem:[%s5072_s1 + $0x17c] sm:$0x3] %v1919_v15  ;;  %v1877_v30 = vld [vmem:[#allocation2 + $0x5b8] sm:$0x3]  ;;  %v1787_v34 = vld [vmem:[#allocation2 + $0x540] sm:$0x3] }
 0x152   :  { %3273 = vst [vmem:[%s5072_s1 + $0x17e] sm:$0x3] %v1925_v17  ;;  %v1793_v35 = vld [vmem:[#allocation2 + $0x548] sm:$0x3]  ;;  %v1799_v36 = vld [vmem:[#allocation2 + $0x550] sm:$0x3] }
 0x153   :  { %3258 = vst [vmem:[%s5072_s1 + $0x160] sm:$0x3] %v1835_v25  ;;  %v1805_v37 = vld [vmem:[#allocation2 + $0x558] sm:$0x3] }
 0x154   :  { %3259 = vst [vmem:[%s5072_s1 + $0x162] sm:$0x3] %v1841_v26 }
 0x155   :  { %3260 = vst [vmem:[%s5072_s1 + $0x164] sm:$0x3] %v1847_v9 }
 0x156   :  { %3261 = vst [vmem:[%s5072_s1 + $0x166] sm:$0x3] %v1853_v10 }
 0x157   :  { %3262 = vst [vmem:[%s5072_s1 + $0x168] sm:$0x3] %v1859_v27  ;;  %v236_v27 = vld [vmem:[#allocation0 + $0x100] sm:$0xff]  }
 0x158   :  { %3263 = vst [vmem:[%s5072_s1 + $0x16a] sm:$0x3] %v1865_v28  ;;  %v619_v28 = vpop.permute.xlu0 %618  }
 0x159   :  { %3264 = vst [vmem:[%s5072_s1 + $0x16c] sm:$0x3] %v1871_v29  ;;  %v229_v29 = vld [vmem:[#allocation0 + $0xf8] sm:$0xff]  }
 0x15a   :  { %3265 = vst [vmem:[%s5072_s1 + $0x16e] sm:$0x3] %v1877_v30 }
 0x15b   :  { %543 = vst.msk [vmem:[#allocation2 + $0x541] ss:$8 sm:$0xf0] %vm15_vm0, %v4231_v56  }
 0x15c   :  { %197 = vst.msk [vmem:[#allocation2 + $0x680] ss:$8 sm:$0xf] %vm15_vm0, %v194_v31  }
 0x15d   :  { %199 = vst.msk [vmem:[#allocation2 + $0x680] ss:$8 sm:$0xf0] %vm15_vm0, %v194_v31  }
 0x15e   :  { %586 = vst.msk [vmem:[#allocation2 + $0x681] ss:$8 sm:$0xf] %vm15_vm0, %v583_v8  }
 0x15f   :  { %588 = vst.msk [vmem:[#allocation2 + $0x681] ss:$8 sm:$0xf0] %vm15_vm0, %v583_v8  }
 0x160   :  { %190 = vst.msk [vmem:[#allocation2 + $0x640] ss:$8 sm:$0xf] %vm15_vm0, %v187_v33  }
 0x161   :  { %3250 = vst [vmem:[%s5072_s1 + $0x150] sm:$0x3] %v1787_v34 }
 0x162   :  { %3251 = vst [vmem:[%s5072_s1 + $0x152] sm:$0x3] %v1793_v35  ;;  %v1811_v38 = vld [vmem:[#allocation2 + $0x560] sm:$0x3]  ;;  %v1817_v16 = vld [vmem:[#allocation2 + $0x568] sm:$0x3] }
 0x163   :  { %3252 = vst [vmem:[%s5072_s1 + $0x154] sm:$0x3] %v1799_v36  ;;  %v1823_v20 = vld [vmem:[#allocation2 + $0x570] sm:$0x3]  ;;  %v1829_v39 = vld [vmem:[#allocation2 + $0x578] sm:$0x3] }
 0x164   :  { %3253 = vst [vmem:[%s5072_s1 + $0x156] sm:$0x3] %v1805_v37 }
 0x165   :  { %3254 = vst [vmem:[%s5072_s1 + $0x158] sm:$0x3] %v1811_v38  ;;  %v2027_v40 = vld [vmem:[#allocation2 + $0x680] sm:$0x3]  ;;  %v2033_v41 = vld [vmem:[#allocation2 + $0x688] sm:$0x3] }
 0x166   :  { %3255 = vst [vmem:[%s5072_s1 + $0x15a] sm:$0x3] %v1817_v16  ;;  %v2039_v42 = vld [vmem:[#allocation2 + $0x690] sm:$0x3]  ;;  %v2045_v44 = vld [vmem:[#allocation2 + $0x698] sm:$0x3] }
 0x167   :  { %3256 = vst [vmem:[%s5072_s1 + $0x15c] sm:$0x3] %v1823_v20  ;;  %v2051_v14 = vld [vmem:[#allocation2 + $0x6a0] sm:$0x3]  ;;  %v2057_v45 = vld [vmem:[#allocation2 + $0x6a8] sm:$0x3] }
 0x168   :  { %3257 = vst [vmem:[%s5072_s1 + $0x15e] sm:$0x3] %v1829_v39  ;;  %v2063_v46 = vld [vmem:[#allocation2 + $0x6b0] sm:$0x3]  ;;  %v2069_v47 = vld [vmem:[#allocation2 + $0x6b8] sm:$0x3]  ;;  %v664_v39 = vpop.permute.xlu2 %663  }
 0x169   :  { %3290 = vst [vmem:[%s5072_s1 + $0x1a0] sm:$0x3] %v2027_v40 }
 0x16a   :  { %3291 = vst [vmem:[%s5072_s1 + $0x1a2] sm:$0x3] %v2033_v41 }
 0x16b   :  { %3292 = vst [vmem:[%s5072_s1 + $0x1a4] sm:$0x3] %v2039_v42 }
 0x16c   :  { %3293 = vst [vmem:[%s5072_s1 + $0x1a6] sm:$0x3] %v2045_v44 }
 0x16d   :  { %3294 = vst [vmem:[%s5072_s1 + $0x1a8] sm:$0x3] %v2051_v14  ;;  %v222_v14 = vld [vmem:[#allocation0 + $0xf0] sm:$0xff]  }
 0x16e   :  { %3295 = vst [vmem:[%s5072_s1 + $0x1aa] sm:$0x3] %v2057_v45  ;;  %v655_v45 = vpop.permute.xlu1 %654  }
 0x16f   :  { %3296 = vst [vmem:[%s5072_s1 + $0x1ac] sm:$0x3] %v2063_v46  ;;  %v257_v46 = vld [vmem:[#allocation0 + $0x118] sm:$0xff]  }
 0x170   :  { %3297 = vst [vmem:[%s5072_s1 + $0x1ae] sm:$0x3] %v2069_v47 }
 0x171   :  { %192 = vst.msk [vmem:[#allocation2 + $0x640] ss:$8 sm:$0xf0] %vm15_vm0, %v187_v33  }
 0x172   :  { %577 = vst.msk [vmem:[#allocation2 + $0x641] ss:$8 sm:$0xf] %vm15_vm0, %v4290_v11  }
 0x173   :  { %579 = vst.msk [vmem:[#allocation2 + $0x641] ss:$8 sm:$0xf0] %vm15_vm0, %v4290_v11  }
 0x174   :  { %183 = vst.msk [vmem:[#allocation2 + $0x600] ss:$8 sm:$0xf] %vm15_vm0, %v180_v48  }
 0x175   :  { %185 = vst.msk [vmem:[#allocation2 + $0x600] ss:$8 sm:$0xf0] %vm15_vm0, %v180_v48  }
 0x176   :  { %568 = vst.msk [vmem:[#allocation2 + $0x601] ss:$8 sm:$0xf] %vm15_vm0, %v565_v32  }
 0x177   :  { %570 = vst.msk [vmem:[#allocation2 + $0x601] ss:$8 sm:$0xf0] %vm15_vm0, %v565_v32  }
 0x178   :  { %218 = vst.msk [vmem:[#allocation2 + $0x740] ss:$8 sm:$0xf] %vm15_vm0, %v215_v50  }
 0x179   :  { %v1979_v51 = vld [vmem:[#allocation2 + $0x640] sm:$0x3]  ;;  %v1985_v52 = vld [vmem:[#allocation2 + $0x648] sm:$0x3]  ;;  %v1991_v53 = vld [vmem:[#allocation2 + $0x650] sm:$0x3] }
 0x17a   :  { %3282 = vst [vmem:[%s5072_s1 + $0x190] sm:$0x3] %v1979_v51  ;;  %v1997_v19 = vld [vmem:[#allocation2 + $0x658] sm:$0x3]  ;;  %v2003_v54 = vld [vmem:[#allocation2 + $0x660] sm:$0x3] }
 0x17b   :  { %3283 = vst [vmem:[%s5072_s1 + $0x192] sm:$0x3] %v1985_v52  ;;  %v2009_v55 = vld [vmem:[#allocation2 + $0x668] sm:$0x3]  ;;  %v2015_v56 = vld [vmem:[#allocation2 + $0x670] sm:$0x3] }
 0x17c   :  { %3284 = vst [vmem:[%s5072_s1 + $0x194] sm:$0x3] %v1991_v53  ;;  %v2021_v57 = vld [vmem:[#allocation2 + $0x678] sm:$0x3] }
 0x17d   :  { %3285 = vst [vmem:[%s5072_s1 + $0x196] sm:$0x3] %v1997_v19  ;;  %v1931_v58 = vld [vmem:[#allocation2 + $0x600] sm:$0x3]  ;;  %v1937_v59 = vld [vmem:[#allocation2 + $0x608] sm:$0x3] }
 0x17e   :  { %3286 = vst [vmem:[%s5072_s1 + $0x198] sm:$0x3] %v2003_v54  ;;  %v1943_v60 = vld [vmem:[#allocation2 + $0x610] sm:$0x3]  ;;  %v1949_v12 = vld [vmem:[#allocation2 + $0x618] sm:$0x3] }
 0x17f   :  { %3287 = vst [vmem:[%s5072_s1 + $0x19a] sm:$0x3] %v2009_v55  ;;  %v1955_v13 = vld [vmem:[#allocation2 + $0x620] sm:$0x3]  ;;  %v1961_v61 = vld [vmem:[#allocation2 + $0x628] sm:$0x3] }
 0x180   :  { %3288 = vst [vmem:[%s5072_s1 + $0x19c] sm:$0x3] %v2015_v56  ;;  %v1967_v62 = vld [vmem:[#allocation2 + $0x630] sm:$0x3]  ;;  %v1973_v63 = vld [vmem:[#allocation2 + $0x638] sm:$0x3] }
 0x181   :  { %3289 = vst [vmem:[%s5072_s1 + $0x19e] sm:$0x3] %v2021_v57 }
 0x182   :  { %3274 = vst [vmem:[%s5072_s1 + $0x180] sm:$0x3] %v1931_v58 }
 0x183   :  { %3275 = vst [vmem:[%s5072_s1 + $0x182] sm:$0x3] %v1937_v59 }
 0x184   :  { %3276 = vst [vmem:[%s5072_s1 + $0x184] sm:$0x3] %v1943_v60 }
 0x185   :  { %3277 = vst [vmem:[%s5072_s1 + $0x186] sm:$0x3] %v1949_v12 }
 0x186   :  { %3278 = vst [vmem:[%s5072_s1 + $0x188] sm:$0x3] %v1955_v13  ;;  %v250_v13 = vld [vmem:[#allocation0 + $0x110] sm:$0xff]  }
 0x187   :  { %3279 = vst [vmem:[%s5072_s1 + $0x18a] sm:$0x3] %v1961_v61  ;;  %v243_v61 = vld [vmem:[#allocation0 + $0x108] sm:$0xff]  }
 0x188   :  { %3280 = vst [vmem:[%s5072_s1 + $0x18c] sm:$0x3] %v1967_v62 }
 0x189   :  { %3281 = vst [vmem:[%s5072_s1 + $0x18e] sm:$0x3] %v1973_v63 }
 0x18a   :  { %220 = vst.msk [vmem:[#allocation2 + $0x740] ss:$8 sm:$0xf0] %vm15_vm0, %v215_v50   ;;  %v4584_v50 = vpop.permute.xlu0 %645  }
 0x18b   :  { %613 = vst.msk [vmem:[#allocation2 + $0x741] ss:$8 sm:$0xf] %vm15_vm0, %v610_v43  }
 0x18c   :  { %615 = vst.msk [vmem:[#allocation2 + $0x741] ss:$8 sm:$0xf0] %vm15_vm0, %v610_v43  }
 0x18d   :  { %211 = vst.msk [vmem:[#allocation2 + $0x700] ss:$8 sm:$0xf] %vm15_vm0, %v208_v0  }
 0x18e   :  { %213 = vst.msk [vmem:[#allocation2 + $0x700] ss:$8 sm:$0xf0] %vm15_vm0, %v208_v0  }
 0x18f   :  { %604 = vst.msk [vmem:[#allocation2 + $0x701] ss:$8 sm:$0xf] %vm15_vm0, %v601_v49  }
 0x190   :  { %606 = vst.msk [vmem:[#allocation2 + $0x701] ss:$8 sm:$0xf0] %vm15_vm0, %v601_v49  }
 0x191   :  { %204 = vst.msk [vmem:[#allocation2 + $0x6c0] ss:$8 sm:$0xf] %vm15_vm0, %v201_v1  }
 0x192   :  { %v2171_v2 = vld [vmem:[#allocation2 + $0x740] sm:$0x3]  ;;  %v2177_v3 = vld [vmem:[#allocation2 + $0x748] sm:$0x3]  ;;  %v2183_v23 = vld [vmem:[#allocation2 + $0x750] sm:$0x3] }
 0x193   :  { %3314 = vst [vmem:[%s5072_s1 + $0x1d0] sm:$0x3] %v2171_v2  ;;  %v2189_v6 = vld [vmem:[#allocation2 + $0x758] sm:$0x3]  ;;  %v2195_v7 = vld [vmem:[#allocation2 + $0x760] sm:$0x3]  ;;  %v4642_v2 = vpop.permute.xlu1 %681  }
 0x194   :  { %3315 = vst [vmem:[%s5072_s1 + $0x1d2] sm:$0x3] %v2177_v3  ;;  %v2201_v8 = vld [vmem:[#allocation2 + $0x768] sm:$0x3]  ;;  %v2207_v11 = vld [vmem:[#allocation2 + $0x770] sm:$0x3] }
 0x195   :  { %3316 = vst [vmem:[%s5072_s1 + $0x1d4] sm:$0x3] %v2183_v23  ;;  %v2213_v21 = vld [vmem:[#allocation2 + $0x778] sm:$0x3] }
 0x196   :  { %3317 = vst [vmem:[%s5072_s1 + $0x1d6] sm:$0x3] %v2189_v6  ;;  %v2123_v22 = vld [vmem:[#allocation2 + $0x700] sm:$0x3]  ;;  %v2129_v24 = vld [vmem:[#allocation2 + $0x708] sm:$0x3] }
 0x197   :  { %3318 = vst [vmem:[%s5072_s1 + $0x1d8] sm:$0x3] %v2195_v7  ;;  %v2135_v15 = vld [vmem:[#allocation2 + $0x710] sm:$0x3]  ;;  %v2141_v17 = vld [vmem:[#allocation2 + $0x718] sm:$0x3] }
 0x198   :  { %3319 = vst [vmem:[%s5072_s1 + $0x1da] sm:$0x3] %v2201_v8  ;;  %v2147_v25 = vld [vmem:[#allocation2 + $0x720] sm:$0x3]  ;;  %v2153_v26 = vld [vmem:[#allocation2 + $0x728] sm:$0x3] }
 0x199   :  { %3320 = vst [vmem:[%s5072_s1 + $0x1dc] sm:$0x3] %v2207_v11  ;;  %v2159_v9 = vld [vmem:[#allocation2 + $0x730] sm:$0x3]  ;;  %v2165_v10 = vld [vmem:[#allocation2 + $0x738] sm:$0x3] }
 0x19a   :  { %3321 = vst [vmem:[%s5072_s1 + $0x1de] sm:$0x3] %v2213_v21 }
 0x19b   :  { %3306 = vst [vmem:[%s5072_s1 + $0x1c0] sm:$0x3] %v2123_v22 }
 0x19c   :  { %3307 = vst [vmem:[%s5072_s1 + $0x1c2] sm:$0x3] %v2129_v24 }
 0x19d   :  { %3308 = vst [vmem:[%s5072_s1 + $0x1c4] sm:$0x3] %v2135_v15 }
 0x19e   :  { %3309 = vst [vmem:[%s5072_s1 + $0x1c6] sm:$0x3] %v2141_v17 }
 0x19f   :  { %3310 = vst [vmem:[%s5072_s1 + $0x1c8] sm:$0x3] %v2147_v25  ;;  %v278_v25 = vld [vmem:[#allocation0 + $0x130] sm:$0xff]  }
 0x1a0   :  { %3311 = vst [vmem:[%s5072_s1 + $0x1ca] sm:$0x3] %v2153_v26  ;;  %v673_v26 = vpop.permute.xlu0 %672  }
 0x1a1   :  { %3312 = vst [vmem:[%s5072_s1 + $0x1cc] sm:$0x3] %v2159_v9  ;;  %v271_v9 = vld [vmem:[#allocation0 + $0x128] sm:$0xff]  }
 0x1a2   :  { %3313 = vst [vmem:[%s5072_s1 + $0x1ce] sm:$0x3] %v2165_v10 }
 0x1a3   :  { %206 = vst.msk [vmem:[#allocation2 + $0x6c0] ss:$8 sm:$0xf0] %vm15_vm0, %v201_v1   ;;  %v691_v1 = vpop.permute.xlu2 %690  }
 0x1a4   :  { %595 = vst.msk [vmem:[#allocation2 + $0x6c1] ss:$8 sm:$0xf] %vm15_vm0, %v4408_v18  }
 0x1a5   :  { %597 = vst.msk [vmem:[#allocation2 + $0x6c1] ss:$8 sm:$0xf0] %vm15_vm0, %v4408_v18  }
 0x1a6   :  { %239 = vst.msk [vmem:[#allocation2 + $0x800] ss:$8 sm:$0xf] %vm15_vm0, %v236_v27  }
 0x1a7   :  { %241 = vst.msk [vmem:[#allocation2 + $0x800] ss:$8 sm:$0xf0] %vm15_vm0, %v236_v27  }
 0x1a8   :  { %640 = vst.msk [vmem:[#allocation2 + $0x801] ss:$8 sm:$0xf] %vm15_vm0, %v637_v4  }
 0x1a9   :  { %642 = vst.msk [vmem:[#allocation2 + $0x801] ss:$8 sm:$0xf0] %vm15_vm0, %v637_v4  }
 0x1aa   :  { %232 = vst.msk [vmem:[#allocation2 + $0x7c0] ss:$8 sm:$0xf] %vm15_vm0, %v229_v29  }
 0x1ab   :  { %v2075_v30 = vld [vmem:[#allocation2 + $0x6c0] sm:$0x3]  ;;  %v2081_v31 = vld [vmem:[#allocation2 + $0x6c8] sm:$0x3]  ;;  %v2087_v32 = vld [vmem:[#allocation2 + $0x6d0] sm:$0x3] }
 0x1ac   :  { %3298 = vst [vmem:[%s5072_s1 + $0x1b0] sm:$0x3] %v2075_v30  ;;  %v2093_v33 = vld [vmem:[#allocation2 + $0x6d8] sm:$0x3]  ;;  %v2099_v34 = vld [vmem:[#allocation2 + $0x6e0] sm:$0x3] }
 0x1ad   :  { %3299 = vst [vmem:[%s5072_s1 + $0x1b2] sm:$0x3] %v2081_v31  ;;  %v2105_v35 = vld [vmem:[#allocation2 + $0x6e8] sm:$0x3]  ;;  %v2111_v36 = vld [vmem:[#allocation2 + $0x6f0] sm:$0x3] }
 0x1ae   :  { %3300 = vst [vmem:[%s5072_s1 + $0x1b4] sm:$0x3] %v2087_v32  ;;  %v2117_v37 = vld [vmem:[#allocation2 + $0x6f8] sm:$0x3] }
 0x1af   :  { %3301 = vst [vmem:[%s5072_s1 + $0x1b6] sm:$0x3] %v2093_v33  ;;  %v2315_v38 = vld [vmem:[#allocation2 + $0x800] sm:$0x3]  ;;  %v2321_v16 = vld [vmem:[#allocation2 + $0x808] sm:$0x3] }
 0x1b0   :  { %3302 = vst [vmem:[%s5072_s1 + $0x1b8] sm:$0x3] %v2099_v34  ;;  %v2327_v20 = vld [vmem:[#allocation2 + $0x810] sm:$0x3]  ;;  %v2333_v40 = vld [vmem:[#allocation2 + $0x818] sm:$0x3] }
 0x1b1   :  { %3303 = vst [vmem:[%s5072_s1 + $0x1ba] sm:$0x3] %v2105_v35  ;;  %v2339_v41 = vld [vmem:[#allocation2 + $0x820] sm:$0x3]  ;;  %v2345_v42 = vld [vmem:[#allocation2 + $0x828] sm:$0x3] }
 0x1b2   :  { %3304 = vst [vmem:[%s5072_s1 + $0x1bc] sm:$0x3] %v2111_v36  ;;  %v2351_v43 = vld [vmem:[#allocation2 + $0x830] sm:$0x3]  ;;  %v2357_v44 = vld [vmem:[#allocation2 + $0x838] sm:$0x3] }
 0x1b3   :  { %3305 = vst [vmem:[%s5072_s1 + $0x1be] sm:$0x3] %v2117_v37  ;;  %v718_v37 = vpop.permute.xlu2 %717  }
 0x1b4   :  { %3338 = vst [vmem:[%s5072_s1 + $0x200] sm:$0x3] %v2315_v38 }
 0x1b5   :  { %3339 = vst [vmem:[%s5072_s1 + $0x202] sm:$0x3] %v2321_v16 }
 0x1b6   :  { %3340 = vst [vmem:[%s5072_s1 + $0x204] sm:$0x3] %v2327_v20 }
 0x1b7   :  { %3341 = vst [vmem:[%s5072_s1 + $0x206] sm:$0x3] %v2333_v40 }
 0x1b8   :  { %3342 = vst [vmem:[%s5072_s1 + $0x208] sm:$0x3] %v2339_v41  ;;  %v264_v41 = vld [vmem:[#allocation0 + $0x120] sm:$0xff]  }
 0x1b9   :  { %3343 = vst [vmem:[%s5072_s1 + $0x20a] sm:$0x3] %v2345_v42  ;;  %v709_v42 = vpop.permute.xlu1 %708  }
 0x1ba   :  { %3344 = vst [vmem:[%s5072_s1 + $0x20c] sm:$0x3] %v2351_v43  ;;  %v299_v43 = vld [vmem:[#allocation0 + $0x148] sm:$0xff]  }
 0x1bb   :  { %3345 = vst [vmem:[%s5072_s1 + $0x20e] sm:$0x3] %v2357_v44 }
 0x1bc   :  { %234 = vst.msk [vmem:[#allocation2 + $0x7c0] ss:$8 sm:$0xf0] %vm15_vm0, %v229_v29  }
 0x1bd   :  { %631 = vst.msk [vmem:[#allocation2 + $0x7c1] ss:$8 sm:$0xf] %vm15_vm0, %v4466_v5  }
 0x1be   :  { %633 = vst.msk [vmem:[#allocation2 + $0x7c1] ss:$8 sm:$0xf0] %vm15_vm0, %v4466_v5  }
 0x1bf   :  { %225 = vst.msk [vmem:[#allocation2 + $0x780] ss:$8 sm:$0xf] %vm15_vm0, %v222_v14  }
 0x1c0   :  { %227 = vst.msk [vmem:[#allocation2 + $0x780] ss:$8 sm:$0xf0] %vm15_vm0, %v222_v14  }
 0x1c1   :  { %622 = vst.msk [vmem:[#allocation2 + $0x781] ss:$8 sm:$0xf] %vm15_vm0, %v619_v28  }
 0x1c2   :  { %624 = vst.msk [vmem:[#allocation2 + $0x781] ss:$8 sm:$0xf0] %vm15_vm0, %v619_v28  }
 0x1c3   :  { %260 = vst.msk [vmem:[#allocation2 + $0x8c0] ss:$8 sm:$0xf] %vm15_vm0, %v257_v46  }
 0x1c4   :  { %v2267_v47 = vld [vmem:[#allocation2 + $0x7c0] sm:$0x3]  ;;  %v2273_v48 = vld [vmem:[#allocation2 + $0x7c8] sm:$0x3]  ;;  %v2279_v49 = vld [vmem:[#allocation2 + $0x7d0] sm:$0x3] }
 0x1c5   :  { %3330 = vst [vmem:[%s5072_s1 + $0x1f0] sm:$0x3] %v2267_v47  ;;  %v2285_v51 = vld [vmem:[#allocation2 + $0x7d8] sm:$0x3]  ;;  %v2291_v52 = vld [vmem:[#allocation2 + $0x7e0] sm:$0x3] }
 0x1c6   :  { %3331 = vst [vmem:[%s5072_s1 + $0x1f2] sm:$0x3] %v2273_v48  ;;  %v2297_v53 = vld [vmem:[#allocation2 + $0x7e8] sm:$0x3]  ;;  %v2303_v18 = vld [vmem:[#allocation2 + $0x7f0] sm:$0x3] }
 0x1c7   :  { %3332 = vst [vmem:[%s5072_s1 + $0x1f4] sm:$0x3] %v2279_v49  ;;  %v2309_v19 = vld [vmem:[#allocation2 + $0x7f8] sm:$0x3] }
 0x1c8   :  { %3333 = vst [vmem:[%s5072_s1 + $0x1f6] sm:$0x3] %v2285_v51  ;;  %v2219_v54 = vld [vmem:[#allocation2 + $0x780] sm:$0x3]  ;;  %v2225_v55 = vld [vmem:[#allocation2 + $0x788] sm:$0x3] }
 0x1c9   :  { %3334 = vst [vmem:[%s5072_s1 + $0x1f8] sm:$0x3] %v2291_v52  ;;  %v2231_v56 = vld [vmem:[#allocation2 + $0x790] sm:$0x3]  ;;  %v2237_v57 = vld [vmem:[#allocation2 + $0x798] sm:$0x3] }
 0x1ca   :  { %3335 = vst [vmem:[%s5072_s1 + $0x1fa] sm:$0x3] %v2297_v53  ;;  %v2243_v58 = vld [vmem:[#allocation2 + $0x7a0] sm:$0x3]  ;;  %v2249_v59 = vld [vmem:[#allocation2 + $0x7a8] sm:$0x3] }
 0x1cb   :  { %3336 = vst [vmem:[%s5072_s1 + $0x1fc] sm:$0x3] %v2303_v18  ;;  %v2255_v60 = vld [vmem:[#allocation2 + $0x7b0] sm:$0x3]  ;;  %v2261_v12 = vld [vmem:[#allocation2 + $0x7b8] sm:$0x3] }
 0x1cc   :  { %3337 = vst [vmem:[%s5072_s1 + $0x1fe] sm:$0x3] %v2309_v19 }
 0x1cd   :  { %3322 = vst [vmem:[%s5072_s1 + $0x1e0] sm:$0x3] %v2219_v54 }
 0x1ce   :  { %3323 = vst [vmem:[%s5072_s1 + $0x1e2] sm:$0x3] %v2225_v55 }
 0x1cf   :  { %3324 = vst [vmem:[%s5072_s1 + $0x1e4] sm:$0x3] %v2231_v56 }
 0x1d0   :  { %3325 = vst [vmem:[%s5072_s1 + $0x1e6] sm:$0x3] %v2237_v57 }
 0x1d1   :  { %3326 = vst [vmem:[%s5072_s1 + $0x1e8] sm:$0x3] %v2243_v58  ;;  %v292_v58 = vld [vmem:[#allocation0 + $0x140] sm:$0xff]  }
 0x1d2   :  { %3327 = vst [vmem:[%s5072_s1 + $0x1ea] sm:$0x3] %v2249_v59  ;;  %v285_v59 = vld [vmem:[#allocation0 + $0x138] sm:$0xff]  }
 0x1d3   :  { %3328 = vst [vmem:[%s5072_s1 + $0x1ec] sm:$0x3] %v2255_v60 }
 0x1d4   :  { %3329 = vst [vmem:[%s5072_s1 + $0x1ee] sm:$0x3] %v2261_v12 }
 0x1d5   :  { %262 = vst.msk [vmem:[#allocation2 + $0x8c0] ss:$8 sm:$0xf0] %vm15_vm0, %v257_v46   ;;  %v4760_v46 = vpop.permute.xlu0 %699  }
 0x1d6   :  { %667 = vst.msk [vmem:[#allocation2 + $0x8c1] ss:$8 sm:$0xf] %vm15_vm0, %v664_v39  }
 0x1d7   :  { %669 = vst.msk [vmem:[#allocation2 + $0x8c1] ss:$8 sm:$0xf0] %vm15_vm0, %v664_v39  }
 0x1d8   :  { %253 = vst.msk [vmem:[#allocation2 + $0x880] ss:$8 sm:$0xf] %vm15_vm0, %v250_v13  }
 0x1d9   :  { %255 = vst.msk [vmem:[#allocation2 + $0x880] ss:$8 sm:$0xf0] %vm15_vm0, %v250_v13  }
 0x1da   :  { %658 = vst.msk [vmem:[#allocation2 + $0x881] ss:$8 sm:$0xf] %vm15_vm0, %v655_v45  }
 0x1db   :  { %660 = vst.msk [vmem:[#allocation2 + $0x881] ss:$8 sm:$0xf0] %vm15_vm0, %v655_v45  }
 0x1dc   :  { %246 = vst.msk [vmem:[#allocation2 + $0x840] ss:$8 sm:$0xf] %vm15_vm0, %v243_v61  }
 0x1dd   :  { %v2459_v62 = vld [vmem:[#allocation2 + $0x8c0] sm:$0x3]  ;;  %v2465_v63 = vld [vmem:[#allocation2 + $0x8c8] sm:$0x3]  ;;  %v2471_v0 = vld [vmem:[#allocation2 + $0x8d0] sm:$0x3] }
 0x1de   :  { %3362 = vst [vmem:[%s5072_s1 + $0x230] sm:$0x3] %v2459_v62  ;;  %v2477_v3 = vld [vmem:[#allocation2 + $0x8d8] sm:$0x3]  ;;  %v2483_v23 = vld [vmem:[#allocation2 + $0x8e0] sm:$0x3]  ;;  %v4818_v62 = vpop.permute.xlu1 %735  }
 0x1df   :  { %3363 = vst [vmem:[%s5072_s1 + $0x232] sm:$0x3] %v2465_v63  ;;  %v2489_v4 = vld [vmem:[#allocation2 + $0x8e8] sm:$0x3]  ;;  %v2495_v5 = vld [vmem:[#allocation2 + $0x8f0] sm:$0x3] }
 0x1e0   :  { %3364 = vst [vmem:[%s5072_s1 + $0x234] sm:$0x3] %v2471_v0  ;;  %v2501_v6 = vld [vmem:[#allocation2 + $0x8f8] sm:$0x3] }
 0x1e1   :  { %3365 = vst [vmem:[%s5072_s1 + $0x236] sm:$0x3] %v2477_v3  ;;  %v2411_v7 = vld [vmem:[#allocation2 + $0x880] sm:$0x3]  ;;  %v2417_v8 = vld [vmem:[#allocation2 + $0x888] sm:$0x3] }
 0x1e2   :  { %3366 = vst [vmem:[%s5072_s1 + $0x238] sm:$0x3] %v2483_v23  ;;  %v2423_v11 = vld [vmem:[#allocation2 + $0x890] sm:$0x3]  ;;  %v2429_v21 = vld [vmem:[#allocation2 + $0x898] sm:$0x3] }
 0x1e3   :  { %3367 = vst [vmem:[%s5072_s1 + $0x23a] sm:$0x3] %v2489_v4  ;;  %v2435_v22 = vld [vmem:[#allocation2 + $0x8a0] sm:$0x3]  ;;  %v2441_v24 = vld [vmem:[#allocation2 + $0x8a8] sm:$0x3] }
 0x1e4   :  { %3368 = vst [vmem:[%s5072_s1 + $0x23c] sm:$0x3] %v2495_v5  ;;  %v2447_v15 = vld [vmem:[#allocation2 + $0x8b0] sm:$0x3]  ;;  %v2453_v17 = vld [vmem:[#allocation2 + $0x8b8] sm:$0x3] }
 0x1e5   :  { %3369 = vst [vmem:[%s5072_s1 + $0x23e] sm:$0x3] %v2501_v6 }
 0x1e6   :  { %3354 = vst [vmem:[%s5072_s1 + $0x220] sm:$0x3] %v2411_v7 }
 0x1e7   :  { %3355 = vst [vmem:[%s5072_s1 + $0x222] sm:$0x3] %v2417_v8 }
 0x1e8   :  { %3356 = vst [vmem:[%s5072_s1 + $0x224] sm:$0x3] %v2423_v11 }
 0x1e9   :  { %3357 = vst [vmem:[%s5072_s1 + $0x226] sm:$0x3] %v2429_v21 }
 0x1ea   :  { %3358 = vst [vmem:[%s5072_s1 + $0x228] sm:$0x3] %v2435_v22  ;;  %v320_v22 = vld [vmem:[#allocation0 + $0x160] sm:$0xff]  }
 0x1eb   :  { %3359 = vst [vmem:[%s5072_s1 + $0x22a] sm:$0x3] %v2441_v24  ;;  %v727_v24 = vpop.permute.xlu0 %726  }
 0x1ec   :  { %3360 = vst [vmem:[%s5072_s1 + $0x22c] sm:$0x3] %v2447_v15  ;;  %v313_v15 = vld [vmem:[#allocation0 + $0x158] sm:$0xff]  }
 0x1ed   :  { %3361 = vst [vmem:[%s5072_s1 + $0x22e] sm:$0x3] %v2453_v17 }
 0x1ee   :  { %248 = vst.msk [vmem:[#allocation2 + $0x840] ss:$8 sm:$0xf0] %vm15_vm0, %v243_v61   ;;  %v745_v61 = vpop.permute.xlu2 %744  }
 0x1ef   :  { %649 = vst.msk [vmem:[#allocation2 + $0x841] ss:$8 sm:$0xf] %vm15_vm0, %v4584_v50  }
 0x1f0   :  { %651 = vst.msk [vmem:[#allocation2 + $0x841] ss:$8 sm:$0xf0] %vm15_vm0, %v4584_v50  }
 0x1f1   :  { %281 = vst.msk [vmem:[#allocation2 + $0x980] ss:$8 sm:$0xf] %vm15_vm0, %v278_v25  }
 0x1f2   :  { %283 = vst.msk [vmem:[#allocation2 + $0x980] ss:$8 sm:$0xf0] %vm15_vm0, %v278_v25  }
 0x1f3   :  { %694 = vst.msk [vmem:[#allocation2 + $0x981] ss:$8 sm:$0xf] %vm15_vm0, %v691_v1  }
 0x1f4   :  { %696 = vst.msk [vmem:[#allocation2 + $0x981] ss:$8 sm:$0xf0] %vm15_vm0, %v691_v1  }
 0x1f5   :  { %274 = vst.msk [vmem:[#allocation2 + $0x940] ss:$8 sm:$0xf] %vm15_vm0, %v271_v9  }
 0x1f6   :  { %v2363_v10 = vld [vmem:[#allocation2 + $0x840] sm:$0x3]  ;;  %v2369_v27 = vld [vmem:[#allocation2 + $0x848] sm:$0x3]  ;;  %v2375_v28 = vld [vmem:[#allocation2 + $0x850] sm:$0x3] }
 0x1f7   :  { %3346 = vst [vmem:[%s5072_s1 + $0x210] sm:$0x3] %v2363_v10  ;;  %v2381_v29 = vld [vmem:[#allocation2 + $0x858] sm:$0x3]  ;;  %v2387_v30 = vld [vmem:[#allocation2 + $0x860] sm:$0x3] }
 0x1f8   :  { %3347 = vst [vmem:[%s5072_s1 + $0x212] sm:$0x3] %v2369_v27  ;;  %v2393_v31 = vld [vmem:[#allocation2 + $0x868] sm:$0x3]  ;;  %v2399_v32 = vld [vmem:[#allocation2 + $0x870] sm:$0x3] }
 0x1f9   :  { %3348 = vst [vmem:[%s5072_s1 + $0x214] sm:$0x3] %v2375_v28  ;;  %v2405_v33 = vld [vmem:[#allocation2 + $0x878] sm:$0x3] }
 0x1fa   :  { %3349 = vst [vmem:[%s5072_s1 + $0x216] sm:$0x3] %v2381_v29  ;;  %v2603_v34 = vld [vmem:[#allocation2 + $0x980] sm:$0x3]  ;;  %v2609_v35 = vld [vmem:[#allocation2 + $0x988] sm:$0x3] }
 0x1fb   :  { %3350 = vst [vmem:[%s5072_s1 + $0x218] sm:$0x3] %v2387_v30  ;;  %v2615_v36 = vld [vmem:[#allocation2 + $0x990] sm:$0x3]  ;;  %v2621_v38 = vld [vmem:[#allocation2 + $0x998] sm:$0x3] }
 0x1fc   :  { %3351 = vst [vmem:[%s5072_s1 + $0x21a] sm:$0x3] %v2393_v31  ;;  %v2627_v16 = vld [vmem:[#allocation2 + $0x9a0] sm:$0x3]  ;;  %v2633_v20 = vld [vmem:[#allocation2 + $0x9a8] sm:$0x3] }
 0x1fd   :  { %3352 = vst [vmem:[%s5072_s1 + $0x21c] sm:$0x3] %v2399_v32  ;;  %v2639_v39 = vld [vmem:[#allocation2 + $0x9b0] sm:$0x3]  ;;  %v2645_v40 = vld [vmem:[#allocation2 + $0x9b8] sm:$0x3] }
 0x1fe   :  { %3353 = vst [vmem:[%s5072_s1 + $0x21e] sm:$0x3] %v2405_v33  ;;  %v772_v33 = vpop.permute.xlu2 %771  }
 0x1ff   :  { %3386 = vst [vmem:[%s5072_s1 + $0x260] sm:$0x3] %v2603_v34 }
 0x200   :  { %3387 = vst [vmem:[%s5072_s1 + $0x262] sm:$0x3] %v2609_v35 }
 0x201   :  { %3388 = vst [vmem:[%s5072_s1 + $0x264] sm:$0x3] %v2615_v36 }
 0x202   :  { %3389 = vst [vmem:[%s5072_s1 + $0x266] sm:$0x3] %v2621_v38 }
 0x203   :  { %3390 = vst [vmem:[%s5072_s1 + $0x268] sm:$0x3] %v2627_v16  ;;  %v306_v16 = vld [vmem:[#allocation0 + $0x150] sm:$0xff]  }
 0x204   :  { %3391 = vst [vmem:[%s5072_s1 + $0x26a] sm:$0x3] %v2633_v20  ;;  %v763_v20 = vpop.permute.xlu1 %762  }
 0x205   :  { %3392 = vst [vmem:[%s5072_s1 + $0x26c] sm:$0x3] %v2639_v39  ;;  %v341_v39 = vld [vmem:[#allocation0 + $0x178] sm:$0xff]  }
 0x206   :  { %3393 = vst [vmem:[%s5072_s1 + $0x26e] sm:$0x3] %v2645_v40 }
 0x207   :  { %276 = vst.msk [vmem:[#allocation2 + $0x940] ss:$8 sm:$0xf0] %vm15_vm0, %v271_v9  }
 0x208   :  { %685 = vst.msk [vmem:[#allocation2 + $0x941] ss:$8 sm:$0xf] %vm15_vm0, %v4642_v2  }
 0x209   :  { %687 = vst.msk [vmem:[#allocation2 + $0x941] ss:$8 sm:$0xf0] %vm15_vm0, %v4642_v2  }
 0x20a   :  { %267 = vst.msk [vmem:[#allocation2 + $0x900] ss:$8 sm:$0xf] %vm15_vm0, %v264_v41  }
 0x20b   :  { %269 = vst.msk [vmem:[#allocation2 + $0x900] ss:$8 sm:$0xf0] %vm15_vm0, %v264_v41  }
 0x20c   :  { %676 = vst.msk [vmem:[#allocation2 + $0x901] ss:$8 sm:$0xf] %vm15_vm0, %v673_v26  }
 0x20d   :  { %678 = vst.msk [vmem:[#allocation2 + $0x901] ss:$8 sm:$0xf0] %vm15_vm0, %v673_v26  }
 0x20e   :  { %302 = vst.msk [vmem:[#allocation2 + $0xa40] ss:$8 sm:$0xf] %vm15_vm0, %v299_v43  }
 0x20f   :  { %v2555_v44 = vld [vmem:[#allocation2 + $0x940] sm:$0x3]  ;;  %v2561_v14 = vld [vmem:[#allocation2 + $0x948] sm:$0x3]  ;;  %v2567_v45 = vld [vmem:[#allocation2 + $0x950] sm:$0x3] }
 0x210   :  { %3378 = vst [vmem:[%s5072_s1 + $0x250] sm:$0x3] %v2555_v44  ;;  %v2573_v47 = vld [vmem:[#allocation2 + $0x958] sm:$0x3]  ;;  %v2579_v48 = vld [vmem:[#allocation2 + $0x960] sm:$0x3] }
 0x211   :  { %3379 = vst [vmem:[%s5072_s1 + $0x252] sm:$0x3] %v2561_v14  ;;  %v2585_v49 = vld [vmem:[#allocation2 + $0x968] sm:$0x3]  ;;  %v2591_v50 = vld [vmem:[#allocation2 + $0x970] sm:$0x3] }
 0x212   :  { %3380 = vst [vmem:[%s5072_s1 + $0x254] sm:$0x3] %v2567_v45  ;;  %v2597_v51 = vld [vmem:[#allocation2 + $0x978] sm:$0x3] }
 0x213   :  { %3381 = vst [vmem:[%s5072_s1 + $0x256] sm:$0x3] %v2573_v47  ;;  %v2507_v52 = vld [vmem:[#allocation2 + $0x900] sm:$0x3]  ;;  %v2513_v53 = vld [vmem:[#allocation2 + $0x908] sm:$0x3] }
 0x214   :  { %3382 = vst [vmem:[%s5072_s1 + $0x258] sm:$0x3] %v2579_v48  ;;  %v2519_v18 = vld [vmem:[#allocation2 + $0x910] sm:$0x3]  ;;  %v2525_v19 = vld [vmem:[#allocation2 + $0x918] sm:$0x3] }
 0x215   :  { %3383 = vst [vmem:[%s5072_s1 + $0x25a] sm:$0x3] %v2585_v49  ;;  %v2531_v54 = vld [vmem:[#allocation2 + $0x920] sm:$0x3]  ;;  %v2537_v55 = vld [vmem:[#allocation2 + $0x928] sm:$0x3] }
 0x216   :  { %3384 = vst [vmem:[%s5072_s1 + $0x25c] sm:$0x3] %v2591_v50  ;;  %v2543_v56 = vld [vmem:[#allocation2 + $0x930] sm:$0x3]  ;;  %v2549_v57 = vld [vmem:[#allocation2 + $0x938] sm:$0x3] }
 0x217   :  { %3385 = vst [vmem:[%s5072_s1 + $0x25e] sm:$0x3] %v2597_v51 }
 0x218   :  { %3370 = vst [vmem:[%s5072_s1 + $0x240] sm:$0x3] %v2507_v52 }
 0x219   :  { %3371 = vst [vmem:[%s5072_s1 + $0x242] sm:$0x3] %v2513_v53 }
 0x21a   :  { %3372 = vst [vmem:[%s5072_s1 + $0x244] sm:$0x3] %v2519_v18 }
 0x21b   :  { %3373 = vst [vmem:[%s5072_s1 + $0x246] sm:$0x3] %v2525_v19 }
 0x21c   :  { %3374 = vst [vmem:[%s5072_s1 + $0x248] sm:$0x3] %v2531_v54  ;;  %v334_v54 = vld [vmem:[#allocation0 + $0x170] sm:$0xff]  }
 0x21d   :  { %3375 = vst [vmem:[%s5072_s1 + $0x24a] sm:$0x3] %v2537_v55  ;;  %v327_v55 = vld [vmem:[#allocation0 + $0x168] sm:$0xff]  }
 0x21e   :  { %3376 = vst [vmem:[%s5072_s1 + $0x24c] sm:$0x3] %v2543_v56 }
 0x21f   :  { %3377 = vst [vmem:[%s5072_s1 + $0x24e] sm:$0x3] %v2549_v57 }
 0x220   :  { %304 = vst.msk [vmem:[#allocation2 + $0xa40] ss:$8 sm:$0xf0] %vm15_vm0, %v299_v43   ;;  %v4936_v43 = vpop.permute.xlu0 %753  }
 0x221   :  { %721 = vst.msk [vmem:[#allocation2 + $0xa41] ss:$8 sm:$0xf] %vm15_vm0, %v718_v37  }
 0x222   :  { %723 = vst.msk [vmem:[#allocation2 + $0xa41] ss:$8 sm:$0xf0] %vm15_vm0, %v718_v37  }
 0x223   :  { %295 = vst.msk [vmem:[#allocation2 + $0xa00] ss:$8 sm:$0xf] %vm15_vm0, %v292_v58  }
 0x224   :  { %297 = vst.msk [vmem:[#allocation2 + $0xa00] ss:$8 sm:$0xf0] %vm15_vm0, %v292_v58  }
 0x225   :  { %712 = vst.msk [vmem:[#allocation2 + $0xa01] ss:$8 sm:$0xf] %vm15_vm0, %v709_v42  }
 0x226   :  { %714 = vst.msk [vmem:[#allocation2 + $0xa01] ss:$8 sm:$0xf0] %vm15_vm0, %v709_v42  }
 0x227   :  { %288 = vst.msk [vmem:[#allocation2 + $0x9c0] ss:$8 sm:$0xf] %vm15_vm0, %v285_v59  }
 0x228   :  { %v2747_v60 = vld [vmem:[#allocation2 + $0xa40] sm:$0x3]  ;;  %v2753_v12 = vld [vmem:[#allocation2 + $0xa48] sm:$0x3]  ;;  %v2759_v13 = vld [vmem:[#allocation2 + $0xa50] sm:$0x3] }
 0x229   :  { %3410 = vst [vmem:[%s5072_s1 + $0x290] sm:$0x3] %v2747_v60  ;;  %v2765_v63 = vld [vmem:[#allocation2 + $0xa58] sm:$0x3]  ;;  %v2771_v0 = vld [vmem:[#allocation2 + $0xa60] sm:$0x3] }
 0x22a   :  { %3411 = vst [vmem:[%s5072_s1 + $0x292] sm:$0x3] %v2753_v12  ;;  %v2777_v1 = vld [vmem:[#allocation2 + $0xa68] sm:$0x3]  ;;  %v2783_v2 = vld [vmem:[#allocation2 + $0xa70] sm:$0x3] }
 0x22b   :  { %3412 = vst [vmem:[%s5072_s1 + $0x294] sm:$0x3] %v2759_v13  ;;  %v2789_v3 = vld [vmem:[#allocation2 + $0xa78] sm:$0x3] }
 0x22c   :  { %3413 = vst [vmem:[%s5072_s1 + $0x296] sm:$0x3] %v2765_v63  ;;  %v2699_v23 = vld [vmem:[#allocation2 + $0xa00] sm:$0x3]  ;;  %v2705_v4 = vld [vmem:[#allocation2 + $0xa08] sm:$0x3] }
 0x22d   :  { %3414 = vst [vmem:[%s5072_s1 + $0x298] sm:$0x3] %v2771_v0  ;;  %v2711_v5 = vld [vmem:[#allocation2 + $0xa10] sm:$0x3]  ;;  %v2717_v6 = vld [vmem:[#allocation2 + $0xa18] sm:$0x3] }
 0x22e   :  { %3415 = vst [vmem:[%s5072_s1 + $0x29a] sm:$0x3] %v2777_v1  ;;  %v2723_v7 = vld [vmem:[#allocation2 + $0xa20] sm:$0x3]  ;;  %v2729_v8 = vld [vmem:[#allocation2 + $0xa28] sm:$0x3] }
 0x22f   :  { %3416 = vst [vmem:[%s5072_s1 + $0x29c] sm:$0x3] %v2783_v2  ;;  %v2735_v11 = vld [vmem:[#allocation2 + $0xa30] sm:$0x3]  ;;  %v2741_v21 = vld [vmem:[#allocation2 + $0xa38] sm:$0x3] }
 0x230   :  { %3417 = vst [vmem:[%s5072_s1 + $0x29e] sm:$0x3] %v2789_v3 }
 0x231   :  { %3402 = vst [vmem:[%s5072_s1 + $0x280] sm:$0x3] %v2699_v23 }
 0x232   :  { %3403 = vst [vmem:[%s5072_s1 + $0x282] sm:$0x3] %v2705_v4 }
 0x233   :  { %3404 = vst [vmem:[%s5072_s1 + $0x284] sm:$0x3] %v2711_v5 }
 0x234   :  { %3405 = vst [vmem:[%s5072_s1 + $0x286] sm:$0x3] %v2717_v6 }
 0x235   :  { %3406 = vst [vmem:[%s5072_s1 + $0x288] sm:$0x3] %v2723_v7 }
 0x236   :  { %3407 = vst [vmem:[%s5072_s1 + $0x28a] sm:$0x3] %v2729_v8 }
 0x237   :  { %3408 = vst [vmem:[%s5072_s1 + $0x28c] sm:$0x3] %v2735_v11 }
 0x238   :  { %3409 = vst [vmem:[%s5072_s1 + $0x28e] sm:$0x3] %v2741_v21 }
 0x239   :  { %290 = vst.msk [vmem:[#allocation2 + $0x9c0] ss:$8 sm:$0xf0] %vm15_vm0, %v285_v59  }
 0x23a   :  { %703 = vst.msk [vmem:[#allocation2 + $0x9c1] ss:$8 sm:$0xf] %vm15_vm0, %v4760_v46  }
 0x23b   :  { %705 = vst.msk [vmem:[#allocation2 + $0x9c1] ss:$8 sm:$0xf0] %vm15_vm0, %v4760_v46  }
 0x23c   :  { %323 = vst.msk [vmem:[#allocation2 + $0xb00] ss:$8 sm:$0xf] %vm15_vm0, %v320_v22  }
 0x23d   :  { %325 = vst.msk [vmem:[#allocation2 + $0xb00] ss:$8 sm:$0xf0] %vm15_vm0, %v320_v22  }
 0x23e   :  { %748 = vst.msk [vmem:[#allocation2 + $0xb01] ss:$8 sm:$0xf] %vm15_vm0, %v745_v61  }
 0x23f   :  { %750 = vst.msk [vmem:[#allocation2 + $0xb01] ss:$8 sm:$0xf0] %vm15_vm0, %v745_v61  }
 0x240   :  { %316 = vst.msk [vmem:[#allocation2 + $0xac0] ss:$8 sm:$0xf] %vm15_vm0, %v313_v15  }
 0x241   :  { %v2651_v17 = vld [vmem:[#allocation2 + $0x9c0] sm:$0x3]  ;;  %v2657_v25 = vld [vmem:[#allocation2 + $0x9c8] sm:$0x3]  ;;  %v2663_v26 = vld [vmem:[#allocation2 + $0x9d0] sm:$0x3] }
 0x242   :  { %3394 = vst [vmem:[%s5072_s1 + $0x270] sm:$0x3] %v2651_v17  ;;  %v2669_v9 = vld [vmem:[#allocation2 + $0x9d8] sm:$0x3]  ;;  %v2675_v10 = vld [vmem:[#allocation2 + $0x9e0] sm:$0x3] }
 0x243   :  { %3395 = vst [vmem:[%s5072_s1 + $0x272] sm:$0x3] %v2657_v25  ;;  %v2681_v27 = vld [vmem:[#allocation2 + $0x9e8] sm:$0x3]  ;;  %v2687_v28 = vld [vmem:[#allocation2 + $0x9f0] sm:$0x3] }
 0x244   :  { %3396 = vst [vmem:[%s5072_s1 + $0x274] sm:$0x3] %v2663_v26  ;;  %v2693_v29 = vld [vmem:[#allocation2 + $0x9f8] sm:$0x3] }
 0x245   :  { %3397 = vst [vmem:[%s5072_s1 + $0x276] sm:$0x3] %v2669_v9  ;;  %v2891_v30 = vld [vmem:[#allocation2 + $0xb00] sm:$0x3]  ;;  %v2897_v31 = vld [vmem:[#allocation2 + $0xb08] sm:$0x3] }
 0x246   :  { %3398 = vst [vmem:[%s5072_s1 + $0x278] sm:$0x3] %v2675_v10  ;;  %v2903_v32 = vld [vmem:[#allocation2 + $0xb10] sm:$0x3]  ;;  %v2909_v34 = vld [vmem:[#allocation2 + $0xb18] sm:$0x3] }
 0x247   :  { %3399 = vst [vmem:[%s5072_s1 + $0x27a] sm:$0x3] %v2681_v27  ;;  %v2915_v35 = vld [vmem:[#allocation2 + $0xb20] sm:$0x3]  ;;  %v2921_v36 = vld [vmem:[#allocation2 + $0xb28] sm:$0x3] }
 0x248   :  { %3400 = vst [vmem:[%s5072_s1 + $0x27c] sm:$0x3] %v2687_v28  ;;  %v2927_v37 = vld [vmem:[#allocation2 + $0xb30] sm:$0x3]  ;;  %v2933_v38 = vld [vmem:[#allocation2 + $0xb38] sm:$0x3] }
 0x249   :  { %3401 = vst [vmem:[%s5072_s1 + $0x27e] sm:$0x3] %v2693_v29 }
 0x24a   :  { %3434 = vst [vmem:[%s5072_s1 + $0x2c0] sm:$0x3] %v2891_v30 }
 0x24b   :  { %3435 = vst [vmem:[%s5072_s1 + $0x2c2] sm:$0x3] %v2897_v31 }
 0x24c   :  { %3436 = vst [vmem:[%s5072_s1 + $0x2c4] sm:$0x3] %v2903_v32 }
 0x24d   :  { %3437 = vst [vmem:[%s5072_s1 + $0x2c6] sm:$0x3] %v2909_v34 }
 0x24e   :  { %3438 = vst [vmem:[%s5072_s1 + $0x2c8] sm:$0x3] %v2915_v35 }
 0x24f   :  { %3439 = vst [vmem:[%s5072_s1 + $0x2ca] sm:$0x3] %v2921_v36 }
 0x250   :  { %3440 = vst [vmem:[%s5072_s1 + $0x2cc] sm:$0x3] %v2927_v37 }
 0x251   :  { %3441 = vst [vmem:[%s5072_s1 + $0x2ce] sm:$0x3] %v2933_v38 }
 0x252   :  { %318 = vst.msk [vmem:[#allocation2 + $0xac0] ss:$8 sm:$0xf0] %vm15_vm0, %v313_v15  }
 0x253   :  { %739 = vst.msk [vmem:[#allocation2 + $0xac1] ss:$8 sm:$0xf] %vm15_vm0, %v4818_v62  }
 0x254   :  { %741 = vst.msk [vmem:[#allocation2 + $0xac1] ss:$8 sm:$0xf0] %vm15_vm0, %v4818_v62  }
 0x255   :  { %309 = vst.msk [vmem:[#allocation2 + $0xa80] ss:$8 sm:$0xf] %vm15_vm0, %v306_v16  }
 0x256   :  { %311 = vst.msk [vmem:[#allocation2 + $0xa80] ss:$8 sm:$0xf0] %vm15_vm0, %v306_v16  }
 0x257   :  { %730 = vst.msk [vmem:[#allocation2 + $0xa81] ss:$8 sm:$0xf] %vm15_vm0, %v727_v24  }
 0x258   :  { %732 = vst.msk [vmem:[#allocation2 + $0xa81] ss:$8 sm:$0xf0] %vm15_vm0, %v727_v24  }
 0x259   :  { %344 = vst.msk [vmem:[#allocation2 + $0xbc0] ss:$8 sm:$0xf] %vm15_vm0, %v341_v39  }
 0x25a   :  { %v2843_v40 = vld [vmem:[#allocation2 + $0xac0] sm:$0x3]  ;;  %v2849_v41 = vld [vmem:[#allocation2 + $0xac8] sm:$0x3]  ;;  %v2855_v42 = vld [vmem:[#allocation2 + $0xad0] sm:$0x3] }
 0x25b   :  { %3426 = vst [vmem:[%s5072_s1 + $0x2b0] sm:$0x3] %v2843_v40  ;;  %v2861_v44 = vld [vmem:[#allocation2 + $0xad8] sm:$0x3]  ;;  %v2867_v14 = vld [vmem:[#allocation2 + $0xae0] sm:$0x3] }
 0x25c   :  { %3427 = vst [vmem:[%s5072_s1 + $0x2b2] sm:$0x3] %v2849_v41  ;;  %v2873_v45 = vld [vmem:[#allocation2 + $0xae8] sm:$0x3]  ;;  %v2879_v46 = vld [vmem:[#allocation2 + $0xaf0] sm:$0x3] }
 0x25d   :  { %3428 = vst [vmem:[%s5072_s1 + $0x2b4] sm:$0x3] %v2855_v42  ;;  %v2885_v47 = vld [vmem:[#allocation2 + $0xaf8] sm:$0x3] }
 0x25e   :  { %3429 = vst [vmem:[%s5072_s1 + $0x2b6] sm:$0x3] %v2861_v44  ;;  %v2795_v48 = vld [vmem:[#allocation2 + $0xa80] sm:$0x3]  ;;  %v2801_v49 = vld [vmem:[#allocation2 + $0xa88] sm:$0x3] }
 0x25f   :  { %3430 = vst [vmem:[%s5072_s1 + $0x2b8] sm:$0x3] %v2867_v14  ;;  %v2807_v50 = vld [vmem:[#allocation2 + $0xa90] sm:$0x3]  ;;  %v2813_v51 = vld [vmem:[#allocation2 + $0xa98] sm:$0x3] }
 0x260   :  { %3431 = vst [vmem:[%s5072_s1 + $0x2ba] sm:$0x3] %v2873_v45  ;;  %v2819_v52 = vld [vmem:[#allocation2 + $0xaa0] sm:$0x3]  ;;  %v2825_v53 = vld [vmem:[#allocation2 + $0xaa8] sm:$0x3] }
 0x261   :  { %3432 = vst [vmem:[%s5072_s1 + $0x2bc] sm:$0x3] %v2879_v46  ;;  %v2831_v18 = vld [vmem:[#allocation2 + $0xab0] sm:$0x3]  ;;  %v2837_v19 = vld [vmem:[#allocation2 + $0xab8] sm:$0x3] }
 0x262   :  { %3433 = vst [vmem:[%s5072_s1 + $0x2be] sm:$0x3] %v2885_v47 }
 0x263   :  { %3418 = vst [vmem:[%s5072_s1 + $0x2a0] sm:$0x3] %v2795_v48 }
 0x264   :  { %3419 = vst [vmem:[%s5072_s1 + $0x2a2] sm:$0x3] %v2801_v49 }
 0x265   :  { %3420 = vst [vmem:[%s5072_s1 + $0x2a4] sm:$0x3] %v2807_v50 }
 0x266   :  { %3421 = vst [vmem:[%s5072_s1 + $0x2a6] sm:$0x3] %v2813_v51 }
 0x267   :  { %3422 = vst [vmem:[%s5072_s1 + $0x2a8] sm:$0x3] %v2819_v52 }
 0x268   :  { %3423 = vst [vmem:[%s5072_s1 + $0x2aa] sm:$0x3] %v2825_v53 }
 0x269   :  { %3424 = vst [vmem:[%s5072_s1 + $0x2ac] sm:$0x3] %v2831_v18 }
 0x26a   :  { %3425 = vst [vmem:[%s5072_s1 + $0x2ae] sm:$0x3] %v2837_v19 }
 0x26b   :  { %346 = vst.msk [vmem:[#allocation2 + $0xbc0] ss:$8 sm:$0xf0] %vm15_vm0, %v341_v39  }
 0x26c   :  { %775 = vst.msk [vmem:[#allocation2 + $0xbc1] ss:$8 sm:$0xf] %vm15_vm0, %v772_v33  }
 0x26d   :  { %777 = vst.msk [vmem:[#allocation2 + $0xbc1] ss:$8 sm:$0xf0] %vm15_vm0, %v772_v33  }
 0x26e   :  { %337 = vst.msk [vmem:[#allocation2 + $0xb80] ss:$8 sm:$0xf] %vm15_vm0, %v334_v54  }
 0x26f   :  { %339 = vst.msk [vmem:[#allocation2 + $0xb80] ss:$8 sm:$0xf0] %vm15_vm0, %v334_v54  }
 0x270   :  { %766 = vst.msk [vmem:[#allocation2 + $0xb81] ss:$8 sm:$0xf] %vm15_vm0, %v763_v20  }
 0x271   :  { %768 = vst.msk [vmem:[#allocation2 + $0xb81] ss:$8 sm:$0xf0] %vm15_vm0, %v763_v20  }
 0x272   :  { %330 = vst.msk [vmem:[#allocation2 + $0xb40] ss:$8 sm:$0xf] %vm15_vm0, %v327_v55  }
 0x273   :  { %v3035_v56 = vld [vmem:[#allocation2 + $0xbc0] sm:$0x3]  ;;  %v3041_v57 = vld [vmem:[#allocation2 + $0xbc8] sm:$0x3]  ;;  %v3047_v58 = vld [vmem:[#allocation2 + $0xbd0] sm:$0x3] }
 0x274   :  { %3458 = vst [vmem:[%s5072_s1 + $0x2f0] sm:$0x3] %v3035_v56  ;;  %v3053_v59 = vld [vmem:[#allocation2 + $0xbd8] sm:$0x3]  ;;  %v3059_v60 = vld [vmem:[#allocation2 + $0xbe0] sm:$0x3] }
 0x275   :  { %3459 = vst [vmem:[%s5072_s1 + $0x2f2] sm:$0x3] %v3041_v57  ;;  %v3065_v12 = vld [vmem:[#allocation2 + $0xbe8] sm:$0x3]  ;;  %v3071_v13 = vld [vmem:[#allocation2 + $0xbf0] sm:$0x3] }
 0x276   :  { %3460 = vst [vmem:[%s5072_s1 + $0x2f4] sm:$0x3] %v3047_v58  ;;  %v3077_v61 = vld [vmem:[#allocation2 + $0xbf8] sm:$0x3] }
 0x277   :  { %3461 = vst [vmem:[%s5072_s1 + $0x2f6] sm:$0x3] %v3053_v59  ;;  %v2987_v62 = vld [vmem:[#allocation2 + $0xb80] sm:$0x3]  ;;  %v2993_v63 = vld [vmem:[#allocation2 + $0xb88] sm:$0x3] }
 0x278   :  { %3462 = vst [vmem:[%s5072_s1 + $0x2f8] sm:$0x3] %v3059_v60  ;;  %v2999_v0 = vld [vmem:[#allocation2 + $0xb90] sm:$0x3]  ;;  %v3005_v1 = vld [vmem:[#allocation2 + $0xb98] sm:$0x3] }
 0x279   :  { %3463 = vst [vmem:[%s5072_s1 + $0x2fa] sm:$0x3] %v3065_v12  ;;  %v3011_v2 = vld [vmem:[#allocation2 + $0xba0] sm:$0x3]  ;;  %v3017_v3 = vld [vmem:[#allocation2 + $0xba8] sm:$0x3] }
 0x27a   :  { %3464 = vst [vmem:[%s5072_s1 + $0x2fc] sm:$0x3] %v3071_v13  ;;  %v3023_v23 = vld [vmem:[#allocation2 + $0xbb0] sm:$0x3]  ;;  %v3029_v4 = vld [vmem:[#allocation2 + $0xbb8] sm:$0x3] }
 0x27b   :  { %3465 = vst [vmem:[%s5072_s1 + $0x2fe] sm:$0x3] %v3077_v61 }
 0x27c   :  { %3450 = vst [vmem:[%s5072_s1 + $0x2e0] sm:$0x3] %v2987_v62 }
 0x27d   :  { %3451 = vst [vmem:[%s5072_s1 + $0x2e2] sm:$0x3] %v2993_v63 }
 0x27e   :  { %3452 = vst [vmem:[%s5072_s1 + $0x2e4] sm:$0x3] %v2999_v0 }
 0x27f   :  { %3453 = vst [vmem:[%s5072_s1 + $0x2e6] sm:$0x3] %v3005_v1 }
 0x280   :  { %3454 = vst [vmem:[%s5072_s1 + $0x2e8] sm:$0x3] %v3011_v2 }
 0x281   :  { %3455 = vst [vmem:[%s5072_s1 + $0x2ea] sm:$0x3] %v3017_v3 }
 0x282   :  { %3456 = vst [vmem:[%s5072_s1 + $0x2ec] sm:$0x3] %v3023_v23 }
 0x283   :  { %3457 = vst [vmem:[%s5072_s1 + $0x2ee] sm:$0x3] %v3029_v4 }
 0x284   :  { %332 = vst.msk [vmem:[#allocation2 + $0xb40] ss:$8 sm:$0xf0] %vm15_vm0, %v327_v55  }
 0x285   :  { %757 = vst.msk [vmem:[#allocation2 + $0xb41] ss:$8 sm:$0xf] %vm15_vm0, %v4936_v43  }
 0x286   :  { %759 = vst.msk [vmem:[#allocation2 + $0xb41] ss:$8 sm:$0xf0] %vm15_vm0, %v4936_v43  }
 0x28c   :  { %v2939_v5 = vld [vmem:[#allocation2 + $0xb40] sm:$0x3]  ;;  %v2945_v6 = vld [vmem:[#allocation2 + $0xb48] sm:$0x3]  ;;  %v2951_v7 = vld [vmem:[#allocation2 + $0xb50] sm:$0x3] }
 0x28d   :  { %3442 = vst [vmem:[%s5072_s1 + $0x2d0] sm:$0x3] %v2939_v5  ;;  %v2957_v8 = vld [vmem:[#allocation2 + $0xb58] sm:$0x3]  ;;  %v2963_v11 = vld [vmem:[#allocation2 + $0xb60] sm:$0x3] }
 0x28e   :  { %3443 = vst [vmem:[%s5072_s1 + $0x2d2] sm:$0x3] %v2945_v6  ;;  %v2969_v21 = vld [vmem:[#allocation2 + $0xb68] sm:$0x3]  ;;  %v2975_v22 = vld [vmem:[#allocation2 + $0xb70] sm:$0x3] }
 0x28f   :  { %3444 = vst [vmem:[%s5072_s1 + $0x2d4] sm:$0x3] %v2951_v7  ;;  %v2981_v24 = vld [vmem:[#allocation2 + $0xb78] sm:$0x3] }
 0x290   :  { %3445 = vst [vmem:[%s5072_s1 + $0x2d6] sm:$0x3] %v2957_v8 }
 0x291   :  { %3446 = vst [vmem:[%s5072_s1 + $0x2d8] sm:$0x3] %v2963_v11 }
 0x292   :  { %3447 = vst [vmem:[%s5072_s1 + $0x2da] sm:$0x3] %v2969_v21 }
 0x293   :  { %3448 = vst [vmem:[%s5072_s1 + $0x2dc] sm:$0x3] %v2975_v22 }
 0x294   :  { %3449 = vst [vmem:[%s5072_s1 + $0x2de] sm:$0x3] %v2981_v24 }
 0x295   :  { %3082 = vsyncpa [#allocation1], 1 }

// kernel: custom_vit_b_32_forward.1
= control target key start
LH: loop header
LB: loop body
LE: loop exit
PB: predicated region body
PF: predicated region fallthrough
CT: control target
= control target key end

     0   :  { %s3533_s6 = smov 1   ;;  %s3534_s10 = smov 2   ;;  %s4698_s0 = inlined_call_operand.smem [shape: u32[34], index: -1, kind: input, shape index: {}] }
   0x1   :  { %s3583_s5 = sld [smem:[%s4698_s0]]   ;;  %s3535_s14 = smov 3  }
   0x2   :  { %s3588_s9 = sld [smem:[%s4698_s0 + %s3533_s6]]   ;;  %s3536_s18 = smov 4  }
   0x3   :  { %s3593_s13 = sld [smem:[%s4698_s0 + %s3534_s10]]   ;;  %s3537_s22 = smov 5  }
   0x4   :  { %s3598_s17 = sld [smem:[%s4698_s0 + %s3535_s14]]   ;;  %s3538_s26 = smov 6  }
   0x5   :  { %s3603_s21 = sld [smem:[%s4698_s0 + %s3536_s18]]   ;;  %s3539_s30 = smov 7  }
   0x6   :  { %s3608_s25 = sld [smem:[%s4698_s0 + %s3537_s22]]   ;;  %s3540_s4 = smov 8  }
   0x7   :  { %s3613_s29 = sld [smem:[%s4698_s0 + %s3538_s26]]   ;;  %s3541_s10 = smov 9  }
   0x8   :  { %s3618_s3 = sld [smem:[%s4698_s0 + %s3539_s30]]   ;;  %s3542_s15 = smov 10  }
   0x9   :  { %s3623_s8 = sld [smem:[%s4698_s0 + %s3540_s4]]   ;;  %s3543_s20 = smov 11  }
   0xa   :  { %s3628_s14 = sld [smem:[%s4698_s0 + %s3541_s10]]   ;;  %s3544_s26 = smov 12  }
   0xb   :  { %s3633_s19 = sld [smem:[%s4698_s0 + %s3542_s15]]   ;;  %s3545_s1 = smov 13  }
   0xc   :  { %s3638_s24 = sld [smem:[%s4698_s0 + %s3543_s20]]   ;;  %s3546_s7 = smov 14  }
   0xd   :  { %s3643_s30 = sld [smem:[%s4698_s0 + %s3544_s26]]   ;;  %s3547_s15 = smov 15  }
   0xe   :  { %s3648_s6 = sld [smem:[%s4698_s0 + %s3545_s1]]   ;;  %s3548_s22 = smov 16  }
   0xf   :  { %s3653_s12 = sld [smem:[%s4698_s0 + %s3546_s7]]   ;;  %s3549_s28 = smov 17  }
  0x10   :  { %s3658_s20 = sld [smem:[%s4698_s0 + %s3547_s15]]   ;;  %s3550_s7 = smov 18  }
  0x11   :  { %s3663_s27 = sld [smem:[%s4698_s0 + %s3548_s22]]   ;;  %s3551_s15 = smov 19  }
  0x12   :  { %s3668_s4 = sld [smem:[%s4698_s0 + %s3549_s28]]   ;;  %s3552_s22 = smov 20  }
  0x13   :  { %4703 = sst [smem:[#allocation7_spill]] %s3643_s30  ;;  %s3553_s28 = smov 21  }
  0x14   :  { %s3678_s30 = sld [smem:[%s4698_s0 + %s3551_s15]]   ;;  %s3555_s15 = smov 23  }
  0x15   :  { %4704 = sst [smem:[#allocation8_spill]] %s3653_s12 }
  0x16   :  { %s3673_s12 = sld [smem:[%s4698_s0 + %s3550_s7]]   ;;  %s3554_s7 = smov 22  }
  0x17   :  { %4705 = sst [smem:[#allocation9_spill]] %s3663_s27 }
  0x18   :  { %4706 = sst [smem:[#allocation10_spill]] %s3668_s4 }
  0x19   :  { %s3683_s27 = sld [smem:[%s4698_s0 + %s3552_s22]]   ;;  %s3556_s22 = smov 24  }
  0x1a   :  { %4708 = sst [smem:[#allocation12_spill]] %s3678_s30 }
  0x1b   :  { %s3688_s4 = sld [smem:[%s4698_s0 + %s3553_s28]]   ;;  %s3557_s28 = smov 25  }
  0x1c   :  { %4707 = sst [smem:[#allocation11_spill]] %s3673_s12 }
  0x1d   :  { %s3693_s12 = sld [smem:[%s4698_s0 + %s3554_s7]]   ;;  %s3558_s7 = smov 26  }
  0x1e   :  { %s3698_s30 = sld [smem:[%s4698_s0 + %s3555_s15]]   ;;  %s3559_s15 = smov 27  }
  0x1f   :  { %4709 = sst [smem:[#allocation13_spill]] %s3683_s27 }
  0x20   :  { %s3703_s27 = sld [smem:[%s4698_s0 + %s3556_s22]]   ;;  %s3560_s22 = smov 28  }
  0x21   :  { %4710 = sst [smem:[#allocation14_spill]] %s3688_s4 }
  0x22   :  { %s3708_s4 = sld [smem:[%s4698_s0 + %s3557_s28]]   ;;  %s3561_s28 = smov 29  }
  0x23   :  { %4711 = sst [smem:[#allocation15_spill]] %s3693_s12 }
  0x24   :  { %4712 = sst [smem:[#allocation16_spill]] %s3698_s30 }
  0x25   :  { %s3713_s12 = sld [smem:[%s4698_s0 + %s3558_s7]]   ;;  %s3562_s7 = smov 30  }
  0x26   :  { %4713 = sst [smem:[#allocation17_spill]] %s3703_s27 }
  0x27   :  { %s3718_s30 = sld [smem:[%s4698_s0 + %s3559_s15]]   ;;  %s3563_s15 = smov 31  }
  0x28   :  { %4714 = sst [smem:[#allocation18_spill]] %s3708_s4 }
  0x29   :  { %s3723_s27 = sld [smem:[%s4698_s0 + %s3560_s22]]   ;;  %s3564_s22 = smov 32  }
  0x2a   :  { %s3728_s4 = sld [smem:[%s4698_s0 + %s3561_s28]]   ;;  %s3565_s28 = smov 33  }
  0x2b   :  { %4715 = sst [smem:[#allocation19_spill]] %s3713_s12 }
  0x2c   :  { %s3733_s12 = sld [smem:[%s4698_s0 + %s3562_s7]]  }
  0x2d   :  { %4716 = sst [smem:[#allocation20_spill]] %s3718_s30 }
  0x2e   :  { %s3738_s30 = sld [smem:[%s4698_s0 + %s3563_s15]]  }
  0x2f   :  { %4717 = sst [smem:[#allocation21_spill]] %s3723_s27 }
  0x30   :  { %4718 = sst [smem:[#allocation22_spill]] %s3728_s4 }
  0x31   :  { %s3743_s27 = sld [smem:[%s4698_s0 + %s3564_s22]]  }
  0x32   :  { %s3748_s4 = sld [smem:[%s4698_s0 + %s3565_s28]]  }
  0x33   :  { %v178_v0 = vld [vmem:[%s3588_s9 + $0x78] sm:$0xff]  ;;  %v177_v2 = vld [vmem:[%s3588_s9 + $0x70] sm:$0xff]  ;;  %v176_v6 = vld [vmem:[%s3588_s9 + $0x68] sm:$0xff] }
  0x34   :  { %v210_v1 = vld [vmem:[%s3588_s9 + $0x178] sm:$0xff]  ;;  %551 = vmatpush.msra.mxu0 %v178_v0  ;;  %v209_v4 = vld [vmem:[%s3588_s9 + $0x170] sm:$0xff]  ;;  %v208_v8 = vld [vmem:[%s3588_s9 + $0x168] sm:$0xff] }
  0x35   :  { %591 = vmatpush.msra.mxu2 %v210_v1  ;;  %v194_v3 = vld [vmem:[%s3588_s9 + $0xf8] sm:$0xff]  ;;  %v193_v7 = vld [vmem:[%s3588_s9 + $0xf0] sm:$0xff]  ;;  %v192_v10 = vld [vmem:[%s3588_s9 + $0xe8] sm:$0xff] }
  0x36   :  { %v226_v5 = vld [vmem:[%s3588_s9 + $0x1f8] sm:$0xff]  ;;  %571 = vmatpush.msra.mxu1 %v194_v3  ;;  %552 = vmatpush.msra.mxu0 %v177_v2  ;;  %v225_v9 = vld [vmem:[%s3588_s9 + $0x1f0] sm:$0xff]  ;;  %v175_v11 = vld [vmem:[%s3588_s9 + $0x60] sm:$0xff] }
  0x37   :  { %611 = vmatpush.msra.mxu3 %v226_v5  ;;  %592 = vmatpush.msra.mxu2 %v209_v4  ;;  %v207_v12 = vld [vmem:[%s3588_s9 + $0x160] sm:$0xff]  ;;  %v224_v13 = vld [vmem:[%s3588_s9 + $0x1e8] sm:$0xff]  ;;  %v174_v16 = vld [vmem:[%s3588_s9 + $0x58] sm:$0xff] }
  0x38   :  { %572 = vmatpush.msra.mxu1 %v193_v7  ;;  %553 = vmatpush.msra.mxu0 %v176_v6  ;;  %v191_v14 = vld [vmem:[%s3588_s9 + $0xe0] sm:$0xff]  ;;  %v206_v17 = vld [vmem:[%s3588_s9 + $0x158] sm:$0xff]  ;;  %v173_v20 = vld [vmem:[%s3588_s9 + $0x50] sm:$0xff] }
  0x39   :  { %612 = vmatpush.msra.mxu3 %v225_v9  ;;  %593 = vmatpush.msra.mxu2 %v208_v8  ;;  %v223_v15 = vld [vmem:[%s3588_s9 + $0x1e0] sm:$0xff]  ;;  %v190_v18 = vld [vmem:[%s3588_s9 + $0xd8] sm:$0xff]  ;;  %v205_v21 = vld [vmem:[%s3588_s9 + $0x150] sm:$0xff] }
  0x3a   :  { %573 = vmatpush.msra.mxu1 %v192_v10  ;;  %554 = vmatpush.msra.mxu0 %v175_v11  ;;  %v222_v19 = vld [vmem:[%s3588_s9 + $0x1d8] sm:$0xff]  ;;  %v189_v22 = vld [vmem:[%s3588_s9 + $0xd0] sm:$0xff]  ;;  %v172_v24 = vld [vmem:[%s3588_s9 + $0x48] sm:$0xff] }
  0x3b   :  { %613 = vmatpush.msra.mxu3 %v224_v13  ;;  %594 = vmatpush.msra.mxu2 %v207_v12  ;;  %v221_v23 = vld [vmem:[%s3588_s9 + $0x1d0] sm:$0xff]  ;;  %v204_v25 = vld [vmem:[%s3588_s9 + $0x148] sm:$0xff]  ;;  %v171_v28 = vld [vmem:[%s3588_s9 + $0x40] sm:$0xff] }
  0x3c   :  { %574 = vmatpush.msra.mxu1 %v191_v14  ;;  %555 = vmatpush.msra.mxu0 %v174_v16  ;;  %v188_v26 = vld [vmem:[%s3588_s9 + $0xc8] sm:$0xff]  ;;  %v203_v29 = vld [vmem:[%s3588_s9 + $0x140] sm:$0xff]  ;;  %v170_v32 = vld [vmem:[%s3588_s9 + $0x38] sm:$0xff] }
  0x3d   :  { %614 = vmatpush.msra.mxu3 %v223_v15  ;;  %595 = vmatpush.msra.mxu2 %v206_v17  ;;  %v220_v27 = vld [vmem:[%s3588_s9 + $0x1c8] sm:$0xff]  ;;  %v187_v30 = vld [vmem:[%s3588_s9 + $0xc0] sm:$0xff]  ;;  %v202_v33 = vld [vmem:[%s3588_s9 + $0x138] sm:$0xff] }
  0x3e   :  { %575 = vmatpush.msra.mxu1 %v190_v18  ;;  %556 = vmatpush.msra.mxu0 %v173_v20  ;;  %v219_v31 = vld [vmem:[%s3588_s9 + $0x1c0] sm:$0xff]  ;;  %v186_v34 = vld [vmem:[%s3588_s9 + $0xb8] sm:$0xff]  ;;  %v169_v36 = vld [vmem:[%s3588_s9 + $0x30] sm:$0xff] }
  0x3f   :  { %615 = vmatpush.msra.mxu3 %v222_v19  ;;  %596 = vmatpush.msra.mxu2 %v205_v21  ;;  %v218_v35 = vld [vmem:[%s3588_s9 + $0x1b8] sm:$0xff]  ;;  %v201_v37 = vld [vmem:[%s3588_s9 + $0x130] sm:$0xff]  ;;  %v168_v40 = vld [vmem:[%s3588_s9 + $0x28] sm:$0xff] }
  0x40   :  { %576 = vmatpush.msra.mxu1 %v189_v22  ;;  %557 = vmatpush.msra.mxu0 %v172_v24  ;;  %v185_v38 = vld [vmem:[%s3588_s9 + $0xb0] sm:$0xff]  ;;  %v200_v41 = vld [vmem:[%s3588_s9 + $0x128] sm:$0xff]  ;;  %v167_v44 = vld [vmem:[%s3588_s9 + $0x20] sm:$0xff] }
  0x41   :  { %616 = vmatpush.msra.mxu3 %v221_v23  ;;  %597 = vmatpush.msra.mxu2 %v204_v25  ;;  %v217_v39 = vld [vmem:[%s3588_s9 + $0x1b0] sm:$0xff]  ;;  %v184_v42 = vld [vmem:[%s3588_s9 + $0xa8] sm:$0xff]  ;;  %v199_v45 = vld [vmem:[%s3588_s9 + $0x120] sm:$0xff] }
  0x42   :  { %577 = vmatpush.msra.mxu1 %v188_v26  ;;  %558 = vmatpush.msra.mxu0 %v171_v28  ;;  %v216_v43 = vld [vmem:[%s3588_s9 + $0x1a8] sm:$0xff]  ;;  %v183_v46 = vld [vmem:[%s3588_s9 + $0xa0] sm:$0xff]  ;;  %v166_v48 = vld [vmem:[%s3588_s9 + $0x18] sm:$0xff] }
  0x43   :  { %617 = vmatpush.msra.mxu3 %v220_v27  ;;  %598 = vmatpush.msra.mxu2 %v203_v29  ;;  %v215_v47 = vld [vmem:[%s3588_s9 + $0x1a0] sm:$0xff]  ;;  %v198_v49 = vld [vmem:[%s3588_s9 + $0x118] sm:$0xff]  ;;  %v165_v52 = vld [vmem:[%s3588_s9 + $0x10] sm:$0xff] }
  0x44   :  { %578 = vmatpush.msra.mxu1 %v187_v30  ;;  %559 = vmatpush.msra.mxu0 %v170_v32  ;;  %v182_v50 = vld [vmem:[%s3588_s9 + $0x98] sm:$0xff]  ;;  %v197_v53 = vld [vmem:[%s3588_s9 + $0x110] sm:$0xff]  ;;  %v164_v56 = vld [vmem:[%s3588_s9 + $0x8] sm:$0xff] }
  0x45   :  { %618 = vmatpush.msra.mxu3 %v219_v31  ;;  %599 = vmatpush.msra.mxu2 %v202_v33  ;;  %v214_v51 = vld [vmem:[%s3588_s9 + $0x198] sm:$0xff]  ;;  %v181_v54 = vld [vmem:[%s3588_s9 + $0x90] sm:$0xff]  ;;  %v196_v57 = vld [vmem:[%s3588_s9 + $0x108] sm:$0xff] }
  0x46   :  { %579 = vmatpush.msra.mxu1 %v186_v34  ;;  %560 = vmatpush.msra.mxu0 %v169_v36  ;;  %v213_v55 = vld [vmem:[%s3588_s9 + $0x190] sm:$0xff]  ;;  %v180_v58 = vld [vmem:[%s3588_s9 + $0x88] sm:$0xff]  ;;  %v163_v60 = vld [vmem:[%s3588_s9] sm:$0xff] }
  0x47   :  { %619 = vmatpush.msra.mxu3 %v218_v35  ;;  %600 = vmatpush.msra.mxu2 %v201_v37  ;;  %v212_v59 = vld [vmem:[%s3588_s9 + $0x188] sm:$0xff]  ;;  %v195_v61 = vld [vmem:[%s3588_s9 + $0x100] sm:$0xff]  ;;  %v242_v62 = vld [vmem:[%s3588_s9 + $0x278] sm:$0xff] }
  0x48   :  { %580 = vmatpush.msra.mxu1 %v185_v38  ;;  %561 = vmatpush.msra.mxu0 %v168_v40  ;;  %v274_v63 = vld [vmem:[%s3588_s9 + $0x378] sm:$0xff]  ;;  %v179_v0 = vld [vmem:[%s3588_s9 + $0x80] sm:$0xff]  ;;  %v241_v2 = vld [vmem:[%s3588_s9 + $0x270] sm:$0xff] }
  0x49   :  { %620 = vmatpush.msra.mxu3 %v217_v39  ;;  %601 = vmatpush.msra.mxu2 %v200_v41  ;;  %v211_v1 = vld [vmem:[%s3588_s9 + $0x180] sm:$0xff]  ;;  %v258_v3 = vld [vmem:[%s3588_s9 + $0x2f8] sm:$0xff]  ;;  %v273_v4 = vld [vmem:[%s3588_s9 + $0x370] sm:$0xff] }
  0x4a   :  { %581 = vmatpush.msra.mxu1 %v184_v42  ;;  %562 = vmatpush.msra.mxu0 %v167_v44  ;;  %v290_v5 = vld [vmem:[%s3588_s9 + $0x3f8] sm:$0xff]  ;;  %v240_v6 = vld [vmem:[%s3588_s9 + $0x268] sm:$0xff]  ;;  %v257_v7 = vld [vmem:[%s3588_s9 + $0x2f0] sm:$0xff] }
  0x4b   :  { %621 = vmatpush.msra.mxu3 %v216_v43  ;;  %602 = vmatpush.msra.mxu2 %v199_v45  ;;  %v272_v8 = vld [vmem:[%s3588_s9 + $0x368] sm:$0xff]  ;;  %v289_v9 = vld [vmem:[%s3588_s9 + $0x3f0] sm:$0xff]  ;;  %v239_v10 = vld [vmem:[%s3588_s9 + $0x260] sm:$0xff] }
  0x4c   :  { %582 = vmatpush.msra.mxu1 %v183_v46  ;;  %563 = vmatpush.msra.mxu0 %v166_v48  ;;  %v256_v11 = vld [vmem:[%s3588_s9 + $0x2e8] sm:$0xff]  ;;  %v271_v12 = vld [vmem:[%s3588_s9 + $0x360] sm:$0xff]  ;;  %v238_v14 = vld [vmem:[%s3588_s9 + $0x258] sm:$0xff] }
  0x4d   :  { %622 = vmatpush.msra.mxu3 %v215_v47  ;;  %603 = vmatpush.msra.mxu2 %v198_v49  ;;  %v288_v13 = vld [vmem:[%s3588_s9 + $0x3e8] sm:$0xff]  ;;  %v255_v15 = vld [vmem:[%s3588_s9 + $0x2e0] sm:$0xff]  ;;  %v270_v16 = vld [vmem:[%s3588_s9 + $0x358] sm:$0xff] }
  0x4e   :  { %583 = vmatpush.msra.mxu1 %v182_v50  ;;  %564 = vmatpush.msra.mxu0 %v165_v52  ;;  %v287_v17 = vld [vmem:[%s3588_s9 + $0x3e0] sm:$0xff]  ;;  %v237_v18 = vld [vmem:[%s3588_s9 + $0x250] sm:$0xff]  ;;  %v254_v19 = vld [vmem:[%s3588_s9 + $0x2d8] sm:$0xff] }
  0x4f   :  { %623 = vmatpush.msra.mxu3 %v214_v51  ;;  %604 = vmatpush.msra.mxu2 %v197_v53  ;;  %v269_v20 = vld [vmem:[%s3588_s9 + $0x350] sm:$0xff]  ;;  %v286_v21 = vld [vmem:[%s3588_s9 + $0x3d8] sm:$0xff]  ;;  %v236_v22 = vld [vmem:[%s3588_s9 + $0x248] sm:$0xff] }
  0x50   :  { %584 = vmatpush.msra.mxu1 %v181_v54  ;;  %565 = vmatpush.msra.mxu0 %v164_v56  ;;  %v253_v23 = vld [vmem:[%s3588_s9 + $0x2d0] sm:$0xff]  ;;  %v268_v24 = vld [vmem:[%s3588_s9 + $0x348] sm:$0xff]  ;;  %v235_v26 = vld [vmem:[%s3588_s9 + $0x240] sm:$0xff] }
  0x51   :  { %624 = vmatpush.msra.mxu3 %v213_v55  ;;  %605 = vmatpush.msra.mxu2 %v196_v57  ;;  %v285_v25 = vld [vmem:[%s3588_s9 + $0x3d0] sm:$0xff]  ;;  %v252_v27 = vld [vmem:[%s3588_s9 + $0x2c8] sm:$0xff]  ;;  %v267_v28 = vld [vmem:[%s3588_s9 + $0x340] sm:$0xff] }
  0x52   :  { %585 = vmatpush.msra.mxu1 %v180_v58  ;;  %566 = vmatpush.msra.mxu0 %v163_v60  ;;  %v284_v29 = vld [vmem:[%s3588_s9 + $0x3c8] sm:$0xff]  ;;  %v234_v30 = vld [vmem:[%s3588_s9 + $0x238] sm:$0xff]  ;;  %v251_v31 = vld [vmem:[%s3588_s9 + $0x2c0] sm:$0xff] }
  0x53   :  { %625 = vmatpush.msra.mxu3 %v212_v59  ;;  %606 = vmatpush.msra.mxu2 %v195_v61  ;;  %v266_v32 = vld [vmem:[%s3588_s9 + $0x338] sm:$0xff]  ;;  %v283_v33 = vld [vmem:[%s3588_s9 + $0x3c0] sm:$0xff]  ;;  %v233_v34 = vld [vmem:[%s3588_s9 + $0x230] sm:$0xff] }
  0x54   :  { %631 = vmatpush.msrb.mxu0 %v242_v62  ;;  %586 = vmatpush.msra.mxu1 %v179_v0  ;;  %v250_v35 = vld [vmem:[%s3588_s9 + $0x2b8] sm:$0xff]  ;;  %v265_v36 = vld [vmem:[%s3588_s9 + $0x330] sm:$0xff]  ;;  %v232_v38 = vld [vmem:[%s3588_s9 + $0x228] sm:$0xff] }
  0x55   :  { %671 = vmatpush.msrb.mxu2 %v274_v63  ;;  %626 = vmatpush.msra.mxu3 %v211_v1  ;;  %v282_v37 = vld [vmem:[%s3588_s9 + $0x3b8] sm:$0xff]  ;;  %v249_v39 = vld [vmem:[%s3588_s9 + $0x2b0] sm:$0xff]  ;;  %v264_v40 = vld [vmem:[%s3588_s9 + $0x328] sm:$0xff] }
  0x56   :  { %632 = vmatpush.msrb.mxu0 %v241_v2  ;;  %651 = vmatpush.msrb.mxu1 %v258_v3  ;;  %v281_v41 = vld [vmem:[%s3588_s9 + $0x3b0] sm:$0xff]  ;;  %v231_v42 = vld [vmem:[%s3588_s9 + $0x220] sm:$0xff]  ;;  %v248_v43 = vld [vmem:[%s3588_s9 + $0x2a8] sm:$0xff] }
  0x57   :  { %672 = vmatpush.msrb.mxu2 %v273_v4  ;;  %691 = vmatpush.msrb.mxu3 %v290_v5  ;;  %v263_v44 = vld [vmem:[%s3588_s9 + $0x320] sm:$0xff]  ;;  %v280_v45 = vld [vmem:[%s3588_s9 + $0x3a8] sm:$0xff]  ;;  %v230_v46 = vld [vmem:[%s3588_s9 + $0x218] sm:$0xff] }
  0x58   :  { %633 = vmatpush.msrb.mxu0 %v240_v6  ;;  %652 = vmatpush.msrb.mxu1 %v257_v7  ;;  %v247_v47 = vld [vmem:[%s3588_s9 + $0x2a0] sm:$0xff]  ;;  %v262_v48 = vld [vmem:[%s3588_s9 + $0x318] sm:$0xff]  ;;  %v229_v50 = vld [vmem:[%s3588_s9 + $0x210] sm:$0xff] }
  0x59   :  { %673 = vmatpush.msrb.mxu2 %v272_v8  ;;  %692 = vmatpush.msrb.mxu3 %v289_v9  ;;  %v279_v49 = vld [vmem:[%s3588_s9 + $0x3a0] sm:$0xff]  ;;  %v246_v51 = vld [vmem:[%s3588_s9 + $0x298] sm:$0xff]  ;;  %v261_v52 = vld [vmem:[%s3588_s9 + $0x310] sm:$0xff] }
  0x5a   :  { %634 = vmatpush.msrb.mxu0 %v239_v10  ;;  %653 = vmatpush.msrb.mxu1 %v256_v11  ;;  %v278_v53 = vld [vmem:[%s3588_s9 + $0x398] sm:$0xff]  ;;  %v228_v54 = vld [vmem:[%s3588_s9 + $0x208] sm:$0xff]  ;;  %v245_v55 = vld [vmem:[%s3588_s9 + $0x290] sm:$0xff] }
  0x5b   :  { %674 = vmatpush.msrb.mxu2 %v271_v12  ;;  %693 = vmatpush.msrb.mxu3 %v288_v13  ;;  %v260_v56 = vld [vmem:[%s3588_s9 + $0x308] sm:$0xff]  ;;  %v277_v57 = vld [vmem:[%s3588_s9 + $0x390] sm:$0xff]  ;;  %v227_v58 = vld [vmem:[%s3588_s9 + $0x200] sm:$0xff] }
  0x5c   :  { %635 = vmatpush.msrb.mxu0 %v238_v14  ;;  %654 = vmatpush.msrb.mxu1 %v255_v15  ;;  %v244_v59 = vld [vmem:[%s3588_s9 + $0x288] sm:$0xff]  ;;  %v259_v60 = vld [vmem:[%s3588_s9 + $0x300] sm:$0xff]  ;;  %v141_v63 = vld [vmem:[%s3583_s5 + $0x10] sm:$0xff] }
  0x5d   :  { %675 = vmatpush.msrb.mxu2 %v270_v16  ;;  %694 = vmatpush.msrb.mxu3 %v287_v17  ;;  %v276_v61 = vld [vmem:[%s3588_s9 + $0x388] sm:$0xff]  ;;  %v139_v62 = vld [vmem:[%s3583_s5] sm:$0xff]  ;;  %v306_v0 = vld [vmem:[%s3588_s9 + $0x478] sm:$0xff] }
  0x5e   :  { %636 = vmatpush.msrb.mxu0 %v237_v18  ;;  %655 = vmatpush.msrb.mxu1 %v254_v19  ;;  %v338_v1 = vld [vmem:[%s3588_s9 + $0x578] sm:$0xff]  ;;  %v243_v2 = vld [vmem:[%s3588_s9 + $0x280] sm:$0xff]  ;;  %v140_v4 = vld [vmem:[%s3583_s5 + $0x8] sm:$0xff] }
  0x5f   :  { %676 = vmatpush.msrb.mxu2 %v269_v20  ;;  %695 = vmatpush.msrb.mxu3 %v286_v21  ;;  %v275_v3 = vld [vmem:[%s3588_s9 + $0x380] sm:$0xff]  ;;  %v142_v5 = vld [vmem:[%s3583_s5 + $0x18] sm:$0xff]  ;;  %v305_v6 = vld [vmem:[%s3588_s9 + $0x470] sm:$0xff] }
  0x60   :  { %637 = vmatpush.msrb.mxu0 %v236_v22  ;;  %656 = vmatpush.msrb.mxu1 %v253_v23  ;;  %v322_v7 = vld [vmem:[%s3588_s9 + $0x4f8] sm:$0xff]  ;;  %v337_v8 = vld [vmem:[%s3588_s9 + $0x570] sm:$0xff]  ;;  %v304_v10 = vld [vmem:[%s3588_s9 + $0x468] sm:$0xff] }
  0x61   :  { %677 = vmatpush.msrb.mxu2 %v268_v24  ;;  %696 = vmatpush.msrb.mxu3 %v285_v25  ;;  %v354_v9 = vld [vmem:[%s3588_s9 + $0x5f8] sm:$0xff]  ;;  %v321_v11 = vld [vmem:[%s3588_s9 + $0x4f0] sm:$0xff]  ;;  %v336_v12 = vld [vmem:[%s3588_s9 + $0x568] sm:$0xff] }
  0x62   :  { %638 = vmatpush.msrb.mxu0 %v235_v26  ;;  %657 = vmatpush.msrb.mxu1 %v252_v27  ;;  %v353_v13 = vld [vmem:[%s3588_s9 + $0x5f0] sm:$0xff]  ;;  %v303_v14 = vld [vmem:[%s3588_s9 + $0x460] sm:$0xff]  ;;  %v320_v15 = vld [vmem:[%s3588_s9 + $0x4e8] sm:$0xff] }
  0x63   :  { %678 = vmatpush.msrb.mxu2 %v267_v28  ;;  %697 = vmatpush.msrb.mxu3 %v284_v29  ;;  %v335_v16 = vld [vmem:[%s3588_s9 + $0x560] sm:$0xff]  ;;  %v352_v17 = vld [vmem:[%s3588_s9 + $0x5e8] sm:$0xff]  ;;  %v145_v18 = vld [vmem:[%s3583_s5 + $0x30] sm:$0xff] }
  0x64   :  { %639 = vmatpush.msrb.mxu0 %v234_v30  ;;  %658 = vmatpush.msrb.mxu1 %v251_v31  ;;  %v302_v19 = vld [vmem:[%s3588_s9 + $0x458] sm:$0xff]  ;;  %v319_v20 = vld [vmem:[%s3588_s9 + $0x4e0] sm:$0xff]  ;;  %v301_v25 = vld [vmem:[%s3588_s9 + $0x450] sm:$0xff] }
  0x65   :  { %679 = vmatpush.msrb.mxu2 %v266_v32  ;;  %698 = vmatpush.msrb.mxu3 %v283_v33  ;;  %v334_v21 = vld [vmem:[%s3588_s9 + $0x558] sm:$0xff]  ;;  %v351_v22 = vld [vmem:[%s3588_s9 + $0x5e0] sm:$0xff]  ;;  %v333_v27 = vld [vmem:[%s3588_s9 + $0x550] sm:$0xff] }
  0x66   :  { %640 = vmatpush.msrb.mxu0 %v233_v34  ;;  %659 = vmatpush.msrb.mxu1 %v250_v35  ;;  %v143_v23 = vld [vmem:[%s3583_s5 + $0x20] sm:$0xff]  ;;  %v146_v24 = vld [vmem:[%s3583_s5 + $0x38] sm:$0xff]  ;;  %v144_v29 = vld [vmem:[%s3583_s5 + $0x28] sm:$0xff] }
  0x67   :  { %680 = vmatpush.msrb.mxu2 %v265_v36  ;;  %699 = vmatpush.msrb.mxu3 %v282_v37  ;;  %v318_v26 = vld [vmem:[%s3588_s9 + $0x4d8] sm:$0xff]  ;;  %v300_v30 = vld [vmem:[%s3588_s9 + $0x448] sm:$0xff]  ;;  %v317_v31 = vld [vmem:[%s3588_s9 + $0x4d0] sm:$0xff] }
  0x68   :  { %641 = vmatpush.msrb.mxu0 %v232_v38  ;;  %660 = vmatpush.msrb.mxu1 %v249_v39  ;;  %v350_v28 = vld [vmem:[%s3588_s9 + $0x5d8] sm:$0xff]  ;;  %v332_v32 = vld [vmem:[%s3588_s9 + $0x548] sm:$0xff]  ;;  %v349_v33 = vld [vmem:[%s3588_s9 + $0x5d0] sm:$0xff] }
  0x69   :  { %681 = vmatpush.msrb.mxu2 %v264_v40  ;;  %700 = vmatpush.msrb.mxu3 %v281_v41  ;;  %v299_v34 = vld [vmem:[%s3588_s9 + $0x440] sm:$0xff]  ;;  %v316_v35 = vld [vmem:[%s3588_s9 + $0x4c8] sm:$0xff]  ;;  %v298_v38 = vld [vmem:[%s3588_s9 + $0x438] sm:$0xff] }
  0x6a   :  { %642 = vmatpush.msrb.mxu0 %v231_v42  ;;  %661 = vmatpush.msrb.mxu1 %v248_v43  ;;  %v331_v36 = vld [vmem:[%s3588_s9 + $0x540] sm:$0xff]  ;;  %v348_v37 = vld [vmem:[%s3588_s9 + $0x5c8] sm:$0xff] }
  0x6b   :  { %682 = vmatpush.msrb.mxu2 %v263_v44  ;;  %701 = vmatpush.msrb.mxu3 %v280_v45  ;;  %v315_v39 = vld [vmem:[%s3588_s9 + $0x4c0] sm:$0xff] }
  0x6c   :  { %643 = vmatpush.msrb.mxu0 %v230_v46  ;;  %662 = vmatpush.msrb.mxu1 %v247_v47 }
  0x6d   :  { %683 = vmatpush.msrb.mxu2 %v262_v48  ;;  %702 = vmatpush.msrb.mxu3 %v279_v49 }
  0x6e   :  { %644 = vmatpush.msrb.mxu0 %v229_v50  ;;  %663 = vmatpush.msrb.mxu1 %v246_v51 }
  0x6f   :  { %684 = vmatpush.msrb.mxu2 %v261_v52  ;;  %703 = vmatpush.msrb.mxu3 %v278_v53 }
  0x70   :  { %645 = vmatpush.msrb.mxu0 %v228_v54  ;;  %664 = vmatpush.msrb.mxu1 %v245_v55 }
  0x71   :  { %685 = vmatpush.msrb.mxu2 %v260_v56  ;;  %704 = vmatpush.msrb.mxu3 %v277_v57 }
  0x72   :  { %646 = vmatpush.msrb.mxu0 %v227_v58  ;;  %665 = vmatpush.msrb.mxu1 %v244_v59 }
  0x73   :  { %686 = vmatpush.msrb.mxu2 %v259_v60  ;;  %705 = vmatpush.msrb.mxu3 %v276_v61 }
  0x74   :  { %567 = vmatmul.f32.vlgmr.msra.gmra.mxu0 %v139_v62  ;;  %607 = vmatmul.f32.vlgmr.msra.gmra.mxu2 %v141_v63 }
  0x75   :  { %711 = vmatpush.msra.mxu0 %v306_v0  ;;  %751 = vmatpush.msra.mxu2 %v338_v1 }
  0x76   :  { %666 = vmatpush.msrb.mxu1 %v243_v2  ;;  %706 = vmatpush.msrb.mxu3 %v275_v3 }
  0x77   :  { %587 = vmatmul.f32.vlgmr.msra.gmra.mxu1 %v140_v4  ;;  %627 = vmatmul.f32.vlgmr.msra.gmra.mxu3 %v142_v5 }
  0x78   :  { %712 = vmatpush.msra.mxu0 %v305_v6  ;;  %731 = vmatpush.msra.mxu1 %v322_v7 }
  0x79   :  { %752 = vmatpush.msra.mxu2 %v337_v8  ;;  %771 = vmatpush.msra.mxu3 %v354_v9 }
  0x7a   :  { %713 = vmatpush.msra.mxu0 %v304_v10  ;;  %732 = vmatpush.msra.mxu1 %v321_v11 }
  0x7b   :  { %753 = vmatpush.msra.mxu2 %v336_v12  ;;  %772 = vmatpush.msra.mxu3 %v353_v13 }
  0x7c   :  { %714 = vmatpush.msra.mxu0 %v303_v14  ;;  %733 = vmatpush.msra.mxu1 %v320_v15 }
  0x7d   :  { %754 = vmatpush.msra.mxu2 %v335_v16  ;;  %773 = vmatpush.msra.mxu3 %v352_v17 }
  0x7e   :  { %687 = vmatmul.f32.vlgmr.msrb.gmra.mxu2 %v145_v18  ;;  %715 = vmatpush.msra.mxu0 %v302_v19 }
  0x7f   :  { %734 = vmatpush.msra.mxu1 %v319_v20  ;;  %755 = vmatpush.msra.mxu2 %v334_v21 }
  0x80   :  { %774 = vmatpush.msra.mxu3 %v351_v22  ;;  %647 = vmatmul.f32.vlgmr.msrb.gmra.mxu0 %v143_v23 }
  0x81   :  { %707 = vmatmul.f32.vlgmr.msrb.gmra.mxu3 %v146_v24  ;;  %716 = vmatpush.msra.mxu0 %v301_v25 }
  0x82   :  { %735 = vmatpush.msra.mxu1 %v318_v26  ;;  %756 = vmatpush.msra.mxu2 %v333_v27 }
  0x83   :  { %775 = vmatpush.msra.mxu3 %v350_v28  ;;  %667 = vmatmul.f32.vlgmr.msrb.gmra.mxu1 %v144_v29 }
  0x84   :  { %717 = vmatpush.msra.mxu0 %v300_v30  ;;  %736 = vmatpush.msra.mxu1 %v317_v31 }
  0x85   :  { %757 = vmatpush.msra.mxu2 %v332_v32  ;;  %776 = vmatpush.msra.mxu3 %v349_v33 }
  0x86   :  { %72 = vsyncpa [#allocation5], 0  ;;  %718 = vmatpush.msra.mxu0 %v299_v34  ;;  %737 = vmatpush.msra.mxu1 %v316_v35  ;;  %v330_v40 = vld [vmem:[%s3588_s9 + $0x538] sm:$0xff]  ;;  %v347_v41 = vld [vmem:[%s3588_s9 + $0x5c0] sm:$0xff]  ;;  %vm1034_vm0 = vcmask 516096   ;;  %vm1040_vm1 = vcmask 519168  }
  0x87   :  { %758 = vmatpush.msra.mxu2 %v331_v36  ;;  %777 = vmatpush.msra.mxu3 %v348_v37  ;;  %v297_v42 = vld [vmem:[%s3588_s9 + $0x430] sm:$0xff]  ;;  %v314_v43 = vld [vmem:[%s3588_s9 + $0x4b8] sm:$0xff]  ;;  %v296_v46 = vld [vmem:[%s3588_s9 + $0x428] sm:$0xff]  ;;  %vm1046_vm2 = vcmask 523268   ;;  %vm1110_vm3 = vcmask 517120   ;;  %vm1106_vm4 = vcmask 523264  }
  0x88   :  { %719 = vmatpush.msra.mxu0 %v298_v38  ;;  %738 = vmatpush.msra.mxu1 %v315_v39  ;;  %v329_v44 = vld [vmem:[%s3588_s9 + $0x530] sm:$0xff]  ;;  %v346_v45 = vld [vmem:[%s3588_s9 + $0x5b8] sm:$0xff]  ;;  %v328_v48 = vld [vmem:[%s3588_s9 + $0x528] sm:$0xff]  ;;  %vm1270_vm12 = vcmask 1044480   ;;  %s3567_s0 = smov 32   ;;  %vm1229_vm13 = vcmask 130048  }
  0x89   :  { %759 = vmatpush.msra.mxu2 %v330_v40  ;;  %778 = vmatpush.msra.mxu3 %v347_v41  ;;  %v313_v47 = vld [vmem:[%s3588_s9 + $0x4b0] sm:$0xff]  ;;  %v295_v50 = vld [vmem:[%s3588_s9 + $0x420] sm:$0xff]  ;;  %v312_v51 = vld [vmem:[%s3588_s9 + $0x4a8] sm:$0xff]  ;;  %vm1254_vm14 = vcmask 36864   ;;  %vm1594_vm15 = vcmask 1042432   ;;  %s4727_s7 = sld [smem:[#allocation15_spill]] }
  0x8a   :  { %720 = vmatpush.msra.mxu0 %v297_v42  ;;  %739 = vmatpush.msra.mxu1 %v314_v43  ;;  %v345_v49 = vld [vmem:[%s3588_s9 + $0x5b0] sm:$0xff]  ;;  %v327_v52 = vld [vmem:[%s3588_s9 + $0x520] sm:$0xff]  ;;  %v344_v53 = vld [vmem:[%s3588_s9 + $0x5a8] sm:$0xff]  ;;  %s4728_s10 = sld [smem:[#allocation18_spill]]  ;;  %s3220_s28 = sshll.u32 %s3748_s4, 4  ;;  %s3221_s28 = int_to_ptr.hbm [resolvable:$true] %s3220_s28 }
  0x8b   :  { %760 = vmatpush.msra.mxu2 %v329_v44  ;;  %779 = vmatpush.msra.mxu3 %v346_v45  ;;  %v294_v54 = vld [vmem:[%s3588_s9 + $0x418] sm:$0xff]  ;;  %v311_v55 = vld [vmem:[%s3588_s9 + $0x4a0] sm:$0xff]  ;;  %v293_v58 = vld [vmem:[%s3588_s9 + $0x410] sm:$0xff]  ;;  %s4729_s11 = sld [smem:[#allocation20_spill]]  ;;  %s3519_s1 = sshra.s32 %s3221_s28, 4  ;;  %s3520_s1 = int_to_ptr.hbm [resolvable:$true] %s3519_s1 }
  0x8c   :  { %721 = vmatpush.msra.mxu0 %v296_v46  ;;  %740 = vmatpush.msra.mxu1 %v313_v47  ;;  %v326_v56 = vld [vmem:[%s3588_s9 + $0x518] sm:$0xff]  ;;  %v343_v57 = vld [vmem:[%s3588_s9 + $0x5a0] sm:$0xff]  ;;  %v325_v60 = vld [vmem:[%s3588_s9 + $0x510] sm:$0xff]  ;;  %s4730_s15 = sld [smem:[#allocation16_spill]]  ;;  %s3521_s2 = scalar_lea.hbm %s3520_s1, 2 }
  0x8d   :  { %761 = vmatpush.msra.mxu2 %v328_v48  ;;  %780 = vmatpush.msra.mxu3 %v345_v49  ;;  %v310_v59 = vld [vmem:[%s3588_s9 + $0x498] sm:$0xff]  ;;  %v292_v62 = vld [vmem:[%s3588_s9 + $0x408] sm:$0xff]  ;;  %v309_v63 = vld [vmem:[%s3588_s9 + $0x490] sm:$0xff]  ;;  %s4731_s16 = sld [smem:[#allocation17_spill]]  ;;  %p3522_p0 = scmp.ne.s32.totalorder %s3520_s1, %s3521_s2 }
  0x8e   :  { %722 = vmatpush.msra.mxu0 %v295_v50  ;;  %741 = vmatpush.msra.mxu1 %v312_v51  ;;  %v342_v61 = vld [vmem:[%s3588_s9 + $0x598] sm:$0xff]  ;;  %v324_v0 = vld [vmem:[%s3588_s9 + $0x508] sm:$0xff]  ;;  %v341_v1 = vld [vmem:[%s3588_s9 + $0x590] sm:$0xff]  ;;  %s4732_s18 = sld [smem:[#allocation19_spill]]  ;;  %p3524_p1 = scmp.lt.s32.totalorder %s3520_s1, %s3748_s4 }
  0x8f   :  { %762 = vmatpush.msra.mxu2 %v327_v52  ;;  %781 = vmatpush.msra.mxu3 %v344_v53  ;;  %v291_v2 = vld [vmem:[%s3588_s9 + $0x400] sm:$0xff]  ;;  %v308_v3 = vld [vmem:[%s3588_s9 + $0x488] sm:$0xff]  ;;  %v149_v7 = vld [vmem:[%s3583_s5 + $0x50] sm:$0xff]  ;;  %s4733_s22 = sld [smem:[#allocation21_spill]] }
  0x90   :  { %723 = vmatpush.msra.mxu0 %v294_v54  ;;  %742 = vmatpush.msra.mxu1 %v311_v55  ;;  %v323_v4 = vld [vmem:[%s3588_s9 + $0x500] sm:$0xff]  ;;  %v340_v5 = vld [vmem:[%s3588_s9 + $0x588] sm:$0xff]  ;;  %v370_v8 = vld [vmem:[%s3588_s9 + $0x678] sm:$0xff]  ;;  %s4734_s23 = sld [smem:[#allocation22_spill]] }
  0x91   :  { %763 = vmatpush.msra.mxu2 %v326_v56  ;;  %782 = vmatpush.msra.mxu3 %v343_v57  ;;  %v147_v6 = vld [vmem:[%s3583_s5 + $0x40] sm:$0xff]  ;;  %v402_v9 = vld [vmem:[%s3588_s9 + $0x778] sm:$0xff]  ;;  %v148_v12 = vld [vmem:[%s3583_s5 + $0x48] sm:$0xff] }
  0x92   :  { %724 = vmatpush.msra.mxu0 %v293_v58  ;;  %743 = vmatpush.msra.mxu1 %v310_v59  ;;  %v307_v10 = vld [vmem:[%s3588_s9 + $0x480] sm:$0xff]  ;;  %v150_v13 = vld [vmem:[%s3583_s5 + $0x58] sm:$0xff]  ;;  %v369_v14 = vld [vmem:[%s3588_s9 + $0x670] sm:$0xff] }
  0x93   :  { %764 = vmatpush.msra.mxu2 %v325_v60  ;;  %783 = vmatpush.msra.mxu3 %v342_v61  ;;  %v339_v11 = vld [vmem:[%s3588_s9 + $0x580] sm:$0xff]  ;;  %v386_v15 = vld [vmem:[%s3588_s9 + $0x6f8] sm:$0xff]  ;;  %v401_v16 = vld [vmem:[%s3588_s9 + $0x770] sm:$0xff] }
  0x94   :  { %725 = vmatpush.msra.mxu0 %v292_v62  ;;  %744 = vmatpush.msra.mxu1 %v309_v63  ;;  %v418_v17 = vld [vmem:[%s3588_s9 + $0x7f8] sm:$0xff]  ;;  %v368_v18 = vld [vmem:[%s3588_s9 + $0x668] sm:$0xff]  ;;  %v385_v19 = vld [vmem:[%s3588_s9 + $0x6f0] sm:$0xff] }
  0x95   :  { %765 = vmatpush.msra.mxu2 %v324_v0  ;;  %784 = vmatpush.msra.mxu3 %v341_v1  ;;  %v400_v20 = vld [vmem:[%s3588_s9 + $0x768] sm:$0xff]  ;;  %v417_v21 = vld [vmem:[%s3588_s9 + $0x7f0] sm:$0xff]  ;;  %v367_v22 = vld [vmem:[%s3588_s9 + $0x660] sm:$0xff] }
  0x96   :  { %726 = vmatpush.msra.mxu0 %v291_v2  ;;  %745 = vmatpush.msra.mxu1 %v308_v3  ;;  %v384_v23 = vld [vmem:[%s3588_s9 + $0x6e8] sm:$0xff]  ;;  %v399_v24 = vld [vmem:[%s3588_s9 + $0x760] sm:$0xff]  ;;  %v366_v26 = vld [vmem:[%s3588_s9 + $0x658] sm:$0xff] }
  0x97   :  { %766 = vmatpush.msra.mxu2 %v323_v4  ;;  %785 = vmatpush.msra.mxu3 %v340_v5  ;;  %v416_v25 = vld [vmem:[%s3588_s9 + $0x7e8] sm:$0xff]  ;;  %v383_v27 = vld [vmem:[%s3588_s9 + $0x6e0] sm:$0xff]  ;;  %v398_v28 = vld [vmem:[%s3588_s9 + $0x758] sm:$0xff] }
  0x98   :  { %727 = vmatmul.f32.vlgmr.msra.gmra.mxu0 %v147_v6  ;;  %767 = vmatmul.f32.vlgmr.msra.gmra.mxu2 %v149_v7  ;;  %v415_v29 = vld [vmem:[%s3588_s9 + $0x7e0] sm:$0xff]  ;;  %v365_v30 = vld [vmem:[%s3588_s9 + $0x650] sm:$0xff]  ;;  %v382_v31 = vld [vmem:[%s3588_s9 + $0x6d8] sm:$0xff] }
  0x99   :  { %791 = vmatpush.msrb.mxu0 %v370_v8  ;;  %831 = vmatpush.msrb.mxu2 %v402_v9  ;;  %v397_v32 = vld [vmem:[%s3588_s9 + $0x750] sm:$0xff]  ;;  %v414_v33 = vld [vmem:[%s3588_s9 + $0x7d8] sm:$0xff]  ;;  %v364_v34 = vld [vmem:[%s3588_s9 + $0x648] sm:$0xff] }
  0x9a   :  { %746 = vmatpush.msra.mxu1 %v307_v10  ;;  %786 = vmatpush.msra.mxu3 %v339_v11  ;;  %v381_v35 = vld [vmem:[%s3588_s9 + $0x6d0] sm:$0xff]  ;;  %v396_v36 = vld [vmem:[%s3588_s9 + $0x748] sm:$0xff]  ;;  %v363_v38 = vld [vmem:[%s3588_s9 + $0x640] sm:$0xff] }
  0x9b   :  { %747 = vmatmul.f32.vlgmr.msra.gmra.mxu1 %v148_v12  ;;  %787 = vmatmul.f32.vlgmr.msra.gmra.mxu3 %v150_v13  ;;  %v413_v37 = vld [vmem:[%s3588_s9 + $0x7d0] sm:$0xff]  ;;  %v380_v39 = vld [vmem:[%s3588_s9 + $0x6c8] sm:$0xff]  ;;  %v395_v40 = vld [vmem:[%s3588_s9 + $0x740] sm:$0xff] }
  0x9c   :  { %792 = vmatpush.msrb.mxu0 %v369_v14  ;;  %811 = vmatpush.msrb.mxu1 %v386_v15  ;;  %v412_v41 = vld [vmem:[%s3588_s9 + $0x7c8] sm:$0xff]  ;;  %v362_v42 = vld [vmem:[%s3588_s9 + $0x638] sm:$0xff]  ;;  %v379_v43 = vld [vmem:[%s3588_s9 + $0x6c0] sm:$0xff] }
  0x9d   :  { %832 = vmatpush.msrb.mxu2 %v401_v16  ;;  %851 = vmatpush.msrb.mxu3 %v418_v17  ;;  %v394_v44 = vld [vmem:[%s3588_s9 + $0x738] sm:$0xff]  ;;  %v411_v45 = vld [vmem:[%s3588_s9 + $0x7c0] sm:$0xff]  ;;  %v361_v46 = vld [vmem:[%s3588_s9 + $0x630] sm:$0xff] }
  0x9e   :  { %793 = vmatpush.msrb.mxu0 %v368_v18  ;;  %812 = vmatpush.msrb.mxu1 %v385_v19  ;;  %v378_v47 = vld [vmem:[%s3588_s9 + $0x6b8] sm:$0xff]  ;;  %v393_v48 = vld [vmem:[%s3588_s9 + $0x730] sm:$0xff]  ;;  %v360_v50 = vld [vmem:[%s3588_s9 + $0x628] sm:$0xff] }
  0x9f   :  { %833 = vmatpush.msrb.mxu2 %v400_v20  ;;  %852 = vmatpush.msrb.mxu3 %v417_v21  ;;  %v410_v49 = vld [vmem:[%s3588_s9 + $0x7b8] sm:$0xff]  ;;  %v377_v51 = vld [vmem:[%s3588_s9 + $0x6b0] sm:$0xff]  ;;  %v392_v52 = vld [vmem:[%s3588_s9 + $0x728] sm:$0xff] }
  0xa0   :  { %794 = vmatpush.msrb.mxu0 %v367_v22  ;;  %813 = vmatpush.msrb.mxu1 %v384_v23  ;;  %v409_v53 = vld [vmem:[%s3588_s9 + $0x7b0] sm:$0xff]  ;;  %v359_v54 = vld [vmem:[%s3588_s9 + $0x620] sm:$0xff]  ;;  %v376_v55 = vld [vmem:[%s3588_s9 + $0x6a8] sm:$0xff] }
  0xa1   :  { %834 = vmatpush.msrb.mxu2 %v399_v24  ;;  %853 = vmatpush.msrb.mxu3 %v416_v25  ;;  %v391_v56 = vld [vmem:[%s3588_s9 + $0x720] sm:$0xff]  ;;  %v408_v57 = vld [vmem:[%s3588_s9 + $0x7a8] sm:$0xff]  ;;  %v358_v58 = vld [vmem:[%s3588_s9 + $0x618] sm:$0xff] }
  0xa2   :  { %795 = vmatpush.msrb.mxu0 %v366_v26  ;;  %814 = vmatpush.msrb.mxu1 %v383_v27  ;;  %v375_v59 = vld [vmem:[%s3588_s9 + $0x6a0] sm:$0xff]  ;;  %v390_v60 = vld [vmem:[%s3588_s9 + $0x718] sm:$0xff]  ;;  %v357_v62 = vld [vmem:[%s3588_s9 + $0x610] sm:$0xff] }
  0xa3   :  { %835 = vmatpush.msrb.mxu2 %v398_v28  ;;  %854 = vmatpush.msrb.mxu3 %v415_v29  ;;  %v407_v61 = vld [vmem:[%s3588_s9 + $0x7a0] sm:$0xff]  ;;  %v374_v63 = vld [vmem:[%s3588_s9 + $0x698] sm:$0xff]  ;;  %v389_v0 = vld [vmem:[%s3588_s9 + $0x710] sm:$0xff] }
  0xa4   :  { %796 = vmatpush.msrb.mxu0 %v365_v30  ;;  %815 = vmatpush.msrb.mxu1 %v382_v31  ;;  %v406_v1 = vld [vmem:[%s3588_s9 + $0x798] sm:$0xff]  ;;  %v356_v2 = vld [vmem:[%s3588_s9 + $0x608] sm:$0xff]  ;;  %v373_v3 = vld [vmem:[%s3588_s9 + $0x690] sm:$0xff] }
  0xa5   :  { %836 = vmatpush.msrb.mxu2 %v397_v32  ;;  %855 = vmatpush.msrb.mxu3 %v414_v33  ;;  %v388_v4 = vld [vmem:[%s3588_s9 + $0x708] sm:$0xff]  ;;  %v405_v5 = vld [vmem:[%s3588_s9 + $0x790] sm:$0xff]  ;;  %v355_v6 = vld [vmem:[%s3588_s9 + $0x600] sm:$0xff] }
  0xa6   :  { %797 = vmatpush.msrb.mxu0 %v364_v34  ;;  %816 = vmatpush.msrb.mxu1 %v381_v35  ;;  %v372_v7 = vld [vmem:[%s3588_s9 + $0x688] sm:$0xff]  ;;  %v387_v8 = vld [vmem:[%s3588_s9 + $0x700] sm:$0xff]  ;;  %v153_v11 = vld [vmem:[%s3583_s5 + $0x70] sm:$0xff] }
  0xa7   :  { %837 = vmatpush.msrb.mxu2 %v396_v36  ;;  %856 = vmatpush.msrb.mxu3 %v413_v37  ;;  %v404_v9 = vld [vmem:[%s3588_s9 + $0x788] sm:$0xff]  ;;  %v151_v10 = vld [vmem:[%s3583_s5 + $0x60] sm:$0xff]  ;;  %v434_v12 = vld [vmem:[%s3588_s9 + $0x878] sm:$0xff] }
  0xa8   :  { %798 = vmatpush.msrb.mxu0 %v363_v38  ;;  %817 = vmatpush.msrb.mxu1 %v380_v39  ;;  %v466_v13 = vld [vmem:[%s3588_s9 + $0x978] sm:$0xff]  ;;  %v371_v14 = vld [vmem:[%s3588_s9 + $0x680] sm:$0xff]  ;;  %v152_v16 = vld [vmem:[%s3583_s5 + $0x68] sm:$0xff] }
  0xa9   :  { %838 = vmatpush.msrb.mxu2 %v395_v40  ;;  %857 = vmatpush.msrb.mxu3 %v412_v41  ;;  %v403_v15 = vld [vmem:[%s3588_s9 + $0x780] sm:$0xff]  ;;  %v154_v17 = vld [vmem:[%s3583_s5 + $0x78] sm:$0xff]  ;;  %v433_v18 = vld [vmem:[%s3588_s9 + $0x870] sm:$0xff] }
  0xaa   :  { %799 = vmatpush.msrb.mxu0 %v362_v42  ;;  %818 = vmatpush.msrb.mxu1 %v379_v43  ;;  %v450_v19 = vld [vmem:[%s3588_s9 + $0x8f8] sm:$0xff]  ;;  %v465_v20 = vld [vmem:[%s3588_s9 + $0x970] sm:$0xff]  ;;  %v432_v22 = vld [vmem:[%s3588_s9 + $0x868] sm:$0xff] }
  0xab   :  { %839 = vmatpush.msrb.mxu2 %v394_v44  ;;  %858 = vmatpush.msrb.mxu3 %v411_v45  ;;  %v482_v21 = vld [vmem:[%s3588_s9 + $0x9f8] sm:$0xff]  ;;  %v449_v23 = vld [vmem:[%s3588_s9 + $0x8f0] sm:$0xff]  ;;  %v464_v24 = vld [vmem:[%s3588_s9 + $0x968] sm:$0xff] }
  0xac   :  { %800 = vmatpush.msrb.mxu0 %v361_v46  ;;  %819 = vmatpush.msrb.mxu1 %v378_v47  ;;  %v481_v25 = vld [vmem:[%s3588_s9 + $0x9f0] sm:$0xff]  ;;  %v431_v26 = vld [vmem:[%s3588_s9 + $0x860] sm:$0xff]  ;;  %v448_v27 = vld [vmem:[%s3588_s9 + $0x8e8] sm:$0xff] }
  0xad   :  { %840 = vmatpush.msrb.mxu2 %v393_v48  ;;  %859 = vmatpush.msrb.mxu3 %v410_v49  ;;  %v463_v28 = vld [vmem:[%s3588_s9 + $0x960] sm:$0xff]  ;;  %v480_v29 = vld [vmem:[%s3588_s9 + $0x9e8] sm:$0xff]  ;;  %v430_v30 = vld [vmem:[%s3588_s9 + $0x858] sm:$0xff] }
  0xae   :  { %801 = vmatpush.msrb.mxu0 %v360_v50  ;;  %820 = vmatpush.msrb.mxu1 %v377_v51  ;;  %v447_v31 = vld [vmem:[%s3588_s9 + $0x8e0] sm:$0xff]  ;;  %v462_v32 = vld [vmem:[%s3588_s9 + $0x958] sm:$0xff]  ;;  %v429_v34 = vld [vmem:[%s3588_s9 + $0x850] sm:$0xff] }
  0xaf   :  { %841 = vmatpush.msrb.mxu2 %v392_v52  ;;  %860 = vmatpush.msrb.mxu3 %v409_v53  ;;  %v479_v33 = vld [vmem:[%s3588_s9 + $0x9e0] sm:$0xff]  ;;  %v446_v35 = vld [vmem:[%s3588_s9 + $0x8d8] sm:$0xff]  ;;  %v461_v36 = vld [vmem:[%s3588_s9 + $0x950] sm:$0xff] }
  0xb0   :  { %802 = vmatpush.msrb.mxu0 %v359_v54  ;;  %821 = vmatpush.msrb.mxu1 %v376_v55  ;;  %v478_v37 = vld [vmem:[%s3588_s9 + $0x9d8] sm:$0xff]  ;;  %v428_v38 = vld [vmem:[%s3588_s9 + $0x848] sm:$0xff]  ;;  %v445_v39 = vld [vmem:[%s3588_s9 + $0x8d0] sm:$0xff] }
  0xb1   :  { %842 = vmatpush.msrb.mxu2 %v391_v56  ;;  %861 = vmatpush.msrb.mxu3 %v408_v57  ;;  %v460_v40 = vld [vmem:[%s3588_s9 + $0x948] sm:$0xff]  ;;  %v477_v41 = vld [vmem:[%s3588_s9 + $0x9d0] sm:$0xff]  ;;  %v427_v42 = vld [vmem:[%s3588_s9 + $0x840] sm:$0xff] }
  0xb2   :  { %803 = vmatpush.msrb.mxu0 %v358_v58  ;;  %822 = vmatpush.msrb.mxu1 %v375_v59  ;;  %v444_v43 = vld [vmem:[%s3588_s9 + $0x8c8] sm:$0xff]  ;;  %v459_v44 = vld [vmem:[%s3588_s9 + $0x940] sm:$0xff]  ;;  %v426_v46 = vld [vmem:[%s3588_s9 + $0x838] sm:$0xff] }
  0xb3   :  { %843 = vmatpush.msrb.mxu2 %v390_v60  ;;  %862 = vmatpush.msrb.mxu3 %v407_v61  ;;  %v476_v45 = vld [vmem:[%s3588_s9 + $0x9c8] sm:$0xff]  ;;  %v443_v47 = vld [vmem:[%s3588_s9 + $0x8c0] sm:$0xff]  ;;  %v458_v48 = vld [vmem:[%s3588_s9 + $0x938] sm:$0xff] }
  0xb4   :  { %804 = vmatpush.msrb.mxu0 %v357_v62  ;;  %823 = vmatpush.msrb.mxu1 %v374_v63  ;;  %v475_v49 = vld [vmem:[%s3588_s9 + $0x9c0] sm:$0xff]  ;;  %v425_v50 = vld [vmem:[%s3588_s9 + $0x830] sm:$0xff]  ;;  %v442_v51 = vld [vmem:[%s3588_s9 + $0x8b8] sm:$0xff] }
  0xb5   :  { %844 = vmatpush.msrb.mxu2 %v389_v0  ;;  %863 = vmatpush.msrb.mxu3 %v406_v1  ;;  %v457_v52 = vld [vmem:[%s3588_s9 + $0x930] sm:$0xff]  ;;  %v474_v53 = vld [vmem:[%s3588_s9 + $0x9b8] sm:$0xff]  ;;  %v424_v54 = vld [vmem:[%s3588_s9 + $0x828] sm:$0xff] }
  0xb6   :  { %805 = vmatpush.msrb.mxu0 %v356_v2  ;;  %824 = vmatpush.msrb.mxu1 %v373_v3  ;;  %v441_v55 = vld [vmem:[%s3588_s9 + $0x8b0] sm:$0xff]  ;;  %v456_v56 = vld [vmem:[%s3588_s9 + $0x928] sm:$0xff]  ;;  %v423_v58 = vld [vmem:[%s3588_s9 + $0x820] sm:$0xff] }
  0xb7   :  { %845 = vmatpush.msrb.mxu2 %v388_v4  ;;  %864 = vmatpush.msrb.mxu3 %v405_v5  ;;  %v473_v57 = vld [vmem:[%s3588_s9 + $0x9b0] sm:$0xff]  ;;  %v440_v59 = vld [vmem:[%s3588_s9 + $0x8a8] sm:$0xff]  ;;  %v455_v60 = vld [vmem:[%s3588_s9 + $0x920] sm:$0xff] }
  0xb8   :  { %806 = vmatpush.msrb.mxu0 %v355_v6  ;;  %825 = vmatpush.msrb.mxu1 %v372_v7  ;;  %v472_v61 = vld [vmem:[%s3588_s9 + $0x9a8] sm:$0xff]  ;;  %v422_v62 = vld [vmem:[%s3588_s9 + $0x818] sm:$0xff]  ;;  %v439_v63 = vld [vmem:[%s3588_s9 + $0x8a0] sm:$0xff] }
  0xb9   :  { %846 = vmatpush.msrb.mxu2 %v387_v8  ;;  %865 = vmatpush.msrb.mxu3 %v404_v9  ;;  %v454_v0 = vld [vmem:[%s3588_s9 + $0x918] sm:$0xff]  ;;  %v471_v1 = vld [vmem:[%s3588_s9 + $0x9a0] sm:$0xff]  ;;  %v421_v2 = vld [vmem:[%s3588_s9 + $0x810] sm:$0xff] }
  0xba   :  { %807 = vmatmul.f32.vlgmr.msrb.gmra.mxu0 %v151_v10  ;;  %847 = vmatmul.f32.vlgmr.msrb.gmra.mxu2 %v153_v11  ;;  %v438_v3 = vld [vmem:[%s3588_s9 + $0x898] sm:$0xff]  ;;  %v453_v4 = vld [vmem:[%s3588_s9 + $0x910] sm:$0xff]  ;;  %v420_v6 = vld [vmem:[%s3588_s9 + $0x808] sm:$0xff] }
  0xbb   :  { %871 = vmatpush.msra.mxu0 %v434_v12  ;;  %911 = vmatpush.msra.mxu2 %v466_v13  ;;  %v470_v5 = vld [vmem:[%s3588_s9 + $0x998] sm:$0xff]  ;;  %v437_v7 = vld [vmem:[%s3588_s9 + $0x890] sm:$0xff]  ;;  %v452_v8 = vld [vmem:[%s3588_s9 + $0x908] sm:$0xff] }
  0xbc   :  { %826 = vmatpush.msrb.mxu1 %v371_v14  ;;  %866 = vmatpush.msrb.mxu3 %v403_v15  ;;  %v469_v9 = vld [vmem:[%s3588_s9 + $0x990] sm:$0xff]  ;;  %v419_v10 = vld [vmem:[%s3588_s9 + $0x800] sm:$0xff]  ;;  %v436_v11 = vld [vmem:[%s3588_s9 + $0x888] sm:$0xff] }
  0xbd   :  { %827 = vmatmul.f32.vlgmr.msrb.gmra.mxu1 %v152_v16  ;;  %867 = vmatmul.f32.vlgmr.msrb.gmra.mxu3 %v154_v17  ;;  %v451_v12 = vld [vmem:[%s3588_s9 + $0x900] sm:$0xff]  ;;  %v468_v13 = vld [vmem:[%s3588_s9 + $0x988] sm:$0xff]  ;;  %v157_v15 = vld [vmem:[%s3583_s5 + $0x90] sm:$0xff] }
  0xbe   :  { %872 = vmatpush.msra.mxu0 %v433_v18  ;;  %891 = vmatpush.msra.mxu1 %v450_v19  ;;  %v155_v14 = vld [vmem:[%s3583_s5 + $0x80] sm:$0xff]  ;;  %v498_v16 = vld [vmem:[%s3588_s9 + $0xa78] sm:$0xff] }
  0xbf   :  { %912 = vmatpush.msra.mxu2 %v465_v20  ;;  %931 = vmatpush.msra.mxu3 %v482_v21  ;;  %v530_v17 = vld [vmem:[%s3588_s9 + $0xb78] sm:$0xff]  ;;  %v435_v18 = vld [vmem:[%s3588_s9 + $0x880] sm:$0xff]  ;;  %v156_v20 = vld [vmem:[%s3583_s5 + $0x88] sm:$0xff] }
  0xc0   :  { %873 = vmatpush.msra.mxu0 %v432_v22  ;;  %892 = vmatpush.msra.mxu1 %v449_v23  ;;  %v467_v19 = vld [vmem:[%s3588_s9 + $0x980] sm:$0xff]  ;;  %v158_v21 = vld [vmem:[%s3583_s5 + $0x98] sm:$0xff]  ;;  %v497_v22 = vld [vmem:[%s3588_s9 + $0xa70] sm:$0xff] }
  0xc1   :  { %913 = vmatpush.msra.mxu2 %v464_v24  ;;  %932 = vmatpush.msra.mxu3 %v481_v25  ;;  %v514_v23 = vld [vmem:[%s3588_s9 + $0xaf8] sm:$0xff]  ;;  %v529_v24 = vld [vmem:[%s3588_s9 + $0xb70] sm:$0xff] }
  0xc2   :  { %874 = vmatpush.msra.mxu0 %v431_v26  ;;  %893 = vmatpush.msra.mxu1 %v448_v27  ;;  %v546_v25 = vld [vmem:[%s3588_s9 + $0xbf8] sm:$0xff]  ;;  %v496_v26 = vld [vmem:[%s3588_s9 + $0xa68] sm:$0xff]  ;;  %v513_v27 = vld [vmem:[%s3588_s9 + $0xaf0] sm:$0xff] }
  0xc3   :  { %914 = vmatpush.msra.mxu2 %v463_v28  ;;  %933 = vmatpush.msra.mxu3 %v480_v29  ;;  %v528_v28 = vld [vmem:[%s3588_s9 + $0xb68] sm:$0xff]  ;;  %v545_v29 = vld [vmem:[%s3588_s9 + $0xbf0] sm:$0xff] }
  0xc4   :  { %875 = vmatpush.msra.mxu0 %v430_v30  ;;  %894 = vmatpush.msra.mxu1 %v447_v31  ;;  %v495_v30 = vld [vmem:[%s3588_s9 + $0xa60] sm:$0xff]  ;;  %v512_v31 = vld [vmem:[%s3588_s9 + $0xae8] sm:$0xff] }
  0xc5   :  { %915 = vmatpush.msra.mxu2 %v462_v32  ;;  %934 = vmatpush.msra.mxu3 %v479_v33  ;;  %v527_v32 = vld [vmem:[%s3588_s9 + $0xb60] sm:$0xff]  ;;  %v544_v33 = vld [vmem:[%s3588_s9 + $0xbe8] sm:$0xff] }
  0xc6   :  { %876 = vmatpush.msra.mxu0 %v429_v34  ;;  %895 = vmatpush.msra.mxu1 %v446_v35  ;;  %v494_v34 = vld [vmem:[%s3588_s9 + $0xa58] sm:$0xff]  ;;  %v511_v35 = vld [vmem:[%s3588_s9 + $0xae0] sm:$0xff] }
  0xc7   :  { %916 = vmatpush.msra.mxu2 %v461_v36  ;;  %935 = vmatpush.msra.mxu3 %v478_v37  ;;  %v526_v36 = vld [vmem:[%s3588_s9 + $0xb58] sm:$0xff]  ;;  %v543_v37 = vld [vmem:[%s3588_s9 + $0xbe0] sm:$0xff] }
  0xc8   :  { %877 = vmatpush.msra.mxu0 %v428_v38  ;;  %896 = vmatpush.msra.mxu1 %v445_v39  ;;  %v493_v38 = vld [vmem:[%s3588_s9 + $0xa50] sm:$0xff]  ;;  %v510_v39 = vld [vmem:[%s3588_s9 + $0xad8] sm:$0xff] }
  0xc9   :  { %917 = vmatpush.msra.mxu2 %v460_v40  ;;  %936 = vmatpush.msra.mxu3 %v477_v41  ;;  %v525_v40 = vld [vmem:[%s3588_s9 + $0xb50] sm:$0xff]  ;;  %v542_v41 = vld [vmem:[%s3588_s9 + $0xbd8] sm:$0xff] }
  0xca   :  { %878 = vmatpush.msra.mxu0 %v427_v42  ;;  %897 = vmatpush.msra.mxu1 %v444_v43  ;;  %v492_v42 = vld [vmem:[%s3588_s9 + $0xa48] sm:$0xff]  ;;  %v509_v43 = vld [vmem:[%s3588_s9 + $0xad0] sm:$0xff] }
  0xcb   :  { %918 = vmatpush.msra.mxu2 %v459_v44  ;;  %937 = vmatpush.msra.mxu3 %v476_v45  ;;  %v524_v44 = vld [vmem:[%s3588_s9 + $0xb48] sm:$0xff]  ;;  %v541_v45 = vld [vmem:[%s3588_s9 + $0xbd0] sm:$0xff] }
  0xcc   :  { %879 = vmatpush.msra.mxu0 %v426_v46  ;;  %898 = vmatpush.msra.mxu1 %v443_v47  ;;  %v491_v46 = vld [vmem:[%s3588_s9 + $0xa40] sm:$0xff]  ;;  %v508_v47 = vld [vmem:[%s3588_s9 + $0xac8] sm:$0xff] }
  0xcd   :  { %919 = vmatpush.msra.mxu2 %v458_v48  ;;  %938 = vmatpush.msra.mxu3 %v475_v49  ;;  %v523_v48 = vld [vmem:[%s3588_s9 + $0xb40] sm:$0xff]  ;;  %v540_v49 = vld [vmem:[%s3588_s9 + $0xbc8] sm:$0xff] }
  0xce   :  { %880 = vmatpush.msra.mxu0 %v425_v50  ;;  %899 = vmatpush.msra.mxu1 %v442_v51  ;;  %v490_v50 = vld [vmem:[%s3588_s9 + $0xa38] sm:$0xff]  ;;  %v507_v51 = vld [vmem:[%s3588_s9 + $0xac0] sm:$0xff] }
  0xcf   :  { %920 = vmatpush.msra.mxu2 %v457_v52  ;;  %939 = vmatpush.msra.mxu3 %v474_v53  ;;  %v522_v52 = vld [vmem:[%s3588_s9 + $0xb38] sm:$0xff]  ;;  %v539_v53 = vld [vmem:[%s3588_s9 + $0xbc0] sm:$0xff] }
  0xd0   :  { %881 = vmatpush.msra.mxu0 %v424_v54  ;;  %900 = vmatpush.msra.mxu1 %v441_v55  ;;  %v489_v54 = vld [vmem:[%s3588_s9 + $0xa30] sm:$0xff]  ;;  %v506_v55 = vld [vmem:[%s3588_s9 + $0xab8] sm:$0xff] }
  0xd1   :  { %921 = vmatpush.msra.mxu2 %v456_v56  ;;  %940 = vmatpush.msra.mxu3 %v473_v57  ;;  %v521_v56 = vld [vmem:[%s3588_s9 + $0xb30] sm:$0xff]  ;;  %v538_v57 = vld [vmem:[%s3588_s9 + $0xbb8] sm:$0xff] }
  0xd2   :  { %882 = vmatpush.msra.mxu0 %v423_v58  ;;  %901 = vmatpush.msra.mxu1 %v440_v59  ;;  %v488_v58 = vld [vmem:[%s3588_s9 + $0xa28] sm:$0xff]  ;;  %v505_v59 = vld [vmem:[%s3588_s9 + $0xab0] sm:$0xff] }
  0xd3   :  { %922 = vmatpush.msra.mxu2 %v455_v60  ;;  %941 = vmatpush.msra.mxu3 %v472_v61  ;;  %v520_v60 = vld [vmem:[%s3588_s9 + $0xb28] sm:$0xff]  ;;  %v537_v61 = vld [vmem:[%s3588_s9 + $0xbb0] sm:$0xff] }
  0xd4   :  { %883 = vmatpush.msra.mxu0 %v422_v62  ;;  %902 = vmatpush.msra.mxu1 %v439_v63  ;;  %v487_v62 = vld [vmem:[%s3588_s9 + $0xa20] sm:$0xff]  ;;  %v504_v63 = vld [vmem:[%s3588_s9 + $0xaa8] sm:$0xff] }
  0xd5   :  { %923 = vmatpush.msra.mxu2 %v454_v0  ;;  %942 = vmatpush.msra.mxu3 %v471_v1  ;;  %v519_v0 = vld [vmem:[%s3588_s9 + $0xb20] sm:$0xff]  ;;  %v536_v1 = vld [vmem:[%s3588_s9 + $0xba8] sm:$0xff] }
  0xd6   :  { %884 = vmatpush.msra.mxu0 %v421_v2  ;;  %903 = vmatpush.msra.mxu1 %v438_v3  ;;  %v486_v2 = vld [vmem:[%s3588_s9 + $0xa18] sm:$0xff]  ;;  %v503_v3 = vld [vmem:[%s3588_s9 + $0xaa0] sm:$0xff] }
  0xd7   :  { %924 = vmatpush.msra.mxu2 %v453_v4  ;;  %943 = vmatpush.msra.mxu3 %v470_v5  ;;  %v518_v4 = vld [vmem:[%s3588_s9 + $0xb18] sm:$0xff]  ;;  %v535_v5 = vld [vmem:[%s3588_s9 + $0xba0] sm:$0xff] }
  0xd8   :  { %885 = vmatpush.msra.mxu0 %v420_v6  ;;  %904 = vmatpush.msra.mxu1 %v437_v7  ;;  %v485_v6 = vld [vmem:[%s3588_s9 + $0xa10] sm:$0xff]  ;;  %v502_v7 = vld [vmem:[%s3588_s9 + $0xa98] sm:$0xff] }
  0xd9   :  { %925 = vmatpush.msra.mxu2 %v452_v8  ;;  %944 = vmatpush.msra.mxu3 %v469_v9  ;;  %v517_v8 = vld [vmem:[%s3588_s9 + $0xb10] sm:$0xff]  ;;  %v534_v9 = vld [vmem:[%s3588_s9 + $0xb98] sm:$0xff] }
  0xda   :  { %886 = vmatpush.msra.mxu0 %v419_v10  ;;  %905 = vmatpush.msra.mxu1 %v436_v11  ;;  %v484_v10 = vld [vmem:[%s3588_s9 + $0xa08] sm:$0xff]  ;;  %v501_v11 = vld [vmem:[%s3588_s9 + $0xa90] sm:$0xff] }
  0xdb   :  { %926 = vmatpush.msra.mxu2 %v451_v12  ;;  %945 = vmatpush.msra.mxu3 %v468_v13  ;;  %v516_v12 = vld [vmem:[%s3588_s9 + $0xb08] sm:$0xff]  ;;  %v533_v13 = vld [vmem:[%s3588_s9 + $0xb90] sm:$0xff] }
  0xdc   :  { %887 = vmatmul.f32.vlgmr.msra.gmra.mxu0 %v155_v14  ;;  %927 = vmatmul.f32.vlgmr.msra.gmra.mxu2 %v157_v15  ;;  %v483_v14 = vld [vmem:[%s3588_s9 + $0xa00] sm:$0xff]  ;;  %v500_v15 = vld [vmem:[%s3588_s9 + $0xa88] sm:$0xff] }
  0xdd   :  { %951 = vmatpush.msrb.mxu0 %v498_v16  ;;  %991 = vmatpush.msrb.mxu2 %v530_v17  ;;  %v515_v16 = vld [vmem:[%s3588_s9 + $0xb00] sm:$0xff]  ;;  %v532_v17 = vld [vmem:[%s3588_s9 + $0xb88] sm:$0xff] }
  0xde   :  { %906 = vmatpush.msra.mxu1 %v435_v18  ;;  %946 = vmatpush.msra.mxu3 %v467_v19  ;;  %v159_v18 = vld [vmem:[%s3583_s5 + $0xa0] sm:$0xff]  ;;  %v161_v19 = vld [vmem:[%s3583_s5 + $0xb0] sm:$0xff] }
  0xdf   :  { %907 = vmatmul.f32.vlgmr.msra.gmra.mxu1 %v156_v20  ;;  %947 = vmatmul.f32.vlgmr.msra.gmra.mxu3 %v158_v21  ;;  %v499_v20 = vld [vmem:[%s3588_s9 + $0xa80] sm:$0xff] }
  0xe0   :  { %952 = vmatpush.msrb.mxu0 %v497_v22  ;;  %971 = vmatpush.msrb.mxu1 %v514_v23  ;;  %v531_v21 = vld [vmem:[%s3588_s9 + $0xb80] sm:$0xff]  ;;  %v160_v22 = vld [vmem:[%s3583_s5 + $0xa8] sm:$0xff]  ;;  %v162_v23 = vld [vmem:[%s3583_s5 + $0xb8] sm:$0xff]  ;;  %s3568_s5 = smov 112   ;;  %s3569_s9 = smov 64  }
  0xe1   :  { %992 = vmatpush.msrb.mxu2 %v529_v24  ;;  %1011 = vmatpush.msrb.mxu3 %v546_v25  ;;  %v3397_v24 = vld [vmem:[%s3593_s13] ss:$0 sm:$0xff]  ;;  %s3570_s13 = smov 48  }
  0xe2   :  { %953 = vmatpush.msrb.mxu0 %v496_v26  ;;  %972 = vmatpush.msrb.mxu1 %v513_v27 }
  0xe3   :  { %993 = vmatpush.msrb.mxu2 %v528_v28  ;;  %1012 = vmatpush.msrb.mxu3 %v545_v29 }
  0xe4   :  { %954 = vmatpush.msrb.mxu0 %v495_v30  ;;  %973 = vmatpush.msrb.mxu1 %v512_v31 }
  0xe5   :  { %994 = vmatpush.msrb.mxu2 %v527_v32  ;;  %1013 = vmatpush.msrb.mxu3 %v544_v33 }
  0xe6   :  { %955 = vmatpush.msrb.mxu0 %v494_v34  ;;  %974 = vmatpush.msrb.mxu1 %v511_v35 }
  0xe7   :  { %995 = vmatpush.msrb.mxu2 %v526_v36  ;;  %1014 = vmatpush.msrb.mxu3 %v543_v37 }
  0xe8   :  { %956 = vmatpush.msrb.mxu0 %v493_v38  ;;  %975 = vmatpush.msrb.mxu1 %v510_v39 }
  0xe9   :  { %996 = vmatpush.msrb.mxu2 %v525_v40  ;;  %1015 = vmatpush.msrb.mxu3 %v542_v41 }
  0xea   :  { %957 = vmatpush.msrb.mxu0 %v492_v42  ;;  %976 = vmatpush.msrb.mxu1 %v509_v43 }
  0xeb   :  { %997 = vmatpush.msrb.mxu2 %v524_v44  ;;  %1016 = vmatpush.msrb.mxu3 %v541_v45 }
  0xec   :  { %958 = vmatpush.msrb.mxu0 %v491_v46  ;;  %977 = vmatpush.msrb.mxu1 %v508_v47 }
  0xed   :  { %998 = vmatpush.msrb.mxu2 %v523_v48  ;;  %1017 = vmatpush.msrb.mxu3 %v540_v49 }
  0xee   :  { %959 = vmatpush.msrb.mxu0 %v490_v50  ;;  %978 = vmatpush.msrb.mxu1 %v507_v51  ;;  %v1031_v51 = vld [vmem:[%s3603_s21] sm:$0x1f]  ;;  %s3572_s21 = smov 16  }
  0xef   :  { %999 = vmatpush.msrb.mxu2 %v522_v52  ;;  %1018 = vmatpush.msrb.mxu3 %v539_v53  ;;  %v1032_v52 = vld [vmem:[%s3598_s17] sm:$0x1]  ;;  %s3571_s17 = smov 96  }
  0xf0   :  { %960 = vmatpush.msrb.mxu0 %v489_v54  ;;  %979 = vmatpush.msrb.mxu1 %v506_v55  ;;  %v1033_v54 = vadd.f32 %v1032_v52, %v1031_v51  ;;  %v1051_v52 = vld [vmem:[%s3618_s3 + $0x8] sm:$0xff] }
  0xf1   :  { %1000 = vmatpush.msrb.mxu2 %v521_v56  ;;  %1019 = vmatpush.msrb.mxu3 %v538_v57  ;;  %v568_v25 = vpop.f32.mrf.mxu0 }
  0xf2   :  { %961 = vmatpush.msrb.mxu0 %v488_v58  ;;  %980 = vmatpush.msrb.mxu1 %v505_v59  ;;  %v569_v26 = vadd.f32 %v3397_v24, %v568_v25  ;;  %1035 = vst.msk [vmem:[#allocation2] sm:$0x1] %vm1034_vm0, %v1033_v54 }
  0xf3   :  { %1001 = vmatpush.msrb.mxu2 %v520_v60  ;;  %1020 = vmatpush.msrb.mxu3 %v537_v61  ;;  %1042 = vst.msk [vmem:[#allocation2 + $0x5] sm:$0x1] %vm1034_vm0, %v1033_v54 }
  0xf4   :  { %962 = vmatpush.msrb.mxu0 %v487_v62  ;;  %981 = vmatpush.msrb.mxu1 %v504_v63  ;;  %v588_v27 = vpop.f32.mrf.mxu1 }
  0xf5   :  { %1002 = vmatpush.msrb.mxu2 %v519_v0  ;;  %1021 = vmatpush.msrb.mxu3 %v536_v1  ;;  %v589_v28 = vadd.f32 %v588_v27, %v569_v26 }
  0xf6   :  { %963 = vmatpush.msrb.mxu0 %v486_v2  ;;  %982 = vmatpush.msrb.mxu1 %v503_v3 }
  0xf7   :  { %1003 = vmatpush.msrb.mxu2 %v518_v4  ;;  %1022 = vmatpush.msrb.mxu3 %v535_v5  ;;  %v608_v29 = vpop.f32.mrf.mxu2 }
  0xf8   :  { %964 = vmatpush.msrb.mxu0 %v485_v6  ;;  %983 = vmatpush.msrb.mxu1 %v502_v7  ;;  %v609_v30 = vadd.f32 %v608_v29, %v589_v28 }
  0xf9   :  { %1004 = vmatpush.msrb.mxu2 %v517_v8  ;;  %1023 = vmatpush.msrb.mxu3 %v534_v9 }
  0xfa   :  { %965 = vmatpush.msrb.mxu0 %v484_v10  ;;  %984 = vmatpush.msrb.mxu1 %v501_v11  ;;  %v628_v31 = vpop.f32.mrf.mxu3  ;;  %v1037_v10 = vrot.slane %v1031_v51, 1  ;;  %v1043_v11 = vrot.slane %v1031_v51, 5  ;;  %v1050_v51 = vld [vmem:[%s3618_s3] sm:$0xff] }
  0xfb   :  { %1005 = vmatpush.msrb.mxu2 %v516_v12  ;;  %1024 = vmatpush.msrb.mxu3 %v533_v13  ;;  %v629_v32 = vadd.f32 %v628_v31, %v609_v30 }
  0xfc   :  { %966 = vmatpush.msrb.mxu0 %v483_v14  ;;  %985 = vmatpush.msrb.mxu1 %v500_v15 }
  0xfd   :  { %1006 = vmatpush.msrb.mxu2 %v515_v16  ;;  %1025 = vmatpush.msrb.mxu3 %v532_v17  ;;  %v648_v33 = vpop.f32.mrf.mxu0 }
  0xfe   :  { %967 = vmatmul.f32.vlgmr.msrb.gmra.mxu0 %v159_v18  ;;  %1007 = vmatmul.f32.vlgmr.msrb.gmra.mxu2 %v161_v19  ;;  %v649_v34 = vadd.f32 %v648_v33, %v629_v32 }
  0xff   :  { %986 = vmatpush.msrb.mxu1 %v499_v20  ;;  %1026 = vmatpush.msrb.mxu3 %v531_v21  ;;  %v3566_v20 = vmov 64.0  }
 0x100   :  { %987 = vmatmul.f32.vlgmr.msrb.gmra.mxu1 %v160_v22  ;;  %1027 = vmatmul.f32.vlgmr.msrb.gmra.mxu3 %v162_v23  ;;  %v668_v35 = vpop.f32.mrf.mxu1  ;;  %3415 = vrcp.f32 %v3566_v20 }
 0x101   :  { %v669_v36 = vadd.f32 %v668_v35, %v649_v34  ;;  %v688_v37 = vpop.f32.mrf.mxu2 }
 0x103   :  { %v689_v38 = vadd.f32 %v688_v37, %v669_v36  ;;  %v1064_v37 = vld [vmem:[%s3618_s3 + $0x70] sm:$0xff] }
 0x104   :  { %v708_v39 = vpop.f32.mrf.mxu3  ;;  %1188 = vmatpush.msra.mxu0 %v1064_v37 }
 0x105   :  { %v709_v41 = vadd.f32 %v708_v39, %v689_v38  ;;  %v1065_v38 = vld [vmem:[%s3618_s3 + $0x78] sm:$0xff]  ;;  %v1062_v39 = vld [vmem:[%s3618_s3 + $0x60] sm:$0xff] }
 0x106   :  { %v3416_v21 = vpop.eup %3415  ;;  %1211 = vmatpush.msra.mxu1 %v1065_v38  ;;  %1189 = vmatpush.msra.mxu0 %v1062_v39 }
 0x107   :  { %v1115_v22 = vmul.f32 64.0, %v3416_v21  ;;  %vm1119_vm5 = vweird.f32 %v3416_v21 }
 0x109   :  { %v1116_v23 = vsub.f32 1.0, %v1115_v22 }
 0x10b   :  { %v1117_v24 = vmul.f32 %v3416_v21, %v1116_v23 }
 0x10d   :  { %v1118_v25 = vadd.f32 %v3416_v21, %v1117_v24 }
 0x10f   :  { %v4171_v26 = vsel %vm1119_vm5, %v3416_v21, %v1118_v25  ;;  %vm1963_vm5 = vcmask 523269  }
 0x115   :  { %v728_v40 = vpop.f32.mrf.mxu0 }
 0x116   :  { %v729_v42 = vadd.f32 %v728_v40, %v709_v41  ;;  %v1063_v40 = vld [vmem:[%s3618_s3 + $0x68] sm:$0xff]  ;;  %v1060_v41 = vld [vmem:[%s3618_s3 + $0x50] sm:$0xff] }
 0x117   :  { %1212 = vmatpush.msra.mxu1 %v1063_v40  ;;  %1190 = vmatpush.msra.mxu0 %v1060_v41 }
 0x118   :  { %v748_v43 = vpop.f32.mrf.mxu1 }
 0x119   :  { %v749_v45 = vadd.f32 %v748_v43, %v729_v42  ;;  %v1061_v42 = vld [vmem:[%s3618_s3 + $0x58] sm:$0xff]  ;;  %v1058_v43 = vld [vmem:[%s3618_s3 + $0x40] sm:$0xff] }
 0x11a   :  { %1213 = vmatpush.msra.mxu1 %v1061_v42  ;;  %1191 = vmatpush.msra.mxu0 %v1058_v43 }
 0x11b   :  { %v768_v44 = vpop.f32.mrf.mxu2 }
 0x11c   :  { %v769_v46 = vadd.f32 %v768_v44, %v749_v45  ;;  %v1059_v44 = vld [vmem:[%s3618_s3 + $0x48] sm:$0xff]  ;;  %v1056_v45 = vld [vmem:[%s3618_s3 + $0x30] sm:$0xff] }
 0x11d   :  { %1214 = vmatpush.msra.mxu1 %v1059_v44  ;;  %1192 = vmatpush.msra.mxu0 %v1056_v45 }
 0x11e   :  { %v788_v47 = vpop.f32.mrf.mxu3 }
 0x11f   :  { %v789_v49 = vadd.f32 %v788_v47, %v769_v46  ;;  %v1057_v46 = vld [vmem:[%s3618_s3 + $0x38] sm:$0xff]  ;;  %v1054_v47 = vld [vmem:[%s3618_s3 + $0x20] sm:$0xff] }
 0x120   :  { %1215 = vmatpush.msra.mxu1 %v1057_v46  ;;  %1193 = vmatpush.msra.mxu0 %v1054_v47 }
 0x137   :  { %v808_v48 = vpop.f32.mrf.mxu0 }
 0x138   :  { %v809_v50 = vadd.f32 %v808_v48, %v789_v49  ;;  %v1055_v48 = vld [vmem:[%s3618_s3 + $0x28] sm:$0xff]  ;;  %v1052_v49 = vld [vmem:[%s3618_s3 + $0x10] sm:$0xff] }
 0x139   :  { %1216 = vmatpush.msra.mxu1 %v1055_v48  ;;  %1194 = vmatpush.msra.mxu0 %v1052_v49 }
 0x13a   :  { %v828_v53 = vpop.f32.mrf.mxu1 }
 0x13b   :  { %v829_v56 = vadd.f32 %v828_v53, %v809_v50  ;;  %v1053_v50 = vld [vmem:[%s3618_s3 + $0x18] sm:$0xff]  ;;  %1195 = vmatpush.msra.mxu0 %v1050_v51  ;;  %s4720_s3 = sld [smem:[#allocation8_spill]] }
 0x13c   :  { %1217 = vmatpush.msra.mxu1 %v1053_v50 }
 0x13d   :  { %v848_v55 = vpop.f32.mrf.mxu2 }
 0x13e   :  { %v849_v57 = vadd.f32 %v848_v55, %v829_v56  ;;  %1218 = vmatpush.msra.mxu1 %v1051_v52 }
 0x140   :  { %v868_v58 = vpop.f32.mrf.mxu3 }
 0x141   :  { %v869_v60 = vadd.f32 %v868_v58, %v849_v57 }
 0x159   :  { %v888_v59 = vpop.f32.mrf.mxu0 }
 0x15a   :  { %v889_v61 = vadd.f32 %v888_v59, %v869_v60 }
 0x15c   :  { %v908_v62 = vpop.f32.mrf.mxu1 }
 0x15d   :  { %v909_v0 = vadd.f32 %v908_v62, %v889_v61 }
 0x15f   :  { %v928_v63 = vpop.f32.mrf.mxu2 }
 0x160   :  { %v929_v1 = vadd.f32 %v928_v63, %v909_v0 }
 0x162   :  { %v948_v2 = vpop.f32.mrf.mxu3 }
 0x163   :  { %v949_v3 = vadd.f32 %v948_v2, %v929_v1 }
 0x17b   :  { %v968_v4 = vpop.f32.mrf.mxu0 }
 0x17c   :  { %v969_v5 = vadd.f32 %v968_v4, %v949_v3 }
 0x17d   :  { %v988_v6 = vpop.f32.mrf.mxu1 }
 0x17e   :  { %v989_v7 = vadd.f32 %v988_v6, %v969_v5 }
 0x181   :  { %v1008_v8 = vpop.f32.mrf.mxu2 }
 0x182   :  { %v1009_v9 = vadd.f32 %v1008_v8, %v989_v7  ;;  %v3398_v7 = vld [vmem:[%s3608_s25] ss:$0 sm:$0xff]  ;;  %s3573_s25 = smov 80  }
 0x183   :  { %v1028_v12 = vpop.f32.mrf.mxu3 }
 0x184   :  { %v1029_v13 = vadd.f32 %v1028_v12, %v1009_v9 }
 0x186   :  { %v1039_v14 = vadd.f32 %v1037_v10, %v1029_v13  ;;  %v1045_v15 = vadd.f32 %v1043_v11, %v1029_v13  ;;  %v3399_v10 = vld [vmem:[%s3613_s29] ss:$0 sm:$0xff]  ;;  %s4719_s29 = sld [smem:[#allocation7_spill]] }
 0x188   :  { %1041 = vst.msk [vmem:[#allocation2 + $0x1] sm:$0xf] %vm1040_vm1, %v1039_v14  ;;  %vm1266_vm1 = vcmask 39936  }
 0x189   :  { %1047 = vst.msk [vmem:[#allocation2 + $0x2] sm:$0xf0] %vm1046_vm2, %v1045_v15  ;;  %vm1591_vm2 = vcmask 520192  }
 0x190   :  { %v4163_v16 = vld [vmem:[#allocation2 + $0x8] sm:$0x3]  ;;  %v4165_v17 = vld [vmem:[#allocation2] sm:$0xff] }
 0x191   :  { %v1111_v18 = vsel %vm1110_vm3, %v4163_v16, 0.0  ;;  %v1107_v19 = vsel %vm1106_vm4, %v4165_v17, 0.0 }
 0x192   :  { %1112 = vadd.xlane.f32.xlu1 %v1111_v18  ;;  %1108 = vadd.xlane.f32.xlu0 %v1107_v19  ;;  %v4214_v19 = vld [vmem:[%s3623_s8] sm:$0x3]  ;;  %s4721_s8 = sld [smem:[#allocation9_spill]] }
 0x193   :  { %v1170_v20 = vperm.slane %v4214_v19, 0  ;;  %v1171_v21 = vperm.slane %v4214_v19, 1 }
 0x205   :  { %v1113_v27 = vpop.xlane.xlu1 %1112  ;;  %v1109_v28 = vpop.xlane.xlu0 %1108 }
 0x206   :  { %v1122_v29 = vmul.f32 %v4171_v26, %v1113_v27  ;;  %v1121_v30 = vmul.f32 %v4171_v26, %v1109_v28 }
 0x208   :  { %v4176_v31 = vsub.f32 %v4163_v16, %v1122_v29  ;;  %v4179_v32 = vsub.f32 %v4165_v17, %v1121_v30 }
 0x20a   :  { %v1126_v33 = vmul.f32 %v4176_v31, %v4176_v31  ;;  %v1125_v34 = vmul.f32 %v4179_v32, %v4179_v32 }
 0x20c   :  { %v1130_v35 = vsel %vm1110_vm3, %v1126_v33, 0.0  ;;  %v1127_v36 = vsel %vm1106_vm4, %v1125_v34, 0.0 }
 0x20d   :  { %1131 = vadd.xlane.f32.xlu1 %v1130_v35  ;;  %1128 = vadd.xlane.f32.xlu0 %v1127_v36 }
 0x280   :  { %v1132_v53 = vpop.xlane.xlu1 %1131  ;;  %v1129_v54 = vpop.xlane.xlu0 %1128 }
 0x281   :  { %v1134_v55 = vmul.f32 %v1132_v53, %v4171_v26  ;;  %v1133_v56 = vmul.f32 %v1129_v54, %v4171_v26 }
 0x283   :  { %v1136_v57 = vadd.f32 1e-06, %v1134_v55  ;;  %v1135_v58 = vadd.f32 1e-06, %v1133_v56 }
 0x285   :  { %3417 = vrsqrt.f32 %v1136_v57  ;;  %vm1143_vm8 = vweird.f32 %v1135_v58  ;;  %vm1153_vm10 = vweird.f32 %v1136_v57 }
 0x286   :  { %3419 = vrsqrt.f32 %v1135_v58 }
 0x28b   :  { %v3418_v59 = vpop.eup %3417 }
 0x28c   :  { %v3420_v60 = vpop.eup %3419  ;;  %v1148_v61 = vmul.f32 %v3418_v59, %v1136_v57  ;;  %vm1154_vm7 = vweird.f32 %v3418_v59 }
 0x28d   :  { %v1138_v62 = vmul.f32 %v3420_v60, %v1135_v58  ;;  %vm1144_vm6 = vweird.f32 %v3420_v60  ;;  %vm1155_vm11 = vmor %vm1153_vm10, %vm1154_vm7 }
 0x28e   :  { %v1149_v63 = vmul.f32 %v3418_v59, %v1148_v61  ;;  %vm1145_vm9 = vmor %vm1143_vm8, %vm1144_vm6 }
 0x28f   :  { %v1139_v0 = vmul.f32 %v3420_v60, %v1138_v62 }
 0x290   :  { %v1150_v1 = vmul.f32 0.5, %v1149_v63  ;;  %v1068_v63 = vld [vmem:[%s3628_s14 + $0x8] sm:$0xff] }
 0x291   :  { %v1140_v2 = vmul.f32 0.5, %v1139_v0  ;;  %v1067_v0 = vld [vmem:[%s3628_s14] sm:$0xff] }
 0x292   :  { %v1151_v3 = vsub.f32 1.5, %v1150_v1 }
 0x293   :  { %v1141_v4 = vsub.f32 1.5, %v1140_v2 }
 0x294   :  { %v1152_v5 = vmul.f32 %v3418_v59, %v1151_v3 }
 0x295   :  { %v1142_v6 = vmul.f32 %v3420_v60, %v1141_v4 }
 0x296   :  { %v1156_v11 = vsel %vm1155_vm11, %v3418_v59, %v1152_v5 }
 0x297   :  { %v1146_v8 = vsel %vm1145_vm9, %v3420_v60, %v1142_v6  ;;  %v1158_v14 = vmul.f32 %v1156_v11, %v4176_v31  ;;  %v1071_v11 = vld [vmem:[%s3628_s14 + $0x20] sm:$0xff] }
 0x298   :  { %v1157_v9 = vmul.f32 %v1146_v8, %v4179_v32  ;;  %v1070_v8 = vld [vmem:[%s3628_s14 + $0x18] sm:$0xff] }
 0x299   :  { %v1163_v15 = vmul.f32 %v3398_v7, %v1158_v14 }
 0x29a   :  { %v1162_v12 = vmul.f32 %v3398_v7, %v1157_v9  ;;  %v1069_v9 = vld [vmem:[%s3628_s14 + $0x10] sm:$0xff] }
 0x29b   :  { %v1168_v18 = vadd.f32 %v3399_v10, %v1163_v15 }
 0x29c   :  { %v1167_v13 = vadd.f32 %v3399_v10, %v1162_v12  ;;  %v1072_v10 = vld [vmem:[%s3628_s14 + $0x28] sm:$0xff] }
 0x29e   :  { %3262 = vmatmul.msk.f32.vlgmr.msra.gmra.mxu0 %vm1106_vm4, %v1167_v13  ;;  %3264 = vmatmul.msk.f32.vlgmr.msra.gmra.mxu1 %vm1106_vm4, %v1167_v13 }
 0x2a6   :  { %3263 = vmatmul.msk.f32.gmra.mxu0 %vm1106_vm4, %v1168_v18  ;;  %3265 = vmatmul.msk.f32.gmra.mxu1 %vm1106_vm4, %v1168_v18 }
 0x31b   :  { %v1197_v22 = vpop.f32.mrf.mxu0  ;;  %v1220_v23 = vpop.f32.mrf.mxu1 }
 0x31c   :  { %v4220_v24 = vadd.f32 %v1197_v22, %v1170_v20  ;;  %v4224_v25 = vadd.f32 %v1220_v23, %v1171_v21 }
 0x31e   :  { %3268 = vmatpush.msk.msra.mxu3 %vm1270_vm12, %v4224_v25  ;;  %1408 = vrot.lane.b32.xlu1 %v4220_v24, %s3567_s0  ;;  %v1595_v58 = vrot.slane %v4220_v24, 5  ;;  %v1636_v15 = vrot.slane %v4224_v25, 5 }
 0x31f   :  { %1294 = vrot.lane.b32.xlu0 %v4220_v24, %s3568_s5  ;;  %1227 = vrot.lane.b32.xlu2 %v4220_v24, %s3569_s9 }
 0x323   :  { %v1200_v34 = vpop.f32.mrf.mxu0  ;;  %v1223_v12 = vpop.f32.mrf.mxu1 }
 0x324   :  { %v1201_v56 = vadd.f32 %v1200_v34, %v1170_v20  ;;  %v1224_v13 = vadd.f32 %v1223_v12, %v1171_v21 }
 0x326   :  { %v1596_v57 = vrot.slane %v1201_v56, 5  ;;  %v1637_v14 = vrot.slane %v1224_v13, 5 }
 0x327   :  { %1296 = vrot.lane.b32.xlu2 %v4220_v24, %s3570_s13 }
 0x328   :  { %v4265_v59 = vsel %vm1594_vm15, %v1595_v58, %v1596_v57  ;;  %v4283_v20 = vsel %vm1594_vm15, %v1636_v15, %v1637_v14  ;;  %v1073_v57 = vld [vmem:[%s3628_s14 + $0x30] sm:$0xff] }
 0x32f   :  { %1406 = vrot.lane.b32.xlu2 %v4220_v24, %s3571_s17 }
 0x379   :  { %v1228_v27 = vpop.permute.xlu2 %1227 }
 0x37a   :  { %3266 = vmatpush.xpose.msk.msra.mxu2 %vm1229_vm13, %v1228_v27 }
 0x37d   :  { %3267 = vmatmul.msk.f32.vlgmr.msra.gmra.mxu2 %vm1229_vm13, %v4220_v24 }
 0x381   :  { %v1297_v28 = vpop.permute.xlu2 %1296 }
 0x382   :  { %3270 = vmatpush.xpose.msk.msrb.mxu2 %vm1229_vm13, %v1297_v28 }
 0x386   :  { %1377 = vmatpush.msra.mxu2 %v1070_v8 }
 0x388   :  { %1378 = vmatpush.msra.mxu2 %v1069_v9 }
 0x389   :  { %v1407_v31 = vpop.permute.xlu2 %1406 }
 0x390   :  { %v1409_v29 = vpop.permute.xlu1 %1408 }
 0x391   :  { %v1295_v30 = vpop.permute.xlu0 %1294  ;;  %3276 = vmatpush.xpose.msk.msrb.mxu0 %vm1229_vm13, %v1409_v29 }
 0x392   :  { %3271 = vmatmul.msk.f32.vlgmr.msrb.gmra.mxu2 %vm1229_vm13, %v1295_v30 }
 0x393   :  { %1489 = vmatpush.msrb.mxu2 %v1072_v10 }
 0x394   :  { %3277 = vmatmul.msk.f32.vlgmr.msrb.gmra.mxu0 %vm1229_vm13, %v1407_v31 }
 0x395   :  { %1490 = vmatpush.msrb.mxu2 %v1071_v11 }
 0x400   :  { %v1251_v32 = vpop.f32.mrf.mxu2 }
 0x401   :  { %v1255_v33 = vsel %vm1254_vm14, %v1251_v32, -inf }
 0x402   :  { %1256 = vmax.xlane.f32.xlu2 %v1255_v33 }
 0x411   :  { %v1431_v35 = vpop.f32.mrf.mxu0 }
 0x412   :  { %v1434_v36 = vsel %vm1254_vm14, %v1431_v35, -inf }
 0x413   :  { %1435 = vmax.xlane.f32.xlu1 %v1434_v36 }
 0x415   :  { %v1319_v37 = vpop.f32.mrf.mxu2 }
 0x416   :  { %v1322_v38 = vsel %vm1254_vm14, %v1319_v37, -inf }
 0x417   :  { %1323 = vmax.xlane.f32.xlu0 %v1322_v38 }
 0x42b   :  { %1333 = vrot.lane.b32.xlu0 %v4224_v25, %s3568_s5 }
 0x42c   :  { %1445 = vrot.lane.b32.xlu1 %v4224_v25, %s3571_s17 }
 0x433   :  { %1498 = vrot.lane.b32.xlu0 %v4220_v24, %s3572_s21 }
 0x43b   :  { %1496 = vrot.lane.b32.xlu0 %v4220_v24, %s3573_s25 }
 0x475   :  { %v1257_v39 = vpop.xlane.xlu2 %1256 }
 0x476   :  { %v1258_v40 = vsub.f32 %v1251_v32, %v1257_v39 }
 0x478   :  { %v1259_v41 = vmul.f32 1.442695, %v1258_v40 }
 0x47a   :  { %3421 = vpow2.f32 %v1259_v41 }
 0x480   :  { %v3422_v42 = vpop.eup %3421 }
 0x481   :  { %v1261_v43 = vsel %vm1254_vm14, %v3422_v42, 0.0 }
 0x482   :  { %1262 = vadd.xlane.f32.xlu2 %v1261_v43 }
 0x486   :  { %v1436_v44 = vpop.xlane.xlu1 %1435 }
 0x487   :  { %v1437_v47 = vsub.f32 %v1431_v35, %v1436_v44 }
 0x489   :  { %v1438_v49 = vmul.f32 1.442695, %v1437_v47 }
 0x48a   :  { %v1324_v45 = vpop.xlane.xlu0 %1323 }
 0x48b   :  { %v1325_v46 = vsub.f32 %v1319_v37, %v1324_v45  ;;  %v4315_v45 = vld [vmem:[%s3628_s14 + $0x38] sm:$0xff]  ;;  %s4722_s14 = sld [smem:[#allocation12_spill]] }
 0x48d   :  { %v1326_v48 = vmul.f32 1.442695, %v1325_v46 }
 0x48f   :  { %3423 = vpow2.f32 %v1326_v48 }
 0x490   :  { %3425 = vpow2.f32 %v1438_v49 }
 0x495   :  { %v3424_v50 = vpop.eup %3423 }
 0x496   :  { %v1328_v51 = vsel %vm1254_vm14, %v3424_v50, 0.0  ;;  %v3426_v52 = vpop.eup %3425 }
 0x497   :  { %1329 = vadd.xlane.f32.xlu2 %v1328_v51  ;;  %v1440_v55 = vsel %vm1254_vm14, %v3426_v52, 0.0 }
 0x49d   :  { %v1334_v53 = vpop.permute.xlu0 %1333 }
 0x49e   :  { %3272 = vmatpush.msk.msrb.mxu3 %vm1270_vm12, %v1334_v53  ;;  %v1446_v54 = vpop.permute.xlu1 %1445 }
 0x49f   :  { %1441 = vadd.xlane.f32.xlu2 %v1440_v55  ;;  %3278 = vmatpush.msk.msrb.mxu1 %vm1270_vm12, %v1446_v54 }
 0x4a1   :  { %1579 = vmatpush.msra.mxu1 %v4315_v45 }
 0x4a3   :  { %1580 = vmatpush.msra.mxu1 %v1073_v57 }
 0x4a5   :  { %v1499_v5 = vpop.permute.xlu0 %1498 }
 0x4ad   :  { %v1497_v22 = vpop.permute.xlu0 %1496 }
 0x4b7   :  { %1598 = vrot.lane.b32.xlu2 %v4265_v59, %s3569_s9 }
 0x4f5   :  { %v1263_v60 = vpop.xlane.xlu2 %1262 }
 0x4f6   :  { %3427 = vrcp.f32 %v1263_v60 }
 0x4fc   :  { %v3428_v61 = vpop.eup %3427 }
 0x4fd   :  { %v1265_v62 = vmul.f32 %v3428_v61, %v3422_v42 }
 0x4ff   :  { %3269 = vmatmul.msk.f32.vlgmr.msra.gmra.mxu3 %vm1266_vm1, %v1265_v62 }
 0x500   :  { %1400 = vmatpush.msra.mxu3 %v1068_v63 }
 0x502   :  { %1401 = vmatpush.msra.mxu3 %v1067_v0 }
 0x50a   :  { %v1330_v1 = vpop.xlane.xlu2 %1329 }
 0x50b   :  { %3429 = vrcp.f32 %v1330_v1 }
 0x511   :  { %v3430_v2 = vpop.eup %3429 }
 0x512   :  { %v1332_v3 = vmul.f32 %v3430_v2, %v3424_v50  ;;  %v1442_v4 = vpop.xlane.xlu2 %1441 }
 0x513   :  { %3431 = vrcp.f32 %v1442_v4 }
 0x514   :  { %3273 = vmatmul.msk.f32.vlgmr.msrb.gmra.mxu3 %vm1266_vm1, %v1332_v3 }
 0x515   :  { %3281 = vmatpush.xpose.msk.msrb.mxu3 %vm1229_vm13, %v1499_v5  ;;  %v4334_v5 = vld [vmem:[%s3633_s19] ss:$0 sm:$0xff]  ;;  %s4723_s19 = sld [smem:[#allocation10_spill]] }
 0x519   :  { %v3432_v6 = vpop.eup %3431 }
 0x51a   :  { %v1444_v7 = vmul.f32 %v3432_v6, %v3426_v52  ;;  %v1599_v19 = vpop.permute.xlu2 %1598 }
 0x51c   :  { %3279 = vmatmul.msk.f32.vlgmr.msrb.gmra.mxu1 %vm1266_vm1, %v1444_v7 }
 0x582   :  { %v1291_v18 = vpop.f32.mrf.mxu3 }
 0x583   :  { %3275 = vmatmul.msk.f32.vlgmr.msra.gmra.mxu3 %vm1229_vm13, %v1291_v18 }
 0x584   :  { %3288 = vmatpush.msk.msra.mxu3 %vm1270_vm12, %v4283_v20 }
 0x58b   :  { %3282 = vmatmul.msk.f32.vlgmr.msrb.gmra.mxu3 %vm1229_vm13, %v1497_v22 }
 0x58c   :  { %1770 = vmatpush.msrb.mxu3 %v1068_v63 }
 0x58e   :  { %1771 = vmatpush.msrb.mxu3 %v1067_v0 }
 0x597   :  { %v1357_v23 = vpop.f32.mrf.mxu3 }
 0x598   :  { %3274 = vmatmul.msk.f32.vlgmr.msra.gmra.mxu2 %vm1229_vm13, %v1357_v23 }
 0x599   :  { %3286 = vmatpush.xpose.msk.msra.mxu2 %vm1229_vm13, %v1599_v19  ;;  %v1469_v21 = vpop.f32.mrf.mxu1 }
 0x5a0   :  { %3280 = vmatmul.msk.f32.vlgmr.msrb.gmra.mxu2 %vm1229_vm13, %v1469_v21 }
 0x5a1   :  { %1747 = vmatpush.msrb.mxu2 %v1070_v8 }
 0x5a3   :  { %1748 = vmatpush.msrb.mxu2 %v1069_v9 }
 0x5a8   :  { %3287 = vmatmul.msk.f32.vlgmr.msra.gmra.mxu2 %vm1229_vm13, %v4265_v59 }
 0x5a9   :  { %1859 = vmatpush.msra.mxu2 %v1072_v10 }
 0x5ab   :  { %1860 = vmatpush.msra.mxu2 %v1071_v11 }
 0x606   :  { %v1403_v24 = vpop.f32.mrf.mxu3 }
 0x60e   :  { %v1521_v27 = vpop.f32.mrf.mxu3 }
 0x60f   :  { %v1524_v28 = vsel %vm1254_vm14, %v1521_v27, -inf }
 0x610   :  { %1525 = vmax.xlane.f32.xlu0 %v1524_v28 }
 0x61b   :  { %v1380_v29 = vpop.f32.mrf.mxu2 }
 0x61c   :  { %v1404_v30 = vadd.f32 %v1403_v24, %v1380_v29 }
 0x623   :  { %v1492_v31 = vpop.f32.mrf.mxu2 }
 0x624   :  { %v4295_v32 = vadd.f32 %v1492_v31, %v1404_v30  ;;  %1666 = vrot.lane.b32.xlu0 %v4265_v59, %s3570_s13 }
 0x62b   :  { %v1621_v33 = vpop.f32.mrf.mxu2 }
 0x62c   :  { %1778 = vrot.lane.b32.xlu0 %v4265_v59, %s3567_s0  ;;  %v1624_v34 = vsel %vm1254_vm14, %v1621_v33, -inf }
 0x62d   :  { %1625 = vmax.xlane.f32.xlu1 %v1624_v34 }
 0x634   :  { %1866 = vrot.lane.b32.xlu0 %v4265_v59, %s3573_s25 }
 0x683   :  { %v1526_v35 = vpop.xlane.xlu0 %1525 }
 0x684   :  { %v1527_v36 = vsub.f32 %v1521_v27, %v1526_v35 }
 0x686   :  { %v1528_v37 = vmul.f32 1.442695, %v1527_v36 }
 0x688   :  { %3433 = vpow2.f32 %v1528_v37 }
 0x68e   :  { %v3434_v38 = vpop.eup %3433 }
 0x68f   :  { %v1530_v39 = vsel %vm1254_vm14, %v3434_v38, 0.0 }
 0x690   :  { %1531 = vadd.xlane.f32.xlu1 %v1530_v39 }
 0x696   :  { %v1667_v48 = vpop.permute.xlu0 %1666 }
 0x6a0   :  { %v1626_v40 = vpop.xlane.xlu1 %1625 }
 0x6a1   :  { %v1627_v41 = vsub.f32 %v1621_v33, %v1626_v40 }
 0x6a3   :  { %v1628_v42 = vmul.f32 1.442695, %v1627_v41 }
 0x6a5   :  { %3435 = vpow2.f32 %v1628_v42 }
 0x6a9   :  { %1664 = vrot.lane.b32.xlu1 %v4265_v59, %s3568_s5 }
 0x6ab   :  { %v3436_v43 = vpop.eup %3435 }
 0x6ac   :  { %v1630_v44 = vsel %vm1254_vm14, %v3436_v43, 0.0 }
 0x6ad   :  { %1631 = vadd.xlane.f32.xlu2 %v1630_v44 }
 0x6b1   :  { %1776 = vrot.lane.b32.xlu1 %v4265_v59, %s3571_s17 }
 0x6c5   :  { %1535 = vrot.lane.b32.xlu2 %v4224_v25, %s3573_s25  ;;  %v1779_v25 = vpop.permute.xlu0 %1778 }
 0x6cd   :  { %1868 = vrot.lane.b32.xlu2 %v4265_v59, %s3572_s21  ;;  %v1867_v62 = vpop.permute.xlu0 %1866 }
 0x703   :  { %v1532_v46 = vpop.xlane.xlu1 %1531 }
 0x704   :  { %3437 = vrcp.f32 %v1532_v46 }
 0x70a   :  { %v3438_v49 = vpop.eup %3437 }
 0x70b   :  { %v1534_v51 = vmul.f32 %v3438_v49, %v3434_v38 }
 0x71b   :  { %v1665_v54 = vpop.permute.xlu1 %1664 }
 0x720   :  { %v1632_v47 = vpop.xlane.xlu2 %1631 }
 0x721   :  { %3439 = vrcp.f32 %v1632_v47 }
 0x723   :  { %v1777_v56 = vpop.permute.xlu1 %1776 }
 0x727   :  { %v3440_v50 = vpop.eup %3439 }
 0x728   :  { %v1634_v52 = vmul.f32 %v3440_v50, %v3436_v43  ;;  %v1536_v53 = vpop.permute.xlu2 %1535 }
 0x729   :  { %3283 = vmatpush.msk.msra.mxu0 %vm1270_vm12, %v1536_v53 }
 0x72a   :  { %3284 = vmatmul.msk.f32.vlgmr.msra.gmra.mxu0 %vm1266_vm1, %v1534_v51  ;;  %3289 = vmatmul.msk.f32.vlgmr.msra.gmra.mxu3 %vm1266_vm1, %v1634_v52 }
 0x72b   :  { %3290 = vmatpush.xpose.msk.msrb.mxu0 %vm1229_vm13, %v1667_v48 }
 0x72f   :  { %3296 = vmatpush.xpose.msk.msra.mxu0 %vm1229_vm13, %v1779_v25 }
 0x730   :  { %v1869_v55 = vpop.permute.xlu2 %1868 }
 0x731   :  { %3301 = vmatpush.xpose.msk.msra.mxu3 %vm1229_vm13, %v1869_v55 }
 0x732   :  { %3291 = vmatmul.msk.f32.vlgmr.msrb.gmra.mxu0 %vm1229_vm13, %v1665_v54 }
 0x73a   :  { %3297 = vmatmul.msk.f32.vlgmr.msra.gmra.mxu0 %vm1229_vm13, %v1777_v56 }
 0x7a7   :  { %v1559_v58 = vpop.f32.mrf.mxu0 }
 0x7a8   :  { %3285 = vmatmul.msk.f32.vlgmr.msra.gmra.mxu1 %vm1229_vm13, %v1559_v58  ;;  %v1085_v58 = vld [vmem:[%s3648_s6 + $0x38] sm:$0xff] }
 0x7ad   :  { %v1661_v59 = vpop.f32.mrf.mxu3 }
 0x7ae   :  { %3295 = vmatmul.msk.f32.vlgmr.msrb.gmra.mxu3 %vm1229_vm13, %v1661_v59  ;;  %v1084_v59 = vld [vmem:[%s3648_s6 + $0x30] sm:$0xff] }
 0x7af   :  { %v1689_v60 = vpop.f32.mrf.mxu0 }
 0x7b0   :  { %v1692_v61 = vsel %vm1254_vm14, %v1689_v60, -inf }
 0x7b1   :  { %1693 = vmax.xlane.f32.xlu2 %v1692_v61  ;;  %v1082_v61 = vld [vmem:[%s3648_s6 + $0x20] sm:$0xff] }
 0x7b6   :  { %3302 = vmatmul.msk.f32.vlgmr.msra.gmra.mxu3 %vm1229_vm13, %v1867_v62  ;;  %v1081_v62 = vld [vmem:[%s3648_s6 + $0x18] sm:$0xff] }
 0x7b7   :  { %v1801_v63 = vpop.f32.mrf.mxu0 }
 0x7b8   :  { %v1804_v0 = vsel %vm1254_vm14, %v1801_v63, -inf }
 0x7b9   :  { %1805 = vmax.xlane.f32.xlu1 %v1804_v0  ;;  %v1079_v0 = vld [vmem:[%s3648_s6 + $0x8] sm:$0xff] }
 0x824   :  { %v1694_v1 = vpop.xlane.xlu2 %1693 }
 0x825   :  { %v1695_v2 = vsub.f32 %v1689_v60, %v1694_v1  ;;  %v1582_v3 = vpop.f32.mrf.mxu1  ;;  %v1083_v60 = vld [vmem:[%s3648_s6 + $0x28] sm:$0xff]  ;;  %v1078_v1 = vld [vmem:[%s3648_s6] sm:$0xff] }
 0x826   :  { %v1585_v4 = vadd.f32 %v1582_v3, %v4295_v32  ;;  %v1101_v3 = vld [vmem:[%s3658_s20 + $0x70] sm:$0xff] }
 0x827   :  { %v1696_v6 = vmul.f32 1.442695, %v1695_v2  ;;  %v1102_v2 = vld [vmem:[%s3658_s20 + $0x78] sm:$0xff] }
 0x828   :  { %v1586_v7 = vadd.f32 %v1585_v4, %v4165_v17  ;;  %2075 = vmatpush.msrb.mxu3 %v1102_v2  ;;  %v1100_v4 = vld [vmem:[%s3658_s20 + $0x68] sm:$0xff]  ;;  %v2104_v2 = vld [vmem:[%s4722_s14] sm:$0xff] }
 0x829   :  { %3441 = vpow2.f32 %v1696_v6 }
 0x82a   :  { %v1590_v8 = vadd.f32 %v4334_v5, %v1586_v7  ;;  %2076 = vmatpush.msrb.mxu3 %v1101_v3 }
 0x82c   :  { %1592 = vst.msk [vmem:[#allocation2] sm:$0x1f] %vm1591_vm2, %v1590_v8  ;;  %v1806_v9 = vpop.xlane.xlu1 %1805  ;;  %2077 = vmatpush.msrb.mxu3 %v1100_v4 }
 0x82d   :  { %v1807_v10 = vsub.f32 %v1801_v63, %v1806_v9  ;;  %v1080_v63 = vld [vmem:[%s3648_s6 + $0x10] sm:$0xff]  ;;  %s4725_s6 = sld [smem:[#allocation13_spill]] }
 0x82f   :  { %v3442_v11 = vpop.eup %3441  ;;  %v1808_v12 = vmul.f32 1.442695, %v1807_v10 }
 0x830   :  { %v1698_v13 = vsel %vm1254_vm14, %v3442_v11, 0.0 }
 0x831   :  { %3443 = vpow2.f32 %v1808_v12  ;;  %v1773_v14 = vpop.f32.mrf.mxu3  ;;  %1699 = vadd.xlane.f32.xlu2 %v1698_v13 }
 0x837   :  { %v3444_v15 = vpop.eup %3443 }
 0x838   :  { %v1810_v18 = vsel %vm1254_vm14, %v3444_v15, 0.0 }
 0x839   :  { %v1891_v22 = vpop.f32.mrf.mxu3  ;;  %1811 = vadd.xlane.f32.xlu1 %v1810_v18 }
 0x83a   :  { %v1894_v23 = vsel %vm1254_vm14, %v1891_v22, -inf }
 0x83b   :  { %1895 = vmax.xlane.f32.xlu0 %v1894_v23 }
 0x84f   :  { %1703 = vrot.lane.b32.xlu0 %v4283_v20, %s3568_s5 }
 0x852   :  { %1815 = vrot.lane.b32.xlu1 %v4283_v20, %s3571_s17 }
 0x8a4   :  { %v1700_v27 = vpop.xlane.xlu2 %1699 }
 0x8ac   :  { %v1812_v30 = vpop.xlane.xlu1 %1811 }
 0x8ae   :  { %v1896_v19 = vpop.xlane.xlu0 %1895 }
 0x8af   :  { %v1897_v21 = vsub.f32 %v1891_v22, %v1896_v19  ;;  %v4388_v22 = vld [vmem:[%s4719_s29] ss:$0 sm:$0xff] }
 0x8b1   :  { %v1898_v24 = vmul.f32 1.442695, %v1897_v21  ;;  %v1099_v21 = vld [vmem:[%s3658_s20 + $0x60] sm:$0xff] }
 0x8b2   :  { %2078 = vmatpush.msrb.mxu3 %v1099_v21 }
 0x8b3   :  { %3445 = vpow2.f32 %v1898_v24  ;;  %v1098_v24 = vld [vmem:[%s3658_s20 + $0x58] sm:$0xff] }
 0x8b4   :  { %3447 = vrcp.f32 %v1700_v27  ;;  %2079 = vmatpush.msrb.mxu3 %v1098_v24  ;;  %v1097_v27 = vld [vmem:[%s3658_s20 + $0x50] sm:$0xff] }
 0x8b5   :  { %3449 = vrcp.f32 %v1812_v30  ;;  %v1094_v30 = vld [vmem:[%s3658_s20 + $0x38] sm:$0xff] }
 0x8b6   :  { %2080 = vmatpush.msrb.mxu3 %v1097_v27 }
 0x8b9   :  { %v3446_v28 = vpop.eup %3445 }
 0x8ba   :  { %v1900_v29 = vsel %vm1254_vm14, %v3446_v28, 0.0  ;;  %v3448_v31 = vpop.eup %3447 }
 0x8bb   :  { %1901 = vadd.xlane.f32.xlu2 %v1900_v29  ;;  %v1702_v32 = vmul.f32 %v3448_v31, %v3442_v11  ;;  %v3450_v35 = vpop.eup %3449  ;;  %v1095_v29 = vld [vmem:[%s3658_s20 + $0x40] sm:$0xff]  ;;  %v1093_v31 = vld [vmem:[%s3658_s20 + $0x30] sm:$0xff] }
 0x8bc   :  { %v1814_v36 = vmul.f32 %v3450_v35, %v3444_v15  ;;  %v1089_v35 = vld [vmem:[%s3658_s20 + $0x10] sm:$0xff] }
 0x8c1   :  { %v1704_v33 = vpop.permute.xlu0 %1703 }
 0x8c2   :  { %3292 = vmatpush.msk.msrb.mxu1 %vm1270_vm12, %v1704_v33  ;;  %v1091_v33 = vld [vmem:[%s3658_s20 + $0x20] sm:$0xff] }
 0x8c3   :  { %3293 = vmatmul.msk.f32.vlgmr.msrb.gmra.mxu1 %vm1266_vm1, %v1702_v32  ;;  %v1092_v32 = vld [vmem:[%s3658_s20 + $0x28] sm:$0xff] }
 0x8c4   :  { %v1816_v34 = vpop.permute.xlu1 %1815 }
 0x8c5   :  { %3298 = vmatpush.msk.msra.mxu1 %vm1270_vm12, %v1816_v34  ;;  %v1090_v34 = vld [vmem:[%s3658_s20 + $0x18] sm:$0xff] }
 0x8c7   :  { %1949 = vmatpush.msrb.mxu1 %v4315_v45 }
 0x8c9   :  { %1950 = vmatpush.msrb.mxu1 %v1073_v57 }
 0x8cb   :  { %3299 = vmatmul.msk.f32.vlgmr.msra.gmra.mxu1 %vm1266_vm1, %v1814_v36  ;;  %v1088_v36 = vld [vmem:[%s3658_s20 + $0x8] sm:$0xff] }
 0x8d3   :  { %1905 = vrot.lane.b32.xlu2 %v4283_v20, %s3573_s25 }
 0x92e   :  { %v1902_v37 = vpop.xlane.xlu2 %1901 }
 0x92f   :  { %3451 = vrcp.f32 %v1902_v37  ;;  %v1087_v37 = vld [vmem:[%s3658_s20] sm:$0xff] }
 0x935   :  { %v3452_v38 = vpop.eup %3451 }
 0x936   :  { %v1904_v39 = vmul.f32 %v3452_v38, %v3446_v28  ;;  %v1906_v40 = vpop.permute.xlu2 %1905  ;;  %v1096_v28 = vld [vmem:[%s3658_s20 + $0x48] sm:$0xff]  ;;  %v4407_v38 = vld [vmem:[%s4720_s3] ss:$0 sm:$0xff]  ;;  %s4726_s20 = sld [smem:[#allocation14_spill]] }
 0x937   :  { %3303 = vmatpush.msk.msrb.mxu0 %vm1270_vm12, %v1906_v40  ;;  %2081 = vmatpush.msrb.mxu3 %v1096_v28 }
 0x938   :  { %3304 = vmatmul.msk.f32.vlgmr.msrb.gmra.mxu0 %vm1266_vm1, %v1904_v39 }
 0x939   :  { %2082 = vmatpush.msrb.mxu3 %v1095_v29 }
 0x93b   :  { %2083 = vmatpush.msrb.mxu3 %v1094_v30 }
 0x93d   :  { %2084 = vmatpush.msrb.mxu3 %v1093_v31 }
 0x93f   :  { %2085 = vmatpush.msrb.mxu3 %v1092_v32 }
 0x940   :  { %v1727_v41 = vpop.f32.mrf.mxu1 }
 0x941   :  { %3294 = vmatmul.msk.f32.vlgmr.msrb.gmra.mxu2 %vm1229_vm13, %v1727_v41  ;;  %2086 = vmatpush.msrb.mxu3 %v1091_v33 }
 0x942   :  { %2039 = vmatpush.msrb.mxu2 %v1085_v58 }
 0x943   :  { %2087 = vmatpush.msrb.mxu3 %v1090_v34 }
 0x944   :  { %2040 = vmatpush.msrb.mxu2 %v1084_v59  ;;  %v2118_v59 = vld [vmem:[%s4722_s14 + $0x70] sm:$0xff] }
 0x945   :  { %2088 = vmatpush.msrb.mxu3 %v1089_v35  ;;  %2233 = vmatpush.msra.mxu0 %v2118_v59 }
 0x946   :  { %2041 = vmatpush.msrb.mxu2 %v1083_v60  ;;  %v2116_v60 = vld [vmem:[%s4722_s14 + $0x60] sm:$0xff] }
 0x947   :  { %2089 = vmatpush.msrb.mxu3 %v1088_v36  ;;  %2234 = vmatpush.msra.mxu0 %v2116_v60 }
 0x948   :  { %v1839_v42 = vpop.f32.mrf.mxu1  ;;  %2042 = vmatpush.msrb.mxu2 %v1082_v61  ;;  %v2114_v61 = vld [vmem:[%s4722_s14 + $0x50] sm:$0xff] }
 0x949   :  { %3300 = vmatmul.msk.f32.vlgmr.msra.gmra.mxu2 %vm1229_vm13, %v1839_v42  ;;  %2090 = vmatpush.msrb.mxu3 %v1087_v37  ;;  %v4450_v37 = vld [vmem:[%s4725_s6] sm:$0x3] }
 0x94a   :  { %2043 = vmatpush.msrb.mxu2 %v1081_v62  ;;  %2235 = vmatpush.msra.mxu0 %v2114_v61  ;;  %v2112_v62 = vld [vmem:[%s4722_s14 + $0x40] sm:$0xff] }
 0x94c   :  { %2044 = vmatpush.msrb.mxu2 %v1080_v63  ;;  %2236 = vmatpush.msra.mxu0 %v2112_v62  ;;  %v2110_v63 = vld [vmem:[%s4722_s14 + $0x30] sm:$0xff] }
 0x94e   :  { %2045 = vmatpush.msrb.mxu2 %v1079_v0  ;;  %2237 = vmatpush.msra.mxu0 %v2110_v63  ;;  %v2108_v0 = vld [vmem:[%s4722_s14 + $0x20] sm:$0xff] }
 0x950   :  { %2046 = vmatpush.msrb.mxu2 %v1078_v1  ;;  %2238 = vmatpush.msra.mxu0 %v2108_v0  ;;  %v2106_v1 = vld [vmem:[%s4722_s14 + $0x10] sm:$0xff] }
 0x952   :  { %2239 = vmatpush.msra.mxu0 %v2106_v1 }
 0x954   :  { %2240 = vmatpush.msra.mxu0 %v2104_v2 }
 0x9b5   :  { %v1929_v43 = vpop.f32.mrf.mxu0 }
 0x9b6   :  { %3305 = vmatmul.msk.f32.vlgmr.msrb.gmra.mxu1 %vm1229_vm13, %v1929_v43 }
 0x9c4   :  { %v1750_v44 = vpop.f32.mrf.mxu2 }
 0x9c5   :  { %v1774_v45 = vadd.f32 %v1773_v14, %v1750_v44  ;;  %v4385_v14 = vld [vmem:[%s3638_s24] ss:$0 sm:$0xff]  ;;  %s4724_s24 = sld [smem:[#allocation11_spill]] }
 0x9cb   :  { %v4443_v27 = vld [vmem:[%s4724_s24] ss:$0 sm:$0xff] }
 0x9cc   :  { %v1862_v20 = vpop.f32.mrf.mxu2 }
 0x9cd   :  { %v1865_v46 = vadd.f32 %v1862_v20, %v1774_v45 }
 0xa33   :  { %v1952_v47 = vpop.f32.mrf.mxu1 }
 0xa34   :  { %v1955_v48 = vadd.f32 %v1952_v47, %v1865_v46 }
 0xa36   :  { %v1957_v49 = vrot.slane %v1955_v48, 3 }
 0xa38   :  { %v1959_v50 = vadd.f32 %v1957_v49, %v4165_v17  ;;  %v1960_v51 = vadd.f32 %v1957_v49, %v4163_v16  ;;  %v4411_v49 = vld [vmem:[%s4721_s8] ss:$0 sm:$0xff] }
 0xa3a   :  { %v1961_v52 = vadd.f32 %v4334_v5, %v1959_v50  ;;  %v1962_v53 = vadd.f32 %v4334_v5, %v1960_v51 }
 0xa3c   :  { %1964 = vst.msk [vmem:[#allocation2] sm:$0xe0] %vm1963_vm5, %v1961_v52 }
 0xa3d   :  { %1965 = vst.msk [vmem:[#allocation2 + $0x8] sm:$0x3] %vm1110_vm3, %v1962_v53 }
 0xa43   :  { %v4365_v25 = vld [vmem:[#allocation2] sm:$0xff] }
 0xa44   :  { %v1968_v17 = vsel %vm1106_vm4, %v4365_v25, 0.0 }
 0xa45   :  { %1969 = vadd.xlane.f32.xlu0 %v1968_v17 }
 0xab8   :  { %v1970_v16 = vpop.xlane.xlu0 %1969 }
 0xab9   :  { %v1974_v54 = vmul.f32 %v1970_v16, %v4171_v26 }
 0xabb   :  { %v1976_v55 = vsub.f32 %v4365_v25, %v1974_v54 }
 0xabd   :  { %v1978_v56 = vmul.f32 %v1976_v55, %v1976_v55 }
 0xabf   :  { %v1980_v57 = vsel %vm1106_vm4, %v1978_v56, 0.0 }
 0xac0   :  { %1981 = vadd.xlane.f32.xlu1 %v1980_v57  ;;  %v4423_v57 = vld [vmem:[#allocation2 + $0x8] sm:$0x3] }
 0xac1   :  { %v1971_v58 = vsel %vm1110_vm3, %v4423_v57, 0.0 }
 0xb33   :  { %v1982_v5 = vpop.xlane.xlu1 %1981 }
 0xb34   :  { %v1986_v6 = vmul.f32 %v1982_v5, %v4171_v26 }
 0xb36   :  { %v1988_v7 = vadd.f32 1e-06, %v1986_v6 }
 0xb38   :  { %3453 = vrsqrt.f32 %v1988_v7  ;;  %vm1996_vm7 = vweird.f32 %v1988_v7 }
 0xb3e   :  { %v3454_v8 = vpop.eup %3453 }
 0xb3f   :  { %v1991_v9 = vmul.f32 %v3454_v8, %v1988_v7  ;;  %vm1997_vm6 = vweird.f32 %v3454_v8 }
 0xb40   :  { %vm1998_vm8 = vmor %vm1996_vm7, %vm1997_vm6 }
 0xb41   :  { %v1992_v10 = vmul.f32 %v3454_v8, %v1991_v9 }
 0xb43   :  { %v1993_v11 = vmul.f32 0.5, %v1992_v10 }
 0xb45   :  { %v1994_v12 = vsub.f32 1.5, %v1993_v11 }
 0xb47   :  { %v1995_v13 = vmul.f32 %v3454_v8, %v1994_v12 }
 0xb49   :  { %v1999_v15 = vsel %vm1998_vm8, %v3454_v8, %v1995_v13 }
 0xb4a   :  { %v2010_v18 = vmul.f32 %v1999_v15, %v1976_v55 }
 0xb4c   :  { %v2015_v23 = vmul.f32 %v4385_v14, %v2010_v18 }
 0xb4e   :  { %v2020_v19 = vadd.f32 %v4388_v22, %v2015_v23 }
 0xb50   :  { %3306 = vmatmul.msk.f32.vlgmr.msrb.gmra.mxu2 %vm1106_vm4, %v2020_v19  ;;  %v4440_v19 = vld [vmem:[%s4723_s19] ss:$0 sm:$0xff] }
 0xbd3   :  { %v2048_v39 = vpop.f32.mrf.mxu2 }
 0xbd4   :  { %v2049_v40 = vadd.f32 %v4407_v38, %v2048_v39 }
 0xbd6   :  { %v2054_v41 = vmul.f32 %v2049_v40, %v2049_v40 }
 0xbd8   :  { %v2056_v42 = vmul.f32 %v2054_v41, %v2049_v40  ;;  %v2215_v41 = vperm.slane %v4450_v37, 0 }
 0xbda   :  { %v2058_v43 = vmul.f32 0.044715, %v2056_v42 }
 0xbdc   :  { %v2060_v44 = vadd.f32 %v2058_v43, %v2049_v40 }
 0xbde   :  { %v2062_v20 = vmul.f32 0.7978846, %v2060_v44 }
 0xbe0   :  { %3455 = vtanh.f32 %v2062_v20 }
 0xbe6   :  { %v3456_v45 = vpop.eup %3455 }
 0xbe7   :  { %v2066_v46 = vadd.f32 1.0, %v3456_v45 }
 0xbe9   :  { %v2068_v47 = vmul.f32 0.5, %v2066_v46 }
 0xbeb   :  { %v2070_v48 = vmul.f32 %v2068_v47, %v2049_v40 }
 0xbed   :  { %2091 = vmatmul.f32.vlgmr.msrb.gmra.mxu3 %v2070_v48  ;;  %v2119_v48 = vld [vmem:[%s4722_s14 + $0x78] sm:$0xff] }
 0xbee   :  { %2256 = vmatpush.msra.mxu3 %v2119_v48 }
 0xc70   :  { %v2092_v50 = vpop.f32.mrf.mxu3 }
 0xc71   :  { %v2093_v51 = vadd.f32 %v4411_v49, %v2092_v50  ;;  %v2117_v50 = vld [vmem:[%s4722_s14 + $0x68] sm:$0xff] }
 0xc72   :  { %2257 = vmatpush.msra.mxu3 %v2117_v50 }
 0xc73   :  { %v2098_v52 = vadd.f32 %v2093_v51, %v4365_v25  ;;  %v2113_v51 = vld [vmem:[%s4722_s14 + $0x48] sm:$0xff] }
 0xc75   :  { %2100 = vst.msk [vmem:[#allocation2] sm:$0xff] %vm1106_vm4, %v2098_v52 }
 0xc7c   :  { %v4416_v53 = vld [vmem:[#allocation2] sm:$0xff] }
 0xc7d   :  { %v2160_v17 = vsel %vm1106_vm4, %v4416_v53, 0.0 }
 0xc7e   :  { %2161 = vadd.xlane.f32.xlu2 %v2160_v17  ;;  %v2111_v17 = vld [vmem:[%s4722_s14 + $0x38] sm:$0xff] }
 0xcf1   :  { %v2162_v16 = vpop.xlane.xlu2 %2161 }
 0xcf2   :  { %v2166_v54 = vmul.f32 %v2162_v16, %v4171_v26  ;;  %v2107_v16 = vld [vmem:[%s4722_s14 + $0x18] sm:$0xff] }
 0xcf4   :  { %v2168_v55 = vsub.f32 %v4416_v53, %v2166_v54  ;;  %v2105_v54 = vld [vmem:[%s4722_s14 + $0x8] sm:$0xff] }
 0xcf6   :  { %v2170_v56 = vmul.f32 %v2168_v55, %v2168_v55 }
 0xcf8   :  { %v2172_v25 = vsel %vm1106_vm4, %v2170_v56, 0.0 }
 0xcf9   :  { %2173 = vadd.xlane.f32.xlu0 %v2172_v25 }
 0xd01   :  { %1972 = vadd.xlane.f32.xlu0 %v1971_v58 }
 0xd6c   :  { %v2174_v3 = vpop.xlane.xlu0 %2173 }
 0xd6d   :  { %v2178_v4 = vmul.f32 %v2174_v3, %v4171_v26 }
 0xd6f   :  { %v2180_v5 = vadd.f32 1e-06, %v2178_v4 }
 0xd71   :  { %3457 = vrsqrt.f32 %v2180_v5  ;;  %vm2188_vm10 = vweird.f32 %v2180_v5 }
 0xd74   :  { %v1973_v6 = vpop.xlane.xlu0 %1972 }
 0xd75   :  { %v1975_v7 = vmul.f32 %v1973_v6, %v4171_v26  ;;  %v2216_v6 = vperm.slane %v4450_v37, 1 }
 0xd77   :  { %v3458_v8 = vpop.eup %3457  ;;  %v1977_v9 = vsub.f32 %v4423_v57, %v1975_v7 }
 0xd78   :  { %v2183_v10 = vmul.f32 %v3458_v8, %v2180_v5  ;;  %vm2189_vm9 = vweird.f32 %v3458_v8 }
 0xd79   :  { %v1979_v11 = vmul.f32 %v1977_v9, %v1977_v9  ;;  %vm2190_vm11 = vmor %vm2188_vm10, %vm2189_vm9 }
 0xd7a   :  { %v2184_v12 = vmul.f32 %v3458_v8, %v2183_v10 }
 0xd7b   :  { %v1983_v13 = vsel %vm1110_vm3, %v1979_v11, 0.0 }
 0xd7c   :  { %v2185_v15 = vmul.f32 0.5, %v2184_v12  ;;  %1984 = vadd.xlane.f32.xlu1 %v1983_v13 }
 0xd7e   :  { %v2186_v18 = vsub.f32 1.5, %v2185_v15 }
 0xd80   :  { %v2187_v23 = vmul.f32 %v3458_v8, %v2186_v18 }
 0xd82   :  { %v2191_v21 = vsel %vm2190_vm11, %v3458_v8, %v2187_v23 }
 0xd83   :  { %v2202_v24 = vmul.f32 %v2191_v21, %v2168_v55 }
 0xd85   :  { %v2207_v28 = vmul.f32 %v4440_v19, %v2202_v24 }
 0xd87   :  { %v2212_v29 = vadd.f32 %v4443_v27, %v2207_v28 }
 0xd89   :  { %3308 = vmatmul.msk.f32.vlgmr.msra.gmra.mxu0 %vm1106_vm4, %v2212_v29 }
 0xdef   :  { %v1985_v30 = vpop.xlane.xlu1 %1984 }
 0xdf0   :  { %v1987_v31 = vmul.f32 %v1985_v30, %v4171_v26 }
 0xdf2   :  { %v1989_v32 = vadd.f32 1e-06, %v1987_v31 }
 0xdf4   :  { %3459 = vrsqrt.f32 %v1989_v32  ;;  %vm2006_vm7 = vweird.f32 %v1989_v32 }
 0xdfa   :  { %v3460_v33 = vpop.eup %3459 }
 0xdfb   :  { %v2001_v34 = vmul.f32 %v3460_v33, %v1989_v32  ;;  %vm2007_vm6 = vweird.f32 %v3460_v33 }
 0xdfc   :  { %vm2008_vm8 = vmor %vm2006_vm7, %vm2007_vm6 }
 0xdfd   :  { %v2002_v35 = vmul.f32 %v3460_v33, %v2001_v34 }
 0xdff   :  { %v2003_v36 = vmul.f32 0.5, %v2002_v35 }
 0xe01   :  { %v2004_v39 = vsub.f32 1.5, %v2003_v36 }
 0xe03   :  { %v2005_v40 = vmul.f32 %v3460_v33, %v2004_v39 }
 0xe05   :  { %v2009_v42 = vsel %vm2008_vm8, %v3460_v33, %v2005_v40 }
 0xe06   :  { %v2242_v43 = vpop.f32.mrf.mxu0  ;;  %v2011_v44 = vmul.f32 %v2009_v42, %v1977_v9 }
 0xe07   :  { %v4455_v20 = vadd.f32 %v2242_v43, %v2215_v41 }
 0xe08   :  { %v2016_v45 = vmul.f32 %v4385_v14, %v2011_v44  ;;  %v2115_v14 = vld [vmem:[%s4722_s14 + $0x58] sm:$0xff] }
 0xe09   :  { %2335 = vrot.lane.b32.xlu0 %v4455_v20, %s3568_s5  ;;  %2337 = vrot.lane.b32.xlu2 %v4455_v20, %s3570_s13 }
 0xe0a   :  { %v2021_v46 = vadd.f32 %v4388_v22, %v2016_v45  ;;  %2258 = vmatpush.msra.mxu3 %v2115_v14  ;;  %v2109_v22 = vld [vmem:[%s4722_s14 + $0x28] sm:$0xff] }
 0xe0c   :  { %3307 = vmatmul.msk.f32.gmra.mxu2 %vm1106_vm4, %v2021_v46  ;;  %2259 = vmatpush.msra.mxu3 %v2113_v51 }
 0xe0e   :  { %2260 = vmatpush.msra.mxu3 %v2111_v17 }
 0xe10   :  { %2261 = vmatpush.msra.mxu3 %v2109_v22 }
 0xe12   :  { %2262 = vmatpush.msra.mxu3 %v2107_v16 }
 0xe14   :  { %2263 = vmatpush.msra.mxu3 %v2105_v54 }
 0xe63   :  { %v2338_v47 = vpop.permute.xlu2 %2337 }
 0xe64   :  { %3316 = vmatpush.xpose.msk.msra.mxu1 %vm1229_vm13, %v2338_v47 }
 0xe7b   :  { %v2336_v52 = vpop.permute.xlu0 %2335 }
 0xe7c   :  { %3317 = vmatmul.msk.f32.vlgmr.msra.gmra.mxu1 %vm1229_vm13, %v2336_v52 }
 0xe8f   :  { %v2051_v55 = vpop.f32.mrf.mxu2 }
 0xe90   :  { %v2052_v56 = vadd.f32 %v4407_v38, %v2051_v55 }
 0xe92   :  { %v2055_v25 = vmul.f32 %v2052_v56, %v2052_v56 }
 0xe94   :  { %v2057_v58 = vmul.f32 %v2055_v25, %v2052_v56 }
 0xe96   :  { %v2059_v59 = vmul.f32 0.044715, %v2057_v58 }
 0xe98   :  { %v2061_v60 = vadd.f32 %v2059_v59, %v2052_v56  ;;  %v2634_v59 = vrot.slane %v4455_v20, 5 }
 0xe9a   :  { %v2063_v61 = vmul.f32 0.7978846, %v2061_v60 }
 0xe9c   :  { %3461 = vtanh.f32 %v2063_v61 }
 0xea2   :  { %v3462_v62 = vpop.eup %3461 }
 0xea3   :  { %v2067_v63 = vadd.f32 1.0, %v3462_v62  ;;  %v2122_v62 = vld [vmem:[%s4726_s20 + $0x8] sm:$0xff] }
 0xea4   :  { %2441 = vmatpush.msrb.mxu1 %v2122_v62 }
 0xea5   :  { %v2069_v0 = vmul.f32 0.5, %v2067_v63  ;;  %v2121_v63 = vld [vmem:[%s4726_s20] sm:$0xff] }
 0xea6   :  { %2442 = vmatpush.msrb.mxu1 %v2121_v63 }
 0xea7   :  { %v2071_v1 = vmul.f32 %v2069_v0, %v2052_v56  ;;  %v2124_v0 = vld [vmem:[%s4726_s20 + $0x18] sm:$0xff] }
 0xea9   :  { %2094 = vmatmul.f32.gmra.mxu3 %v2071_v1  ;;  %v2123_v1 = vld [vmem:[%s4726_s20 + $0x10] sm:$0xff] }
 0xeb1   :  { %3310 = vmatmul.msk.f32.vlgmr.msra.gmra.mxu3 %vm1106_vm4, %v2212_v29 }
 0xef9   :  { %v2360_v2 = vpop.f32.mrf.mxu1 }
 0xefa   :  { %v2363_v3 = vsel %vm1254_vm14, %v2360_v2, -inf }
 0xefb   :  { %2364 = vmax.xlane.f32.xlu1 %v2363_v3 }
 0xf14   :  { %2272 = vrot.lane.b32.xlu1 %v4455_v20, %s3569_s9 }
 0xf2c   :  { %v2095_v38 = vpop.f32.mrf.mxu3 }
 0xf2d   :  { %v2096_v4 = vadd.f32 %v4411_v49, %v2095_v38 }
 0xf2f   :  { %v2099_v5 = vadd.f32 %v2096_v4, %v4423_v57 }
 0xf31   :  { %2101 = vst.msk [vmem:[#allocation2 + $0x8] sm:$0x3] %vm1110_vm3, %v2099_v5 }
 0xf34   :  { %v2265_v7 = vpop.f32.mrf.mxu3 }
 0xf35   :  { %v4485_v8 = vadd.f32 %v2265_v7, %v2216_v6 }
 0xf37   :  { %2374 = vrot.lane.b32.xlu2 %v4485_v8, %s3568_s5  ;;  %3314 = vmatpush.msk.msrb.mxu0 %vm1270_vm12, %v4485_v8 }
 0xf38   :  { %v4491_v9 = vld [vmem:[#allocation2 + $0x8] sm:$0x3] }
 0xf39   :  { %v2163_v49 = vsel %vm1110_vm3, %v4491_v9, 0.0  ;;  %2418 = vmatpush.msra.mxu0 %v2124_v0 }
 0xf3b   :  { %2419 = vmatpush.msra.mxu0 %v2123_v1 }
 0xf3e   :  { %2164 = vadd.xlane.f32.xlu1 %v2163_v49 }
 0xf3f   :  { %2449 = vrot.lane.b32.xlu2 %v4455_v20, %s3567_s0 }
 0xf47   :  { %2447 = vrot.lane.b32.xlu2 %v4455_v20, %s3571_s17 }
 0xf6e   :  { %v2365_v57 = vpop.xlane.xlu1 %2364 }
 0xf6f   :  { %v2366_v10 = vsub.f32 %v2360_v2, %v2365_v57 }
 0xf71   :  { %v2367_v11 = vmul.f32 1.442695, %v2366_v10  ;;  %v2126_v10 = vld [vmem:[%s4726_s20 + $0x28] sm:$0xff] }
 0xf73   :  { %3463 = vpow2.f32 %v2367_v11  ;;  %v2125_v11 = vld [vmem:[%s4726_s20 + $0x20] sm:$0xff] }
 0xf79   :  { %v3464_v12 = vpop.eup %3463 }
 0xf7a   :  { %v2369_v13 = vsel %vm1254_vm14, %v3464_v12, 0.0 }
 0xf7b   :  { %2370 = vadd.xlane.f32.xlu0 %v2369_v13 }
 0xf86   :  { %v2273_v15 = vpop.permute.xlu1 %2272 }
 0xf87   :  { %3312 = vmatpush.xpose.msk.msra.mxu2 %vm1229_vm13, %v2273_v15 }
 0xf8a   :  { %3313 = vmatmul.msk.f32.vlgmr.msra.gmra.mxu2 %vm1229_vm13, %v4455_v20 }
 0xf91   :  { %v2375_v18 = vpop.permute.xlu2 %2374 }
 0xf92   :  { %3318 = vmatpush.msk.msrb.mxu2 %vm1270_vm12, %v2375_v18 }
 0xf99   :  { %v2450_v23 = vpop.permute.xlu2 %2449 }
 0xf9a   :  { %3322 = vmatpush.xpose.msk.msra.mxu2 %vm1229_vm13, %v2450_v23 }
 0xfa1   :  { %v2448_v34 = vpop.permute.xlu2 %2447 }
 0xfb1   :  { %v2165_v21 = vpop.xlane.xlu1 %2164 }
 0xfb2   :  { %v2167_v24 = vmul.f32 %v2165_v21, %v4171_v26 }
 0xfb4   :  { %v2169_v28 = vsub.f32 %v4491_v9, %v2167_v24  ;;  %v2675_v24 = vrot.slane %v4485_v8, 5 }
 0xfb6   :  { %v2171_v29 = vmul.f32 %v2169_v28, %v2169_v28 }
 0xfb8   :  { %v2175_v30 = vsel %vm1110_vm3, %v2171_v29, 0.0 }
 0xfb9   :  { %2176 = vadd.xlane.f32.xlu2 %v2175_v30 }
 0xfee   :  { %v2371_v31 = vpop.xlane.xlu0 %2370 }
 0xfef   :  { %3465 = vrcp.f32 %v2371_v31 }
 0xff5   :  { %v3466_v32 = vpop.eup %3465 }
 0xff6   :  { %v2373_v33 = vmul.f32 %v3466_v32, %v3464_v12 }
 0xff8   :  { %3319 = vmatmul.msk.f32.vlgmr.msrb.gmra.mxu2 %vm1266_vm1, %v2373_v33 }
0x1000   :  { %3323 = vmatmul.msk.f32.vlgmr.msra.gmra.mxu2 %vm1229_vm13, %v2448_v34 }
0x100d   :  { %v2295_v35 = vpop.f32.mrf.mxu2 }
0x100e   :  { %v2298_v36 = vsel %vm1254_vm14, %v2295_v35, -inf }
0x100f   :  { %2299 = vmax.xlane.f32.xlu1 %v2298_v36 }
0x102c   :  { %v2177_v39 = vpop.xlane.xlu2 %2176 }
0x102d   :  { %v2179_v40 = vmul.f32 %v2177_v39, %v4171_v26 }
0x102f   :  { %v2181_v42 = vadd.f32 1e-06, %v2179_v40 }
0x1031   :  { %3467 = vrsqrt.f32 %v2181_v42  ;;  %vm2198_vm10 = vweird.f32 %v2181_v42 }
0x1037   :  { %v3468_v43 = vpop.eup %3467 }
0x1038   :  { %v2193_v44 = vmul.f32 %v3468_v43, %v2181_v42  ;;  %vm2199_vm9 = vweird.f32 %v3468_v43 }
0x1039   :  { %vm2200_vm11 = vmor %vm2198_vm10, %vm2199_vm9 }
0x103a   :  { %v2194_v45 = vmul.f32 %v3468_v43, %v2193_v44 }
0x103c   :  { %v2195_v46 = vmul.f32 0.5, %v2194_v45 }
0x103e   :  { %v2196_v47 = vsub.f32 1.5, %v2195_v46 }
0x1040   :  { %v2197_v48 = vmul.f32 %v3468_v43, %v2196_v47 }
0x1042   :  { %v2201_v50 = vsel %vm2200_vm11, %v3468_v43, %v2197_v48 }
0x1043   :  { %v2203_v14 = vmul.f32 %v2201_v50, %v2169_v28 }
0x1045   :  { %v2208_v51 = vmul.f32 %v4440_v19, %v2203_v14 }
0x1047   :  { %v2213_v52 = vadd.f32 %v4443_v27, %v2208_v51 }
0x1049   :  { %3309 = vmatmul.msk.f32.gmra.mxu0 %vm1106_vm4, %v2213_v52  ;;  %3311 = vmatmul.msk.f32.gmra.mxu3 %vm1106_vm4, %v2213_v52 }
0x107b   :  { %v2398_v17 = vpop.f32.mrf.mxu2 }
0x1082   :  { %v2300_v22 = vpop.xlane.xlu1 %2299 }
0x1083   :  { %v2301_v16 = vsub.f32 %v2295_v35, %v2300_v22  ;;  %v2472_v54 = vpop.f32.mrf.mxu2 }
0x1084   :  { %v2475_v55 = vsel %vm1254_vm14, %v2472_v54, -inf }
0x1085   :  { %v2302_v56 = vmul.f32 1.442695, %v2301_v16  ;;  %2476 = vmax.xlane.f32.xlu0 %v2475_v55 }
0x1087   :  { %3469 = vpow2.f32 %v2302_v56 }
0x108d   :  { %v3470_v19 = vpop.eup %3469 }
0x108e   :  { %v2304_v27 = vsel %vm1254_vm14, %v3470_v19, 0.0 }
0x108f   :  { %2305 = vadd.xlane.f32.xlu2 %v2304_v27 }
0x10a7   :  { %2539 = vrot.lane.b32.xlu2 %v4455_v20, %s3572_s21 }
0x10c6   :  { %v2245_v25 = vpop.f32.mrf.mxu0 }
0x10c7   :  { %v2246_v58 = vadd.f32 %v2245_v25, %v2215_v41 }
0x10c9   :  { %v2635_v60 = vrot.slane %v2246_v58, 5 }
0x10cb   :  { %v4524_v61 = vsel %vm1594_vm15, %v2634_v59, %v2635_v60  ;;  %v2128_v60 = vld [vmem:[%s4726_s20 + $0x38] sm:$0xff] }
0x10cc   :  { %2637 = vrot.lane.b32.xlu1 %v4524_v61, %s3569_s9  ;;  %v2268_v13 = vpop.f32.mrf.mxu3 }
0x10cd   :  { %v2269_v18 = vadd.f32 %v2268_v13, %v2216_v6 }
0x10cf   :  { %v2676_v23 = vrot.slane %v2269_v18, 5 }
0x10d1   :  { %v4547_v29 = vsel %vm1594_vm15, %v2675_v24, %v2676_v23 }
0x10f8   :  { %v2477_v41 = vpop.xlane.xlu0 %2476 }
0x10f9   :  { %v2478_v2 = vsub.f32 %v2472_v54, %v2477_v41 }
0x10fb   :  { %v2479_v3 = vmul.f32 1.442695, %v2478_v2 }
0x10fd   :  { %3471 = vpow2.f32 %v2479_v3 }
0x1102   :  { %v2306_v38 = vpop.xlane.xlu2 %2305 }
0x1103   :  { %v3472_v4 = vpop.eup %3471  ;;  %3473 = vrcp.f32 %v2306_v38 }
0x1104   :  { %v2481_v5 = vsel %vm1254_vm14, %v3472_v4, 0.0 }
0x1105   :  { %2482 = vadd.xlane.f32.xlu0 %v2481_v5 }
0x1109   :  { %v3474_v7 = vpop.eup %3473 }
0x110a   :  { %v2308_v49 = vmul.f32 %v3474_v7, %v3470_v19  ;;  %v2540_v57 = vpop.permute.xlu2 %2539 }
0x110b   :  { %3327 = vmatpush.xpose.msk.msra.mxu1 %vm1229_vm13, %v2540_v57 }
0x110c   :  { %3315 = vmatmul.msk.f32.vlgmr.msrb.gmra.mxu0 %vm1266_vm1, %v2308_v49 }
0x110d   :  { %2530 = vmatpush.msrb.mxu0 %v2126_v10 }
0x110f   :  { %2531 = vmatpush.msrb.mxu0 %v2125_v11 }
0x1114   :  { %3320 = vmatmul.msk.f32.vlgmr.msra.gmra.mxu0 %vm1229_vm13, %v2398_v17 }
0x1119   :  { %2486 = vrot.lane.b32.xlu0 %v4485_v8, %s3571_s17 }
0x1121   :  { %2537 = vrot.lane.b32.xlu0 %v4455_v20, %s3573_s25 }
0x113e   :  { %v2638_v12 = vpop.permute.xlu1 %2637 }
0x113f   :  { %3332 = vmatpush.xpose.msk.msra.mxu0 %vm1229_vm13, %v2638_v12  ;;  %v4598_v12 = vld [vmem:[%s4727_s7] ss:$0 sm:$0xff] }
0x1178   :  { %v2483_v15 = vpop.xlane.xlu0 %2482 }
0x1179   :  { %3475 = vrcp.f32 %v2483_v15 }
0x117f   :  { %v3476_v21 = vpop.eup %3475 }
0x1180   :  { %v2485_v20 = vmul.f32 %v3476_v21, %v3472_v4 }
0x1189   :  { %v2332_v28 = vpop.f32.mrf.mxu0 }
0x118a   :  { %3321 = vmatmul.msk.f32.vlgmr.msrb.gmra.mxu1 %vm1229_vm13, %v2332_v28 }
0x118b   :  { %3334 = vmatpush.msk.msrb.mxu1 %vm1270_vm12, %v4547_v29  ;;  %v2487_v30 = vpop.permute.xlu0 %2486 }
0x118c   :  { %3324 = vmatpush.msk.msrb.mxu3 %vm1270_vm12, %v2487_v30 }
0x118d   :  { %3325 = vmatmul.msk.f32.vlgmr.msrb.gmra.mxu3 %vm1266_vm1, %v2485_v20 }
0x118e   :  { %2620 = vmatpush.msra.mxu3 %v2128_v60 }
0x1191   :  { %v2421_v34 = vpop.f32.mrf.mxu0 }
0x1193   :  { %v2538_v37 = vpop.permute.xlu0 %2537 }
0x1194   :  { %3328 = vmatmul.msk.f32.vlgmr.msra.gmra.mxu1 %vm1229_vm13, %v2538_v37 }
0x1195   :  { %2809 = vmatpush.msra.mxu1 %v2122_v62 }
0x1197   :  { %2810 = vmatpush.msra.mxu1 %v2121_v63 }
0x1207   :  { %v2444_v6 = vpop.f32.mrf.mxu1 }
0x1208   :  { %v2445_v36 = vadd.f32 %v2444_v6, %v2421_v34 }
0x1210   :  { %v2510_v31 = vpop.f32.mrf.mxu3 }
0x1211   :  { %3326 = vmatmul.msk.f32.vlgmr.msrb.gmra.mxu0 %vm1229_vm13, %v2510_v31  ;;  %v2562_v32 = vpop.f32.mrf.mxu1 }
0x1212   :  { %v2565_v33 = vsel %vm1254_vm14, %v2562_v32, -inf  ;;  %2786 = vmatpush.msrb.mxu0 %v2124_v0 }
0x1213   :  { %2566 = vmax.xlane.f32.xlu2 %v2565_v33 }
0x1214   :  { %2787 = vmatpush.msrb.mxu0 %v2123_v1 }
0x1219   :  { %3333 = vmatmul.msk.f32.vlgmr.msra.gmra.mxu0 %vm1229_vm13, %v4524_v61 }
0x121a   :  { %2898 = vmatpush.msra.mxu0 %v2126_v10 }
0x121c   :  { %2899 = vmatpush.msra.mxu0 %v2125_v11 }
0x122b   :  { %2703 = vrot.lane.b32.xlu2 %v4524_v61, %s3568_s5 }
0x1233   :  { %2815 = vrot.lane.b32.xlu2 %v4524_v61, %s3571_s17 }
0x1286   :  { %v2567_v35 = vpop.xlane.xlu2 %2566 }
0x1287   :  { %v2568_v39 = vsub.f32 %v2562_v32, %v2567_v35 }
0x1289   :  { %v2569_v43 = vmul.f32 1.442695, %v2568_v39 }
0x128b   :  { %3477 = vpow2.f32 %v2569_v43 }
0x128e   :  { %v2533_v40 = vpop.f32.mrf.mxu0  ;;  %v2704_v25 = vpop.permute.xlu2 %2703 }
0x128f   :  { %v4563_v42 = vadd.f32 %v2533_v40, %v2445_v36 }
0x1291   :  { %v3478_v46 = vpop.eup %3477 }
0x1292   :  { %v2571_v47 = vsel %vm1254_vm14, %v3478_v46, 0.0 }
0x1296   :  { %v2660_v44 = vpop.f32.mrf.mxu0  ;;  %v2816_v59 = vpop.permute.xlu2 %2815 }
0x1297   :  { %v2663_v45 = vsel %vm1254_vm14, %v2660_v44, -inf }
0x1298   :  { %2664 = vmax.xlane.f32.xlu0 %v2663_v45 }
0x12a0   :  { %2572 = vadd.xlane.f32.xlu0 %v2571_v47 }
0x12b4   :  { %2705 = vrot.lane.b32.xlu0 %v4524_v61, %s3570_s13 }
0x12bc   :  { %2817 = vrot.lane.b32.xlu0 %v4524_v61, %s3567_s0 }
0x12c4   :  { %2905 = vrot.lane.b32.xlu0 %v4524_v61, %s3573_s25 }
0x130b   :  { %v2665_v48 = vpop.xlane.xlu0 %2664 }
0x130c   :  { %v2666_v50 = vsub.f32 %v2660_v44, %v2665_v48 }
0x130e   :  { %v2667_v14 = vmul.f32 1.442695, %v2666_v50 }
0x1310   :  { %3479 = vpow2.f32 %v2667_v14 }
0x1313   :  { %v2573_v54 = vpop.xlane.xlu0 %2572 }
0x1316   :  { %v3480_v51 = vpop.eup %3479 }
0x1317   :  { %v2669_v52 = vsel %vm1254_vm14, %v3480_v51, 0.0 }
0x1318   :  { %2670 = vadd.xlane.f32.xlu1 %v2669_v52 }
0x1326   :  { %v2706_v55 = vpop.permute.xlu0 %2705 }
0x1331   :  { %2576 = vrot.lane.b32.xlu1 %v4485_v8, %s3573_s25  ;;  %v2818_v8 = vpop.permute.xlu0 %2817 }
0x1339   :  { %2907 = vrot.lane.b32.xlu1 %v4524_v61, %s3572_s21  ;;  %v2127_v61 = vld [vmem:[%s4726_s20 + $0x30] sm:$0xff]  ;;  %v2906_v63 = vpop.permute.xlu0 %2905 }
0x133a   :  { %2621 = vmatpush.msra.mxu3 %v2127_v61 }
0x138b   :  { %v2671_v17 = vpop.xlane.xlu1 %2670 }
0x138c   :  { %3481 = vrcp.f32 %v2671_v17 }
0x138d   :  { %3483 = vrcp.f32 %v2573_v54 }
0x1392   :  { %v3482_v22 = vpop.eup %3481 }
0x1393   :  { %v2673_v16 = vmul.f32 %v3482_v22, %v3480_v51  ;;  %v3484_v56 = vpop.eup %3483 }
0x1394   :  { %v2575_v19 = vmul.f32 %v3484_v56, %v3478_v46 }
0x1395   :  { %3335 = vmatmul.msk.f32.vlgmr.msrb.gmra.mxu1 %vm1266_vm1, %v2673_v16 }
0x13a3   :  { %v2577_v27 = vpop.permute.xlu1 %2576 }
0x13a4   :  { %3329 = vmatpush.msk.msrb.mxu2 %vm1270_vm12, %v2577_v27 }
0x13a5   :  { %3330 = vmatmul.msk.f32.vlgmr.msrb.gmra.mxu2 %vm1266_vm1, %v2575_v19 }
0x13a6   :  { %3336 = vmatpush.xpose.msk.msra.mxu2 %vm1229_vm13, %v2706_v55 }
0x13aa   :  { %3342 = vmatpush.xpose.msk.msrb.mxu2 %vm1229_vm13, %v2818_v8 }
0x13ab   :  { %v2908_v58 = vpop.permute.xlu1 %2907 }
0x13ac   :  { %3347 = vmatpush.xpose.msk.msrb.mxu1 %vm1229_vm13, %v2908_v58 }
0x13ad   :  { %3337 = vmatmul.msk.f32.vlgmr.msra.gmra.mxu2 %vm1229_vm13, %v2704_v25 }
0x13b5   :  { %3343 = vmatmul.msk.f32.vlgmr.msrb.gmra.mxu2 %vm1229_vm13, %v2816_v59 }
0x1412   :  { %v2700_v62 = vpop.f32.mrf.mxu1 }
0x1413   :  { %3341 = vmatmul.msk.f32.vlgmr.msra.gmra.mxu1 %vm1229_vm13, %v2700_v62 }
0x141b   :  { %3348 = vmatmul.msk.f32.vlgmr.msrb.gmra.mxu1 %vm1229_vm13, %v2906_v63 }
0x1428   :  { %v2600_v0 = vpop.f32.mrf.mxu2 }
0x1429   :  { %3331 = vmatmul.msk.f32.vlgmr.msra.gmra.mxu3 %vm1229_vm13, %v2600_v0 }
0x1430   :  { %v2728_v1 = vpop.f32.mrf.mxu2 }
0x1431   :  { %v2731_v41 = vsel %vm1254_vm14, %v2728_v1, -inf }
0x1432   :  { %2732 = vmax.xlane.f32.xlu1 %v2731_v41 }
0x1438   :  { %v2840_v2 = vpop.f32.mrf.mxu2 }
0x1439   :  { %v2843_v3 = vsel %vm1254_vm14, %v2840_v2, -inf }
0x143a   :  { %2844 = vmax.xlane.f32.xlu0 %v2843_v3 }
0x1490   :  { %v4593_v38 = vpop.f32.mrf.mxu1 }
0x1498   :  { %v2930_v4 = vpop.f32.mrf.mxu1 }
0x1499   :  { %v2933_v5 = vsel %vm1254_vm14, %v2930_v4, -inf }
0x149a   :  { %2934 = vmax.xlane.f32.xlu2 %v2933_v5  ;;  %v2137_v5 = vld [vmem:[%s4728_s10 + $0x28] sm:$0xff] }
0x14a5   :  { %v2733_v7 = vpop.xlane.xlu1 %2732 }
0x14a6   :  { %v2734_v49 = vsub.f32 %v2728_v1, %v2733_v7  ;;  %v2136_v7 = vld [vmem:[%s4728_s10 + $0x20] sm:$0xff] }
0x14a8   :  { %v2735_v57 = vmul.f32 1.442695, %v2734_v49  ;;  %v2135_v49 = vld [vmem:[%s4728_s10 + $0x18] sm:$0xff] }
0x14aa   :  { %3485 = vpow2.f32 %v2735_v57  ;;  %v2134_v57 = vld [vmem:[%s4728_s10 + $0x10] sm:$0xff] }
0x14ac   :  { %v2623_v10 = vpop.f32.mrf.mxu3 }
0x14ad   :  { %v2626_v11 = vadd.f32 %v2623_v10, %v4563_v42  ;;  %v2845_v13 = vpop.xlane.xlu0 %2844  ;;  %v2133_v10 = vld [vmem:[%s4728_s10 + $0x8] sm:$0xff] }
0x14ae   :  { %v2846_v15 = vsub.f32 %v2840_v2, %v2845_v13 }
0x14af   :  { %v2627_v18 = vadd.f32 %v2626_v11, %v4416_v53  ;;  %v2132_v11 = vld [vmem:[%s4728_s10] sm:$0xff] }
0x14b0   :  { %v3486_v23 = vpop.eup %3485  ;;  %v2847_v21 = vmul.f32 1.442695, %v2846_v15 }
0x14b1   :  { %v2631_v24 = vadd.f32 %v4598_v12, %v2627_v18  ;;  %v2737_v28 = vsel %vm1254_vm14, %v3486_v23, 0.0 }
0x14b2   :  { %3487 = vpow2.f32 %v2847_v21  ;;  %2738 = vadd.xlane.f32.xlu1 %v2737_v28  ;;  %v2155_v28 = vld [vmem:[%s4729_s11 + $0x70] sm:$0xff] }
0x14b3   :  { %2632 = vst.msk [vmem:[#allocation2] sm:$0x1f] %vm1591_vm2, %v2631_v24  ;;  %v2156_v24 = vld [vmem:[%s4729_s11 + $0x78] sm:$0xff] }
0x14b4   :  { %3113 = vmatpush.msra.mxu1 %v2156_v24  ;;  %v3411_v24 = vld [vmem:[%s4733_s22] ss:$0 sm:$0xff] }
0x14b6   :  { %3114 = vmatpush.msra.mxu1 %v2155_v28 }
0x14b8   :  { %v3488_v20 = vpop.eup %3487 }
0x14b9   :  { %v2849_v30 = vsel %vm1254_vm14, %v3488_v20, 0.0 }
0x14ba   :  { %2850 = vadd.xlane.f32.xlu0 %v2849_v30 }
0x14cb   :  { %2742 = vrot.lane.b32.xlu1 %v4547_v29, %s3568_s5 }
0x14ce   :  { %2854 = vrot.lane.b32.xlu0 %v4547_v29, %s3571_s17 }
0x150d   :  { %v2935_v37 = vpop.xlane.xlu2 %2934 }
0x150e   :  { %v2936_v6 = vsub.f32 %v2930_v4, %v2935_v37  ;;  %v2138_v4 = vld [vmem:[%s4728_s10 + $0x30] sm:$0xff] }
0x1510   :  { %v2937_v31 = vmul.f32 1.442695, %v2936_v6 }
0x1512   :  { %3489 = vpow2.f32 %v2937_v31 }
0x1518   :  { %v3490_v32 = vpop.eup %3489 }
0x1519   :  { %v2939_v33 = vsel %vm1254_vm14, %v3490_v32, 0.0 }
0x151a   :  { %2940 = vadd.xlane.f32.xlu2 %v2939_v33 }
0x1525   :  { %v2739_v34 = vpop.xlane.xlu1 %2738 }
0x1526   :  { %3491 = vrcp.f32 %v2739_v34 }
0x152c   :  { %v3492_v36 = vpop.eup %3491 }
0x152d   :  { %v2851_v35 = vpop.xlane.xlu0 %2850  ;;  %v2741_v39 = vmul.f32 %v3492_v36, %v3486_v23 }
0x152e   :  { %3493 = vrcp.f32 %v2851_v35 }
0x1532   :  { %2944 = vrot.lane.b32.xlu2 %v4547_v29, %s3573_s25 }
0x1534   :  { %v3494_v43 = vpop.eup %3493 }
0x1535   :  { %v2853_v44 = vmul.f32 %v3494_v43, %v3488_v20  ;;  %v2154_v20 = vld [vmem:[%s4729_s11 + $0x68] sm:$0xff] }
0x1536   :  { %3115 = vmatpush.msra.mxu1 %v2154_v20 }
0x153d   :  { %v2743_v40 = vpop.permute.xlu1 %2742 }
0x153e   :  { %3338 = vmatpush.msk.msrb.mxu3 %vm1270_vm12, %v2743_v40 }
0x153f   :  { %3339 = vmatmul.msk.f32.vlgmr.msrb.gmra.mxu3 %vm1266_vm1, %v2741_v39 }
0x1540   :  { %v2855_v42 = vpop.permute.xlu0 %2854 }
0x1541   :  { %3344 = vmatpush.msk.msra.mxu3 %vm1270_vm12, %v2855_v42  ;;  %v3408_v42 = vld [vmem:[%s4730_s15] ss:$0 sm:$0xff] }
0x1543   :  { %2988 = vmatpush.msrb.mxu3 %v2128_v60 }
0x1545   :  { %2989 = vmatpush.msrb.mxu3 %v2127_v61 }
0x1547   :  { %3345 = vmatmul.msk.f32.vlgmr.msra.gmra.mxu3 %vm1266_vm1, %v2853_v44 }
0x158d   :  { %v2941_v29 = vpop.xlane.xlu2 %2940 }
0x158e   :  { %3495 = vrcp.f32 %v2941_v29 }
0x1594   :  { %v3496_v45 = vpop.eup %3495 }
0x1595   :  { %v2943_v46 = vmul.f32 %v3496_v45, %v3490_v32  ;;  %v2945_v47 = vpop.permute.xlu2 %2944  ;;  %v3409_v45 = vld [vmem:[%s4731_s16] ss:$0 sm:$0xff] }
0x1596   :  { %3349 = vmatpush.msk.msra.mxu2 %vm1270_vm12, %v2945_v47 }
0x1597   :  { %3350 = vmatmul.msk.f32.vlgmr.msra.gmra.mxu2 %vm1266_vm1, %v2943_v46 }
0x15c2   :  { %v2766_v48 = vpop.f32.mrf.mxu3 }
0x15c3   :  { %3340 = vmatmul.msk.f32.vlgmr.msrb.gmra.mxu0 %vm1229_vm13, %v2766_v48 }
0x15ca   :  { %v2878_v50 = vpop.f32.mrf.mxu3 }
0x15cb   :  { %3346 = vmatmul.msk.f32.vlgmr.msra.gmra.mxu0 %vm1229_vm13, %v2878_v50 }
0x161a   :  { %v2968_v14 = vpop.f32.mrf.mxu2 }
0x161b   :  { %3351 = vmatmul.msk.f32.vlgmr.msrb.gmra.mxu3 %vm1229_vm13, %v2968_v14 }
0x1640   :  { %v2789_v51 = vpop.f32.mrf.mxu0 }
0x1641   :  { %v2813_v17 = vadd.f32 %v4593_v38, %v2789_v51  ;;  %v2139_v38 = vld [vmem:[%s4728_s10 + $0x38] sm:$0xff] }
0x1642   :  { %3077 = vmatpush.msrb.mxu0 %v2139_v38 }
0x1644   :  { %3078 = vmatpush.msrb.mxu0 %v2138_v4 }
0x1646   :  { %3079 = vmatpush.msrb.mxu0 %v2137_v5 }
0x1648   :  { %v2901_v52 = vpop.f32.mrf.mxu0  ;;  %3080 = vmatpush.msrb.mxu0 %v2136_v7 }
0x1649   :  { %v2904_v22 = vadd.f32 %v2901_v52, %v2813_v17  ;;  %v2153_v52 = vld [vmem:[%s4729_s11 + $0x60] sm:$0xff]  ;;  %v2152_v17 = vld [vmem:[%s4729_s11 + $0x58] sm:$0xff] }
0x164a   :  { %3081 = vmatpush.msrb.mxu0 %v2135_v49  ;;  %3116 = vmatpush.msra.mxu1 %v2153_v52 }
0x164c   :  { %3082 = vmatpush.msrb.mxu0 %v2134_v57  ;;  %3117 = vmatpush.msra.mxu1 %v2152_v17 }
0x164e   :  { %3083 = vmatpush.msrb.mxu0 %v2133_v10 }
0x1650   :  { %3084 = vmatpush.msrb.mxu0 %v2132_v11 }
0x169e   :  { %v2991_v16 = vpop.f32.mrf.mxu3 }
0x169f   :  { %v2994_v54 = vadd.f32 %v2991_v16, %v2904_v22  ;;  %v2151_v22 = vld [vmem:[%s4729_s11 + $0x50] sm:$0xff]  ;;  %v2150_v16 = vld [vmem:[%s4729_s11 + $0x48] sm:$0xff] }
0x16a0   :  { %3118 = vmatpush.msra.mxu1 %v2151_v22 }
0x16a1   :  { %v2996_v55 = vrot.slane %v2994_v54, 3  ;;  %v2149_v54 = vld [vmem:[%s4729_s11 + $0x40] sm:$0xff] }
0x16a2   :  { %3119 = vmatpush.msra.mxu1 %v2150_v16 }
0x16a3   :  { %v2998_v56 = vadd.f32 %v2996_v55, %v4416_v53  ;;  %v2999_v19 = vadd.f32 %v2996_v55, %v4491_v9  ;;  %v2148_v55 = vld [vmem:[%s4729_s11 + $0x38] sm:$0xff] }
0x16a4   :  { %3120 = vmatpush.msra.mxu1 %v2149_v54 }
0x16a5   :  { %v3000_v27 = vadd.f32 %v4598_v12, %v2998_v56  ;;  %v3001_v8 = vadd.f32 %v4598_v12, %v2999_v19  ;;  %v2147_v56 = vld [vmem:[%s4729_s11 + $0x30] sm:$0xff]  ;;  %v2146_v19 = vld [vmem:[%s4729_s11 + $0x28] sm:$0xff] }
0x16a6   :  { %3121 = vmatpush.msra.mxu1 %v2148_v55  ;;  %v3412_v55 = vld [vmem:[%s4734_s23] ss:$0 sm:$0xff] }
0x16a7   :  { %3002 = vst.msk [vmem:[#allocation2] sm:$0xe0] %vm1963_vm5, %v3000_v27  ;;  %v2145_v27 = vld [vmem:[%s4729_s11 + $0x20] sm:$0xff]  ;;  %vm3142_vm5 = vcmask 521221  }
0x16a8   :  { %3003 = vst.msk [vmem:[#allocation2 + $0x8] sm:$0x3] %vm1110_vm3, %v3001_v8  ;;  %3122 = vmatpush.msra.mxu1 %v2147_v56  ;;  %v2144_v8 = vld [vmem:[%s4729_s11 + $0x18] sm:$0xff] }
0x16aa   :  { %3123 = vmatpush.msra.mxu1 %v2146_v19 }
0x16ac   :  { %3124 = vmatpush.msra.mxu1 %v2145_v27  ;;  %v3413_v27 = vld [vmem:[%s3733_s12] ss:$0 sm:$0xff]  ;;  %s3523_s12 = scalar_lea.hbm %s3748_s4, 2 }
0x16ad   :  { %p3525_p2 = scmp.lt.s32.totalorder %s3523_s12, %s3521_s2 }
0x16ae   :  { %v4628_v25 = vld [vmem:[#allocation2] sm:$0xff]  ;;  %3125 = vmatpush.msra.mxu1 %v2144_v8 }
0x16af   :  { %v4630_v58 = vld [vmem:[#allocation2 + $0x8] sm:$0x3]  ;;  %v3006_v59 = vsel %vm1106_vm4, %v4628_v25, 0.0  ;;  %p3526_p3 = por %p3525_p2, %p3524_p1 }
0x16b0   :  { %v3009_v53 = vsel %vm1110_vm3, %v4630_v58, 0.0  ;;  %3007 = vadd.xlane.f32.xlu0 %v3006_v59  ;;  %v2143_v59 = vld [vmem:[%s4729_s11 + $0x10] sm:$0xff] }
0x16b1   :  { %3010 = vadd.xlane.f32.xlu2 %v3009_v53  ;;  %v2142_v53 = vld [vmem:[%s4729_s11 + $0x8] sm:$0xff]  ;;  %3126 = vmatpush.msra.mxu1 %v2143_v59  ;;  %v3414_v59 = vld [vmem:[%s3743_s27] ss:$0 sm:$0xff]  ;;  %p3527_p4 = pnand %p3526_p3, %p3522_p0 }
0x16b3   :  { %3127 = vmatpush.msra.mxu1 %v2142_v53 }
0x1723   :  { %v3008_v9 = vpop.xlane.xlu0 %3007 }
0x1724   :  { %v3011_v60 = vpop.xlane.xlu2 %3010  ;;  %v3012_v61 = vmul.f32 %v3008_v9, %v4171_v26  ;;  %v2141_v9 = vld [vmem:[%s4729_s11] sm:$0xff] }
0x1725   :  { %v3013_v62 = vmul.f32 %v3011_v60, %v4171_v26  ;;  %3128 = vmatpush.msra.mxu1 %v2141_v9  ;;  %v3410_v60 = vld [vmem:[%s4732_s18] ss:$0 sm:$0xff] }
0x1726   :  { %v3014_v63 = vsub.f32 %v4628_v25, %v3012_v61 }
0x1727   :  { %v3015_v0 = vsub.f32 %v4630_v58, %v3013_v62 }
0x1728   :  { %v3016_v1 = vmul.f32 %v3014_v63, %v3014_v63 }
0x1729   :  { %v3017_v41 = vmul.f32 %v3015_v0, %v3015_v0 }
0x172a   :  { %v3018_v2 = vsel %vm1106_vm4, %v3016_v1, 0.0 }
0x172b   :  { %v3021_v3 = vsel %vm1110_vm3, %v3017_v41, 0.0  ;;  %3019 = vadd.xlane.f32.xlu1 %v3018_v2 }
0x172c   :  { %3022 = vadd.xlane.f32.xlu0 %v3021_v3 }
0x179e   :  { %v3020_v12 = vpop.xlane.xlu1 %3019 }
0x179f   :  { %v3024_v13 = vmul.f32 %v3020_v12, %v4171_v26  ;;  %v3023_v15 = vpop.xlane.xlu0 %3022 }
0x17a0   :  { %v3025_v18 = vmul.f32 %v3023_v15, %v4171_v26 }
0x17a1   :  { %v3026_v23 = vadd.f32 1e-06, %v3024_v13 }
0x17a2   :  { %v3027_v21 = vadd.f32 1e-06, %v3025_v18 }
0x17a3   :  { %3497 = vrsqrt.f32 %v3026_v23  ;;  %vm3034_vm13 = vweird.f32 %v3026_v23 }
0x17a4   :  { %3499 = vrsqrt.f32 %v3027_v21  ;;  %vm3044_vm1 = vweird.f32 %v3027_v21 }
0x17a9   :  { %v3498_v30 = vpop.eup %3497 }
0x17aa   :  { %v3500_v37 = vpop.eup %3499  ;;  %v3029_v6 = vmul.f32 %v3498_v30, %v3026_v23  ;;  %vm3035_vm12 = vweird.f32 %v3498_v30 }
0x17ab   :  { %v3039_v31 = vmul.f32 %v3500_v37, %v3027_v21  ;;  %vm3045_vm14 = vweird.f32 %v3500_v37  ;;  %vm3036_vm15 = vmor %vm3034_vm13, %vm3035_vm12 }
0x17ac   :  { %v3030_v32 = vmul.f32 %v3498_v30, %v3029_v6  ;;  %vm3046_vm2 = vmor %vm3044_vm1, %vm3045_vm14 }
0x17ad   :  { %v3040_v33 = vmul.f32 %v3500_v37, %v3039_v31 }
0x17ae   :  { %v3031_v34 = vmul.f32 0.5, %v3030_v32 }
0x17af   :  { %v3041_v35 = vmul.f32 0.5, %v3040_v33 }
0x17b0   :  { %v3032_v36 = vsub.f32 1.5, %v3031_v34 }
0x17b1   :  { %v3042_v39 = vsub.f32 1.5, %v3041_v35 }
0x17b2   :  { %v3033_v40 = vmul.f32 %v3498_v30, %v3032_v36 }
0x17b3   :  { %v3043_v43 = vmul.f32 %v3500_v37, %v3042_v39 }
0x17b4   :  { %v3037_v44 = vsel %vm3036_vm15, %v3498_v30, %v3033_v40  ;;  %v3184_v40 = vld [vmem:[%s3738_s30 + $0x38] sm:$0xff] }
0x17b5   :  { %v3048_v29 = vmul.f32 %v3037_v44, %v3014_v63  ;;  %v3047_v46 = vsel %vm3046_vm2, %v3500_v37, %v3043_v43  ;;  %3200 = vmatpush.msrb.mxu2 %v3184_v40  ;;  %v3182_v43 = vld [vmem:[%s3738_s30 + $0x28] sm:$0xff]  ;;  %v3181_v44 = vld [vmem:[%s3738_s30 + $0x20] sm:$0xff] }
0x17b6   :  { %v3049_v50 = vmul.f32 %v3047_v46, %v3015_v0  ;;  %v3178_v46 = vld [vmem:[%s3738_s30 + $0x8] sm:$0xff] }
0x17b7   :  { %v3053_v47 = vmul.f32 %v3408_v42, %v3048_v29  ;;  %v3180_v29 = vld [vmem:[%s3738_s30 + $0x18] sm:$0xff] }
0x17b8   :  { %v3054_v14 = vmul.f32 %v3408_v42, %v3049_v50  ;;  %v3183_v42 = vld [vmem:[%s3738_s30 + $0x30] sm:$0xff] }
0x17b9   :  { %v3058_v48 = vadd.f32 %v3409_v45, %v3053_v47  ;;  %3201 = vmatpush.msrb.mxu2 %v3183_v42  ;;  %v3177_v47 = vld [vmem:[%s3738_s30] sm:$0xff] }
0x17ba   :  { %v3059_v51 = vadd.f32 %v3409_v45, %v3054_v14  ;;  %v3179_v45 = vld [vmem:[%s3738_s30 + $0x10] sm:$0xff]  ;;  %s3574_s30 = smov [#allocation4]  }
0x17bb   :  { %3352 = vmatmul.msk.f32.vlgmr.msrb.gmra.mxu0 %vm1106_vm4, %v3058_v48  ;;  %3202 = vmatpush.msrb.mxu2 %v3182_v43  ;;  %s3218_s26 = sshll.u32 %s3574_s30, 4  ;;  %s3219_s26 = int_to_ptr.vmem [resolvable:$true] %s3218_s26 }
0x17bd   :  { %3203 = vmatpush.msrb.mxu2 %v3181_v44 }
0x17bf   :  { %3204 = vmatpush.msrb.mxu2 %v3180_v29 }
0x17c1   :  { %3205 = vmatpush.msrb.mxu2 %v3179_v45 }
0x17c3   :  { %3353 = vmatmul.msk.f32.gmra.mxu0 %vm1106_vm4, %v3059_v51  ;;  %3206 = vmatpush.msrb.mxu2 %v3178_v46 }
0x17c5   :  { %3207 = vmatpush.msrb.mxu2 %v3177_v47 }
0x1838   :  { %v3086_v61 = vpop.f32.mrf.mxu0 }
0x1839   :  { %v3087_v62 = vadd.f32 %v3410_v60, %v3086_v61 }
0x183b   :  { %v3092_v63 = vmul.f32 %v3087_v62, %v3087_v62 }
0x183d   :  { %v3094_v0 = vmul.f32 %v3092_v63, %v3087_v62 }
0x183f   :  { %v3096_v1 = vmul.f32 0.044715, %v3094_v0 }
0x1840   :  { %v3089_v41 = vpop.f32.mrf.mxu0 }
0x1841   :  { %v3098_v2 = vadd.f32 %v3096_v1, %v3087_v62  ;;  %v3090_v3 = vadd.f32 %v3410_v60, %v3089_v41 }
0x1843   :  { %v3100_v38 = vmul.f32 0.7978846, %v3098_v2  ;;  %v3093_v4 = vmul.f32 %v3090_v3, %v3090_v3 }
0x1845   :  { %3501 = vtanh.f32 %v3100_v38  ;;  %v3095_v5 = vmul.f32 %v3093_v4, %v3090_v3 }
0x1847   :  { %v3097_v7 = vmul.f32 0.044715, %v3095_v5 }
0x1849   :  { %v3099_v49 = vadd.f32 %v3097_v7, %v3090_v3 }
0x184b   :  { %v3502_v57 = vpop.eup %3501  ;;  %v3101_v10 = vmul.f32 0.7978846, %v3099_v49 }
0x184c   :  { %v3104_v11 = vadd.f32 1.0, %v3502_v57 }
0x184d   :  { %3503 = vtanh.f32 %v3101_v10 }
0x184e   :  { %v3106_v12 = vmul.f32 0.5, %v3104_v11 }
0x1850   :  { %v3108_v13 = vmul.f32 %v3106_v12, %v3087_v62 }
0x1852   :  { %3129 = vmatmul.f32.vlgmr.msra.gmra.mxu1 %v3108_v13 }
0x1853   :  { %v3504_v15 = vpop.eup %3503 }
0x1854   :  { %v3105_v18 = vadd.f32 1.0, %v3504_v15 }
0x1856   :  { %v3107_v23 = vmul.f32 0.5, %v3105_v18 }
0x1858   :  { %v3109_v21 = vmul.f32 %v3107_v23, %v3090_v3 }
0x185a   :  { %3132 = vmatmul.f32.gmra.mxu1 %v3109_v21 }
0x18cf   :  { %v3130_v28 = vpop.f32.mrf.mxu1 }
0x18d0   :  { %v3131_v20 = vadd.f32 %v3411_v24, %v3130_v28 }
0x18d2   :  { %v3136_v30 = vadd.f32 %v3131_v20, %v4628_v25 }
0x18d4   :  { %3138 = vst.msk [vmem:[#allocation2] sm:$0xff] %vm1106_vm4, %v3136_v30 }
0x18d7   :  { %v3133_v37 = vpop.f32.mrf.mxu1 }
0x18d8   :  { %v3134_v6 = vadd.f32 %v3411_v24, %v3133_v37 }
0x18da   :  { %v3137_v31 = vadd.f32 %v3134_v6, %v4630_v58 }
0x18db   :  { %v3140_v32 = vld [vmem:[#allocation2] sm:$0xff] }
0x18dc   :  { %3139 = vst.msk [vmem:[#allocation2 + $0x8] sm:$0x3] %vm1110_vm3, %v3137_v31 }
0x18dd   :  { %3141 = vst.msk [vmem:[#allocation3] sm:$0x1] %vm1034_vm0, %v3140_v32 }
0x18de   :  { %3143 = vst.msk [vmem:[#allocation3 - $0x4] sm:$0x20] %vm3142_vm5, %v3140_v32 }
0x18e5   :  { %v3144_v33 = vld [vmem:[#allocation3] sm:$0x3] }
0x18e6   :  { %v3147_v25 = vsel %vm1110_vm3, %v3144_v33, 0.0 }
0x18e7   :  { %3148 = vadd.xlane.f32.xlu1 %v3147_v25 }
0x195a   :  { %v3149_v34 = vpop.xlane.xlu1 %3148 }
0x195b   :  { %v3150_v35 = vmul.f32 %v3149_v34, %v4171_v26 }
0x195d   :  { %v3151_v58 = vsub.f32 %v3144_v33, %v3150_v35 }
0x195f   :  { %v3152_v36 = vmul.f32 %v3151_v58, %v3151_v58 }
0x1961   :  { %v3153_v39 = vsel %vm1110_vm3, %v3152_v36, 0.0 }
0x1962   :  { %3154 = vadd.xlane.f32.xlu2 %v3153_v39 }
0x19d5   :  { %v3155_v48 = vpop.xlane.xlu2 %3154 }
0x19d6   :  { %v3156_v50 = vmul.f32 %v3155_v48, %v4171_v26 }
0x19d8   :  { %v3157_v14 = vadd.f32 1e-06, %v3156_v50 }
0x19da   :  { %3505 = vrsqrt.f32 %v3157_v14  ;;  %vm3164_vm3 = vweird.f32 %v3157_v14 }
0x19e0   :  { %v3506_v51 = vpop.eup %3505 }
0x19e1   :  { %v3159_v52 = vmul.f32 %v3506_v51, %v3157_v14  ;;  %vm3165_vm0 = vweird.f32 %v3506_v51 }
0x19e2   :  { %vm3166_vm6 = vmor %vm3164_vm3, %vm3165_vm0 }
0x19e3   :  { %v3160_v17 = vmul.f32 %v3506_v51, %v3159_v52 }
0x19e5   :  { %v3161_v22 = vmul.f32 0.5, %v3160_v17 }
0x19e7   :  { %v3162_v16 = vsub.f32 1.5, %v3161_v22 }
0x19e9   :  { %v3163_v54 = vmul.f32 %v3506_v51, %v3162_v16 }
0x19eb   :  { %v3167_v56 = vsel %vm3166_vm6, %v3506_v51, %v3163_v54 }
0x19ec   :  { %v3168_v19 = vmul.f32 %v3167_v56, %v3151_v58 }
0x19ee   :  { %v3172_v8 = vmul.f32 %v3412_v55, %v3168_v19 }
0x19f0   :  { %v3176_v26 = vadd.f32 %v3413_v27, %v3172_v8 }
0x19f2   :  { %3354 = vmatmul.msk.f32.vlgmr.msrb.gmra.mxu2 %vm1106_vm4, %v3176_v26 }
0x1a75   :  { %v3209_v53 = vpop.f32.mrf.mxu2 }
0x1a76   :  { %v3210_v9 = vadd.f32 %v3414_v59, %v3209_v53 }
0x1a78   :  { %3212 = vst [vmem:[#allocation4] sm:$0x3] %v3210_v9 }
0x1a79   :  { %3530 = shalt.err (!%p3527_p4)
}
0x1a7a   :  { %3223 = dma.vmem_to_hbm [thread:$0]  %s3219_s26, 32, %s3221_s28, [#allocation5]  }
0x1a7b   :  { %3531 = dma.done.wait [#allocation5], 32  }
0x1a7c   :  { %3532 = vsyncadd [#allocation5], 4294967264 }
0x1a7d   :  { %3228 = vsyncpa [#allocation5], 1 }

</bundles_post_ra>
